<compile_context>
chip_gen: v7x
topology: tpu7x:2x2x1
jax: 0.10.0
libtpu: 0.0.40
codegen_flags: <defaults>
</compile_context>

<pallas_src>
import functools

import numpy as np
import jax
import jax.numpy as jnp
from jax.experimental import pallas as pl
from jax.experimental.pallas import tpu as pltpu


def _align8(x):
    return (x + 7) // 8 * 8


def _slab_offsets(F, A):
    """Row offsets inside the packed (rows, H) weight slab (8-row aligned segments)."""
    o_w1a_f = 0                        # rel_path layer1 weight, feature rows   (F)
    o_w1a_p = _align8(F)               # rel_path layer1 weight, rel_pose rows  (5)
    o_w1b_f = o_w1a_p + 8              # memory  layer1 weight, feature rows    (F)
    o_w1b_a = o_w1b_f + _align8(F)     # memory  layer1 weight, action rows     (A)
    o_bias = o_w1b_a + _align8(A)      # vector rows: b1a, w2a^T, b1b, b2b(padded)
    rows = _align8(o_bias + 4)
    return (o_w1a_f, o_w1a_p, o_w1b_f, o_w1b_a, o_bias), rows


# --------------------------------- fused kernel ----------------------------------


def _make_evm_kernel(F, A, M, offs):
    o_w1a_f, o_w1a_p, o_w1b_f, o_w1b_a, o_bias = offs

    def kernel(feat_ref, pose_ref, act_ref, slab_ref, w2b_ref, mem_ref, synth_ref):
        BB, N, _ = feat_ref.shape
        H = slab_ref.shape[1]
        R = BB * N

        feats3 = feat_ref[...]                               # (BB, N, F)
        feats2 = feats3.reshape(R, F)                        # (BB*N, F)
        pose2 = pose_ref[...].reshape(R, 5)                  # (BB*N, 5)

        # static slices of the packed weight slab (free)
        w1a_f = slab_ref[o_w1a_f:o_w1a_f + F, :]             # (F, H)
        w1a_p = slab_ref[o_w1a_p:o_w1a_p + 5, :]             # (5, H)
        w1b_f = slab_ref[o_w1b_f:o_w1b_f + F, :]             # (F, H)
        w1b_a = slab_ref[o_w1b_a:o_w1b_a + A, :]             # (A, H)
        b1a = slab_ref[o_bias + 0:o_bias + 1, :]             # (1, H)
        w2a_r = slab_ref[o_bias + 1:o_bias + 2, :]           # (1, H)  rel_w2 as a row
        b1b = slab_ref[o_bias + 2:o_bias + 3, :]             # (1, H)
        b2b = slab_ref[o_bias + 3:o_bias + 4, 0:M]           # (1, M)

        # Both layer-1 matmuls issue back-to-back (memory path reassociated so it
        # does not wait on the softmax).
        h = (jnp.dot(feats2, w1a_f, preferred_element_type=jnp.float32)
             + jnp.dot(pose2, w1a_p, preferred_element_type=jnp.float32)
             + b1a)
        h = jnp.maximum(h, 0.0)                              # (R, H)
        g = jnp.dot(feats2, w1b_f, preferred_element_type=jnp.float32)   # (R, H)

        # rel-path layer 2 as VPU multiply + lane reduction; rel_b2 dropped
        # (a per-bag constant cancels in the softmax over the feature axis).
        logits = jnp.sum(h * w2a_r, axis=-1, keepdims=True)  # (R, 1)
        logits3 = logits.reshape(BB, N, 1)

        # per-bag softmax over the N features
        m = jnp.max(logits3, axis=1, keepdims=True)          # (BB, 1, 1)
        e = jnp.exp(logits3 - m)
        w = e / jnp.sum(e, axis=1, keepdims=True)            # (BB, N, 1)

        synth = jnp.sum(feats3 * w, axis=1)                  # (BB, F)
        pooled_g = jnp.sum(g.reshape(BB, N, H) * w, axis=1)  # (BB, H) == synth @ w1b_f

        # visual_memory_fc: Linear + ReLU + Linear + ReLU
        h2 = (pooled_g
              + jnp.dot(act_ref[...], w1b_a, preferred_element_type=jnp.float32)
              + b1b)
        h2 = jnp.maximum(h2, 0.0)                            # (BB, H)
        mem = jnp.dot(h2, w2b_ref[...], preferred_element_type=jnp.float32) + b2b
        mem_ref[...] = jnp.maximum(mem, 0.0)                 # (BB, M)
        synth_ref[...] = synth                               # (BB, F)

    return kernel


# ---------------------------------- wrappers --------------------------------------


def pack_params(params):
    """Pack the 8 parameter tensors into 2 VMEM slabs (done once, outside hot path)."""
    rel_w1 = jnp.asarray(params["rel_w1"], jnp.float32)
    rel_b1 = jnp.asarray(params["rel_b1"], jnp.float32)
    rel_w2 = jnp.asarray(params["rel_w2"], jnp.float32)
    mem_w1 = jnp.asarray(params["mem_w1"], jnp.float32)
    mem_b1 = jnp.asarray(params["mem_b1"], jnp.float32)
    mem_w2 = jnp.asarray(params["mem_w2"], jnp.float32)
    mem_b2 = jnp.asarray(params["mem_b2"], jnp.float32)
    # rel_b2 is intentionally NOT packed: it cancels in the softmax (shift invariance).

    H = rel_w1.shape[1]
    F = rel_w1.shape[0] - 5
    A = mem_w1.shape[0] - F
    M = mem_w2.shape[1]
    (o_w1a_f, o_w1a_p, o_w1b_f, o_w1b_a, o_bias), rows = _slab_offsets(F, A)

    slab = jnp.zeros((rows, H), jnp.float32)
    slab = slab.at[o_w1a_f:o_w1a_f + F].set(rel_w1[:F])
    slab = slab.at[o_w1a_p:o_w1a_p + 5].set(rel_w1[F:])
    slab = slab.at[o_w1b_f:o_w1b_f + F].set(mem_w1[:F])
    slab = slab.at[o_w1b_a:o_w1b_a + A].set(mem_w1[F:])
    slab = slab.at[o_bias + 0].set(rel_b1.reshape(H))
    slab = slab.at[o_bias + 1].set(rel_w2.reshape(H))        # (H,1) column stored as row
    slab = slab.at[o_bias + 2].set(mem_b1.reshape(H))
    slab = slab.at[o_bias + 3, :M].set(mem_b2.reshape(M))
    return slab, mem_w2


@functools.partial(jax.jit, static_argnames=("block_bags",))
def evm_forward_batched(slab, w2b, act, feats, rel_pose, *, block_bags=32):
    """B independent encodeVisualMemoryRelatedPath forwards in one pallas_call.

    feats    : (B, N, F)  -- per bag, the torch.cat(features, 0) result
    rel_pose : (B, N, 5)
    act      : (B, A)
    returns  : mem (B, M), synthesized_feat (B, F)
    """
    B, N, F = feats.shape
    A = act.shape[-1]
    H, M = w2b.shape
    offs, rows = _slab_offsets(F, A)
    assert slab.shape == (rows, H)

    BB = max(1, min(block_bags, B))
    Bp = ((B + BB - 1) // BB) * BB
    if Bp != B:                       # pad the bag axis to a whole number of blocks
        pad = Bp - B
        feats = jnp.pad(feats, ((0, pad), (0, 0), (0, 0)))
        rel_pose = jnp.pad(rel_pose, ((0, pad), (0, 0), (0, 0)))
        act = jnp.pad(act, ((0, pad), (0, 0)))

    mem, synth = pl.pallas_call(
        _make_evm_kernel(F, A, M, offs),
        out_shape=(jax.ShapeDtypeStruct((Bp, M), jnp.float32),
                   jax.ShapeDtypeStruct((Bp, F), jnp.float32)),
        grid_spec=pltpu.PrefetchScalarGridSpec(
            num_scalar_prefetch=0,
            grid=(Bp // BB,),
            in_specs=[
                pl.BlockSpec((BB, N, F), lambda i: (i, 0, 0)),
                pl.BlockSpec((BB, N, 5), lambda i: (i, 0, 0)),
                pl.BlockSpec((BB, A), lambda i: (i, 0)),
                # weight slabs: constant block index -> DMA'd once, reused each step
                pl.BlockSpec((rows, H), lambda i: (0, 0)),
                pl.BlockSpec((H, M), lambda i: (0, 0)),
            ],
            out_specs=(pl.BlockSpec((BB, M), lambda i: (i, 0)),
                       pl.BlockSpec((BB, F), lambda i: (i, 0))),
        ),
        compiler_params=pltpu.CompilerParams(
            dimension_semantics=("parallel",)),
    )(feats, rel_pose, act, slab, w2b)

    return mem[:B], synth[:B]


# ----------------------------- params / pure-JAX reference -------------------------


def init_params(key, action_dim, memory_dim, feature_dim, hidden=512):
    d1 = feature_dim + 5
    d2 = feature_dim + action_dim
    k = jax.random.split(key, 8)
    return {
        "rel_w1": jax.random.normal(k[0], (d1, hidden), jnp.float32) / np.sqrt(d1),
        "rel_b1": jax.random.normal(k[1], (1, hidden), jnp.float32) * 0.01,
        "rel_w2": jax.random.normal(k[2], (hidden, 1), jnp.float32) / np.sqrt(hidden),
        "rel_b2": jax.random.normal(k[3], (1, 1), jnp.float32) * 0.01,
        "mem_w1": jax.random.normal(k[4], (d2, hidden), jnp.float32) / np.sqrt(d2),
        "mem_b1": jax.random.normal(k[5], (1, hidden), jnp.float32) * 0.01,
        "mem_w2": jax.random.normal(k[6], (hidden, memory_dim), jnp.float32) / np.sqrt(hidden),
        "mem_b2": jax.random.normal(k[7], (1, memory_dim), jnp.float32) * 0.01,
    }


def evm_reference_batched(params, act, feats, rel_pose):
    """Pure-JAX reference mirroring the PyTorch forward exactly, per bag."""
    x = jnp.concatenate([feats, rel_pose], axis=-1)                        # (B,N,F+5)
    h = jnp.maximum(x @ params["rel_w1"] + params["rel_b1"], 0.0)
    logits = h @ params["rel_w2"] + params["rel_b2"]                       # (B,N,1)
    w = jax.nn.softmax(logits, axis=1)
    synth = jnp.sum(feats * w, axis=1)                                     # (B,F)
    mem_in = jnp.concatenate([synth, act], axis=-1)                        # (B,F+A)
    h2 = jnp.maximum(mem_in @ params["mem_w1"] + params["mem_b1"], 0.0)
    mem = jnp.maximum(h2 @ params["mem_w2"] + params["mem_b2"], 0.0)
    return mem, synth


# ------------------------------------- main ---------------------------------------


if __name__ == "__main__":
    feature_dim, action_dim, memory_dim = 16, 8, 32
    n_feats, batch = 8, 64                  # 8 features per bag, 64 bags per call

    key = jax.random.PRNGKey(0)
    key, kp, ka, kf, kr = jax.random.split(key, 5)
    params = init_params(kp, action_dim, memory_dim, feature_dim)
    slab, w2b = pack_params(params)         # packed once, outside the hot path

    feats = jax.random.normal(kf, (batch, n_feats, feature_dim), jnp.float32)
    rel_pose = jax.random.normal(kr, (batch, n_feats, 5), jnp.float32)
    act = jax.random.normal(ka, (batch, action_dim), jnp.float32)

    mem, synth = evm_forward_batched(slab, w2b, act, feats, rel_pose, block_bags=32)
    mem = jax.block_until_ready(mem)
    synth = jax.block_until_ready(synth)

    assert mem.shape == (batch, memory_dim), mem.shape
    assert synth.shape == (batch, feature_dim), synth.shape

    ref_mem, ref_synth = evm_reference_batched(params, act, feats, rel_pose)
    np.testing.assert_allclose(np.asarray(mem), np.asarray(ref_mem),
                               rtol=2e-2, atol=1e-3)
    np.testing.assert_allclose(np.asarray(synth), np.asarray(ref_synth),
                               rtol=2e-2, atol=1e-3)
    print("KERNEL_OK")
</pallas_src>

<mosaic_0001>
module attributes {stable_mosaic.version = 11 : i64} {
  func.func @kernel(%arg0: i32, %arg1: memref<32x8x16xf32, #tpu.memory_space<vmem>>, %arg2: memref<32x8x5xf32, #tpu.memory_space<vmem>>, %arg3: memref<32x8xf32, #tpu.memory_space<vmem>>, %arg4: memref<56x512xf32, #tpu.memory_space<vmem>>, %arg5: memref<512x32xf32, #tpu.memory_space<vmem>>, %arg6: memref<32x32xf32, #tpu.memory_space<vmem>>, %arg7: memref<32x16xf32, #tpu.memory_space<vmem>>) attributes {dimension_semantics = [#tpu.dimension_semantics<parallel>], iteration_bounds = array<i64: 2>, scalar_prefetch = 0 : i64, scratch_operands = 0 : i64, tpu.core_type = #tpu.core_type<tc>, window_params = [{transform_indices = @transform_0, window_bounds = array<i64: 32, 8, 16>}, {transform_indices = @transform_1, window_bounds = array<i64: 32, 8, 5>}, {transform_indices = @transform_2, window_bounds = array<i64: 32, 8>}, {pipeline_mode = #tpu.pipeline_mode<synchronous>, transform_indices = @transform_3, window_bounds = array<i64: 56, 512>}, {pipeline_mode = #tpu.pipeline_mode<synchronous>, transform_indices = @transform_4, window_bounds = array<i64: 512, 32>}, {transform_indices = @transform_5, window_bounds = array<i64: 32, 32>}, {transform_indices = @transform_6, window_bounds = array<i64: 32, 16>}]} {
    %c0 = arith.constant 0 : index
    %c0_0 = arith.constant 0 : index
    %c0_1 = arith.constant 0 : index
    %0 = vector.load %arg1[%c0, %c0_0, %c0_1] : memref<32x8x16xf32, #tpu.memory_space<vmem>>, vector<32x8x16xf32>
    %1 = vector.shape_cast %0 : vector<32x8x16xf32> to vector<256x16xf32>
    %c0_2 = arith.constant 0 : index
    %c0_3 = arith.constant 0 : index
    %c0_4 = arith.constant 0 : index
    %2 = vector.load %arg2[%c0_2, %c0_3, %c0_4] : memref<32x8x5xf32, #tpu.memory_space<vmem>>, vector<32x8x5xf32>
    %3 = vector.shape_cast %2 : vector<32x8x5xf32> to vector<256x5xf32>
    %c0_5 = arith.constant 0 : index
    %c0_6 = arith.constant 0 : index
    %4 = vector.load %arg4[%c0_5, %c0_6] : memref<56x512xf32, #tpu.memory_space<vmem>>, vector<16x512xf32>
    %c16 = arith.constant 16 : index
    %c0_7 = arith.constant 0 : index
    %5 = vector.load %arg4[%c16, %c0_7] : memref<56x512xf32, #tpu.memory_space<vmem>>, vector<5x512xf32>
    %c24 = arith.constant 24 : index
    %c0_8 = arith.constant 0 : index
    %6 = vector.load %arg4[%c24, %c0_8] : memref<56x512xf32, #tpu.memory_space<vmem>>, vector<16x512xf32>
    %c40 = arith.constant 40 : index
    %c0_9 = arith.constant 0 : index
    %7 = vector.load %arg4[%c40, %c0_9] : memref<56x512xf32, #tpu.memory_space<vmem>>, vector<8x512xf32>
    %c48 = arith.constant 48 : index
    %c0_10 = arith.constant 0 : index
    %8 = vector.load %arg4[%c48, %c0_10] : memref<56x512xf32, #tpu.memory_space<vmem>>, vector<1x512xf32>
    %c49 = arith.constant 49 : index
    %c0_11 = arith.constant 0 : index
    %9 = vector.load %arg4[%c49, %c0_11] : memref<56x512xf32, #tpu.memory_space<vmem>>, vector<1x512xf32>
    %c50 = arith.constant 50 : index
    %c0_12 = arith.constant 0 : index
    %10 = vector.load %arg4[%c50, %c0_12] : memref<56x512xf32, #tpu.memory_space<vmem>>, vector<1x512xf32>
    %c51 = arith.constant 51 : index
    %c0_13 = arith.constant 0 : index
    %11 = vector.load %arg4[%c51, %c0_13] : memref<56x512xf32, #tpu.memory_space<vmem>>, vector<1x32xf32>
    %cst = arith.constant dense<0.000000e+00> : vector<256x512xf32>
    %12 = tpu.matmul %1, %4, %cst {dimension_numbers = #tpu.dot_dimension_numbers<[1], [0], [0], [1], [0, 0, 1, 1], [], []>} : vector<256x16xf32>, vector<16x512xf32>, vector<256x512xf32> -> vector<256x512xf32>
    %cst_14 = arith.constant dense<0.000000e+00> : vector<256x512xf32>
    %13 = tpu.matmul %3, %5, %cst_14 {dimension_numbers = #tpu.dot_dimension_numbers<[1], [0], [0], [1], [0, 0, 1, 1], [], []>} : vector<256x5xf32>, vector<5x512xf32>, vector<256x512xf32> -> vector<256x512xf32>
    %14 = arith.addf %12, %13 : vector<256x512xf32>
    %15 = vector.broadcast %8 : vector<1x512xf32> to vector<256x512xf32>
    %16 = arith.addf %14, %15 : vector<256x512xf32>
    %cst_15 = arith.constant 0.000000e+00 : f32
    %17 = vector.broadcast %cst_15 : f32 to vector<256x512xf32>
    %18 = arith.maximumf %16, %17 : vector<256x512xf32>
    %cst_16 = arith.constant dense<0.000000e+00> : vector<256x512xf32>
    %19 = tpu.matmul %1, %6, %cst_16 {dimension_numbers = #tpu.dot_dimension_numbers<[1], [0], [0], [1], [0, 0, 1, 1], [], []>} : vector<256x16xf32>, vector<16x512xf32>, vector<256x512xf32> -> vector<256x512xf32>
    %20 = vector.broadcast %9 : vector<1x512xf32> to vector<256x512xf32>
    %21 = arith.mulf %18, %20 : vector<256x512xf32>
    %cst_17 = arith.constant dense<0.000000e+00> : vector<256xf32>
    %22 = vector.multi_reduction <add>, %21, %cst_17 [1] : vector<256x512xf32> to vector<256xf32>
    %23 = vector.shape_cast %22 : vector<256xf32> to vector<256x1xf32>
    %24 = vector.shape_cast %23 : vector<256x1xf32> to vector<32x8x1xf32>
    %cst_18 = arith.constant dense<0xFF800000> : vector<32x1xf32>
    %25 = vector.multi_reduction <maximumf>, %24, %cst_18 [1] : vector<32x8x1xf32> to vector<32x1xf32>
    %26 = vector.shape_cast %25 : vector<32x1xf32> to vector<32x1x1xf32>
    %27 = vector.broadcast %26 : vector<32x1x1xf32> to vector<32x8x1xf32>
    %28 = arith.subf %24, %27 : vector<32x8x1xf32>
    %29 = math.exp %28 : vector<32x8x1xf32>
    %cst_19 = arith.constant dense<0.000000e+00> : vector<32x1xf32>
    %30 = vector.multi_reduction <add>, %29, %cst_19 [1] : vector<32x8x1xf32> to vector<32x1xf32>
    %31 = vector.shape_cast %30 : vector<32x1xf32> to vector<32x1x1xf32>
    %32 = vector.broadcast %31 : vector<32x1x1xf32> to vector<32x8x1xf32>
    %33 = arith.divf %29, %32 : vector<32x8x1xf32>
    %34 = vector.broadcast %33 : vector<32x8x1xf32> to vector<32x8x16xf32>
    %35 = arith.mulf %0, %34 : vector<32x8x16xf32>
    %cst_20 = arith.constant dense<0.000000e+00> : vector<32x16xf32>
    %36 = vector.multi_reduction <add>, %35, %cst_20 [1] : vector<32x8x16xf32> to vector<32x16xf32>
    %37 = vector.shape_cast %19 : vector<256x512xf32> to vector<32x8x512xf32>
    %38 = vector.broadcast %33 : vector<32x8x1xf32> to vector<32x8x512xf32>
    %39 = arith.mulf %37, %38 : vector<32x8x512xf32>
    %cst_21 = arith.constant dense<0.000000e+00> : vector<32x512xf32>
    %40 = vector.multi_reduction <add>, %39, %cst_21 [1] : vector<32x8x512xf32> to vector<32x512xf32>
    %c0_22 = arith.constant 0 : index
    %c0_23 = arith.constant 0 : index
    %41 = vector.load %arg3[%c0_22, %c0_23] : memref<32x8xf32, #tpu.memory_space<vmem>>, vector<32x8xf32>
    %cst_24 = arith.constant dense<0.000000e+00> : vector<32x512xf32>
    %42 = tpu.matmul %41, %7, %cst_24 {dimension_numbers = #tpu.dot_dimension_numbers<[1], [0], [0], [1], [0, 0, 1, 1], [], []>} : vector<32x8xf32>, vector<8x512xf32>, vector<32x512xf32> -> vector<32x512xf32>
    %43 = arith.addf %40, %42 : vector<32x512xf32>
    %44 = vector.broadcast %10 : vector<1x512xf32> to vector<32x512xf32>
    %45 = arith.addf %43, %44 : vector<32x512xf32>
    %cst_25 = arith.constant 0.000000e+00 : f32
    %46 = vector.broadcast %cst_25 : f32 to vector<32x512xf32>
    %47 = arith.maximumf %45, %46 : vector<32x512xf32>
    %c0_26 = arith.constant 0 : index
    %c0_27 = arith.constant 0 : index
    %48 = vector.load %arg5[%c0_26, %c0_27] : memref<512x32xf32, #tpu.memory_space<vmem>>, vector<512x32xf32>
    %cst_28 = arith.constant dense<0.000000e+00> : vector<32x32xf32>
    %49 = tpu.matmul %47, %48, %cst_28 {dimension_numbers = #tpu.dot_dimension_numbers<[1], [0], [0], [1], [0, 0, 1, 1], [], []>} : vector<32x512xf32>, vector<512x32xf32>, vector<32x32xf32> -> vector<32x32xf32>
    %50 = vector.broadcast %11 : vector<1x32xf32> to vector<32x32xf32>
    %51 = arith.addf %49, %50 : vector<32x32xf32>
    %cst_29 = arith.constant 0.000000e+00 : f32
    %52 = vector.broadcast %cst_29 : f32 to vector<32x32xf32>
    %53 = arith.maximumf %51, %52 : vector<32x32xf32>
    %c0_30 = arith.constant 0 : index
    %c0_31 = arith.constant 0 : index
    %54 = vector.load %arg6[%c0_30, %c0_31] : memref<32x32xf32, #tpu.memory_space<vmem>>, vector<32x32xf32>
    tpu.vector_store %arg6[%c0_30, %c0_31], %53 {strides = array<i32>} : memref<32x32xf32, #tpu.memory_space<vmem>>, vector<32x32xf32>,
    %c0_32 = arith.constant 0 : index
    %c0_33 = arith.constant 0 : index
    %55 = vector.load %arg7[%c0_32, %c0_33] : memref<32x16xf32, #tpu.memory_space<vmem>>, vector<32x16xf32>
    tpu.vector_store %arg7[%c0_32, %c0_33], %36 {strides = array<i32>} : memref<32x16xf32, #tpu.memory_space<vmem>>, vector<32x16xf32>,
    return
  }
  func.func @transform_0(%arg0: i32) -> (i32, i32, i32) {
    %c0_i32 = arith.constant 0 : i32
    %c0_i32_0 = arith.constant 0 : i32
    %c0_i32_1 = arith.constant 0 : i32
    return %arg0, %c0_i32, %c0_i32_0 : i32, i32, i32
  }
  func.func @transform_1(%arg0: i32) -> (i32, i32, i32) {
    %c0_i32 = arith.constant 0 : i32
    %c0_i32_0 = arith.constant 0 : i32
    %c0_i32_1 = arith.constant 0 : i32
    return %arg0, %c0_i32, %c0_i32_0 : i32, i32, i32
  }
  func.func @transform_2(%arg0: i32) -> (i32, i32) {
    %c0_i32 = arith.constant 0 : i32
    %c0_i32_0 = arith.constant 0 : i32
    return %arg0, %c0_i32 : i32, i32
  }
  func.func @transform_3(%arg0: i32) -> (i32, i32) {
    %c0_i32 = arith.constant 0 : i32
    %c0_i32_0 = arith.constant 0 : i32
    %c0_i32_1 = arith.constant 0 : i32
    return %c0_i32, %c0_i32_0 : i32, i32
  }
  func.func @transform_4(%arg0: i32) -> (i32, i32) {
    %c0_i32 = arith.constant 0 : i32
    %c0_i32_0 = arith.constant 0 : i32
    %c0_i32_1 = arith.constant 0 : i32
    return %c0_i32, %c0_i32_0 : i32, i32
  }
  func.func @transform_5(%arg0: i32) -> (i32, i32) {
    %c0_i32 = arith.constant 0 : i32
    %c0_i32_0 = arith.constant 0 : i32
    return %arg0, %c0_i32 : i32, i32
  }
  func.func @transform_6(%arg0: i32) -> (i32, i32) {
    %c0_i32 = arith.constant 0 : i32
    %c0_i32_0 = arith.constant 0 : i32
    return %arg0, %c0_i32 : i32, i32
  }
}

</mosaic_0001>

<bundles_post_ra>
// kernel: evm_forward_batched.1
= control target key start
LH: loop header
LB: loop body
LE: loop exit
PB: predicated region body
PF: predicated region fallthrough
CT: control target
= control target key end

     0   :  { %s6829_s21 = smov 0   ;;  %s10007_s0 = inlined_call_operand.vmem [shape: f32[64,8,16], index: 0, kind: input, shape index: {}]   ;;  %s10008_s1 = inlined_call_operand.vmem [shape: f32[64,8,5], index: 1, kind: input, shape index: {}]   ;;  %s10009_s2 = inlined_call_operand.vmem [shape: f32[64,8], index: 2, kind: input, shape index: {}]   ;;  %s10010_s3 = inlined_call_operand.vmem [shape: f32[56,512], index: 3, kind: input, shape index: {}]   ;;  %s10011_s4 = inlined_call_operand.vmem [shape: f32[512,32], index: 4, kind: input, shape index: {}]   ;;  %s10012_s5 = inlined_call_operand.vmem [shape: f32[64,32], index: 5, kind: output, shape index: {0}]   ;;  %s10013_s6 = inlined_call_operand.vmem [shape: f32[64,16], index: 6, kind: output, shape index: {1}]  }
   0x1 LB: > { %s6095_s22 = sadd.s32 4294967295, %s6791_s21   ;;  %p6099_p0 = scmp.ge.s32.totalorder %s6791_s21, 1  ;;  %s6791_s21 = sphi %s6829_s21, %s17_s21  }
   0x2   : > { %p238_p1 = scmp.lt.s32.totalorder %s6791_s21, 3 }
   0x4   : > { %p239_p2 = pnand %p6099_p0, %p238_p1 }
   0x6   : > { %242 = sbr.rel (%p239_p2) target bundleno = 1393 (0x571), region = 40 }
   0xd   : > { %v386_v0 = vld [vmem:[%s10010_s3 + $0x48] sm:$0x1f]  ;;  %vm505_vm0 = vcmask 1044480   ;;  %v385_v1 = vld [vmem:[%s10010_s3 + $0x40] sm:$0x1f]  ;;  %v6793_v3 = vmov 0.0  }
   0xe   : > { %6113 = vmatprep.subr.msk.mxu0 %vm505_vm0, %v386_v0  ;;  %v388_v2 = vld [vmem:[%s10010_s3 + $0x58] sm:$0x1f]  ;;  %582 = vmatprep.mubr.f32.mxu0 %v6793_v3  ;;  %v387_v4 = vld [vmem:[%s10010_s3 + $0x50] sm:$0x1f]  ;;  %v378_v5 = vld [vmem:[%s10010_s3 + $0x8] sm:$0xff]  ;;  %s6100_s9 = sshll.u32 %s6095_s22, 5 }
   0xf   : > { %6114 = vmatpush1.msk.msra.mxu0 %vm505_vm0, %v385_v1  ;;  %6147 = vmatprep.subr.msk.mxu1 %vm505_vm0, %v388_v2  ;;  %v382_v6 = vld [vmem:[%s10010_s3 + $0x28] sm:$0xff]  ;;  %p284_p3 = scmp.lt.s32.totalorder %s6100_s9, 63  ;;  %v377_v7 = vld [vmem:[%s10010_s3] sm:$0xff]  ;;  %v380_v10 = vld [vmem:[%s10010_s3 + $0x18] sm:$0xff]  ;;  %vm408_vm1 = vcmask 39936   ;;  %vm1032_vm2 = vcmask 130048  }
  0x10   : > { %6148 = vmatpush1.msk.msra.mxu1 %vm505_vm0, %v387_v4  ;;  %839 = vmatprep.mubr.f32.mxu1 %v6793_v3  ;;  %v6407_v8 = vpack.c.bf16 %v382_v6, %v378_v5  ;;  %v381_v9 = vld [vmem:[%s10010_s3 + $0x20] sm:$0xff]  ;;  %v384_v11 = vld [vmem:[%s10010_s3 + $0x38] sm:$0xff]  ;;  %v379_v13 = vld [vmem:[%s10010_s3 + $0x10] sm:$0xff]  ;;  %s7631_s16 = sshll.u32 %s6095_s22, 2  ;;  %vm4443_vm3 = vcmask 64512   ;;  %vm5488_vm4 = vcmask 1041409  }
  0x11   : > { %s10487_s9 = smov (!%p284_p3, %s6100_s9), 63  ;;  %v6411_v12 = vpack.c.bf16 %v384_v11, %v380_v10  ;;  %v383_v14 = vld [vmem:[%s10010_s3 + $0x30] sm:$0xff]  ;;  %v6409_v15 = vpack.c.bf16 %v381_v9, %v377_v7  ;;  %v390_v35 = vld [vmem:[%s10010_s3 + $0x68] sm:$0xff]  ;;  %v392_v38 = vld [vmem:[%s10010_s3 + $0x78] sm:$0xff]  ;;  %p296_p4 = scmp.lt.s32.totalorder %s7631_s16, 7  ;;  %vm5491_vm5 = vcmask 1042434  }
  0x12   : > { %6408 = vmatprep.subr.bf16.mxu0 %v6407_v8  ;;  %s6101_s26 = sshll.u32 %s10487_s9, 3  ;;  %v6413_v16 = vpack.c.bf16 %v383_v14, %v379_v13  ;;  %v394_v36 = vld [vmem:[%s10010_s3 + $0x88] sm:$0xff]  ;;  %v396_v40 = vld [vmem:[%s10010_s3 + $0x98] sm:$0xff]  ;;  %v389_v55 = vld [vmem:[%s10010_s3 + $0x60] sm:$0xff]  ;;  %vm5494_vm6 = vcmask 1043459   ;;  %vm5497_vm7 = vcmask 1044484  }
  0x13   : > { %6412 = vmatprep.subr.bf16.mxu1 %v6411_v12  ;;  %s6885_s29 = scalar_lea.vmem %s10008_s1, %s6101_s26  ;;  %v6415_v37 = vpack.c.bf16 %v394_v36, %v390_v35  ;;  %v6419_v41 = vpack.c.bf16 %v396_v40, %v392_v38  ;;  %s7060_s17 = scalar_lea.vmem %s10007_s0, %s6101_s26  ;;  %v393_v56 = vld [vmem:[%s10010_s3 + $0x80] sm:$0xff]  ;;  %v391_v57 = vld [vmem:[%s10010_s3 + $0x70] sm:$0xff]  ;;  %vm5500_vm8 = vcmask 1045509   ;;  %vm5503_vm9 = vcmask 1046534  }
  0x14   : > { %v345_v17 = vld [vmem:[%s6885_s29] sm:$0xff]  ;;  %v346_v18 = vld [vmem:[%s6885_s29 + $0x8] sm:$0xff]  ;;  %v347_v19 = vld [vmem:[%s6885_s29 + $0x10] sm:$0xff]  ;;  %v6417_v60 = vpack.c.bf16 %v393_v56, %v389_v55  ;;  %s10489_s16 = smov (!%p296_p4, %s7631_s16), 7  ;;  %vm5506_vm10 = vcmask 1047559   ;;  %vm5908_vm11 = vcmask 261120  }
  0x15   : > { %6115 = vmatmul.mubr.msk.f32.vlgmr.msra.gmra.mrb[0].mxu0 %vm408_vm1, %v345_v17  ;;  %6149 = vmatmul.mubr.msk.f32.vlgmr.msra.gmra.mrb[0].mxu1 %vm408_vm1, %v345_v17  ;;  %v348_v20 = vld [vmem:[%s6885_s29 + $0x18] sm:$0xff]  ;;  %v349_v21 = vld [vmem:[%s6885_s29 + $0x20] sm:$0xff]  ;;  %v350_v22 = vld [vmem:[%s6885_s29 + $0x28] sm:$0xff]  ;;  %s7674_s22 = sshll.u32 %s10489_s16, 3 }
  0x16   : > { %6410 = vmatpush1.bf16.msra.mxu0 %v6409_v15  ;;  %588 = vmatprep.mubr.f32.mxu0 %v6793_v3  ;;  %v351_v23 = vld [vmem:[%s6885_s29 + $0x30] sm:$0xff]  ;;  %v352_v24 = vld [vmem:[%s6885_s29 + $0x38] sm:$0xff]  ;;  %v353_v25 = vld [vmem:[%s6885_s29 + $0x40] sm:$0xff]  ;;  %s7691_s20 = scalar_lea.vmem %s10009_s2, %s7674_s22  ;;  %s8414_s27 = scalar_lea.vmem %s10013_s6, %s7674_s22 }
  0x17   : > { %845 = vmatprep.mubr.f32.mxu1 %v6793_v3  ;;  %6414 = vmatpush1.bf16.msra.mxu1 %v6413_v16  ;;  %v354_v26 = vld [vmem:[%s6885_s29 + $0x48] sm:$0xff]  ;;  %v355_v27 = vld [vmem:[%s6885_s29 + $0x50] sm:$0xff]  ;;  %v356_v28 = vld [vmem:[%s6885_s29 + $0x58] sm:$0xff]  ;;  %s9986_s16 = scalar_lea.vmem %s10012_s5, %s7674_s22 }
  0x18   : > { %v357_v29 = vld [vmem:[%s6885_s29 + $0x60] sm:$0xff]  ;;  %v358_v30 = vld [vmem:[%s6885_s29 + $0x68] sm:$0xff]  ;;  %v359_v31 = vld [vmem:[%s6885_s29 + $0x70] sm:$0xff]  ;;  %6416 = vmatprep.subr.bf16.mxu0 %v6415_v37  ;;  %6420 = vmatprep.subr.bf16.mxu1 %v6419_v41 }
  0x19   : > { %6116 = vmatmul.mubr.msk.f32.gmra.mrb[2].mxu0 %vm408_vm1, %v346_v18  ;;  %6150 = vmatmul.mubr.msk.f32.gmra.mrb[2].mxu1 %vm408_vm1, %v346_v18  ;;  %v360_v32 = vld [vmem:[%s6885_s29 + $0x78] sm:$0xff]  ;;  %v361_v33 = vld [vmem:[%s6885_s29 + $0x80] sm:$0xff]  ;;  %v362_v34 = vld [vmem:[%s6885_s29 + $0x88] sm:$0xff] }
  0x1a   : > { %594 = vmatprep.mubr.f32.mxu0 %v6793_v3  ;;  %851 = vmatprep.mubr.f32.mxu1 %v6793_v3  ;;  %v363_v39 = vld [vmem:[%s6885_s29 + $0x90] sm:$0xff]  ;;  %v364_v42 = vld [vmem:[%s6885_s29 + $0x98] sm:$0xff]  ;;  %v365_v43 = vld [vmem:[%s6885_s29 + $0xa0] sm:$0xff] }
  0x1b   : > { %v366_v44 = vld [vmem:[%s6885_s29 + $0xa8] sm:$0xff]  ;;  %v367_v45 = vld [vmem:[%s6885_s29 + $0xb0] sm:$0xff]  ;;  %v368_v46 = vld [vmem:[%s6885_s29 + $0xb8] sm:$0xff] }
  0x1c   : > { %v369_v47 = vld [vmem:[%s6885_s29 + $0xc0] sm:$0xff]  ;;  %v370_v48 = vld [vmem:[%s6885_s29 + $0xc8] sm:$0xff]  ;;  %v371_v49 = vld [vmem:[%s6885_s29 + $0xd0] sm:$0xff] }
  0x1d   : > { %6117 = vmatmul.mubr.msk.f32.gmra.mrb[4].mxu0 %vm408_vm1, %v347_v19  ;;  %6151 = vmatmul.mubr.msk.f32.gmra.mrb[4].mxu1 %vm408_vm1, %v347_v19  ;;  %v372_v50 = vld [vmem:[%s6885_s29 + $0xd8] sm:$0xff]  ;;  %v373_v51 = vld [vmem:[%s6885_s29 + $0xe0] sm:$0xff]  ;;  %v374_v52 = vld [vmem:[%s6885_s29 + $0xe8] sm:$0xff] }
  0x1e   : > { %600 = vmatprep.mubr.f32.mxu0 %v6793_v3  ;;  %857 = vmatprep.mubr.f32.mxu1 %v6793_v3  ;;  %v375_v53 = vld [vmem:[%s6885_s29 + $0xf0] sm:$0xff]  ;;  %v376_v54 = vld [vmem:[%s6885_s29 + $0xf8] sm:$0xff]  ;;  %v7079_v59 = vld [vmem:[%s7060_s17] sm:$0xff] }
  0x1f   : > { %v395_v58 = vld [vmem:[%s10010_s3 + $0x90] sm:$0xff]  ;;  %v7088_v62 = vld [vmem:[%s7060_s17 + $0x8] sm:$0xff]  ;;  %v7106_v0 = vld [vmem:[%s7060_s17 + $0x18] sm:$0xff] }
  0x20   : > { %v6421_v61 = vpack.c.bf16 %v395_v58, %v391_v57  ;;  %v7097_v63 = vld [vmem:[%s7060_s17 + $0x10] sm:$0xff]  ;;  %v7115_v1 = vld [vmem:[%s7060_s17 + $0x20] sm:$0xff]  ;;  %v7124_v2 = vld [vmem:[%s7060_s17 + $0x28] sm:$0xff] }
  0x21   : > { %6118 = vmatmul.mubr.msk.f32.gmra.mrb[6].mxu0 %vm408_vm1, %v348_v20  ;;  %6152 = vmatmul.mubr.msk.f32.gmra.mrb[6].mxu1 %vm408_vm1, %v348_v20  ;;  %v7133_v4 = vld [vmem:[%s7060_s17 + $0x30] sm:$0xff]  ;;  %v7142_v5 = vld [vmem:[%s7060_s17 + $0x38] sm:$0xff]  ;;  %v7151_v6 = vld [vmem:[%s7060_s17 + $0x40] sm:$0xff] }
  0x22   : > { %606 = vmatprep.mubr.f32.mxu0 %v6793_v3  ;;  %863 = vmatprep.mubr.f32.mxu1 %v6793_v3  ;;  %v7160_v7 = vld [vmem:[%s7060_s17 + $0x48] sm:$0xff]  ;;  %v7169_v8 = vld [vmem:[%s7060_s17 + $0x50] sm:$0xff]  ;;  %v7178_v9 = vld [vmem:[%s7060_s17 + $0x58] sm:$0xff] }
  0x23   : > { %v7187_v10 = vld [vmem:[%s7060_s17 + $0x60] sm:$0xff]  ;;  %v7196_v11 = vld [vmem:[%s7060_s17 + $0x68] sm:$0xff]  ;;  %v7205_v12 = vld [vmem:[%s7060_s17 + $0x70] sm:$0xff] }
  0x24   : > { %v7214_v13 = vld [vmem:[%s7060_s17 + $0x78] sm:$0xff]  ;;  %v7223_v14 = vld [vmem:[%s7060_s17 + $0x80] sm:$0xff]  ;;  %v7232_v15 = vld [vmem:[%s7060_s17 + $0x88] sm:$0xff] }
  0x25   : > { %6119 = vmatmul.mubr.msk.f32.gmra.mrb[8].mxu0 %vm408_vm1, %v349_v21  ;;  %6153 = vmatmul.mubr.msk.f32.gmra.mrb[8].mxu1 %vm408_vm1, %v349_v21  ;;  %v398_v16 = vld [vmem:[%s10010_s3 + $0xa8] sm:$0xff]  ;;  %v400_v17 = vld [vmem:[%s10010_s3 + $0xb8] sm:$0xff]  ;;  %v7247_v18 = vld [vmem:[%s7060_s17 + $0x90] sm:$0xff] }
  0x26   : > { %612 = vmatprep.mubr.f32.mxu0 %v6793_v3  ;;  %869 = vmatprep.mubr.f32.mxu1 %v6793_v3  ;;  %v7256_v19 = vld [vmem:[%s7060_s17 + $0x98] sm:$0xff]  ;;  %v7265_v20 = vld [vmem:[%s7060_s17 + $0xa0] sm:$0xff]  ;;  %v7274_v21 = vld [vmem:[%s7060_s17 + $0xa8] sm:$0xff] }
  0x27   : > { %v6110_v38 = vld [vmem:[%s10010_s3 + $0xc0] ss:$8 sm:$0xf] }
  0x29   : > { %6120 = vmatmul.mubr.msk.f32.gmra.mrb[10].mxu0 %vm408_vm1, %v350_v22  ;;  %6154 = vmatmul.mubr.msk.f32.gmra.mrb[10].mxu1 %vm408_vm1, %v350_v22  ;;  %v7283_v22 = vld [vmem:[%s7060_s17 + $0xb0] sm:$0xff] }
  0x2a   : > { %618 = vmatprep.mubr.f32.mxu0 %v6793_v3  ;;  %875 = vmatprep.mubr.f32.mxu1 %v6793_v3 }
  0x2d   : > { %6121 = vmatmul.mubr.msk.f32.gmra.mrb[12].mxu0 %vm408_vm1, %v351_v23  ;;  %6155 = vmatmul.mubr.msk.f32.gmra.mrb[12].mxu1 %vm408_vm1, %v351_v23  ;;  %v7292_v23 = vld [vmem:[%s7060_s17 + $0xb8] sm:$0xff] }
  0x2e   : > { %624 = vmatprep.mubr.f32.mxu0 %v6793_v3  ;;  %881 = vmatprep.mubr.f32.mxu1 %v6793_v3 }
  0x31   : > { %6122 = vmatmul.mubr.msk.f32.gmra.mrb[14].mxu0 %vm408_vm1, %v352_v24  ;;  %6156 = vmatmul.mubr.msk.f32.gmra.mrb[14].mxu1 %vm408_vm1, %v352_v24  ;;  %v7301_v24 = vld [vmem:[%s7060_s17 + $0xc0] sm:$0xff] }
  0x32   : > { %630 = vmatprep.mubr.f32.mxu0 %v6793_v3  ;;  %887 = vmatprep.mubr.f32.mxu1 %v6793_v3 }
  0x35   : > { %6123 = vmatmul.mubr.msk.f32.gmra.mrb[16].mxu0 %vm408_vm1, %v353_v25  ;;  %6157 = vmatmul.mubr.msk.f32.gmra.mrb[16].mxu1 %vm408_vm1, %v353_v25  ;;  %v7310_v25 = vld [vmem:[%s7060_s17 + $0xc8] sm:$0xff] }
  0x36   : > { %636 = vmatprep.mubr.f32.mxu0 %v6793_v3  ;;  %893 = vmatprep.mubr.f32.mxu1 %v6793_v3 }
  0x39   : > { %6124 = vmatmul.mubr.msk.f32.gmra.mrb[18].mxu0 %vm408_vm1, %v354_v26  ;;  %6158 = vmatmul.mubr.msk.f32.gmra.mrb[18].mxu1 %vm408_vm1, %v354_v26  ;;  %v7319_v26 = vld [vmem:[%s7060_s17 + $0xd0] sm:$0xff] }
  0x3a   : > { %642 = vmatprep.mubr.f32.mxu0 %v6793_v3  ;;  %899 = vmatprep.mubr.f32.mxu1 %v6793_v3 }
  0x3d   : > { %6125 = vmatmul.mubr.msk.f32.gmra.mrb[20].mxu0 %vm408_vm1, %v355_v27  ;;  %6159 = vmatmul.mubr.msk.f32.gmra.mrb[20].mxu1 %vm408_vm1, %v355_v27  ;;  %v7328_v27 = vld [vmem:[%s7060_s17 + $0xd8] sm:$0xff] }
  0x3e   : > { %648 = vmatprep.mubr.f32.mxu0 %v6793_v3  ;;  %905 = vmatprep.mubr.f32.mxu1 %v6793_v3 }
  0x41   : > { %6126 = vmatmul.mubr.msk.f32.gmra.mrb[22].mxu0 %vm408_vm1, %v356_v28  ;;  %6160 = vmatmul.mubr.msk.f32.gmra.mrb[22].mxu1 %vm408_vm1, %v356_v28  ;;  %v7337_v28 = vld [vmem:[%s7060_s17 + $0xe0] sm:$0xff] }
  0x42   : > { %654 = vmatprep.mubr.f32.mxu0 %v6793_v3  ;;  %911 = vmatprep.mubr.f32.mxu1 %v6793_v3 }
  0x45   : > { %6127 = vmatmul.mubr.msk.f32.gmra.mrb[24].mxu0 %vm408_vm1, %v357_v29  ;;  %6161 = vmatmul.mubr.msk.f32.gmra.mrb[24].mxu1 %vm408_vm1, %v357_v29  ;;  %v7346_v29 = vld [vmem:[%s7060_s17 + $0xe8] sm:$0xff] }
  0x46   : > { %660 = vmatprep.mubr.f32.mxu0 %v6793_v3  ;;  %917 = vmatprep.mubr.f32.mxu1 %v6793_v3 }
  0x49   : > { %6128 = vmatmul.mubr.msk.f32.gmra.mrb[26].mxu0 %vm408_vm1, %v358_v30  ;;  %6162 = vmatmul.mubr.msk.f32.gmra.mrb[26].mxu1 %vm408_vm1, %v358_v30  ;;  %v7355_v30 = vld [vmem:[%s7060_s17 + $0xf0] sm:$0xff] }
  0x4a   : > { %666 = vmatprep.mubr.f32.mxu0 %v6793_v3  ;;  %923 = vmatprep.mubr.f32.mxu1 %v6793_v3 }
  0x4d   : > { %6129 = vmatmul.mubr.msk.f32.gmra.mrb[28].mxu0 %vm408_vm1, %v359_v31  ;;  %6163 = vmatmul.mubr.msk.f32.gmra.mrb[28].mxu1 %vm408_vm1, %v359_v31  ;;  %v7364_v31 = vld [vmem:[%s7060_s17 + $0xf8] sm:$0xff] }
  0x4e   : > { %672 = vmatprep.mubr.f32.mxu0 %v6793_v3  ;;  %929 = vmatprep.mubr.f32.mxu1 %v6793_v3 }
  0x51   : > { %6130 = vmatmul.mubr.msk.f32.gmra.mrb[30].mxu0 %vm408_vm1, %v360_v32  ;;  %6164 = vmatmul.mubr.msk.f32.gmra.mrb[30].mxu1 %vm408_vm1, %v360_v32  ;;  %v397_v32 = vld [vmem:[%s10010_s3 + $0xa0] sm:$0xff] }
  0x52   : > { %678 = vmatprep.mubr.f32.mxu0 %v6793_v3  ;;  %935 = vmatprep.mubr.f32.mxu1 %v6793_v3 }
  0x55   : > { %6131 = vmatmul.mubr.msk.f32.gmra.mrb[32].mxu0 %vm408_vm1, %v361_v33  ;;  %6165 = vmatmul.mubr.msk.f32.gmra.mrb[32].mxu1 %vm408_vm1, %v361_v33  ;;  %v399_v33 = vld [vmem:[%s10010_s3 + $0xb0] sm:$0xff] }
  0x56   : > { %684 = vmatprep.mubr.f32.mxu0 %v6793_v3  ;;  %941 = vmatprep.mubr.f32.mxu1 %v6793_v3 }
  0x59   : > { %6132 = vmatmul.mubr.msk.f32.gmra.mrb[34].mxu0 %vm408_vm1, %v362_v34  ;;  %6166 = vmatmul.mubr.msk.f32.gmra.mrb[34].mxu1 %vm408_vm1, %v362_v34  ;;  %v1644_v34 = vlaneseq }
  0x5a   : > { %690 = vmatprep.mubr.f32.mxu0 %v6793_v3  ;;  %947 = vmatprep.mubr.f32.mxu1 %v6793_v3 }
  0x5b   : > { %v1645_v35 = vshrl.u32 %v1644_v34, 7 }
  0x5d   : > { %6133 = vmatmul.mubr.msk.f32.gmra.mrb[36].mxu0 %vm408_vm1, %v363_v39  ;;  %6167 = vmatmul.mubr.msk.f32.gmra.mrb[36].mxu1 %vm408_vm1, %v363_v39  ;;  %v7496_v36 = vsub.s32 0, %v1645_v35  ;;  %v7498_v37 = vsub.s32 2, %v1645_v35  ;;  %v7505_v39 = vsub.s32 1, %v1645_v35  ;;  %v7507_v40 = vsub.s32 3, %v1645_v35 }
  0x5e   : > { %696 = vmatprep.mubr.f32.mxu0 %v6793_v3  ;;  %953 = vmatprep.mubr.f32.mxu1 %v6793_v3 }
  0x5f   : > { %10044 = vst [vmem:[#allocation2_spill] sm:$0xff] %v7505_v39  ;;  %10045 = vst [vmem:[#allocation3_spill] sm:$0xff] %v7507_v40  ;;  %v7514_v41 = vrot.slane %v6110_v38, %v7496_v36 }
  0x61   : > { %6134 = vmatmul.mubr.msk.f32.gmra.mrb[38].mxu0 %vm408_vm1, %v364_v42  ;;  %6168 = vmatmul.mubr.msk.f32.gmra.mrb[38].mxu1 %vm408_vm1, %v364_v42  ;;  %v7517_v42 = vrot.slane %v6110_v38, %v7498_v37 }
  0x62   : > { %702 = vmatprep.mubr.f32.mxu0 %v6793_v3  ;;  %959 = vmatprep.mubr.f32.mxu1 %v6793_v3 }
  0x65   : > { %6135 = vmatmul.mubr.msk.f32.gmra.mrb[40].mxu0 %vm408_vm1, %v365_v43  ;;  %6169 = vmatmul.mubr.msk.f32.gmra.mrb[40].mxu1 %vm408_vm1, %v365_v43  ;;  %v6111_v43 = vld [vmem:[%s10010_s3 + $0xc1] ss:$8 sm:$0xf] }
  0x66   : > { %708 = vmatprep.mubr.f32.mxu0 %v6793_v3  ;;  %965 = vmatprep.mubr.f32.mxu1 %v6793_v3  ;;  %v7547_v58 = vrot.slane %v6111_v43, %v7498_v37 }
  0x69   : > { %6136 = vmatmul.mubr.msk.f32.gmra.mrb[42].mxu0 %vm408_vm1, %v366_v44  ;;  %6170 = vmatmul.mubr.msk.f32.gmra.mrb[42].mxu1 %vm408_vm1, %v366_v44  ;;  %v7525_v44 = vrot.slane %v6110_v38, %v7505_v39 }
  0x6a   : > { %714 = vmatprep.mubr.f32.mxu0 %v6793_v3  ;;  %971 = vmatprep.mubr.f32.mxu1 %v6793_v3 }
  0x6d   : > { %6137 = vmatmul.mubr.msk.f32.gmra.mrb[44].mxu0 %vm408_vm1, %v367_v45  ;;  %6171 = vmatmul.mubr.msk.f32.gmra.mrb[44].mxu1 %vm408_vm1, %v367_v45  ;;  %v7528_v45 = vrot.slane %v6110_v38, %v7507_v40 }
  0x6e   : > { %720 = vmatprep.mubr.f32.mxu0 %v6793_v3  ;;  %977 = vmatprep.mubr.f32.mxu1 %v6793_v3 }
  0x71   : > { %6138 = vmatmul.mubr.msk.f32.gmra.mrb[46].mxu0 %vm408_vm1, %v368_v46  ;;  %6172 = vmatmul.mubr.msk.f32.gmra.mrb[46].mxu1 %vm408_vm1, %v368_v46 }
  0x72   : > { %726 = vmatprep.mubr.f32.mxu0 %v6793_v3  ;;  %983 = vmatprep.mubr.f32.mxu1 %v6793_v3 }
  0x75   : > { %6139 = vmatmul.mubr.msk.f32.gmra.mrb[48].mxu0 %vm408_vm1, %v369_v47  ;;  %6173 = vmatmul.mubr.msk.f32.gmra.mrb[48].mxu1 %vm408_vm1, %v369_v47 }
  0x76   : > { %732 = vmatprep.mubr.f32.mxu0 %v6793_v3  ;;  %989 = vmatprep.mubr.f32.mxu1 %v6793_v3 }
  0x79   : > { %6140 = vmatmul.mubr.msk.f32.gmra.mrb[50].mxu0 %vm408_vm1, %v370_v48  ;;  %6174 = vmatmul.mubr.msk.f32.gmra.mrb[50].mxu1 %vm408_vm1, %v370_v48 }
  0x7a   : > { %738 = vmatprep.mubr.f32.mxu0 %v6793_v3  ;;  %995 = vmatprep.mubr.f32.mxu1 %v6793_v3 }
  0x7d   : > { %6141 = vmatmul.mubr.msk.f32.gmra.mrb[52].mxu0 %vm408_vm1, %v371_v49  ;;  %6175 = vmatmul.mubr.msk.f32.gmra.mrb[52].mxu1 %vm408_vm1, %v371_v49  ;;  %v7532_v49 = vrot.slane %v6111_v43, %v7496_v36 }
  0x7e   : > { %744 = vmatprep.mubr.f32.mxu0 %v6793_v3  ;;  %1001 = vmatprep.mubr.f32.mxu1 %v6793_v3 }
  0x81   : > { %6142 = vmatmul.mubr.msk.f32.gmra.mrb[54].mxu0 %vm408_vm1, %v372_v50  ;;  %6176 = vmatmul.mubr.msk.f32.gmra.mrb[54].mxu1 %vm408_vm1, %v372_v50 }
  0x82   : > { %750 = vmatprep.mubr.f32.mxu0 %v6793_v3  ;;  %1007 = vmatprep.mubr.f32.mxu1 %v6793_v3 }
  0x85   : > { %6143 = vmatmul.mubr.msk.f32.gmra.mrb[56].mxu0 %vm408_vm1, %v373_v51  ;;  %6177 = vmatmul.mubr.msk.f32.gmra.mrb[56].mxu1 %vm408_vm1, %v373_v51 }
  0x86   : > { %756 = vmatprep.mubr.f32.mxu0 %v6793_v3  ;;  %1013 = vmatprep.mubr.f32.mxu1 %v6793_v3 }
  0x89   : > { %6144 = vmatmul.mubr.msk.f32.gmra.mrb[58].mxu0 %vm408_vm1, %v374_v52  ;;  %6178 = vmatmul.mubr.msk.f32.gmra.mrb[58].mxu1 %vm408_vm1, %v374_v52 }
  0x8a   : > { %762 = vmatprep.mubr.f32.mxu0 %v6793_v3  ;;  %1019 = vmatprep.mubr.f32.mxu1 %v6793_v3 }
  0x8d   : > { %6145 = vmatmul.mubr.msk.f32.gmra.mrb[60].mxu0 %vm408_vm1, %v375_v53  ;;  %6179 = vmatmul.mubr.msk.f32.gmra.mrb[60].mxu1 %vm408_vm1, %v375_v53 }
  0x8e   : > { %768 = vmatprep.mubr.f32.mxu0 %v6793_v3  ;;  %1025 = vmatprep.mubr.f32.mxu1 %v6793_v3 }
  0x91   : > { %6146 = vmatmul.mubr.msk.f32.gmra.mrb[62].mxu0 %vm408_vm1, %v376_v54  ;;  %6180 = vmatmul.mubr.msk.f32.gmra.mrb[62].mxu1 %vm408_vm1, %v376_v54  ;;  %v7541_v54 = vrot.slane %v6111_v43, %v7505_v39 }
  0x92   : > { %1193 = vmatprep.mubr.f32.mxu0 %v6793_v3  ;;  %1450 = vmatprep.mubr.f32.mxu1 %v6793_v3 }
  0x95   : > { %6181 = vmatmul.mubr.msk.f32.vlgmr.msra.gmra.mrb[0].mxu0 %vm1032_vm2, %v7079_v59  ;;  %6213 = vmatmul.mubr.msk.f32.vlgmr.msra.gmra.mrb[0].mxu1 %vm1032_vm2, %v7079_v59 }
  0x96   : > { %1199 = vmatprep.mubr.f32.mxu0 %v6793_v3  ;;  %1456 = vmatprep.mubr.f32.mxu1 %v6793_v3 }
  0x97   : > { %6418 = vmatpush1.bf16.msra.mxu0 %v6417_v60  ;;  %6422 = vmatpush1.bf16.msra.mxu1 %v6421_v61 }
  0x98   : > { %4456 = vmatprep.subr.mxu0 %v398_v16  ;;  %4545 = vmatprep.subr.mxu1 %v400_v17 }
  0x99   : > { %6182 = vmatmul.mubr.msk.f32.gmra.mrb[2].mxu0 %vm1032_vm2, %v7088_v62  ;;  %6214 = vmatmul.mubr.msk.f32.gmra.mrb[2].mxu1 %vm1032_vm2, %v7088_v62 }
  0x9a   : > { %1205 = vmatprep.mubr.f32.mxu0 %v6793_v3  ;;  %1462 = vmatprep.mubr.f32.mxu1 %v6793_v3 }
  0x9d   : > { %6183 = vmatmul.mubr.msk.f32.gmra.mrb[4].mxu0 %vm1032_vm2, %v7097_v63  ;;  %6215 = vmatmul.mubr.msk.f32.gmra.mrb[4].mxu1 %vm1032_vm2, %v7097_v63 }
  0x9e   : > { %1211 = vmatprep.mubr.f32.mxu0 %v6793_v3  ;;  %1468 = vmatprep.mubr.f32.mxu1 %v6793_v3 }
  0xa1   : > { %6184 = vmatmul.mubr.msk.f32.gmra.mrb[6].mxu0 %vm1032_vm2, %v7106_v0  ;;  %6216 = vmatmul.mubr.msk.f32.gmra.mrb[6].mxu1 %vm1032_vm2, %v7106_v0 }
  0xa2   : > { %1217 = vmatprep.mubr.f32.mxu0 %v6793_v3  ;;  %1474 = vmatprep.mubr.f32.mxu1 %v6793_v3 }
  0xa5   : > { %6185 = vmatmul.mubr.msk.f32.gmra.mrb[8].mxu0 %vm1032_vm2, %v7115_v1  ;;  %6217 = vmatmul.mubr.msk.f32.gmra.mrb[8].mxu1 %vm1032_vm2, %v7115_v1 }
  0xa6   : > { %1223 = vmatprep.mubr.f32.mxu0 %v6793_v3  ;;  %1480 = vmatprep.mubr.f32.mxu1 %v6793_v3 }
  0xa9   : > { %6186 = vmatmul.mubr.msk.f32.gmra.mrb[10].mxu0 %vm1032_vm2, %v7124_v2  ;;  %6218 = vmatmul.mubr.msk.f32.gmra.mrb[10].mxu1 %vm1032_vm2, %v7124_v2 }
  0xaa   : > { %1229 = vmatprep.mubr.f32.mxu0 %v6793_v3  ;;  %1486 = vmatprep.mubr.f32.mxu1 %v6793_v3 }
  0xad   : > { %6187 = vmatmul.mubr.msk.f32.gmra.mrb[12].mxu0 %vm1032_vm2, %v7133_v4  ;;  %6219 = vmatmul.mubr.msk.f32.gmra.mrb[12].mxu1 %vm1032_vm2, %v7133_v4 }
  0xae   : > { %1235 = vmatprep.mubr.f32.mxu0 %v6793_v3  ;;  %1492 = vmatprep.mubr.f32.mxu1 %v6793_v3 }
  0xb1   : > { %6188 = vmatmul.mubr.msk.f32.gmra.mrb[14].mxu0 %vm1032_vm2, %v7142_v5  ;;  %6220 = vmatmul.mubr.msk.f32.gmra.mrb[14].mxu1 %vm1032_vm2, %v7142_v5 }
  0xb2   : > { %1241 = vmatprep.mubr.f32.mxu0 %v6793_v3  ;;  %1498 = vmatprep.mubr.f32.mxu1 %v6793_v3 }
  0xb5   : > { %6189 = vmatmul.mubr.msk.f32.gmra.mrb[16].mxu0 %vm1032_vm2, %v7151_v6  ;;  %6221 = vmatmul.mubr.msk.f32.gmra.mrb[16].mxu1 %vm1032_vm2, %v7151_v6 }
  0xb6   : > { %1247 = vmatprep.mubr.f32.mxu0 %v6793_v3  ;;  %1504 = vmatprep.mubr.f32.mxu1 %v6793_v3 }
  0xb9   : > { %6190 = vmatmul.mubr.msk.f32.gmra.mrb[18].mxu0 %vm1032_vm2, %v7160_v7  ;;  %6222 = vmatmul.mubr.msk.f32.gmra.mrb[18].mxu1 %vm1032_vm2, %v7160_v7 }
  0xba   : > { %1253 = vmatprep.mubr.f32.mxu0 %v6793_v3  ;;  %1510 = vmatprep.mubr.f32.mxu1 %v6793_v3 }
  0xbd   : > { %6191 = vmatmul.mubr.msk.f32.gmra.mrb[20].mxu0 %vm1032_vm2, %v7169_v8  ;;  %6223 = vmatmul.mubr.msk.f32.gmra.mrb[20].mxu1 %vm1032_vm2, %v7169_v8 }
  0xbe   : > { %1259 = vmatprep.mubr.f32.mxu0 %v6793_v3  ;;  %1516 = vmatprep.mubr.f32.mxu1 %v6793_v3 }
  0xc1   : > { %6192 = vmatmul.mubr.msk.f32.gmra.mrb[22].mxu0 %vm1032_vm2, %v7178_v9  ;;  %6224 = vmatmul.mubr.msk.f32.gmra.mrb[22].mxu1 %vm1032_vm2, %v7178_v9 }
  0xc2   : > { %1265 = vmatprep.mubr.f32.mxu0 %v6793_v3  ;;  %1522 = vmatprep.mubr.f32.mxu1 %v6793_v3 }
  0xc5   : > { %6193 = vmatmul.mubr.msk.f32.gmra.mrb[24].mxu0 %vm1032_vm2, %v7187_v10  ;;  %6225 = vmatmul.mubr.msk.f32.gmra.mrb[24].mxu1 %vm1032_vm2, %v7187_v10 }
  0xc6   : > { %1271 = vmatprep.mubr.f32.mxu0 %v6793_v3  ;;  %1528 = vmatprep.mubr.f32.mxu1 %v6793_v3 }
  0xc9   : > { %6194 = vmatmul.mubr.msk.f32.gmra.mrb[26].mxu0 %vm1032_vm2, %v7196_v11  ;;  %6226 = vmatmul.mubr.msk.f32.gmra.mrb[26].mxu1 %vm1032_vm2, %v7196_v11 }
  0xca   : > { %1277 = vmatprep.mubr.f32.mxu0 %v6793_v3  ;;  %1534 = vmatprep.mubr.f32.mxu1 %v6793_v3 }
  0xcd   : > { %6195 = vmatmul.mubr.msk.f32.gmra.mrb[28].mxu0 %vm1032_vm2, %v7205_v12  ;;  %6227 = vmatmul.mubr.msk.f32.gmra.mrb[28].mxu1 %vm1032_vm2, %v7205_v12 }
  0xce   : > { %1283 = vmatprep.mubr.f32.mxu0 %v6793_v3  ;;  %1540 = vmatprep.mubr.f32.mxu1 %v6793_v3 }
  0xd1   : > { %6196 = vmatmul.mubr.msk.f32.gmra.mrb[30].mxu0 %vm1032_vm2, %v7214_v13  ;;  %6228 = vmatmul.mubr.msk.f32.gmra.mrb[30].mxu1 %vm1032_vm2, %v7214_v13 }
  0xd2   : > { %1289 = vmatprep.mubr.f32.mxu0 %v6793_v3  ;;  %1546 = vmatprep.mubr.f32.mxu1 %v6793_v3 }
  0xd5   : > { %6197 = vmatmul.mubr.msk.f32.gmra.mrb[32].mxu0 %vm1032_vm2, %v7223_v14  ;;  %6229 = vmatmul.mubr.msk.f32.gmra.mrb[32].mxu1 %vm1032_vm2, %v7223_v14 }
  0xd6   : > { %1295 = vmatprep.mubr.f32.mxu0 %v6793_v3  ;;  %1552 = vmatprep.mubr.f32.mxu1 %v6793_v3 }
  0xd9   : > { %6198 = vmatmul.mubr.msk.f32.gmra.mrb[34].mxu0 %vm1032_vm2, %v7232_v15  ;;  %6230 = vmatmul.mubr.msk.f32.gmra.mrb[34].mxu1 %vm1032_vm2, %v7232_v15 }
  0xda   : > { %1301 = vmatprep.mubr.f32.mxu0 %v6793_v3  ;;  %1558 = vmatprep.mubr.f32.mxu1 %v6793_v3 }
  0xdd   : > { %6199 = vmatmul.mubr.msk.f32.gmra.mrb[36].mxu0 %vm1032_vm2, %v7247_v18  ;;  %6231 = vmatmul.mubr.msk.f32.gmra.mrb[36].mxu1 %vm1032_vm2, %v7247_v18 }
  0xde   : > { %1307 = vmatprep.mubr.f32.mxu0 %v6793_v3  ;;  %1564 = vmatprep.mubr.f32.mxu1 %v6793_v3 }
  0xe1   : > { %6200 = vmatmul.mubr.msk.f32.gmra.mrb[38].mxu0 %vm1032_vm2, %v7256_v19  ;;  %6232 = vmatmul.mubr.msk.f32.gmra.mrb[38].mxu1 %vm1032_vm2, %v7256_v19 }
  0xe2   : > { %1313 = vmatprep.mubr.f32.mxu0 %v6793_v3  ;;  %1570 = vmatprep.mubr.f32.mxu1 %v6793_v3 }
  0xe5   : > { %6201 = vmatmul.mubr.msk.f32.gmra.mrb[40].mxu0 %vm1032_vm2, %v7265_v20  ;;  %6233 = vmatmul.mubr.msk.f32.gmra.mrb[40].mxu1 %vm1032_vm2, %v7265_v20 }
  0xe6   : > { %1319 = vmatprep.mubr.f32.mxu0 %v6793_v3  ;;  %1576 = vmatprep.mubr.f32.mxu1 %v6793_v3 }
  0xe9   : > { %6202 = vmatmul.mubr.msk.f32.gmra.mrb[42].mxu0 %vm1032_vm2, %v7274_v21  ;;  %6234 = vmatmul.mubr.msk.f32.gmra.mrb[42].mxu1 %vm1032_vm2, %v7274_v21 }
  0xea   : > { %1325 = vmatprep.mubr.f32.mxu0 %v6793_v3  ;;  %1582 = vmatprep.mubr.f32.mxu1 %v6793_v3 }
  0xed   : > { %6203 = vmatmul.mubr.msk.f32.gmra.mrb[44].mxu0 %vm1032_vm2, %v7283_v22  ;;  %6235 = vmatmul.mubr.msk.f32.gmra.mrb[44].mxu1 %vm1032_vm2, %v7283_v22 }
  0xee   : > { %1331 = vmatprep.mubr.f32.mxu0 %v6793_v3  ;;  %1588 = vmatprep.mubr.f32.mxu1 %v6793_v3 }
  0xf1   : > { %6204 = vmatmul.mubr.msk.f32.gmra.mrb[46].mxu0 %vm1032_vm2, %v7292_v23  ;;  %6236 = vmatmul.mubr.msk.f32.gmra.mrb[46].mxu1 %vm1032_vm2, %v7292_v23 }
  0xf2   : > { %1337 = vmatprep.mubr.f32.mxu0 %v6793_v3  ;;  %1594 = vmatprep.mubr.f32.mxu1 %v6793_v3 }
  0xf5   : > { %6205 = vmatmul.mubr.msk.f32.gmra.mrb[48].mxu0 %vm1032_vm2, %v7301_v24  ;;  %6237 = vmatmul.mubr.msk.f32.gmra.mrb[48].mxu1 %vm1032_vm2, %v7301_v24 }
  0xf6   : > { %1343 = vmatprep.mubr.f32.mxu0 %v6793_v3  ;;  %1600 = vmatprep.mubr.f32.mxu1 %v6793_v3 }
  0xf9   : > { %6206 = vmatmul.mubr.msk.f32.gmra.mrb[50].mxu0 %vm1032_vm2, %v7310_v25  ;;  %6238 = vmatmul.mubr.msk.f32.gmra.mrb[50].mxu1 %vm1032_vm2, %v7310_v25 }
  0xfa   : > { %1349 = vmatprep.mubr.f32.mxu0 %v6793_v3  ;;  %1606 = vmatprep.mubr.f32.mxu1 %v6793_v3 }
  0xfd   : > { %6207 = vmatmul.mubr.msk.f32.gmra.mrb[52].mxu0 %vm1032_vm2, %v7319_v26  ;;  %6239 = vmatmul.mubr.msk.f32.gmra.mrb[52].mxu1 %vm1032_vm2, %v7319_v26 }
  0xfe   : > { %1355 = vmatprep.mubr.f32.mxu0 %v6793_v3  ;;  %1612 = vmatprep.mubr.f32.mxu1 %v6793_v3 }
 0x101   : > { %6208 = vmatmul.mubr.msk.f32.gmra.mrb[54].mxu0 %vm1032_vm2, %v7328_v27  ;;  %6240 = vmatmul.mubr.msk.f32.gmra.mrb[54].mxu1 %vm1032_vm2, %v7328_v27 }
 0x102   : > { %1361 = vmatprep.mubr.f32.mxu0 %v6793_v3  ;;  %1618 = vmatprep.mubr.f32.mxu1 %v6793_v3 }
 0x105   : > { %6209 = vmatmul.mubr.msk.f32.gmra.mrb[56].mxu0 %vm1032_vm2, %v7337_v28  ;;  %6241 = vmatmul.mubr.msk.f32.gmra.mrb[56].mxu1 %vm1032_vm2, %v7337_v28 }
 0x106   : > { %1367 = vmatprep.mubr.f32.mxu0 %v6793_v3  ;;  %1624 = vmatprep.mubr.f32.mxu1 %v6793_v3 }
 0x109   : > { %6210 = vmatmul.mubr.msk.f32.gmra.mrb[58].mxu0 %vm1032_vm2, %v7346_v29  ;;  %6242 = vmatmul.mubr.msk.f32.gmra.mrb[58].mxu1 %vm1032_vm2, %v7346_v29 }
 0x10a   : > { %1373 = vmatprep.mubr.f32.mxu0 %v6793_v3  ;;  %1630 = vmatprep.mubr.f32.mxu1 %v6793_v3 }
 0x10d   : > { %6211 = vmatmul.mubr.msk.f32.gmra.mrb[60].mxu0 %vm1032_vm2, %v7355_v30  ;;  %6243 = vmatmul.mubr.msk.f32.gmra.mrb[60].mxu1 %vm1032_vm2, %v7355_v30 }
 0x10e   : > { %1379 = vmatprep.mubr.f32.mxu0 %v6793_v3  ;;  %1636 = vmatprep.mubr.f32.mxu1 %v6793_v3 }
 0x111   : > { %6212 = vmatmul.mubr.msk.f32.gmra.mrb[62].mxu0 %vm1032_vm2, %v7364_v31  ;;  %6244 = vmatmul.mubr.msk.f32.gmra.mrb[62].mxu1 %vm1032_vm2, %v7364_v31 }
 0x112   : > { %1984 = vmatprep.mubr.f32.mxu0 %v6793_v3  ;;  %2241 = vmatprep.mubr.f32.mxu1 %v6793_v3 }
 0x115   : > { %6245 = vmatmul.mubr.msk.f32.vlgmr.msra.gmra.mrb[64].mxu0 %vm1032_vm2, %v7079_v59  ;;  %6277 = vmatmul.mubr.msk.f32.vlgmr.msra.gmra.mrb[64].mxu1 %vm1032_vm2, %v7079_v59 }
 0x116   : > { %1990 = vmatprep.mubr.f32.mxu0 %v6793_v3  ;;  %2247 = vmatprep.mubr.f32.mxu1 %v6793_v3 }
 0x117   : > { %4457 = vmatpush1.msra.mxu0 %v397_v32  ;;  %4546 = vmatpush1.msra.mxu1 %v399_v33 }
 0x119   : > { %6246 = vmatmul.mubr.msk.f32.gmra.mrb[66].mxu0 %vm1032_vm2, %v7088_v62  ;;  %6278 = vmatmul.mubr.msk.f32.gmra.mrb[66].mxu1 %vm1032_vm2, %v7088_v62 }
 0x11a   : > { %1996 = vmatprep.mubr.f32.mxu0 %v6793_v3  ;;  %2253 = vmatprep.mubr.f32.mxu1 %v6793_v3 }
 0x11d   : > { %6247 = vmatmul.mubr.msk.f32.gmra.mrb[68].mxu0 %vm1032_vm2, %v7097_v63  ;;  %6279 = vmatmul.mubr.msk.f32.gmra.mrb[68].mxu1 %vm1032_vm2, %v7097_v63 }
 0x11e   : > { %2002 = vmatprep.mubr.f32.mxu0 %v6793_v3  ;;  %2259 = vmatprep.mubr.f32.mxu1 %v6793_v3 }
 0x121   : > { %6248 = vmatmul.mubr.msk.f32.gmra.mrb[70].mxu0 %vm1032_vm2, %v7106_v0  ;;  %6280 = vmatmul.mubr.msk.f32.gmra.mrb[70].mxu1 %vm1032_vm2, %v7106_v0 }
 0x122   : > { %2008 = vmatprep.mubr.f32.mxu0 %v6793_v3  ;;  %2265 = vmatprep.mubr.f32.mxu1 %v6793_v3 }
 0x125   : > { %6249 = vmatmul.mubr.msk.f32.gmra.mrb[72].mxu0 %vm1032_vm2, %v7115_v1  ;;  %6281 = vmatmul.mubr.msk.f32.gmra.mrb[72].mxu1 %vm1032_vm2, %v7115_v1 }
 0x126   : > { %2014 = vmatprep.mubr.f32.mxu0 %v6793_v3  ;;  %2271 = vmatprep.mubr.f32.mxu1 %v6793_v3 }
 0x129   : > { %6250 = vmatmul.mubr.msk.f32.gmra.mrb[74].mxu0 %vm1032_vm2, %v7124_v2  ;;  %6282 = vmatmul.mubr.msk.f32.gmra.mrb[74].mxu1 %vm1032_vm2, %v7124_v2 }
 0x12a   : > { %2020 = vmatprep.mubr.f32.mxu0 %v6793_v3  ;;  %2277 = vmatprep.mubr.f32.mxu1 %v6793_v3 }
 0x12d   : > { %6251 = vmatmul.mubr.msk.f32.gmra.mrb[76].mxu0 %vm1032_vm2, %v7133_v4  ;;  %6283 = vmatmul.mubr.msk.f32.gmra.mrb[76].mxu1 %vm1032_vm2, %v7133_v4 }
 0x12e   : > { %2026 = vmatprep.mubr.f32.mxu0 %v6793_v3  ;;  %2283 = vmatprep.mubr.f32.mxu1 %v6793_v3 }
 0x131   : > { %6252 = vmatmul.mubr.msk.f32.gmra.mrb[78].mxu0 %vm1032_vm2, %v7142_v5  ;;  %6284 = vmatmul.mubr.msk.f32.gmra.mrb[78].mxu1 %vm1032_vm2, %v7142_v5 }
 0x132   : > { %2032 = vmatprep.mubr.f32.mxu0 %v6793_v3  ;;  %2289 = vmatprep.mubr.f32.mxu1 %v6793_v3 }
 0x135   : > { %6253 = vmatmul.mubr.msk.f32.gmra.mrb[80].mxu0 %vm1032_vm2, %v7151_v6  ;;  %6285 = vmatmul.mubr.msk.f32.gmra.mrb[80].mxu1 %vm1032_vm2, %v7151_v6 }
 0x136   : > { %2038 = vmatprep.mubr.f32.mxu0 %v6793_v3  ;;  %2295 = vmatprep.mubr.f32.mxu1 %v6793_v3 }
 0x139   : > { %6254 = vmatmul.mubr.msk.f32.gmra.mrb[82].mxu0 %vm1032_vm2, %v7160_v7  ;;  %6286 = vmatmul.mubr.msk.f32.gmra.mrb[82].mxu1 %vm1032_vm2, %v7160_v7 }
 0x13a   : > { %2044 = vmatprep.mubr.f32.mxu0 %v6793_v3  ;;  %2301 = vmatprep.mubr.f32.mxu1 %v6793_v3 }
 0x13d   : > { %6255 = vmatmul.mubr.msk.f32.gmra.mrb[84].mxu0 %vm1032_vm2, %v7169_v8  ;;  %6287 = vmatmul.mubr.msk.f32.gmra.mrb[84].mxu1 %vm1032_vm2, %v7169_v8  ;;  %v7561_v8 = vrot.slane %v6111_v43, %v7507_v40 }
 0x13e   : > { %2050 = vmatprep.mubr.f32.mxu0 %v6793_v3  ;;  %2307 = vmatprep.mubr.f32.mxu1 %v6793_v3 }
 0x141   : > { %6256 = vmatmul.mubr.msk.f32.gmra.mrb[86].mxu0 %vm1032_vm2, %v7178_v9  ;;  %6288 = vmatmul.mubr.msk.f32.gmra.mrb[86].mxu1 %vm1032_vm2, %v7178_v9 }
 0x142   : > { %2056 = vmatprep.mubr.f32.mxu0 %v6793_v3  ;;  %2313 = vmatprep.mubr.f32.mxu1 %v6793_v3 }
 0x145   : > { %6257 = vmatmul.mubr.msk.f32.gmra.mrb[88].mxu0 %vm1032_vm2, %v7187_v10  ;;  %6289 = vmatmul.mubr.msk.f32.gmra.mrb[88].mxu1 %vm1032_vm2, %v7187_v10 }
 0x146   : > { %2062 = vmatprep.mubr.f32.mxu0 %v6793_v3  ;;  %2319 = vmatprep.mubr.f32.mxu1 %v6793_v3 }
 0x149   : > { %6258 = vmatmul.mubr.msk.f32.gmra.mrb[90].mxu0 %vm1032_vm2, %v7196_v11  ;;  %6290 = vmatmul.mubr.msk.f32.gmra.mrb[90].mxu1 %vm1032_vm2, %v7196_v11 }
 0x14a   : > { %2068 = vmatprep.mubr.f32.mxu0 %v6793_v3  ;;  %2325 = vmatprep.mubr.f32.mxu1 %v6793_v3 }
 0x14d   : > { %6259 = vmatmul.mubr.msk.f32.gmra.mrb[92].mxu0 %vm1032_vm2, %v7205_v12  ;;  %6291 = vmatmul.mubr.msk.f32.gmra.mrb[92].mxu1 %vm1032_vm2, %v7205_v12 }
 0x14e   : > { %2074 = vmatprep.mubr.f32.mxu0 %v6793_v3  ;;  %2331 = vmatprep.mubr.f32.mxu1 %v6793_v3 }
 0x151   : > { %6260 = vmatmul.mubr.msk.f32.gmra.mrb[94].mxu0 %vm1032_vm2, %v7214_v13  ;;  %6292 = vmatmul.mubr.msk.f32.gmra.mrb[94].mxu1 %vm1032_vm2, %v7214_v13 }
 0x152   : > { %2080 = vmatprep.mubr.f32.mxu0 %v6793_v3  ;;  %2337 = vmatprep.mubr.f32.mxu1 %v6793_v3 }
 0x155   : > { %6261 = vmatmul.mubr.msk.f32.gmra.mrb[96].mxu0 %vm1032_vm2, %v7223_v14  ;;  %6293 = vmatmul.mubr.msk.f32.gmra.mrb[96].mxu1 %vm1032_vm2, %v7223_v14 }
 0x156   : > { %2086 = vmatprep.mubr.f32.mxu0 %v6793_v3  ;;  %2343 = vmatprep.mubr.f32.mxu1 %v6793_v3 }
 0x159   : > { %6262 = vmatmul.mubr.msk.f32.gmra.mrb[98].mxu0 %vm1032_vm2, %v7232_v15  ;;  %6294 = vmatmul.mubr.msk.f32.gmra.mrb[98].mxu1 %vm1032_vm2, %v7232_v15 }
 0x15a   : > { %2092 = vmatprep.mubr.f32.mxu0 %v6793_v3  ;;  %2349 = vmatprep.mubr.f32.mxu1 %v6793_v3 }
 0x15d   : > { %6263 = vmatmul.mubr.msk.f32.gmra.mrb[100].mxu0 %vm1032_vm2, %v7247_v18  ;;  %6295 = vmatmul.mubr.msk.f32.gmra.mrb[100].mxu1 %vm1032_vm2, %v7247_v18 }
 0x15e   : > { %2098 = vmatprep.mubr.f32.mxu0 %v6793_v3  ;;  %2355 = vmatprep.mubr.f32.mxu1 %v6793_v3 }
 0x161   : > { %6264 = vmatmul.mubr.msk.f32.gmra.mrb[102].mxu0 %vm1032_vm2, %v7256_v19  ;;  %6296 = vmatmul.mubr.msk.f32.gmra.mrb[102].mxu1 %vm1032_vm2, %v7256_v19 }
 0x162   : > { %2104 = vmatprep.mubr.f32.mxu0 %v6793_v3  ;;  %2361 = vmatprep.mubr.f32.mxu1 %v6793_v3 }
 0x165   : > { %6265 = vmatmul.mubr.msk.f32.gmra.mrb[104].mxu0 %vm1032_vm2, %v7265_v20  ;;  %6297 = vmatmul.mubr.msk.f32.gmra.mrb[104].mxu1 %vm1032_vm2, %v7265_v20 }
 0x166   : > { %2110 = vmatprep.mubr.f32.mxu0 %v6793_v3  ;;  %2367 = vmatprep.mubr.f32.mxu1 %v6793_v3 }
 0x168   : > { %v1195_v46 = vpop.f32.mrb[0].mxu0  ;;  %v1452_v47 = vpop.f32.mrb[0].mxu1 }
 0x169   : > { %v1664_v48 = vadd.f32 %v7514_v41, %v1195_v46  ;;  %v1666_v50 = vadd.f32 %v7517_v42, %v1452_v47  ;;  %v1197_v51 = vpop.f32.mrb[1].mxu0  ;;  %v1454_v52 = vpop.f32.mrb[1].mxu1  ;;  %6266 = vmatmul.mubr.msk.f32.gmra.mrb[106].mxu0 %vm1032_vm2, %v7274_v21  ;;  %6298 = vmatmul.mubr.msk.f32.gmra.mrb[106].mxu1 %vm1032_vm2, %v7274_v21 }
 0x16a   : > { %v1665_v53 = vadd.f32 %v7525_v44, %v1197_v51  ;;  %2116 = vmatprep.mubr.f32.mxu0 %v6793_v3  ;;  %2373 = vmatprep.mubr.f32.mxu1 %v6793_v3  ;;  %v1667_v56 = vadd.f32 %v7528_v45, %v1454_v52 }
 0x16b   : > { %v1792_v55 = vmax.f32 %v1664_v48, 0.0  ;;  %v1794_v57 = vmax.f32 %v1666_v50, 0.0 }
 0x16c   : > { %v1793_v59 = vmax.f32 %v1665_v53, 0.0  ;;  %v1201_v60 = vpop.f32.mrb[2].mxu0  ;;  %v1458_v61 = vpop.f32.mrb[2].mxu1  ;;  %v1795_v6 = vmax.f32 %v1667_v56, 0.0 }
 0x16d   : > { %v2455_v62 = vmul.f32 %v7532_v49, %v1792_v55  ;;  %v1668_v63 = vadd.f32 %v7514_v41, %v1201_v60  ;;  %v1670_v0 = vadd.f32 %v7517_v42, %v1458_v61  ;;  %v1203_v1 = vpop.f32.mrb[3].mxu0  ;;  %v1460_v2 = vpop.f32.mrb[3].mxu1  ;;  %6267 = vmatmul.mubr.msk.f32.gmra.mrb[108].mxu0 %vm1032_vm2, %v7283_v22  ;;  %6299 = vmatmul.mubr.msk.f32.gmra.mrb[108].mxu1 %vm1032_vm2, %v7283_v22 }
 0x16e   : > { %v2456_v4 = vmul.f32 %v7541_v54, %v1793_v59  ;;  %v1669_v5 = vadd.f32 %v7525_v44, %v1203_v1  ;;  %2122 = vmatprep.mubr.f32.mxu0 %v6793_v3  ;;  %2379 = vmatprep.mubr.f32.mxu1 %v6793_v3  ;;  %v2457_v9 = vmul.f32 %v7547_v58, %v1794_v57 }
 0x16f   : > { %v1796_v7 = vmax.f32 %v1668_v63, 0.0  ;;  %v1671_v11 = vadd.f32 %v7528_v45, %v1460_v2  ;;  %v1798_v16 = vmax.f32 %v1670_v0, 0.0  ;;  %v2458_v34 = vmul.f32 %v7561_v8, %v1795_v6 }
 0x170   : > { %v1797_v10 = vmax.f32 %v1669_v5, 0.0  ;;  %v1207_v12 = vpop.f32.mrb[4].mxu0  ;;  %v1464_v13 = vpop.f32.mrb[4].mxu1  ;;  %v2583_v14 = vadd.f32 %v2456_v4, %v2455_v62 }
 0x171   : > { %v2459_v15 = vmul.f32 %v7532_v49, %v1796_v7  ;;  %v1672_v17 = vadd.f32 %v7514_v41, %v1207_v12  ;;  %v1674_v18 = vadd.f32 %v7517_v42, %v1464_v13  ;;  %v1209_v19 = vpop.f32.mrb[5].mxu0  ;;  %v1466_v20 = vpop.f32.mrb[5].mxu1  ;;  %6268 = vmatmul.mubr.msk.f32.gmra.mrb[110].mxu0 %vm1032_vm2, %v7292_v23  ;;  %6300 = vmatmul.mubr.msk.f32.gmra.mrb[110].mxu1 %vm1032_vm2, %v7292_v23  ;;  %v1799_v38 = vmax.f32 %v1671_v11, 0.0 }
 0x172   : > { %v2460_v21 = vmul.f32 %v7541_v54, %v1797_v10  ;;  %v1673_v22 = vadd.f32 %v7525_v44, %v1209_v19  ;;  %2128 = vmatprep.mubr.f32.mxu0 %v6793_v3  ;;  %v1675_v33 = vadd.f32 %v7528_v45, %v1466_v20  ;;  %2385 = vmatprep.mubr.f32.mxu1 %v6793_v3 }
 0x173   : > { %v1800_v32 = vmax.f32 %v1672_v17, 0.0  ;;  %v2584_v35 = vadd.f32 %v2583_v14, %v2457_v9  ;;  %v1802_v43 = vmax.f32 %v1674_v18, 0.0  ;;  %v2461_v51 = vmul.f32 %v7547_v58, %v1798_v16 }
 0x174   : > { %v1801_v46 = vmax.f32 %v1673_v22, 0.0  ;;  %v1213_v47 = vpop.f32.mrb[6].mxu0  ;;  %v1470_v48 = vpop.f32.mrb[6].mxu1  ;;  %v2588_v50 = vadd.f32 %v2460_v21, %v2459_v15  ;;  %v1803_v61 = vmax.f32 %v1675_v33, 0.0  ;;  %v2462_v7 = vmul.f32 %v7561_v8, %v1799_v38 }
 0x175   : > { %v2463_v23 = vmul.f32 %v7532_v49, %v1800_v32  ;;  %v1676_v52 = vadd.f32 %v7514_v41, %v1213_v47  ;;  %v1678_v53 = vadd.f32 %v7517_v42, %v1470_v48  ;;  %v1215_v55 = vpop.f32.mrb[7].mxu0  ;;  %v1472_v56 = vpop.f32.mrb[7].mxu1  ;;  %6269 = vmatmul.mubr.msk.f32.gmra.mrb[112].mxu0 %vm1032_vm2, %v7301_v24  ;;  %6301 = vmatmul.mubr.msk.f32.gmra.mrb[112].mxu1 %vm1032_vm2, %v7301_v24 }
 0x176   : > { %v2464_v57 = vmul.f32 %v7541_v54, %v1801_v46  ;;  %v1677_v59 = vadd.f32 %v7525_v44, %v1215_v55  ;;  %v1679_v60 = vadd.f32 %v7528_v45, %v1472_v56  ;;  %v2585_v63 = vadd.f32 %v2584_v35, %v2458_v34  ;;  %2134 = vmatprep.mubr.f32.mxu0 %v6793_v3 }
 0x177   : > { %v1804_v62 = vmax.f32 %v1676_v52, 0.0  ;;  %2391 = vmatprep.mubr.f32.mxu1 %v6793_v3  ;;  %v2589_v0 = vadd.f32 %v2588_v50, %v2461_v51  ;;  %v2465_v1 = vmul.f32 %v7547_v58, %v1802_v43  ;;  %v1806_v10 = vmax.f32 %v1678_v53, 0.0 }
 0x178   : > { %v2593_v2 = vadd.f32 %v2464_v57, %v2463_v23  ;;  %v1805_v4 = vmax.f32 %v1677_v59, 0.0  ;;  %v1219_v5 = vpop.f32.mrb[8].mxu0  ;;  %v1476_v6 = vpop.f32.mrb[8].mxu1  ;;  %2586 = vadd.xlane.f32.xlu1 %v2585_v63  ;;  %v1807_v15 = vmax.f32 %v1679_v60, 0.0  ;;  %v2466_v17 = vmul.f32 %v7561_v8, %v1803_v61 }
 0x179   : > { %v2467_v9 = vmul.f32 %v7532_v49, %v1804_v62  ;;  %v1680_v24 = vadd.f32 %v7514_v41, %v1219_v5  ;;  %v1682_v11 = vadd.f32 %v7517_v42, %v1476_v6  ;;  %v1221_v12 = vpop.f32.mrb[9].mxu0  ;;  %v1478_v13 = vpop.f32.mrb[9].mxu1  ;;  %6270 = vmatmul.mubr.msk.f32.gmra.mrb[114].mxu0 %vm1032_vm2, %v7310_v25  ;;  %6302 = vmatmul.mubr.msk.f32.gmra.mrb[114].mxu1 %vm1032_vm2, %v7310_v25 }
 0x17a   : > { %v2468_v14 = vmul.f32 %v7541_v54, %v1805_v4  ;;  %v1681_v16 = vadd.f32 %v7525_v44, %v1221_v12  ;;  %v2590_v19 = vadd.f32 %v2589_v0, %v2462_v7  ;;  %2140 = vmatprep.mubr.f32.mxu0 %v6793_v3  ;;  %v2594_v20 = vadd.f32 %v2593_v2, %v2465_v1 }
 0x17b   : > { %v1808_v18 = vmax.f32 %v1680_v24, 0.0  ;;  %v1810_v22 = vmax.f32 %v1682_v11, 0.0  ;;  %v1683_v33 = vadd.f32 %v7528_v45, %v1478_v13  ;;  %2397 = vmatprep.mubr.f32.mxu1 %v6793_v3  ;;  %v2469_v38 = vmul.f32 %v7547_v58, %v1806_v10 }
 0x17c   : > { %v2598_v21 = vadd.f32 %v2468_v14, %v2467_v9  ;;  %v1809_v32 = vmax.f32 %v1681_v16, 0.0  ;;  %v1225_v34 = vpop.f32.mrb[10].mxu0  ;;  %v1482_v35 = vpop.f32.mrb[10].mxu1  ;;  %2591 = vadd.xlane.f32.xlu0 %v2590_v19  ;;  %v2470_v50 = vmul.f32 %v7561_v8, %v1807_v15  ;;  %v2595_v55 = vadd.f32 %v2594_v20, %v2466_v17 }
 0x17d   : > { %v2471_v43 = vmul.f32 %v7532_v49, %v1808_v18  ;;  %v1684_v25 = vadd.f32 %v7514_v41, %v1225_v34  ;;  %v1686_v46 = vadd.f32 %v7517_v42, %v1482_v35  ;;  %v1227_v47 = vpop.f32.mrb[11].mxu0  ;;  %v1484_v48 = vpop.f32.mrb[11].mxu1  ;;  %6271 = vmatmul.mubr.msk.f32.gmra.mrb[116].mxu0 %vm1032_vm2, %v7319_v26  ;;  %6303 = vmatmul.mubr.msk.f32.gmra.mrb[116].mxu1 %vm1032_vm2, %v7319_v26  ;;  %v1811_v60 = vmax.f32 %v1683_v33, 0.0 }
 0x17e   : > { %v2472_v51 = vmul.f32 %v7541_v54, %v1809_v32  ;;  %v1685_v23 = vadd.f32 %v7525_v44, %v1227_v47  ;;  %v1687_v53 = vadd.f32 %v7528_v45, %v1484_v48  ;;  %2146 = vmatprep.mubr.f32.mxu0 %v6793_v3  ;;  %v2599_v56 = vadd.f32 %v2598_v21, %v2469_v38 }
 0x17f   : > { %v1812_v52 = vmax.f32 %v1684_v25, 0.0  ;;  %v2473_v57 = vmul.f32 %v7547_v58, %v1810_v22  ;;  %2403 = vmatprep.mubr.f32.mxu1 %v6793_v3  ;;  %v1814_v1 = vmax.f32 %v1686_v46, 0.0  ;;  %v2474_v13 = vmul.f32 %v7561_v8, %v1811_v60 }
 0x180   : > { %v2603_v59 = vadd.f32 %v2472_v51, %v2471_v43  ;;  %v1813_v61 = vmax.f32 %v1685_v23, 0.0  ;;  %v1231_v62 = vpop.f32.mrb[12].mxu0  ;;  %v1488_v63 = vpop.f32.mrb[12].mxu1  ;;  %2596 = vadd.xlane.f32.xlu0 %v2595_v55  ;;  %v1815_v10 = vmax.f32 %v1687_v53, 0.0  ;;  %v2600_v11 = vadd.f32 %v2599_v56, %v2470_v50 }
 0x181   : > { %v2475_v0 = vmul.f32 %v7532_v49, %v1812_v52  ;;  %v1688_v26 = vadd.f32 %v7514_v41, %v1231_v62  ;;  %v1690_v2 = vadd.f32 %v7517_v42, %v1488_v63  ;;  %v1233_v4 = vpop.f32.mrb[13].mxu0  ;;  %v1490_v5 = vpop.f32.mrb[13].mxu1  ;;  %6272 = vmatmul.mubr.msk.f32.gmra.mrb[118].mxu0 %vm1032_vm2, %v7328_v27  ;;  %6304 = vmatmul.mubr.msk.f32.gmra.mrb[118].mxu1 %vm1032_vm2, %v7328_v27 }
 0x182   : > { %v2476_v6 = vmul.f32 %v7541_v54, %v1813_v61  ;;  %v1689_v7 = vadd.f32 %v7525_v44, %v1233_v4  ;;  %v1691_v9 = vadd.f32 %v7528_v45, %v1490_v5  ;;  %2152 = vmatprep.mubr.f32.mxu0 %v6793_v3  ;;  %v2604_v12 = vadd.f32 %v2603_v59, %v2473_v57 }
 0x183   : > { %v1816_v24 = vmax.f32 %v1688_v26, 0.0  ;;  %v1818_v15 = vmax.f32 %v1690_v2, 0.0  ;;  %2409 = vmatprep.mubr.f32.mxu1 %v6793_v3  ;;  %v2477_v19 = vmul.f32 %v7547_v58, %v1814_v1  ;;  %2601 = vadd.xlane.f32.xlu1 %v2600_v11  ;;  %v2478_v38 = vmul.f32 %v7561_v8, %v1815_v10 }
 0x184   : > { %v2608_v14 = vadd.f32 %v2476_v6, %v2475_v0  ;;  %v1817_v16 = vmax.f32 %v1689_v7, 0.0  ;;  %v1237_v17 = vpop.f32.mrb[14].mxu0  ;;  %v1494_v18 = vpop.f32.mrb[14].mxu1  ;;  %v1819_v34 = vmax.f32 %v1691_v9, 0.0  ;;  %v2605_v25 = vadd.f32 %v2604_v12, %v2474_v13 }
 0x185   : > { %v2479_v20 = vmul.f32 %v7532_v49, %v1816_v24  ;;  %v1692_v27 = vadd.f32 %v7514_v41, %v1237_v17  ;;  %v1694_v21 = vadd.f32 %v7517_v42, %v1494_v18  ;;  %v1239_v22 = vpop.f32.mrb[15].mxu0  ;;  %v1496_v32 = vpop.f32.mrb[15].mxu1  ;;  %6273 = vmatmul.mubr.msk.f32.gmra.mrb[120].mxu0 %vm1032_vm2, %v7337_v28  ;;  %6305 = vmatmul.mubr.msk.f32.gmra.mrb[120].mxu1 %vm1032_vm2, %v7337_v28 }
 0x186   : > { %v2480_v33 = vmul.f32 %v7541_v54, %v1817_v16  ;;  %v1693_v35 = vadd.f32 %v7525_v44, %v1239_v22  ;;  %2158 = vmatprep.mubr.f32.mxu0 %v6793_v3  ;;  %v2609_v46 = vadd.f32 %v2608_v14, %v2477_v19  ;;  %v2481_v47 = vmul.f32 %v7547_v58, %v1818_v15 }
 0x187   : > { %v1820_v43 = vmax.f32 %v1692_v27, 0.0  ;;  %v1695_v51 = vadd.f32 %v7528_v45, %v1496_v32  ;;  %2415 = vmatprep.mubr.f32.mxu1 %v6793_v3  ;;  %v1822_v55 = vmax.f32 %v1694_v21, 0.0  ;;  %2606 = vadd.xlane.f32.xlu0 %v2605_v25  ;;  %v2482_v60 = vmul.f32 %v7561_v8, %v1819_v34 }
 0x188   : > { %v2613_v48 = vadd.f32 %v2480_v33, %v2479_v20  ;;  %v1821_v50 = vmax.f32 %v1693_v35, 0.0  ;;  %v1243_v23 = vpop.f32.mrb[16].mxu0  ;;  %v1500_v52 = vpop.f32.mrb[16].mxu1  ;;  %v2610_v1 = vadd.f32 %v2609_v46, %v2478_v38 }
 0x189   : > { %v2483_v53 = vmul.f32 %v7532_v49, %v1820_v43  ;;  %v1696_v28 = vadd.f32 %v7514_v41, %v1243_v23  ;;  %v1698_v56 = vadd.f32 %v7517_v42, %v1500_v52  ;;  %v1245_v57 = vpop.f32.mrb[17].mxu0  ;;  %v1502_v59 = vpop.f32.mrb[17].mxu1  ;;  %6274 = vmatmul.mubr.msk.f32.gmra.mrb[122].mxu0 %vm1032_vm2, %v7346_v29  ;;  %6306 = vmatmul.mubr.msk.f32.gmra.mrb[122].mxu1 %vm1032_vm2, %v7346_v29  ;;  %v1823_v4 = vmax.f32 %v1695_v51, 0.0 }
 0x18a   : > { %v2484_v61 = vmul.f32 %v7541_v54, %v1821_v50  ;;  %v1697_v62 = vadd.f32 %v7525_v44, %v1245_v57  ;;  %v1699_v0 = vadd.f32 %v7528_v45, %v1502_v59  ;;  %2164 = vmatprep.mubr.f32.mxu0 %v6793_v3  ;;  %v2614_v26 = vadd.f32 %v2613_v48, %v2481_v47 }
 0x18b   : > { %v1824_v63 = vmax.f32 %v1696_v28, 0.0  ;;  %v1826_v5 = vmax.f32 %v1698_v56, 0.0  ;;  %2421 = vmatprep.mubr.f32.mxu1 %v6793_v3  ;;  %v2485_v10 = vmul.f32 %v7547_v58, %v1822_v55  ;;  %2611 = vadd.xlane.f32.xlu1 %v2610_v1  ;;  %v2486_v27 = vmul.f32 %v7561_v8, %v1823_v4 }
 0x18c   : > { %v2618_v2 = vadd.f32 %v2484_v61, %v2483_v53  ;;  %v1825_v6 = vmax.f32 %v1697_v62, 0.0  ;;  %v1249_v7 = vpop.f32.mrb[18].mxu0  ;;  %v1506_v9 = vpop.f32.mrb[18].mxu1  ;;  %v1827_v17 = vmax.f32 %v1699_v0, 0.0  ;;  %v2615_v19 = vadd.f32 %v2614_v26, %v2482_v60  ;;  %v4439_v53 = vld [vmem:[%s7691_s20] sm:$0xff] }
 0x18d   : > { %v2487_v24 = vmul.f32 %v7532_v49, %v1824_v63  ;;  %v1700_v11 = vadd.f32 %v7514_v41, %v1249_v7  ;;  %v1702_v29 = vadd.f32 %v7517_v42, %v1506_v9  ;;  %v1251_v12 = vpop.f32.mrb[19].mxu0  ;;  %v1508_v13 = vpop.f32.mrb[19].mxu1  ;;  %6275 = vmatmul.mubr.msk.f32.gmra.mrb[124].mxu0 %vm1032_vm2, %v7355_v30  ;;  %6307 = vmatmul.mubr.msk.f32.gmra.mrb[124].mxu1 %vm1032_vm2, %v7355_v30 }
 0x18e   : > { %v2488_v14 = vmul.f32 %v7541_v54, %v1825_v6  ;;  %v1701_v15 = vadd.f32 %v7525_v44, %v1251_v12  ;;  %v1703_v16 = vadd.f32 %v7528_v45, %v1508_v13  ;;  %2170 = vmatprep.mubr.f32.mxu0 %v6793_v3  ;;  %v2619_v20 = vadd.f32 %v2618_v2, %v2485_v10  ;;  %v4440_v10 = vld [vmem:[%s7691_s20 + $0x8] sm:$0xff] }
 0x18f   : > { %v1828_v18 = vmax.f32 %v1700_v11, 0.0  ;;  %v2489_v21 = vmul.f32 %v7547_v58, %v1826_v5  ;;  %2427 = vmatprep.mubr.f32.mxu1 %v6793_v3  ;;  %v1830_v35 = vmax.f32 %v1702_v29, 0.0  ;;  %2616 = vadd.xlane.f32.xlu1 %v2615_v19  ;;  %v2490_v51 = vmul.f32 %v7561_v8, %v1827_v17 }
 0x190   : > { %v2623_v22 = vadd.f32 %v2488_v14, %v2487_v24  ;;  %v1829_v32 = vmax.f32 %v1701_v15, 0.0  ;;  %v1255_v33 = vpop.f32.mrb[20].mxu0  ;;  %v1512_v34 = vpop.f32.mrb[20].mxu1  ;;  %v1831_v48 = vmax.f32 %v1703_v16, 0.0  ;;  %v2620_v52 = vadd.f32 %v2619_v20, %v2486_v27 }
 0x191   : > { %v2491_v30 = vmul.f32 %v7532_v49, %v1828_v18  ;;  %v1704_v38 = vadd.f32 %v7514_v41, %v1255_v33  ;;  %v1706_v43 = vadd.f32 %v7517_v42, %v1512_v34  ;;  %v1257_v25 = vpop.f32.mrb[21].mxu0  ;;  %v1514_v46 = vpop.f32.mrb[21].mxu1  ;;  %6276 = vmatmul.mubr.msk.f32.gmra.mrb[126].mxu0 %vm1032_vm2, %v7364_v31  ;;  %6308 = vmatmul.mubr.msk.f32.gmra.mrb[126].mxu1 %vm1032_vm2, %v7364_v31 }
 0x192   : > { %v2492_v47 = vmul.f32 %v7541_v54, %v1829_v32  ;;  %v1705_v50 = vadd.f32 %v7525_v44, %v1257_v25  ;;  %4520 = vmatprep.mubr.f32.mxu0 %v6793_v3  ;;  %v2624_v55 = vadd.f32 %v2623_v22, %v2489_v21  ;;  %v1707_v59 = vadd.f32 %v7528_v45, %v1514_v46 }
 0x193   : > { %v1832_v23 = vmax.f32 %v1704_v38, 0.0  ;;  %v1834_v56 = vmax.f32 %v1706_v43, 0.0  ;;  %4609 = vmatprep.mubr.f32.mxu1 %v6793_v3  ;;  %v2493_v62 = vmul.f32 %v7547_v58, %v1830_v35  ;;  %2621 = vadd.xlane.f32.xlu1 %v2620_v52  ;;  %v2494_v2 = vmul.f32 %v7561_v8, %v1831_v48  ;;  %v4441_v38 = vld [vmem:[%s7691_s20 + $0x10] sm:$0xff] }
 0x194   : > { %v2628_v28 = vadd.f32 %v2492_v47, %v2491_v30  ;;  %v1833_v57 = vmax.f32 %v1705_v50, 0.0  ;;  %v1261_v60 = vpop.f32.mrb[22].mxu0  ;;  %v1518_v61 = vpop.f32.mrb[22].mxu1  ;;  %v2625_v9 = vadd.f32 %v2624_v55, %v2490_v51  ;;  %v1835_v12 = vmax.f32 %v1707_v59, 0.0 }
 0x195   : > { %v2495_v63 = vmul.f32 %v7532_v49, %v1832_v23  ;;  %v1708_v31 = vadd.f32 %v7514_v41, %v1261_v60  ;;  %v1710_v0 = vadd.f32 %v7517_v42, %v1518_v61  ;;  %v1263_v1 = vpop.f32.mrb[23].mxu0  ;;  %v1520_v26 = vpop.f32.mrb[23].mxu1  ;;  %6309 = vmatmul.mubr.msk.f32.vlgmr.msra.gmra.mrb[128].mxu0 %vm4443_vm3, %v4439_v53  ;;  %6313 = vmatmul.mubr.msk.f32.vlgmr.msra.gmra.mrb[128].mxu1 %vm4443_vm3, %v4439_v53 }
 0x196   : > { %v2496_v4 = vmul.f32 %v7541_v54, %v1833_v57  ;;  %v1709_v5 = vadd.f32 %v7525_v44, %v1263_v1  ;;  %v1711_v7 = vadd.f32 %v7528_v45, %v1520_v26  ;;  %4526 = vmatprep.mubr.f32.mxu0 %v6793_v3  ;;  %v2629_v24 = vadd.f32 %v2628_v28, %v2493_v62 }
 0x197   : > { %v1836_v6 = vmax.f32 %v1708_v31, 0.0  ;;  %v2497_v11 = vmul.f32 %v7547_v58, %v1834_v56  ;;  %4615 = vmatprep.mubr.f32.mxu1 %v6793_v3  ;;  %v1838_v17 = vmax.f32 %v1710_v0, 0.0  ;;  %2626 = vadd.xlane.f32.xlu0 %v2625_v9  ;;  %v2498_v43 = vmul.f32 %v7561_v8, %v1835_v12  ;;  %v4442_v31 = vld [vmem:[%s7691_s20 + $0x18] sm:$0xff] }
 0x198   : > { %v2633_v29 = vadd.f32 %v2496_v4, %v2495_v63  ;;  %v1837_v13 = vmax.f32 %v1709_v5, 0.0  ;;  %v1267_v14 = vpop.f32.mrb[24].mxu0  ;;  %v1524_v15 = vpop.f32.mrb[24].mxu1  ;;  %v1839_v33 = vmax.f32 %v1711_v7, 0.0  ;;  %v2630_v30 = vadd.f32 %v2629_v24, %v2494_v2 }
 0x199   : > { %v2499_v16 = vmul.f32 %v7532_v49, %v1836_v6  ;;  %v1712_v18 = vadd.f32 %v7514_v41, %v1267_v14  ;;  %v1714_v19 = vadd.f32 %v7517_v42, %v1524_v15  ;;  %v1269_v20 = vpop.f32.mrb[25].mxu0  ;;  %v1526_v27 = vpop.f32.mrb[25].mxu1  ;;  %6310 = vmatmul.mubr.msk.f32.gmra.mrb[130].mxu0 %vm4443_vm3, %v4440_v10  ;;  %6314 = vmatmul.mubr.msk.f32.gmra.mrb[130].mxu1 %vm4443_vm3, %v4440_v10 }
 0x19a   : > { %v2500_v21 = vmul.f32 %v7541_v54, %v1837_v13  ;;  %v1713_v22 = vadd.f32 %v7525_v44, %v1269_v20  ;;  %v1715_v32 = vadd.f32 %v7528_v45, %v1526_v27  ;;  %v2634_v35 = vadd.f32 %v2633_v29, %v2497_v11  ;;  %4532 = vmatprep.mubr.f32.mxu0 %v6793_v3 }
 0x19b   : > { %v1840_v34 = vmax.f32 %v1712_v18, 0.0  ;;  %v1842_v46 = vmax.f32 %v1714_v19, 0.0  ;;  %4621 = vmatprep.mubr.f32.mxu1 %v6793_v3  ;;  %v2501_v51 = vmul.f32 %v7547_v58, %v1838_v17  ;;  %2631 = vadd.xlane.f32.xlu0 %v2630_v30  ;;  %v2502_v60 = vmul.f32 %v7561_v8, %v1839_v33 }
 0x19c   : > { %v2638_v25 = vadd.f32 %v2500_v21, %v2499_v16  ;;  %v1841_v47 = vmax.f32 %v1713_v22, 0.0  ;;  %v1273_v48 = vpop.f32.mrb[26].mxu0  ;;  %v1530_v50 = vpop.f32.mrb[26].mxu1  ;;  %v1843_v57 = vmax.f32 %v1715_v32, 0.0  ;;  %v2635_v62 = vadd.f32 %v2634_v35, %v2498_v43 }
 0x19d   : > { %v2503_v23 = vmul.f32 %v7532_v49, %v1840_v34  ;;  %v1716_v52 = vadd.f32 %v7514_v41, %v1273_v48  ;;  %v1718_v53 = vadd.f32 %v7517_v42, %v1530_v50  ;;  %v1275_v55 = vpop.f32.mrb[27].mxu0  ;;  %v1532_v28 = vpop.f32.mrb[27].mxu1  ;;  %6311 = vmatmul.mubr.msk.f32.gmra.mrb[132].mxu0 %vm4443_vm3, %v4441_v38  ;;  %6315 = vmatmul.mubr.msk.f32.gmra.mrb[132].mxu1 %vm4443_vm3, %v4441_v38 }
 0x19e   : > { %v2504_v56 = vmul.f32 %v7541_v54, %v1841_v47  ;;  %v1717_v59 = vadd.f32 %v7525_v44, %v1275_v55  ;;  %v2639_v63 = vadd.f32 %v2638_v25, %v2501_v51  ;;  %4538 = vmatprep.mubr.f32.mxu0 %v6793_v3  ;;  %v2505_v0 = vmul.f32 %v7547_v58, %v1842_v46 }
 0x19f   : > { %v1844_v61 = vmax.f32 %v1716_v52, 0.0  ;;  %v1719_v2 = vadd.f32 %v7528_v45, %v1532_v28  ;;  %4627 = vmatprep.mubr.f32.mxu1 %v6793_v3  ;;  %v1846_v7 = vmax.f32 %v1718_v53, 0.0  ;;  %2636 = vadd.xlane.f32.xlu0 %v2635_v62  ;;  %v2506_v29 = vmul.f32 %v7561_v8, %v1843_v57 }
 0x1a0   : > { %v2643_v1 = vadd.f32 %v2504_v56, %v2503_v23  ;;  %v1845_v26 = vmax.f32 %v1717_v59, 0.0  ;;  %v1279_v4 = vpop.f32.mrb[28].mxu0  ;;  %v1536_v5 = vpop.f32.mrb[28].mxu1  ;;  %v2640_v15 = vadd.f32 %v2639_v63, %v2502_v60 }
 0x1a1   : > { %v2507_v6 = vmul.f32 %v7532_v49, %v1844_v61  ;;  %v1720_v9 = vadd.f32 %v7514_v41, %v1279_v4  ;;  %v1722_v10 = vadd.f32 %v7517_v42, %v1536_v5  ;;  %v1281_v24 = vpop.f32.mrb[29].mxu0  ;;  %v1538_v11 = vpop.f32.mrb[29].mxu1  ;;  %6312 = vmatmul.mubr.msk.f32.gmra.mrb[134].mxu0 %vm4443_vm3, %v4442_v31  ;;  %6316 = vmatmul.mubr.msk.f32.gmra.mrb[134].mxu1 %vm4443_vm3, %v4442_v31  ;;  %v1847_v18 = vmax.f32 %v1719_v2, 0.0 }
 0x1a2   : > { %v2508_v12 = vmul.f32 %v7541_v54, %v1845_v26  ;;  %v1721_v13 = vadd.f32 %v7525_v44, %v1281_v24  ;;  %v1723_v3 = vadd.f32 %v7528_v45, %v1538_v11  ;;  %v2644_v16 = vadd.f32 %v2643_v1, %v2505_v0  ;;  %2641 = vadd.xlane.f32.xlu1 %v2640_v15 }
 0x1a3   : > { %v1848_v14 = vmax.f32 %v1720_v9, 0.0  ;;  %v1850_v19 = vmax.f32 %v1722_v10, 0.0  ;;  %v2509_v22 = vmul.f32 %v7547_v58, %v1846_v7  ;;  %v2510_v51 = vmul.f32 %v7561_v8, %v1847_v18 }
 0x1a4   : > { %v2648_v17 = vadd.f32 %v2508_v12, %v2507_v6  ;;  %v1849_v20 = vmax.f32 %v1721_v13, 0.0  ;;  %v1285_v27 = vpop.f32.mrb[30].mxu0  ;;  %v1542_v21 = vpop.f32.mrb[30].mxu1  ;;  %v1851_v46 = vmax.f32 %v1723_v3, 0.0  ;;  %v2645_v48 = vadd.f32 %v2644_v16, %v2506_v29 }
 0x1a5   : > { %v2511_v32 = vmul.f32 %v7532_v49, %v1848_v14  ;;  %v1724_v33 = vadd.f32 %v7514_v41, %v1285_v27  ;;  %v1726_v34 = vadd.f32 %v7517_v42, %v1542_v21  ;;  %v1287_v30 = vpop.f32.mrb[31].mxu0  ;;  %v1544_v35 = vpop.f32.mrb[31].mxu1  ;;  %v2513_v23 = vmul.f32 %v7547_v58, %v1850_v19 }
 0x1a6   : > { %v2512_v38 = vmul.f32 %v7541_v54, %v1849_v20  ;;  %v1725_v43 = vadd.f32 %v7525_v44, %v1287_v30  ;;  %v1727_v25 = vadd.f32 %v7528_v45, %v1544_v35  ;;  %v2649_v50 = vadd.f32 %v2648_v17, %v2509_v22  ;;  %2646 = vadd.xlane.f32.xlu0 %v2645_v48 }
 0x1a7   : > { %v1852_v47 = vmax.f32 %v1724_v33, 0.0  ;;  %v1854_v57 = vmax.f32 %v1726_v34, 0.0  ;;  %v2514_v1 = vmul.f32 %v7561_v8, %v1851_v46 }
 0x1a8   : > { %v2653_v52 = vadd.f32 %v2512_v38, %v2511_v32  ;;  %v1853_v53 = vmax.f32 %v1725_v43, 0.0  ;;  %v1291_v55 = vpop.f32.mrb[32].mxu0  ;;  %v1548_v28 = vpop.f32.mrb[32].mxu1  ;;  %v1855_v31 = vmax.f32 %v1727_v25, 0.0  ;;  %v2650_v2 = vadd.f32 %v2649_v50, %v2510_v51 }
 0x1a9   : > { %v2515_v56 = vmul.f32 %v7532_v49, %v1852_v47  ;;  %v1728_v59 = vadd.f32 %v7514_v41, %v1291_v55  ;;  %v1730_v60 = vadd.f32 %v7517_v42, %v1548_v28  ;;  %v1293_v61 = vpop.f32.mrb[33].mxu0  ;;  %v1550_v62 = vpop.f32.mrb[33].mxu1  ;;  %v2517_v11 = vmul.f32 %v7547_v58, %v1854_v57 }
 0x1aa   : > { %v2516_v63 = vmul.f32 %v7541_v54, %v1853_v53  ;;  %v1729_v0 = vadd.f32 %v7525_v44, %v1293_v61  ;;  %v2654_v4 = vadd.f32 %v2653_v52, %v2513_v23  ;;  %v1731_v9 = vadd.f32 %v7528_v45, %v1550_v62  ;;  %2651 = vadd.xlane.f32.xlu1 %v2650_v2 }
 0x1ab   : > { %v1856_v26 = vmax.f32 %v1728_v59, 0.0  ;;  %v1858_v6 = vmax.f32 %v1730_v60, 0.0  ;;  %v2518_v15 = vmul.f32 %v7561_v8, %v1855_v31 }
 0x1ac   : > { %v2658_v5 = vadd.f32 %v2516_v63, %v2515_v56  ;;  %v1857_v7 = vmax.f32 %v1729_v0, 0.0  ;;  %v1297_v10 = vpop.f32.mrb[34].mxu0  ;;  %v1554_v24 = vpop.f32.mrb[34].mxu1  ;;  %v2655_v20 = vadd.f32 %v2654_v4, %v2514_v1  ;;  %v1859_v32 = vmax.f32 %v1731_v9, 0.0 }
 0x1ad   : > { %v2519_v29 = vmul.f32 %v7532_v49, %v1856_v26  ;;  %v1732_v12 = vadd.f32 %v7514_v41, %v1297_v10  ;;  %v1734_v13 = vadd.f32 %v7517_v42, %v1554_v24  ;;  %v1299_v14 = vpop.f32.mrb[35].mxu0  ;;  %v1556_v3 = vpop.f32.mrb[35].mxu1  ;;  %v2521_v21 = vmul.f32 %v7547_v58, %v1858_v6 }
 0x1ae   : > { %v2520_v16 = vmul.f32 %v7541_v54, %v1857_v7  ;;  %v1733_v17 = vadd.f32 %v7525_v44, %v1299_v14  ;;  %v1735_v19 = vadd.f32 %v7528_v45, %v1556_v3  ;;  %v2659_v27 = vadd.f32 %v2658_v5, %v2517_v11  ;;  %2656 = vadd.xlane.f32.xlu1 %v2655_v20 }
 0x1af   : > { %v1860_v18 = vmax.f32 %v1732_v12, 0.0  ;;  %v1862_v38 = vmax.f32 %v1734_v13, 0.0  ;;  %v2522_v28 = vmul.f32 %v7561_v8, %v1859_v32 }
 0x1b0   : > { %v2663_v22 = vadd.f32 %v2520_v16, %v2519_v29  ;;  %v1861_v33 = vmax.f32 %v1733_v17, 0.0  ;;  %v1303_v34 = vpop.f32.mrb[36].mxu0  ;;  %v1560_v30 = vpop.f32.mrb[36].mxu1  ;;  %v1863_v23 = vmax.f32 %v1735_v19, 0.0  ;;  %v2660_v53 = vadd.f32 %v2659_v27, %v2518_v15 }
 0x1b1   : > { %v2523_v35 = vmul.f32 %v7532_v49, %v1860_v18  ;;  %v1736_v43 = vadd.f32 %v7514_v41, %v1303_v34  ;;  %v1738_v25 = vadd.f32 %v7517_v42, %v1560_v30  ;;  %v1305_v46 = vpop.f32.mrb[37].mxu0  ;;  %v1562_v47 = vpop.f32.mrb[37].mxu1  ;;  %v2525_v62 = vmul.f32 %v7547_v58, %v1862_v38 }
 0x1b2   : > { %v2524_v48 = vmul.f32 %v7541_v54, %v1861_v33  ;;  %v1737_v50 = vadd.f32 %v7525_v44, %v1305_v46  ;;  %v1739_v51 = vadd.f32 %v7528_v45, %v1562_v47  ;;  %v2664_v55 = vadd.f32 %v2663_v22, %v2521_v21  ;;  %2661 = vadd.xlane.f32.xlu1 %v2660_v53 }
 0x1b3   : > { %v1864_v52 = vmax.f32 %v1736_v43, 0.0  ;;  %v1866_v57 = vmax.f32 %v1738_v25, 0.0  ;;  %v2526_v6 = vmul.f32 %v7561_v8, %v1863_v23 }
 0x1b4   : > { %v2668_v56 = vadd.f32 %v2524_v48, %v2523_v35  ;;  %v1865_v59 = vmax.f32 %v1737_v50, 0.0  ;;  %v1309_v60 = vpop.f32.mrb[38].mxu0  ;;  %v1566_v61 = vpop.f32.mrb[38].mxu1  ;;  %v1867_v4 = vmax.f32 %v1739_v51, 0.0  ;;  %v2665_v9 = vadd.f32 %v2664_v55, %v2522_v28 }
 0x1b5   : > { %v2527_v63 = vmul.f32 %v7532_v49, %v1864_v52  ;;  %v1740_v31 = vadd.f32 %v7514_v41, %v1309_v60  ;;  %v1742_v0 = vadd.f32 %v7517_v42, %v1566_v61  ;;  %v1311_v1 = vpop.f32.mrb[39].mxu0  ;;  %v1568_v26 = vpop.f32.mrb[39].mxu1  ;;  %v2529_v24 = vmul.f32 %v7547_v58, %v1866_v57 }
 0x1b6   : > { %v2528_v2 = vmul.f32 %v7541_v54, %v1865_v59  ;;  %v1741_v5 = vadd.f32 %v7525_v44, %v1311_v1  ;;  %v2669_v10 = vadd.f32 %v2668_v56, %v2525_v62  ;;  %v1743_v12 = vadd.f32 %v7528_v45, %v1568_v26  ;;  %2666 = vadd.xlane.f32.xlu0 %v2665_v9 }
 0x1b7   : > { %v1868_v7 = vmax.f32 %v1740_v31, 0.0  ;;  %v1870_v15 = vmax.f32 %v1742_v0, 0.0  ;;  %v2530_v20 = vmul.f32 %v7561_v8, %v1867_v4 }
 0x1b8   : > { %v2673_v11 = vadd.f32 %v2528_v2, %v2527_v63  ;;  %v1869_v29 = vmax.f32 %v1741_v5, 0.0  ;;  %v1315_v13 = vpop.f32.mrb[40].mxu0  ;;  %v1572_v14 = vpop.f32.mrb[40].mxu1  ;;  %v2670_v33 = vadd.f32 %v2669_v10, %v2526_v6  ;;  %v1871_v35 = vmax.f32 %v1743_v12, 0.0 }
 0x1b9   : > { %v2531_v3 = vmul.f32 %v7532_v49, %v1868_v7  ;;  %v1744_v16 = vadd.f32 %v7514_v41, %v1315_v13  ;;  %v1746_v17 = vadd.f32 %v7517_v42, %v1572_v14  ;;  %v1317_v18 = vpop.f32.mrb[41].mxu0  ;;  %v1574_v19 = vpop.f32.mrb[41].mxu1  ;;  %v2533_v47 = vmul.f32 %v7547_v58, %v1870_v15 }
 0x1ba   : > { %v2532_v27 = vmul.f32 %v7541_v54, %v1869_v29  ;;  %v1745_v21 = vadd.f32 %v7525_v44, %v1317_v18  ;;  %v1747_v32 = vadd.f32 %v7528_v45, %v1574_v19  ;;  %v2674_v34 = vadd.f32 %v2673_v11, %v2529_v24  ;;  %2671 = vadd.xlane.f32.xlu0 %v2670_v33 }
 0x1bb   : > { %v1872_v22 = vmax.f32 %v1744_v16, 0.0  ;;  %v1874_v38 = vmax.f32 %v1746_v17, 0.0  ;;  %v2534_v61 = vmul.f32 %v7561_v8, %v1871_v35 }
 0x1bc   : > { %v2678_v30 = vadd.f32 %v2532_v27, %v2531_v3  ;;  %v1873_v43 = vmax.f32 %v1745_v21, 0.0  ;;  %v1321_v25 = vpop.f32.mrb[42].mxu0  ;;  %v1578_v46 = vpop.f32.mrb[42].mxu1  ;;  %v1875_v56 = vmax.f32 %v1747_v32, 0.0  ;;  %v2675_v59 = vadd.f32 %v2674_v34, %v2530_v20 }
 0x1bd   : > { %v2535_v48 = vmul.f32 %v7532_v49, %v1872_v22  ;;  %v1748_v50 = vadd.f32 %v7514_v41, %v1321_v25  ;;  %v1750_v51 = vadd.f32 %v7517_v42, %v1578_v46  ;;  %v1323_v23 = vpop.f32.mrb[43].mxu0  ;;  %v1580_v52 = vpop.f32.mrb[43].mxu1  ;;  %v2537_v62 = vmul.f32 %v7547_v58, %v1874_v38 }
 0x1be   : > { %v2536_v53 = vmul.f32 %v7541_v54, %v1873_v43  ;;  %v1749_v55 = vadd.f32 %v7525_v44, %v1323_v23  ;;  %v1751_v28 = vadd.f32 %v7528_v45, %v1580_v52  ;;  %v2679_v60 = vadd.f32 %v2678_v30, %v2533_v47  ;;  %2676 = vadd.xlane.f32.xlu0 %v2675_v59 }
 0x1bf   : > { %v1876_v57 = vmax.f32 %v1748_v50, 0.0  ;;  %v1878_v2 = vmax.f32 %v1750_v51, 0.0  ;;  %v2538_v11 = vmul.f32 %v7561_v8, %v1875_v56 }
 0x1c0   : > { %v2683_v63 = vadd.f32 %v2536_v53, %v2535_v48  ;;  %v1877_v31 = vmax.f32 %v1749_v55, 0.0  ;;  %v1327_v0 = vpop.f32.mrb[44].mxu0  ;;  %v1584_v1 = vpop.f32.mrb[44].mxu1  ;;  %v1879_v10 = vmax.f32 %v1751_v28, 0.0  ;;  %v2680_v12 = vadd.f32 %v2679_v60, %v2534_v61 }
 0x1c1   : > { %v2539_v26 = vmul.f32 %v7532_v49, %v1876_v57  ;;  %v1752_v4 = vadd.f32 %v7514_v41, %v1327_v0  ;;  %v1754_v5 = vadd.f32 %v7517_v42, %v1584_v1  ;;  %v1329_v6 = vpop.f32.mrb[45].mxu0  ;;  %v1586_v7 = vpop.f32.mrb[45].mxu1  ;;  %v2541_v19 = vmul.f32 %v7547_v58, %v1878_v2 }
 0x1c2   : > { %v2540_v9 = vmul.f32 %v7541_v54, %v1877_v31  ;;  %v1753_v24 = vadd.f32 %v7525_v44, %v1329_v6  ;;  %v2684_v13 = vadd.f32 %v2683_v63, %v2537_v62  ;;  %v1755_v16 = vadd.f32 %v7528_v45, %v1586_v7  ;;  %2681 = vadd.xlane.f32.xlu1 %v2680_v12 }
 0x1c3   : > { %v1880_v29 = vmax.f32 %v1752_v4, 0.0  ;;  %v1882_v3 = vmax.f32 %v1754_v5, 0.0  ;;  %v2542_v33 = vmul.f32 %v7561_v8, %v1879_v10 }
 0x1c4   : > { %v2688_v14 = vadd.f32 %v2540_v9, %v2539_v26  ;;  %v1881_v15 = vmax.f32 %v1753_v24, 0.0  ;;  %v1333_v17 = vpop.f32.mrb[46].mxu0  ;;  %v1590_v18 = vpop.f32.mrb[46].mxu1  ;;  %v2685_v43 = vadd.f32 %v2684_v13, %v2538_v11  ;;  %v1883_v48 = vmax.f32 %v1755_v16, 0.0 }
 0x1c5   : > { %v2543_v20 = vmul.f32 %v7532_v49, %v1880_v29  ;;  %v1756_v27 = vadd.f32 %v7514_v41, %v1333_v17  ;;  %v1758_v21 = vadd.f32 %v7517_v42, %v1590_v18  ;;  %v1335_v22 = vpop.f32.mrb[47].mxu0  ;;  %v1592_v32 = vpop.f32.mrb[47].mxu1  ;;  %v2545_v46 = vmul.f32 %v7547_v58, %v1882_v3 }
 0x1c6   : > { %v2544_v34 = vmul.f32 %v7541_v54, %v1881_v15  ;;  %v1757_v30 = vadd.f32 %v7525_v44, %v1335_v22  ;;  %v1759_v38 = vadd.f32 %v7528_v45, %v1592_v32  ;;  %v2689_v25 = vadd.f32 %v2688_v14, %v2541_v19  ;;  %2686 = vadd.xlane.f32.xlu0 %v2685_v43 }
 0x1c7   : > { %v1884_v35 = vmax.f32 %v1756_v27, 0.0  ;;  %v1886_v53 = vmax.f32 %v1758_v21, 0.0  ;;  %v2546_v1 = vmul.f32 %v7561_v8, %v1883_v48 }
 0x1c8   : > { %v2693_v47 = vadd.f32 %v2544_v34, %v2543_v20  ;;  %v1885_v50 = vmax.f32 %v1757_v30, 0.0  ;;  %v1339_v51 = vpop.f32.mrb[48].mxu0  ;;  %v1596_v23 = vpop.f32.mrb[48].mxu1  ;;  %v1887_v62 = vmax.f32 %v1759_v38, 0.0  ;;  %v2690_v31 = vadd.f32 %v2689_v25, %v2542_v33 }
 0x1c9   : > { %v2547_v52 = vmul.f32 %v7532_v49, %v1884_v35  ;;  %v1760_v55 = vadd.f32 %v7514_v41, %v1339_v51  ;;  %v1762_v28 = vadd.f32 %v7517_v42, %v1596_v23  ;;  %v1341_v56 = vpop.f32.mrb[49].mxu0  ;;  %v1598_v57 = vpop.f32.mrb[49].mxu1  ;;  %v2549_v7 = vmul.f32 %v7547_v58, %v1886_v53 }
 0x1ca   : > { %v2548_v59 = vmul.f32 %v7541_v54, %v1885_v50  ;;  %v1761_v60 = vadd.f32 %v7525_v44, %v1341_v56  ;;  %v1763_v61 = vadd.f32 %v7528_v45, %v1598_v57  ;;  %v2694_v0 = vadd.f32 %v2693_v47, %v2545_v46  ;;  %2691 = vadd.xlane.f32.xlu1 %v2690_v31 }
 0x1cb   : > { %v1888_v63 = vmax.f32 %v1760_v55, 0.0  ;;  %v1890_v2 = vmax.f32 %v1762_v28, 0.0  ;;  %v2550_v3 = vmul.f32 %v7561_v8, %v1887_v62 }
 0x1cc   : > { %v2698_v26 = vadd.f32 %v2548_v59, %v2547_v52  ;;  %v1889_v4 = vmax.f32 %v1761_v60, 0.0  ;;  %v1345_v5 = vpop.f32.mrb[50].mxu0  ;;  %v1602_v6 = vpop.f32.mrb[50].mxu1  ;;  %v1891_v13 = vmax.f32 %v1763_v61, 0.0  ;;  %v2695_v16 = vadd.f32 %v2694_v0, %v2546_v1 }
 0x1cd   : > { %v2551_v9 = vmul.f32 %v7532_v49, %v1888_v63  ;;  %v1764_v10 = vadd.f32 %v7514_v41, %v1345_v5  ;;  %v1766_v24 = vadd.f32 %v7517_v42, %v1602_v6  ;;  %v1347_v11 = vpop.f32.mrb[51].mxu0  ;;  %v1604_v29 = vpop.f32.mrb[51].mxu1  ;;  %v2553_v18 = vmul.f32 %v7547_v58, %v1890_v2 }
 0x1ce   : > { %v2552_v12 = vmul.f32 %v7541_v54, %v1889_v4  ;;  %v1765_v14 = vadd.f32 %v7525_v44, %v1347_v11  ;;  %v2699_v17 = vadd.f32 %v2698_v26, %v2549_v7  ;;  %v1767_v27 = vadd.f32 %v7528_v45, %v1604_v29  ;;  %2696 = vadd.xlane.f32.xlu1 %v2695_v16 }
 0x1cf   : > { %v1892_v15 = vmax.f32 %v1764_v10, 0.0  ;;  %v1894_v33 = vmax.f32 %v1766_v24, 0.0  ;;  %v2554_v43 = vmul.f32 %v7561_v8, %v1891_v13 }
 0x1d0   : > { %v2703_v19 = vadd.f32 %v2552_v12, %v2551_v9  ;;  %v1893_v20 = vmax.f32 %v1765_v14, 0.0  ;;  %v1351_v21 = vpop.f32.mrb[52].mxu0  ;;  %v1608_v22 = vpop.f32.mrb[52].mxu1  ;;  %v2700_v50 = vadd.f32 %v2699_v17, %v2550_v3  ;;  %v1895_v52 = vmax.f32 %v1767_v27, 0.0 }
 0x1d1   : > { %v2555_v32 = vmul.f32 %v7532_v49, %v1892_v15  ;;  %v1768_v34 = vadd.f32 %v7514_v41, %v1351_v21  ;;  %v1770_v30 = vadd.f32 %v7517_v42, %v1608_v22  ;;  %v1353_v35 = vpop.f32.mrb[53].mxu0  ;;  %v1610_v38 = vpop.f32.mrb[53].mxu1  ;;  %v2557_v57 = vmul.f32 %v7547_v58, %v1894_v33 }
 0x1d2   : > { %v2556_v25 = vmul.f32 %v7541_v54, %v1893_v20  ;;  %v1769_v46 = vadd.f32 %v7525_v44, %v1353_v35  ;;  %v1771_v48 = vadd.f32 %v7528_v45, %v1610_v38  ;;  %v2704_v51 = vadd.f32 %v2703_v19, %v2553_v18  ;;  %2701 = vadd.xlane.f32.xlu1 %v2700_v50 }
 0x1d3   : > { %v1896_v47 = vmax.f32 %v1768_v34, 0.0  ;;  %v1898_v53 = vmax.f32 %v1770_v30, 0.0  ;;  %v2558_v6 = vmul.f32 %v7561_v8, %v1895_v52 }
 0x1d4   : > { %v2708_v23 = vadd.f32 %v2556_v25, %v2555_v32  ;;  %v1897_v55 = vmax.f32 %v1769_v46, 0.0  ;;  %v1357_v28 = vpop.f32.mrb[54].mxu0  ;;  %v1614_v56 = vpop.f32.mrb[54].mxu1  ;;  %v1899_v26 = vmax.f32 %v1771_v48, 0.0  ;;  %v2705_v4 = vadd.f32 %v2704_v51, %v2554_v43 }
 0x1d5   : > { %v2559_v59 = vmul.f32 %v7532_v49, %v1896_v47  ;;  %v1772_v60 = vadd.f32 %v7514_v41, %v1357_v28  ;;  %v1774_v61 = vadd.f32 %v7517_v42, %v1614_v56  ;;  %v1359_v62 = vpop.f32.mrb[55].mxu0  ;;  %v1616_v63 = vpop.f32.mrb[55].mxu1  ;;  %v2561_v7 = vmul.f32 %v7547_v58, %v1898_v53 }
 0x1d6   : > { %v2560_v31 = vmul.f32 %v7541_v54, %v1897_v55  ;;  %v1773_v0 = vadd.f32 %v7525_v44, %v1359_v62  ;;  %v1775_v1 = vadd.f32 %v7528_v45, %v1616_v63  ;;  %v2709_v5 = vadd.f32 %v2708_v23, %v2557_v57  ;;  %2706 = vadd.xlane.f32.xlu0 %v2705_v4 }
 0x1d7   : > { %v1900_v2 = vmax.f32 %v1772_v60, 0.0  ;;  %v1902_v12 = vmax.f32 %v1774_v61, 0.0  ;;  %v2562_v19 = vmul.f32 %v7561_v8, %v1899_v26 }
 0x1d8   : > { %v2713_v9 = vadd.f32 %v2560_v31, %v2559_v59  ;;  %v1901_v10 = vmax.f32 %v1773_v0, 0.0  ;;  %v1363_v24 = vpop.f32.mrb[56].mxu0  ;;  %v1620_v11 = vpop.f32.mrb[56].mxu1  ;;  %v1903_v17 = vmax.f32 %v1775_v1, 0.0  ;;  %v2710_v27 = vadd.f32 %v2709_v5, %v2558_v6 }
 0x1d9   : > { %v2563_v29 = vmul.f32 %v7532_v49, %v1900_v2  ;;  %v1776_v13 = vadd.f32 %v7514_v41, %v1363_v24  ;;  %v1778_v14 = vadd.f32 %v7517_v42, %v1620_v11  ;;  %v1365_v3 = vpop.f32.mrb[57].mxu0  ;;  %v1622_v15 = vpop.f32.mrb[57].mxu1  ;;  %v2565_v38 = vmul.f32 %v7547_v58, %v1902_v12 }
 0x1da   : > { %v2564_v16 = vmul.f32 %v7541_v54, %v1901_v10  ;;  %v1777_v18 = vadd.f32 %v7525_v44, %v1365_v3  ;;  %v2714_v21 = vadd.f32 %v2713_v9, %v2561_v7  ;;  %v1779_v34 = vadd.f32 %v7528_v45, %v1622_v15  ;;  %2711 = vadd.xlane.f32.xlu0 %v2710_v27 }
 0x1db   : > { %v1904_v20 = vmax.f32 %v1776_v13, 0.0  ;;  %v1906_v32 = vmax.f32 %v1778_v14, 0.0  ;;  %v2566_v50 = vmul.f32 %v7561_v8, %v1903_v17 }
 0x1dc   : > { %v2718_v22 = vadd.f32 %v2564_v16, %v2563_v29  ;;  %v1905_v33 = vmax.f32 %v1777_v18, 0.0  ;;  %v1369_v30 = vpop.f32.mrb[58].mxu0  ;;  %v1626_v35 = vpop.f32.mrb[58].mxu1  ;;  %v2715_v55 = vadd.f32 %v2714_v21, %v2562_v19  ;;  %v1907_v59 = vmax.f32 %v1779_v34, 0.0 }
 0x1dd   : > { %v2567_v43 = vmul.f32 %v7532_v49, %v1904_v20  ;;  %v1780_v25 = vadd.f32 %v7514_v41, %v1369_v30  ;;  %v1782_v46 = vadd.f32 %v7517_v42, %v1626_v35  ;;  %v1371_v47 = vpop.f32.mrb[59].mxu0  ;;  %v1628_v48 = vpop.f32.mrb[59].mxu1  ;;  %v2569_v56 = vmul.f32 %v7547_v58, %v1906_v32 }
 0x1de   : > { %v2568_v51 = vmul.f32 %v7541_v54, %v1905_v33  ;;  %v1781_v23 = vadd.f32 %v7525_v44, %v1371_v47  ;;  %v1783_v53 = vadd.f32 %v7528_v45, %v1628_v48  ;;  %v2719_v28 = vadd.f32 %v2718_v22, %v2565_v38  ;;  %2716 = vadd.xlane.f32.xlu0 %v2715_v55 }
 0x1df   : > { %v1908_v52 = vmax.f32 %v1780_v25, 0.0  ;;  %v1910_v31 = vmax.f32 %v1782_v46, 0.0  ;;  %v2570_v11 = vmul.f32 %v7561_v8, %v1907_v59 }
 0x1e0   : > { %v2723_v57 = vadd.f32 %v2568_v51, %v2567_v43  ;;  %v1909_v60 = vmax.f32 %v1781_v23, 0.0  ;;  %v1375_v61 = vpop.f32.mrb[60].mxu0  ;;  %v1632_v62 = vpop.f32.mrb[60].mxu1  ;;  %v1911_v7 = vmax.f32 %v1783_v53, 0.0  ;;  %v2720_v10 = vadd.f32 %v2719_v28, %v2566_v50 }
 0x1e1   : > { %v2571_v63 = vmul.f32 %v7532_v49, %v1908_v52  ;;  %v1784_v0 = vadd.f32 %v7514_v41, %v1375_v61  ;;  %v1786_v1 = vadd.f32 %v7517_v42, %v1632_v62  ;;  %v1377_v26 = vpop.f32.mrb[61].mxu0  ;;  %v1634_v2 = vpop.f32.mrb[61].mxu1  ;;  %v2573_v15 = vmul.f32 %v7547_v58, %v1910_v31 }
 0x1e2   : > { %v2572_v4 = vmul.f32 %v7541_v54, %v1909_v60  ;;  %v1785_v5 = vadd.f32 %v7525_v44, %v1377_v26  ;;  %v1787_v6 = vadd.f32 %v7528_v45, %v1634_v2  ;;  %v2724_v24 = vadd.f32 %v2723_v57, %v2569_v56  ;;  %2721 = vadd.xlane.f32.xlu1 %v2720_v10 }
 0x1e3   : > { %v1912_v9 = vmax.f32 %v1784_v0, 0.0  ;;  %v1914_v12 = vmax.f32 %v1786_v1, 0.0  ;;  %v2574_v33 = vmul.f32 %v7561_v8, %v1911_v7 }
 0x1e4   : > { %v2728_v29 = vadd.f32 %v2572_v4, %v2571_v63  ;;  %v1913_v13 = vmax.f32 %v1785_v5, 0.0  ;;  %v1381_v14 = vpop.f32.mrb[62].mxu0  ;;  %v1638_v3 = vpop.f32.mrb[62].mxu1  ;;  %v1915_v21 = vmax.f32 %v1787_v6, 0.0  ;;  %v2725_v30 = vadd.f32 %v2724_v24, %v2570_v11 }
 0x1e5   : > { %v2575_v16 = vmul.f32 %v7532_v49, %v1912_v9  ;;  %v1788_v17 = vadd.f32 %v7514_v41, %v1381_v14  ;;  %v1790_v18 = vadd.f32 %v7517_v42, %v1638_v3  ;;  %v1383_v19 = vpop.f32.mrb[63].mxu0  ;;  %v1640_v20 = vpop.f32.mrb[63].mxu1  ;;  %v2577_v38 = vmul.f32 %v7547_v58, %v1914_v12 }
 0x1e6   : > { %v2576_v27 = vmul.f32 %v7541_v54, %v1913_v13  ;;  %v1789_v22 = vadd.f32 %v7525_v44, %v1383_v19  ;;  %v1791_v32 = vadd.f32 %v7528_v45, %v1640_v20  ;;  %v2729_v35 = vadd.f32 %v2728_v29, %v2573_v15  ;;  %2726 = vadd.xlane.f32.xlu0 %v2725_v30 }
 0x1e7   : > { %v1916_v34 = vmax.f32 %v1788_v17, 0.0  ;;  %v1918_v41 = vmax.f32 %v1790_v18, 0.0  ;;  %v2578_v50 = vmul.f32 %v7561_v8, %v1915_v21 }
 0x1e8   : > { %v2733_v43 = vadd.f32 %v2576_v27, %v2575_v16  ;;  %v1917_v25 = vmax.f32 %v1789_v22, 0.0  ;;  %v7893_v42 = vpop.f32.mrb[64].mxu0  ;;  %v7895_v46 = vpop.f32.mrb[64].mxu1  ;;  %v2730_v44 = vadd.f32 %v2729_v35, %v2574_v33  ;;  %v1919_v23 = vmax.f32 %v1791_v32, 0.0 }
 0x1e9   : > { %v2579_v47 = vmul.f32 %v7532_v49, %v1916_v34  ;;  %v7898_v48 = vpop.f32.mrb[65].mxu0  ;;  %v7900_v45 = vpop.f32.mrb[65].mxu1  ;;  %v2581_v53 = vmul.f32 %v7547_v58, %v1918_v41 }
 0x1ea   : > { %v2580_v51 = vmul.f32 %v7541_v54, %v1917_v25  ;;  %v2734_v52 = vadd.f32 %v2733_v43, %v2577_v38  ;;  %2731 = vadd.xlane.f32.xlu1 %v2730_v44  ;;  %v2582_v60 = vmul.f32 %v7561_v8, %v1919_v23 }
 0x1ec   : > { %v2738_v55 = vadd.f32 %v2580_v51, %v2579_v47  ;;  %v2735_v28 = vadd.f32 %v2734_v52, %v2578_v50  ;;  %v7905_v56 = vpop.f32.mrb[66].mxu0  ;;  %v7907_v49 = vpop.f32.mrb[66].mxu1 }
 0x1ed   : > { %v7909_v57 = vpop.f32.mrb[67].mxu1  ;;  %v7911_v59 = vpop.f32.mrb[67].mxu0 }
 0x1ee   : > { %2736 = vadd.xlane.f32.xlu0 %v2735_v28  ;;  %v2739_v61 = vadd.f32 %v2738_v55, %v2581_v53 }
 0x1f0   : > { %v2740_v54 = vadd.f32 %v2739_v61, %v2582_v60  ;;  %v7914_v62 = vpop.f32.mrb[68].mxu0  ;;  %v7916_v63 = vpop.f32.mrb[68].mxu1 }
 0x1f1   : > { %v7918_v58 = vpop.f32.mrb[69].mxu0  ;;  %v7920_v31 = vpop.f32.mrb[69].mxu1 }
 0x1f2   : > { %2741 = vadd.xlane.f32.xlu1 %v2740_v54 }
 0x1f4   : > { %v7922_v0 = vpop.f32.mrb[70].mxu0  ;;  %v7924_v1 = vpop.f32.mrb[70].mxu1 }
 0x1f5   : > { %v7926_v26 = vpop.f32.mrb[71].mxu1  ;;  %v7928_v2 = vpop.f32.mrb[71].mxu0 }
 0x1f8   : > { %v7930_v8 = vpop.f32.mrb[72].mxu0  ;;  %v7932_v4 = vpop.f32.mrb[72].mxu1 }
 0x1f9   : > { %v7934_v5 = vpop.f32.mrb[73].mxu0  ;;  %v7936_v6 = vpop.f32.mrb[73].mxu1 }
 0x1fc   : > { %v7938_v7 = vpop.f32.mrb[74].mxu0  ;;  %v7940_v9 = vpop.f32.mrb[74].mxu1 }
 0x1fd   : > { %v7942_v10 = vpop.f32.mrb[75].mxu1  ;;  %v7944_v24 = vpop.f32.mrb[75].mxu0 }
 0x200   : > { %v7946_v11 = vpop.f32.mrb[76].mxu0  ;;  %v7948_v29 = vpop.f32.mrb[76].mxu1 }
 0x201   : > { %v7950_v12 = vpop.f32.mrb[77].mxu0  ;;  %v7952_v13 = vpop.f32.mrb[77].mxu1 }
 0x202   : > { %10046 = vst [vmem:[#allocation4_spill] sm:$0xff] %v7950_v12  ;;  %10047 = vst [vmem:[#allocation5_spill] sm:$0xff] %v7952_v13 }
 0x204   : > { %v7954_v14 = vpop.f32.mrb[78].mxu0  ;;  %v7956_v3 = vpop.f32.mrb[78].mxu1 }
 0x205   : > { %10048 = vst [vmem:[#allocation6_spill] sm:$0xff] %v7954_v14  ;;  %10049 = vst [vmem:[#allocation7_spill] sm:$0xff] %v7956_v3  ;;  %v7958_v15 = vpop.f32.mrb[79].mxu1  ;;  %v7960_v16 = vpop.f32.mrb[79].mxu0 }
 0x206   : > { %10050 = vst [vmem:[#allocation8_spill] sm:$0xff] %v7958_v15  ;;  %10051 = vst [vmem:[#allocation9_spill] sm:$0xff] %v7960_v16  ;;  %v2587_v17 = vpop.xlane.xlu1 %2586 }
 0x207   : > { %v2743_v18 = vrot.slane %v2587_v17, 4 }
 0x208   : > { %v7962_v19 = vpop.f32.mrb[80].mxu0  ;;  %v7964_v20 = vpop.f32.mrb[80].mxu1 }
 0x209   : > { %10052 = vst [vmem:[#allocation10_spill] sm:$0xff] %v7962_v19  ;;  %10053 = vst [vmem:[#allocation11_spill] sm:$0xff] %v7964_v20  ;;  %v2744_v27 = vmax.f32 %v2587_v17, %v2743_v18  ;;  %v7966_v21 = vpop.f32.mrb[81].mxu0  ;;  %v7968_v22 = vpop.f32.mrb[81].mxu1 }
 0x20a   : > { %10054 = vst [vmem:[#allocation12_spill] sm:$0xff] %v7966_v21  ;;  %10055 = vst [vmem:[#allocation13_spill] sm:$0xff] %v7968_v22  ;;  %v2592_v32 = vpop.xlane.xlu0 %2591 }
 0x20b   : > { %v2745_v33 = vrot.slane %v2744_v27, 2  ;;  %v2749_v34 = vrot.slane %v2592_v32, 4 }
 0x20c   : > { %v7970_v30 = vpop.f32.mrb[82].mxu0  ;;  %v7972_v35 = vpop.f32.mrb[82].mxu1 }
 0x20d   : > { %10056 = vst [vmem:[#allocation14_spill] sm:$0xff] %v7970_v30  ;;  %10057 = vst [vmem:[#allocation15_spill] sm:$0xff] %v7972_v35  ;;  %v2746_v38 = vmax.f32 %v2744_v27, %v2745_v33  ;;  %v2750_v43 = vmax.f32 %v2592_v32, %v2749_v34  ;;  %v7974_v41 = vpop.f32.mrb[83].mxu1  ;;  %v7976_v51 = vpop.f32.mrb[83].mxu0 }
 0x20e   : > { %10058 = vst [vmem:[#allocation16_spill] sm:$0xff] %v7974_v41  ;;  %v2597_v25 = vpop.xlane.xlu0 %2596  ;;  %10059 = vst [vmem:[#allocation17_spill] sm:$0xff] %v7976_v51 }
 0x20f   : > { %v2747_v47 = vrot.slane %v2746_v38, 1  ;;  %v2751_v44 = vrot.slane %v2750_v43, 2  ;;  %v2755_v50 = vrot.slane %v2597_v25, 4 }
 0x210   : > { %v7978_v55 = vpop.f32.mrb[84].mxu0  ;;  %v7980_v28 = vpop.f32.mrb[84].mxu1 }
 0x211   : > { %v2748_v23 = vmax.f32 %v2746_v38, %v2747_v47  ;;  %v2752_v52 = vmax.f32 %v2750_v43, %v2751_v44  ;;  %v2756_v53 = vmax.f32 %v2597_v25, %v2755_v50  ;;  %10060 = vst [vmem:[#allocation18_spill] sm:$0xff] %v7978_v55  ;;  %10061 = vst [vmem:[#allocation19_spill] sm:$0xff] %v7980_v28  ;;  %v2602_v60 = vpop.xlane.xlu1 %2601  ;;  %v7982_v61 = vpop.f32.mrb[85].mxu0 }
 0x212   : > { %10062 = vst [vmem:[#allocation20_spill] sm:$0xff] %v7982_v61  ;;  %v2761_v33 = vrot.slane %v2602_v60, 4  ;;  %v7984_v34 = vpop.f32.mrb[85].mxu1 }
 0x213   : > { %v2935_v54 = vsub.f32 %v2587_v17, %v2748_v23  ;;  %v2753_v18 = vrot.slane %v2752_v52, 1  ;;  %v2757_v27 = vrot.slane %v2756_v53, 2  ;;  %10063 = vst [vmem:[#allocation21_spill] sm:$0xff] %v7984_v34 }
 0x214   : > { %v7986_v39 = vpop.f32.mrb[86].mxu0  ;;  %v2762_v43 = vmax.f32 %v2602_v60, %v2761_v33  ;;  %v7988_v47 = vpop.f32.mrb[86].mxu1 }
 0x215   : > { %10064 = vst [vmem:[#allocation22_spill] sm:$0xff] %v7986_v39  ;;  %v2967_v40 = vmul.f32 1.442695, %v2935_v54  ;;  %v2754_v51 = vmax.f32 %v2752_v52, %v2753_v18  ;;  %v2758_v38 = vmax.f32 %v2756_v53, %v2757_v27  ;;  %10065 = vst [vmem:[#allocation23_spill] sm:$0xff] %v7988_v47  ;;  %v2607_v44 = vpop.xlane.xlu0 %2606  ;;  %v7990_v61 = vpop.f32.mrb[87].mxu1 }
 0x216   : > { %v2763_v55 = vrot.slane %v2762_v43, 2  ;;  %10066 = vst [vmem:[#allocation24_spill] sm:$0xff] %v7990_v61  ;;  %v2767_v17 = vrot.slane %v2607_v44, 4 }
 0x217   : > { %6624 = vpow2.f32 %v2967_v40  ;;  %v2936_v50 = vsub.f32 %v2592_v32, %v2754_v51  ;;  %v2759_v28 = vrot.slane %v2758_v38, 1 }
 0x218   : > { %v2764_v35 = vmax.f32 %v2762_v43, %v2763_v55  ;;  %v2768_v34 = vmax.f32 %v2607_v44, %v2767_v17  ;;  %v2612_v30 = vpop.xlane.xlu1 %2611 }
 0x219   : > { %v2969_v23 = vmul.f32 1.442695, %v2936_v50  ;;  %v2760_v41 = vmax.f32 %v2758_v38, %v2759_v28  ;;  %v2773_v53 = vrot.slane %v2612_v30, 4 }
 0x21a   : > { %v2765_v52 = vrot.slane %v2764_v35, 1  ;;  %v2769_v18 = vrot.slane %v2768_v34, 2 }
 0x21b   : > { %6626 = vpow2.f32 %v2969_v23  ;;  %v2937_v54 = vsub.f32 %v2597_v25, %v2760_v41  ;;  %v2774_v47 = vmax.f32 %v2612_v30, %v2773_v53 }
 0x21c   : > { %v2766_v33 = vmax.f32 %v2764_v35, %v2765_v52  ;;  %v2770_v40 = vmax.f32 %v2768_v34, %v2769_v18  ;;  %v2617_v32 = vpop.xlane.xlu1 %2616 }
 0x21d   : > { %v2971_v27 = vmul.f32 1.442695, %v2937_v54  ;;  %v2775_v39 = vrot.slane %v2774_v47, 2  ;;  %v2779_v61 = vrot.slane %v2617_v32, 4 }
 0x21e   : > { %v2938_v51 = vsub.f32 %v2602_v60, %v2766_v33  ;;  %v2771_v22 = vrot.slane %v2770_v40, 1 }
 0x21f   : > { %6628 = vpow2.f32 %v2971_v27  ;;  %v2776_v28 = vmax.f32 %v2774_v47, %v2775_v39  ;;  %v2780_v38 = vmax.f32 %v2617_v32, %v2779_v61 }
 0x220   : > { %v2973_v55 = vmul.f32 1.442695, %v2938_v51  ;;  %v2772_v25 = vmax.f32 %v2770_v40, %v2771_v22  ;;  %v7995_v43 = vpop.xlane.xlu1 %2621 }
 0x221   : > { %v7992_v50 = vpop.eup %6624  ;;  %v2777_v35 = vrot.slane %v2776_v28, 1  ;;  %v2781_v17 = vrot.slane %v2780_v38, 2  ;;  %v2785_v34 = vrot.slane %v7995_v43, 4 }
 0x222   : > { %v3031_v41 = vrot.slane %v7992_v50, 4  ;;  %6630 = vpow2.f32 %v2973_v55  ;;  %v2939_v23 = vsub.f32 %v2607_v44, %v2772_v25 }
 0x223   : > { %v2778_v52 = vmax.f32 %v2776_v28, %v2777_v35  ;;  %v2782_v53 = vmax.f32 %v2780_v38, %v2781_v17  ;;  %v2786_v39 = vmax.f32 %v7995_v43, %v2785_v34  ;;  %v8010_v17 = vpop.f32.mrb[87].mxu0 }
 0x224   : > { %v3032_v60 = vadd.f32 %v7992_v50, %v3031_v41  ;;  %v2975_v47 = vmul.f32 1.442695, %v2939_v23  ;;  %v8003_v22 = vpop.xlane.xlu0 %2626  ;;  %10067 = vst [vmem:[#allocation25_spill] sm:$0xff] %v8010_v17  ;;  %v8015_v21 = vpop.f32.mrb[88].mxu0 }
 0x225   : > { %v7999_v54 = vpop.eup %6626  ;;  %v2940_v27 = vsub.f32 %v2612_v30, %v2778_v52  ;;  %v2783_v33 = vrot.slane %v2782_v53, 1  ;;  %v2787_v40 = vrot.slane %v2786_v39, 2  ;;  %v2791_v51 = vrot.slane %v8003_v22, 4  ;;  %10068 = vst [vmem:[#allocation26_spill] sm:$0xff] %v8015_v21 }
 0x226   : > { %v3037_v61 = vrot.slane %v7999_v54, 4  ;;  %v3033_v18 = vrot.slane %v3032_v60, 2  ;;  %6632 = vpow2.f32 %v2975_v47 }
 0x227   : > { %v2977_v28 = vmul.f32 1.442695, %v2940_v27  ;;  %v2784_v38 = vmax.f32 %v2782_v53, %v2783_v33  ;;  %v2788_v25 = vmax.f32 %v2786_v39, %v2787_v40  ;;  %v2792_v35 = vmax.f32 %v8003_v22, %v2791_v51  ;;  %v8019_v53 = vpop.f32.mrb[89].mxu0 }
 0x228   : > { %v3034_v44 = vadd.f32 %v3033_v18, %v3032_v60  ;;  %v3038_v55 = vadd.f32 %v7999_v54, %v3037_v61  ;;  %v8013_v30 = vpop.xlane.xlu0 %2631  ;;  %v8017_v18 = vpop.f32.mrb[88].mxu1  ;;  %10070 = vst [vmem:[#allocation28_spill] sm:$0xff] %v8019_v53  ;;  %v6112_v53 = vld [vmem:[%s10010_s3 + $0xc2] ss:$8 sm:$0xf] }
 0x229   : > { %v8007_v41 = vpop.eup %6628  ;;  %6634 = vpow2.f32 %v2977_v28  ;;  %v2941_v60 = vsub.f32 %v2617_v32, %v2784_v38  ;;  %v2789_v61 = vrot.slane %v2788_v25, 1  ;;  %v2793_v47 = vrot.slane %v2792_v35, 2  ;;  %10069 = vst [vmem:[#allocation27_spill] sm:$0xff] %v8017_v18  ;;  %v8023_v51 = vpop.f32.mrb[89].mxu1 }
 0x22a   : > { %v3043_v34 = vrot.slane %v8007_v41, 4  ;;  %v3035_v23 = vrot.slane %v3034_v44, 1  ;;  %v3039_v52 = vrot.slane %v3038_v55, 2  ;;  %v2797_v39 = vrot.slane %v8013_v30, 4  ;;  %10071 = vst [vmem:[#allocation29_spill] sm:$0xff] %v8023_v51  ;;  %v8027_v32 = vpop.f32.mrb[90].mxu0 }
 0x22b   : > { %v2979_v20 = vmul.f32 1.442695, %v2941_v60  ;;  %v2790_v21 = vmax.f32 %v2788_v25, %v2789_v61  ;;  %v2794_v28 = vmax.f32 %v2792_v35, %v2793_v47  ;;  %10072 = vst [vmem:[#allocation30_spill] sm:$0xff] %v8027_v32  ;;  %v8029_v38 = vpop.f32.mrb[90].mxu1  ;;  %v8044_v51 = vrot.slane %v6112_v53, %v7496_v36 }
 0x22c   : > { %v3036_v27 = vadd.f32 %v3035_v23, %v3034_v44  ;;  %v3040_v33 = vadd.f32 %v3039_v52, %v3038_v55  ;;  %v3044_v40 = vadd.f32 %v8007_v41, %v3043_v34  ;;  %v8025_v17 = vpop.eup %6630  ;;  %10073 = vst [vmem:[#allocation31_spill] sm:$0xff] %v8029_v38  ;;  %v2798_v55 = vmax.f32 %v8013_v30, %v2797_v39  ;;  %v8036_v23 = vpop.xlane.xlu0 %2636 }
 0x22d   : > { %v3049_v44 = vrot.slane %v8025_v17, 4  ;;  %v2942_v25 = vsub.f32 %v7995_v43, %v2790_v21  ;;  %v2795_v35 = vrot.slane %v2794_v28, 1  ;;  %v2803_v52 = vrot.slane %v8036_v23, 4  ;;  %v8041_v32 = vpop.f32.mrb[91].mxu1  ;;  %10075 = vst [vmem:[#allocation33_spill] sm:$0xff] %v8044_v51 }
 0x22e   : > { %6636 = vrcp.f32 %v3036_v27  ;;  %v3041_v34 = vrot.slane %v3040_v33, 1  ;;  %v2799_v60 = vrot.slane %v2798_v55, 2  ;;  %v3045_v47 = vrot.slane %v3044_v40, 2  ;;  %10074 = vst [vmem:[#allocation32_spill] sm:$0xff] %v8041_v32  ;;  %v8097_v12 = vpop.f32.mrb[92].mxu1 }
 0x22f   : > { %6638 = vpow2.f32 %v2979_v20  ;;  %v3050_v38 = vadd.f32 %v8025_v17, %v3049_v44  ;;  %v2981_v39 = vmul.f32 1.442695, %v2942_v25  ;;  %v2796_v27 = vmax.f32 %v2794_v28, %v2795_v35  ;;  %v8049_v16 = vpop.xlane.xlu1 %2641  ;;  %10078 = vst [vmem:[#allocation36_spill] sm:$0xff] %v8097_v12 }
 0x230   : > { %v3042_v61 = vadd.f32 %v3041_v34, %v3040_v33  ;;  %v2804_v18 = vmax.f32 %v8036_v23, %v2803_v52  ;;  %v8047_v20 = vpop.eup %6632  ;;  %v2800_v21 = vmax.f32 %v2798_v55, %v2799_v60  ;;  %v3046_v43 = vadd.f32 %v3045_v47, %v3044_v40 }
 0x231   : > { %v3051_v19 = vrot.slane %v3050_v38, 2  ;;  %v3055_v33 = vrot.slane %v8047_v20, 4  ;;  %v2943_v44 = vsub.f32 %v8003_v22, %v2796_v27  ;;  %v2809_v28 = vrot.slane %v8049_v16, 4 }
 0x232   : > { %6640 = vrcp.f32 %v3042_v61  ;;  %v2805_v34 = vrot.slane %v2804_v18, 2  ;;  %v2801_v36 = vrot.slane %v2800_v21, 1  ;;  %v3047_v51 = vrot.slane %v3046_v43, 1 }
 0x233   : > { %6642 = vpow2.f32 %v2981_v39  ;;  %v3052_v25 = vadd.f32 %v3051_v19, %v3050_v38  ;;  %v8054_v35 = vpop.eup %6634  ;;  %v8057_v55 = vrot.slane %v6112_v53, %v7498_v37  ;;  %v2983_v40 = vmul.f32 1.442695, %v2943_v44 }
 0x234   : > { %v2806_v52 = vmax.f32 %v2804_v18, %v2805_v34  ;;  %v3056_v60 = vadd.f32 %v8047_v20, %v3055_v33  ;;  %v3061_v61 = vrot.slane %v8054_v35, 4  ;;  %v2802_v47 = vmax.f32 %v2800_v21, %v2801_v36 }
 0x235   : > { %10076 = vst [vmem:[#allocation34_spill] sm:$0xff] %v8057_v55  ;;  %v3048_v39 = vadd.f32 %v3047_v51, %v3046_v43  ;;  %v3053_v22 = vrot.slane %v3052_v25, 1  ;;  %6644 = vpow2.f32 %v2983_v40  ;;  %v2810_v19 = vmax.f32 %v8049_v16, %v2809_v28 }
 0x236   : > { %v2807_v27 = vrot.slane %v2806_v52, 1  ;;  %v3057_v38 = vrot.slane %v3056_v60, 2  ;;  %v2944_v15 = vsub.f32 %v8013_v30, %v2802_v47  ;;  %v8064_v18 = vadd.f32 %v8054_v35, %v3061_v61  ;;  %v6752_v30 = vld [vmem:[%s7060_s17] sm:$0xff] }
 0x237   : > { %6646 = vrcp.f32 %v3048_v39  ;;  %v3054_v37 = vadd.f32 %v3053_v22, %v3052_v25  ;;  %v2811_v43 = vrot.slane %v2810_v19, 2 }
 0x238   : > { %v6637_v32 = vpop.eup %6636  ;;  %v2808_v51 = vmax.f32 %v2806_v52, %v2807_v27  ;;  %v8069_v33 = vadd.f32 %v3057_v38, %v3056_v60  ;;  %v2985_v34 = vmul.f32 1.442695, %v2944_v15 }
 0x239   : > { %v8066_v53 = vpop.eup %6638  ;;  %v3224_v21 = vmul.f32 %v6637_v32, %v7992_v50  ;;  %6648 = vrcp.f32 %v3054_v37  ;;  %v8079_v52 = vmax.f32 %v2810_v19, %v2811_v43  ;;  %v6753_v43 = vld [vmem:[%s7060_s17 + $0x8] sm:$0xff] }
 0x23a   : > { %6650 = vpow2.f32 %v2985_v34  ;;  %v2945_v32 = vsub.f32 %v8036_v23, %v2808_v51 }
 0x23b   : > { %v3287_v28 = vmul.f32 %v6752_v30, %v3224_v21  ;;  %v3543_v25 = vmul.f32 %v3224_v21, %v7893_v42  ;;  %v3545_v40 = vmul.f32 %v3224_v21, %v7895_v46  ;;  %v3544_v61 = vmul.f32 %v3224_v21, %v7898_v48 }
 0x23c   : > { %v6641_v47 = vpop.eup %6640  ;;  %v3546_v50 = vmul.f32 %v3224_v21, %v7900_v45  ;;  %v2987_v23 = vmul.f32 1.442695, %v2945_v32 }
 0x23d   : > { %v8081_v15 = vpop.eup %6642  ;;  %v3319_v60 = vsel %vm1032_vm2, %v3287_v28, 0.0  ;;  %v3671_v39 = vrot.slane %v3543_v25, 4  ;;  %v3683_v22 = vrot.slane %v3545_v40, 4  ;;  %v3677_v42 = vrot.slane %v3544_v61, 4 }
 0x23e   : > { %v3320_v27 = vrot.slane %v3319_v60, 4  ;;  %v3689_v48 = vrot.slane %v3546_v50, 4  ;;  %v3226_v38 = vmul.f32 %v6641_v47, %v7999_v54  ;;  %6652 = vpow2.f32 %v2987_v23 }
 0x23f   : > { %v3672_v37 = vadd.f32 %v3671_v39, %v3543_v25  ;;  %v3684_v45 = vadd.f32 %v3683_v22, %v3545_v40  ;;  %v3678_v21 = vadd.f32 %v3677_v42, %v3544_v61  ;;  %v8088_v28 = vpop.eup %6644 }
 0x240   : > { %v3321_v19 = vadd.f32 %v3320_v27, %v3319_v60  ;;  %v3690_v51 = vadd.f32 %v3689_v48, %v3546_v50  ;;  %v3288_v34 = vmul.f32 %v6753_v43, %v3226_v38  ;;  %v3547_v30 = vmul.f32 %v3226_v38, %v7905_v56  ;;  %v8093_v48 = vpop.f32.mrb[91].mxu0 }
 0x241   : > { %v3673_v44 = vrot.slane %v3672_v37, 2  ;;  %v3685_v36 = vrot.slane %v3684_v45, 2  ;;  %v3679_v55 = vrot.slane %v3678_v21, 2  ;;  %v3549_v46 = vmul.f32 %v3226_v38, %v7907_v49  ;;  %v6647_v3 = vpop.eup %6646  ;;  %v8095_v54 = vpop.f32.mrb[92].mxu0 }
 0x242   : > { %v3322_v25 = vrot.slane %v3321_v19, 2  ;;  %v3691_v40 = vrot.slane %v3690_v51, 2  ;;  %v3326_v61 = vsel %vm1032_vm2, %v3288_v34, 0.0  ;;  %v3695_v42 = vrot.slane %v3547_v30, 4  ;;  %10077 = vst [vmem:[#allocation35_spill] sm:$0xff] %v8095_v54 }
 0x243   : > { %v3674_v47 = vadd.f32 %v3673_v44, %v3672_v37  ;;  %v3686_v50 = vadd.f32 %v3685_v36, %v3684_v45  ;;  %v3680_v32 = vadd.f32 %v3679_v55, %v3678_v21  ;;  %v3327_v60 = vrot.slane %v3326_v61, 4  ;;  %v6649_v39 = vpop.eup %6648  ;;  %v8101_v21 = vpop.f32.mrb[93].mxu0 }
 0x244   : > { %v3323_v56 = vadd.f32 %v3322_v25, %v3321_v19  ;;  %v3692_v22 = vadd.f32 %v3691_v40, %v3690_v51  ;;  %v3707_v27 = vrot.slane %v3549_v46, 4  ;;  %v8099_v44 = vpop.eup %6650  ;;  %v3696_v37 = vadd.f32 %v3695_v42, %v3547_v30  ;;  %v8110_v40 = vpop.f32.mrb[93].mxu1 }
 0x245   : > { %v3675_v43 = vrot.slane %v3674_v47, 1  ;;  %v3687_v49 = vrot.slane %v3686_v50, 1  ;;  %v3681_v14 = vrot.slane %v3680_v32, 1  ;;  %v3328_v13 = vadd.f32 %v3327_v60, %v3326_v61  ;;  %v8112_v61 = vpop.f32.mrb[94].mxu0 }
 0x246   : > { %v3324_v55 = vrot.slane %v3323_v56, 1  ;;  %v3693_v36 = vrot.slane %v3692_v22, 1  ;;  %v3708_v45 = vadd.f32 %v3707_v27, %v3549_v46  ;;  %v3697_v30 = vrot.slane %v3696_v37, 2  ;;  %v8116_v46 = vpop.f32.mrb[94].mxu1 }
 0x247   : > { %v8104_v51 = vadd.f32 %v3675_v43, %v3674_v47  ;;  %v8106_v34 = vadd.f32 %v3687_v49, %v3686_v50  ;;  %v8108_v25 = vadd.f32 %v3681_v14, %v3680_v32  ;;  %v3329_v54 = vrot.slane %v3328_v13, 2  ;;  %v8120_v14 = vpop.f32.mrb[95].mxu1 }
 0x248   : > { %v3325_v60 = vadd.f32 %v3324_v55, %v3323_v56  ;;  %v8114_v12 = vadd.f32 %v3693_v36, %v3692_v22  ;;  %v3709_v42 = vrot.slane %v3708_v45, 2  ;;  %v3550_v47 = vmul.f32 %v3226_v38, %v7909_v57  ;;  %v6754_v57 = vld [vmem:[%s7060_s17 + $0x10] sm:$0xff] }
 0x249   : > { %10079 = vst [vmem:[#allocation37_spill] sm:$0xff] %v8104_v51  ;;  %10080 = vst [vmem:[#allocation38_spill] sm:$0xff] %v8106_v34  ;;  %v3548_v50 = vmul.f32 %v3226_v38, %v7911_v59  ;;  %v3330_v32 = vadd.f32 %v3329_v54, %v3328_v13  ;;  %v3698_v27 = vadd.f32 %v3697_v30, %v3696_v37 }
 0x24a   : > { %10081 = vst [vmem:[#allocation39_spill] sm:$0xff] %v8108_v25  ;;  %10082 = vst [vmem:[#allocation40_spill] sm:$0xff] %v8114_v12  ;;  %v3228_v43 = vmul.f32 %v6647_v3, %v8007_v41  ;;  %v8124_v56 = vmul.f32 %v6649_v39, %v8025_v17  ;;  %v3710_v22 = vadd.f32 %v3709_v42, %v3708_v45  ;;  %v3713_v49 = vrot.slane %v3550_v47, 4 }
 0x24b   : > { %v3701_v55 = vrot.slane %v3548_v50, 4  ;;  %v3331_v19 = vrot.slane %v3330_v32, 1  ;;  %v3699_v12 = vrot.slane %v3698_v27, 1 }
 0x24c   : > { %v3289_v23 = vmul.f32 %v6754_v57, %v3228_v43  ;;  %v3551_v59 = vmul.f32 %v3228_v43, %v7914_v62  ;;  %v3711_v38 = vrot.slane %v3710_v22, 1  ;;  %v3714_v25 = vadd.f32 %v3713_v49, %v3550_v47 }
 0x24d   : > { %v3702_v13 = vadd.f32 %v3701_v55, %v3548_v50  ;;  %v3553_v54 = vmul.f32 %v3228_v43, %v7916_v63  ;;  %v3332_v3 = vadd.f32 %v3331_v19, %v3330_v32  ;;  %v8130_v41 = vadd.f32 %v3699_v12, %v3698_v27  ;;  %v6755_v55 = vld [vmem:[%s7060_s17 + $0x18] sm:$0xff] }
 0x24e   : > { %v3333_v17 = vsel %vm1032_vm2, %v3289_v23, 0.0  ;;  %v3719_v39 = vrot.slane %v3551_v59, 4  ;;  %v8133_v37 = vadd.f32 %v3711_v38, %v3710_v22  ;;  %v3715_v45 = vrot.slane %v3714_v25, 2  ;;  %v8140_v38 = vpop.eup %6652 }
 0x24f   : > { %10083 = vst [vmem:[#allocation41_spill] sm:$0xff] %v8130_v41  ;;  %v3703_v30 = vrot.slane %v3702_v13, 2  ;;  %v3334_v42 = vrot.slane %v3333_v17, 4  ;;  %v5945_v57 = vsel %vm5488_vm4, %v3332_v3, %v3325_v60  ;;  %v3731_v47 = vrot.slane %v3553_v54, 4 }
 0x250   : > { %10084 = vst [vmem:[#allocation42_spill] sm:$0xff] %v8133_v37  ;;  %v3720_v62 = vadd.f32 %v3719_v39, %v3551_v59  ;;  %v3552_v50 = vmul.f32 %v3228_v43, %v7918_v58  ;;  %v3716_v63 = vadd.f32 %v3715_v45, %v3714_v25  ;;  %v3554_v32 = vmul.f32 %v3228_v43, %v7920_v31 }
 0x251   : > { %v3704_v19 = vadd.f32 %v3703_v30, %v3702_v13  ;;  %v3335_v12 = vadd.f32 %v3334_v42, %v3333_v17  ;;  %v3732_v49 = vadd.f32 %v3731_v47, %v3553_v54  ;;  %v3290_v23 = vmul.f32 %v6755_v55, %v8124_v56 }
 0x252   : > { %v3721_v27 = vrot.slane %v3720_v62, 2  ;;  %v3725_v22 = vrot.slane %v3552_v50, 4  ;;  %v3717_v36 = vrot.slane %v3716_v63, 1  ;;  %v3737_v3 = vrot.slane %v3554_v32, 4 }
 0x253   : > { %v3705_v60 = vrot.slane %v3704_v19, 1  ;;  %v3336_v59 = vrot.slane %v3335_v12, 2  ;;  %v3733_v25 = vrot.slane %v3732_v49, 2  ;;  %v3340_v47 = vsel %vm1032_vm2, %v3290_v23, 0.0 }
 0x254   : > { %v3722_v58 = vadd.f32 %v3721_v27, %v3720_v62  ;;  %v3726_v13 = vadd.f32 %v3725_v22, %v3552_v50  ;;  %v8143_v17 = vadd.f32 %v3717_v36, %v3716_v63  ;;  %v3738_v54 = vadd.f32 %v3737_v3, %v3554_v32 }
 0x255   : > { %v8145_v31 = vadd.f32 %v3705_v60, %v3704_v19  ;;  %v3337_v43 = vadd.f32 %v3336_v59, %v3335_v12  ;;  %v3734_v30 = vadd.f32 %v3733_v25, %v3732_v49  ;;  %v3341_v34 = vrot.slane %v3340_v47, 4 }
 0x256   : > { %10085 = vst [vmem:[#allocation43_spill] sm:$0xff] %v8143_v17  ;;  %v3723_v45 = vrot.slane %v3722_v58, 1  ;;  %v3727_v42 = vrot.slane %v3726_v13, 2  ;;  %v3739_v37 = vrot.slane %v3738_v54, 2  ;;  %v3555_v39 = vmul.f32 %v8124_v56, %v7922_v0 }
 0x257   : > { %10086 = vst [vmem:[#allocation44_spill] sm:$0xff] %v8145_v31  ;;  %v3338_v55 = vrot.slane %v3337_v43, 1  ;;  %v3735_v50 = vrot.slane %v3734_v30, 1  ;;  %v3557_v63 = vmul.f32 %v8124_v56, %v7924_v1  ;;  %v3342_v32 = vadd.f32 %v3341_v34, %v3340_v47 }
 0x258   : > { %v8150_v62 = vadd.f32 %v3723_v45, %v3722_v58  ;;  %v3728_v36 = vadd.f32 %v3727_v42, %v3726_v13  ;;  %v3740_v12 = vadd.f32 %v3739_v37, %v3738_v54  ;;  %v3743_v27 = vrot.slane %v3555_v39, 4 }
 0x259   : > { %v3339_v19 = vadd.f32 %v3338_v55, %v3337_v43  ;;  %v8154_v49 = vadd.f32 %v3735_v50, %v3734_v30  ;;  %v3755_v23 = vrot.slane %v3557_v63, 4  ;;  %v3558_v60 = vmul.f32 %v8124_v56, %v7926_v26 }
 0x25a   : > { %10087 = vst [vmem:[#allocation45_spill] sm:$0xff] %v8150_v62  ;;  %v3729_v22 = vrot.slane %v3728_v36, 1  ;;  %v3741_v59 = vrot.slane %v3740_v12, 1  ;;  %v3343_v3 = vrot.slane %v3342_v32, 2  ;;  %v3744_v58 = vadd.f32 %v3743_v27, %v3555_v39 }
 0x25b   : > { %10088 = vst [vmem:[#allocation46_spill] sm:$0xff] %v8154_v49  ;;  %v5946_v0 = vsel %vm5491_vm5, %v3339_v19, %v5945_v57  ;;  %v3756_v13 = vadd.f32 %v3755_v23, %v3557_v63  ;;  %v3761_v1 = vrot.slane %v3558_v60, 4  ;;  %v10090_v37 = vrot.slane %v8079_v52, 1  ;;  %v8173_v63 = vpop.xlane.xlu0 %2646  ;;  %v8175_v19 = vpop.xlane.xlu1 %2651 }
 0x25c   : > { %v8159_v25 = vadd.f32 %v3729_v22, %v3728_v36  ;;  %v8164_v43 = vadd.f32 %v3741_v59, %v3740_v12  ;;  %v3344_v54 = vadd.f32 %v3343_v3, %v3342_v32  ;;  %v3745_v45 = vrot.slane %v3744_v58, 2 }
 0x25d   : > { %v2814_v34 = vmax.f32 %v8079_v52, %v10090_v37  ;;  %v3556_v26 = vmul.f32 %v8124_v56, %v7928_v2  ;;  %v3757_v30 = vrot.slane %v3756_v13, 2  ;;  %v3762_v57 = vadd.f32 %v3761_v1, %v3558_v60 }
 0x25e   : > { %10089 = vst [vmem:[#allocation47_spill] sm:$0xff] %v8159_v25  ;;  %10091 = vst [vmem:[#allocation48_spill] sm:$0xff] %v8164_v43  ;;  %v3059_v39 = vrot.slane %v8069_v33, 1  ;;  %v3345_v47 = vrot.slane %v3344_v54, 1  ;;  %v3746_v55 = vadd.f32 %v3745_v45, %v3744_v58  ;;  %v10092_v36 = vrot.slane %v8064_v18, 2  ;;  %v8179_v58 = vpop.f32.mrb[95].mxu0 }
 0x25f   : > { %v2946_v42 = vsub.f32 %v8049_v16, %v2814_v34  ;;  %v3749_v50 = vrot.slane %v3556_v26, 4  ;;  %v3758_v12 = vadd.f32 %v3757_v30, %v3756_v13  ;;  %v3763_v32 = vrot.slane %v3762_v57, 2  ;;  %v8186_v37 = vpop.f32.mrb[96].mxu0 }
 0x260   : > { %v3064_v52 = vadd.f32 %v10092_v36, %v8064_v18  ;;  %v3060_v56 = vadd.f32 %v3059_v39, %v8069_v33  ;;  %v3346_v27 = vadd.f32 %v3345_v47, %v3344_v54  ;;  %v3747_v16 = vrot.slane %v3746_v55, 1  ;;  %v8188_v33 = vpop.f32.mrb[96].mxu1  ;;  %v8193_v30 = vpop.f32.mrb[97].mxu0 }
 0x261   : > { %v2989_v2 = vmul.f32 1.442695, %v2946_v42  ;;  %v3750_v22 = vadd.f32 %v3749_v50, %v3556_v26  ;;  %v3759_v60 = vrot.slane %v3758_v12, 1  ;;  %v3764_v59 = vadd.f32 %v3763_v32, %v3762_v57  ;;  %v8195_v57 = vpop.f32.mrb[97].mxu1  ;;  %v8204_v36 = vpop.xlane.xlu1 %2656 }
 0x262   : > { %v3065_v23 = vrot.slane %v3064_v52, 1  ;;  %v2815_v3 = vrot.slane %v8173_v63, 4  ;;  %v8181_v18 = vadd.f32 %v3747_v16, %v3746_v55  ;;  %v8184_v1 = vsel %vm5494_vm6, %v3346_v27, %v5946_v0  ;;  %v8213_v27 = vpop.f32.mrb[98].mxu1 }
 0x263   : > { %6654 = vpow2.f32 %v2989_v2  ;;  %v3751_v13 = vrot.slane %v3750_v22, 2  ;;  %v8190_v34 = vadd.f32 %v3759_v60, %v3758_v12  ;;  %v3765_v54 = vrot.slane %v3764_v59, 1 }
 0x264   : > { %10093 = vst [vmem:[#allocation49_spill] sm:$0xff] %v8181_v18  ;;  %6656 = vrcp.f32 %v3060_v56  ;;  %v3066_v45 = vadd.f32 %v3065_v23, %v3064_v52  ;;  %v2816_v26 = vmax.f32 %v8173_v63, %v2815_v3  ;;  %v10095_v0 = vrot.slane %v8066_v53, 4  ;;  %v8206_v52 = vpop.f32.mrb[98].mxu0  ;;  %v8216_v3 = vpop.f32.mrb[99].mxu1 }
 0x265   : > { %10094 = vst [vmem:[#allocation50_spill] sm:$0xff] %v8190_v34  ;;  %v3752_v42 = vadd.f32 %v3751_v13, %v3750_v22  ;;  %v10096_v47 = vrot.slane %v8081_v15, 4  ;;  %v2821_v50 = vrot.slane %v8175_v19, 4  ;;  %v8208_v12 = vadd.f32 %v3765_v54, %v3764_v59  ;;  %10099 = vst [vmem:[#allocation52_spill] sm:$0xff] %v8216_v3 }
 0x266   : > { %v3068_v39 = vadd.f32 %v8066_v53, %v10095_v0  ;;  %6658 = vrcp.f32 %v3066_v45  ;;  %v2817_v32 = vrot.slane %v2816_v26, 2  ;;  %v10098_v2 = vrot.slane %v8088_v28, 4 }
 0x267   : > { %v3074_v55 = vadd.f32 %v8081_v15, %v10096_v47  ;;  %10097 = vst [vmem:[#allocation51_spill] sm:$0xff] %v8208_v12  ;;  %v3753_v16 = vrot.slane %v3752_v42, 1  ;;  %v2822_v60 = vmax.f32 %v8175_v19, %v2821_v50  ;;  %v10100_v59 = vrot.slane %v8099_v44, 4  ;;  %v8222_v47 = vpop.f32.mrb[99].mxu0  ;;  %v8228_v50 = vpop.f32.mrb[100].mxu1 }
 0x268   : > { %v3080_v56 = vadd.f32 %v8088_v28, %v10098_v2  ;;  %v3069_v22 = vrot.slane %v3068_v39, 2  ;;  %v2818_v13 = vmax.f32 %v2816_v26, %v2817_v32  ;;  %v2827_v45 = vrot.slane %v8204_v36, 4  ;;  %10101 = vst [vmem:[#allocation53_spill] sm:$0xff] %v8222_v47  ;;  %v8226_v17 = vpop.f32.mrb[100].mxu0  ;;  %10104 = vst [vmem:[#allocation56_spill] sm:$0xff] %v8228_v50 }
 0x269   : > { %v3075_v23 = vrot.slane %v3074_v55, 2  ;;  %v3086_v54 = vadd.f32 %v8099_v44, %v10100_v59  ;;  %v8224_v2 = vadd.f32 %v3753_v16, %v3752_v42  ;;  %v2823_v43 = vrot.slane %v2822_v60, 2  ;;  %10103 = vst [vmem:[#allocation55_spill] sm:$0xff] %v8226_v17 }
 0x26a   : > { %v3081_v0 = vrot.slane %v3080_v56, 2  ;;  %v3070_v25 = vadd.f32 %v3069_v22, %v3068_v39  ;;  %v2819_v31 = vrot.slane %v2818_v13, 1  ;;  %v2828_v34 = vmax.f32 %v8204_v36, %v2827_v45 }
 0x26b   : > { %10102 = vst [vmem:[#allocation54_spill] sm:$0xff] %v8224_v2  ;;  %v3076_v12 = vadd.f32 %v3075_v23, %v3074_v55  ;;  %v3087_v32 = vrot.slane %v3086_v54, 2  ;;  %v2824_v18 = vmax.f32 %v2822_v60, %v2823_v43  ;;  %v10105_v62 = vrot.slane %v8140_v38, 4 }
 0x26c   : > { %v3082_v26 = vadd.f32 %v3081_v0, %v3080_v56  ;;  %v3071_v49 = vrot.slane %v3070_v25, 1  ;;  %v2820_v55 = vmax.f32 %v2818_v13, %v2819_v31  ;;  %v2829_v23 = vrot.slane %v2828_v34, 2  ;;  %v8240_v56 = vpop.f32.mrb[101].mxu0 }
 0x26d   : > { %v3077_v59 = vrot.slane %v3076_v12, 1  ;;  %v8234_v42 = vadd.f32 %v8140_v38, %v10105_v62  ;;  %v8236_v39 = vpop.eup %6654  ;;  %v8238_v22 = vadd.f32 %v3087_v32, %v3086_v54  ;;  %10106 = vst [vmem:[#allocation57_spill] sm:$0xff] %v8240_v56  ;;  %v2825_v60 = vrot.slane %v2824_v18, 1 }
 0x26e   : > { %v3083_v16 = vrot.slane %v3082_v26, 1  ;;  %v6657_v0 = vpop.eup %6656  ;;  %v3072_v2 = vadd.f32 %v3071_v49, %v3070_v25  ;;  %v2947_v62 = vsub.f32 %v8173_v63, %v2820_v55  ;;  %v8250_v54 = vmax.f32 %v2828_v34, %v2829_v23  ;;  %v6756_v49 = vld [vmem:[%s7060_s17 + $0x20] sm:$0xff] }
 0x26f   : > { %v3078_v43 = vadd.f32 %v3077_v59, %v3076_v12  ;;  %v3232_v41 = vmul.f32 %v6657_v0, %v8047_v20  ;;  %v8248_v13 = vmax.f32 %v2824_v18, %v2825_v60  ;;  %v8272_v60 = vpop.f32.mrb[102].mxu0 }
 0x270   : > { %v8245_v51 = vadd.f32 %v3083_v16, %v3082_v26  ;;  %6660 = vrcp.f32 %v3072_v2  ;;  %v6659_v56 = vpop.eup %6658  ;;  %v8261_v18 = vmul.f32 1.442695, %v2947_v62  ;;  %10108 = vst [vmem:[#allocation59_spill] sm:$0xff] %v8272_v60 }
 0x271   : > { %v3291_v25 = vmul.f32 %v6756_v49, %v3232_v41  ;;  %v3559_v12 = vmul.f32 %v3232_v41, %v7930_v8  ;;  %v3561_v20 = vmul.f32 %v3232_v41, %v7932_v4  ;;  %v3560_v63 = vmul.f32 %v3232_v41, %v7934_v5  ;;  %v6757_v8 = vld [vmem:[%s7060_s17 + $0x28] sm:$0xff] }
 0x272   : > { %v3562_v26 = vmul.f32 %v3232_v41, %v7936_v6  ;;  %v8259_v2 = vmul.f32 %v6659_v56, %v8054_v35  ;;  %6662 = vrcp.f32 %v3078_v43  ;;  %v8268_v6 = vpop.f32.mrb[101].mxu1 }
 0x273   : > { %v3347_v34 = vsel %vm1032_vm2, %v3291_v25, 0.0  ;;  %v3767_v59 = vrot.slane %v3559_v12, 4  ;;  %v3779_v55 = vrot.slane %v3561_v20, 4  ;;  %v3773_v16 = vrot.slane %v3560_v63, 4  ;;  %10107 = vst [vmem:[#allocation58_spill] sm:$0xff] %v8268_v6  ;;  %v8274_v62 = vpop.f32.mrb[102].mxu1 }
 0x274   : > { %v3348_v23 = vrot.slane %v3347_v34, 4  ;;  %v3785_v0 = vrot.slane %v3562_v26, 4  ;;  %v3292_v4 = vmul.f32 %v6757_v8, %v8259_v2  ;;  %v3563_v5 = vmul.f32 %v8259_v2, %v7938_v7  ;;  %10109 = vst [vmem:[#allocation60_spill] sm:$0xff] %v8274_v62  ;;  %v8277_v32 = vpop.f32.mrb[103].mxu1 }
 0x275   : > { %v3768_v35 = vadd.f32 %v3767_v59, %v3559_v12  ;;  %v3780_v41 = vadd.f32 %v3779_v55, %v3561_v20  ;;  %v3774_v56 = vadd.f32 %v3773_v16, %v3560_v63  ;;  %v3565_v43 = vmul.f32 %v8259_v2, %v7940_v9  ;;  %10110 = vst [vmem:[#allocation61_spill] sm:$0xff] %v8277_v32  ;;  %v8279_v20 = vpop.f32.mrb[103].mxu0 }
 0x276   : > { %v3349_v49 = vadd.f32 %v3348_v23, %v3347_v34  ;;  %v3786_v25 = vadd.f32 %v3785_v0, %v3562_v26  ;;  %v3354_v8 = vsel %vm1032_vm2, %v3292_v4, 0.0  ;;  %v3791_v45 = vrot.slane %v3563_v5, 4  ;;  %10111 = vst [vmem:[#allocation62_spill] sm:$0xff] %v8279_v20  ;;  %v8281_v60 = vpop.f32.mrb[104].mxu0  ;;  %v8283_v34 = vpop.f32.mrb[104].mxu1 }
 0x277   : > { %v3769_v7 = vrot.slane %v3768_v35, 2  ;;  %v3781_v31 = vrot.slane %v3780_v41, 2  ;;  %v3775_v12 = vrot.slane %v3774_v56, 2  ;;  %v3355_v59 = vrot.slane %v3354_v8, 4  ;;  %10112 = vst [vmem:[#allocation63_spill] sm:$0xff] %v8281_v60  ;;  %10113 = vst [vmem:[#allocation64_spill] sm:$0xff] %v8283_v34 }
 0x278   : > { %v3350_v63 = vrot.slane %v3349_v49, 2  ;;  %v3787_v55 = vrot.slane %v3786_v25, 2  ;;  %v3792_v9 = vadd.f32 %v3791_v45, %v3563_v5  ;;  %v3803_v16 = vrot.slane %v3565_v43, 4  ;;  %v8285_v32 = vpop.f32.mrb[105].mxu0  ;;  %v8287_v62 = vpop.f32.mrb[105].mxu1 }
 0x279   : > { %v3770_v26 = vadd.f32 %v3769_v7, %v3768_v35  ;;  %v3782_v23 = vadd.f32 %v3781_v31, %v3780_v41  ;;  %v3776_v0 = vadd.f32 %v3775_v12, %v3774_v56  ;;  %v3356_v4 = vadd.f32 %v3355_v59, %v3354_v8  ;;  %10114 = vst [vmem:[#allocation65_spill] sm:$0xff] %v8285_v32  ;;  %v8289_v45 = vpop.f32.mrb[106].mxu0  ;;  %v8291_v5 = vpop.f32.mrb[106].mxu1  ;;  %v10145_v32 = vld [vmem:[#allocation6_spill] sm:$0xff] }
 0x27a   : > { %10115 = vst [vmem:[#allocation66_spill] sm:$0xff] %v8287_v62  ;;  %v6661_v6 = vpop.eup %6660  ;;  %v3351_v50 = vadd.f32 %v3350_v63, %v3349_v49  ;;  %v3788_v20 = vadd.f32 %v3787_v55, %v3786_v25  ;;  %v3793_v17 = vrot.slane %v3792_v9, 2  ;;  %v3804_v47 = vadd.f32 %v3803_v16, %v3565_v43  ;;  %10116 = vst [vmem:[#allocation67_spill] sm:$0xff] %v8289_v45  ;;  %v8293_v31 = vpop.f32.mrb[107].mxu1 }
 0x27b   : > { %10117 = vst [vmem:[#allocation68_spill] sm:$0xff] %v8291_v5  ;;  %v3771_v60 = vrot.slane %v3770_v26, 1  ;;  %v3783_v3 = vrot.slane %v3782_v23, 1  ;;  %v3777_v34 = vrot.slane %v3776_v0, 1  ;;  %v3357_v35 = vrot.slane %v3356_v4, 2  ;;  %10118 = vst [vmem:[#allocation69_spill] sm:$0xff] %v8293_v31 }
 0x27c   : > { %v6663_v41 = vpop.eup %6662  ;;  %v3352_v56 = vrot.slane %v3351_v50, 1  ;;  %v3789_v8 = vrot.slane %v3788_v20, 1  ;;  %v3794_v7 = vadd.f32 %v3793_v17, %v3792_v9  ;;  %v3805_v12 = vrot.slane %v3804_v47, 2  ;;  %v8313_v9 = vpop.f32.mrb[107].mxu0 }
 0x27d   : > { %v8295_v59 = vadd.f32 %v3771_v60, %v3770_v26  ;;  %v8297_v49 = vadd.f32 %v3783_v3, %v3782_v23  ;;  %v8299_v43 = vadd.f32 %v3777_v34, %v3776_v0  ;;  %v3358_v25 = vadd.f32 %v3357_v35, %v3356_v4  ;;  %10124 = vst [vmem:[#allocation75_spill] sm:$0xff] %v8313_v9  ;;  %v8320_v23 = vpop.f32.mrb[108].mxu1 }
 0x27e   : > { %v3353_v63 = vadd.f32 %v3352_v56, %v3351_v50  ;;  %v8301_v55 = vadd.f32 %v3789_v8, %v3788_v20  ;;  %v3795_v16 = vrot.slane %v3794_v7, 1  ;;  %v3806_v5 = vadd.f32 %v3805_v12, %v3804_v47  ;;  %10126 = vst [vmem:[#allocation77_spill] sm:$0xff] %v8320_v23  ;;  %v8329_v4 = vpop.f32.mrb[109].mxu1  ;;  %v10133_v12 = vld [vmem:[#allocation5_spill] sm:$0xff] }
 0x27f   : > { %10119 = vst [vmem:[#allocation70_spill] sm:$0xff] %v8295_v59  ;;  %10120 = vst [vmem:[#allocation71_spill] sm:$0xff] %v8297_v49  ;;  %v3359_v45 = vrot.slane %v3358_v25, 1  ;;  %v3566_v31 = vmul.f32 %v8259_v2, %v7942_v10  ;;  %6664 = vpow2.f32 %v8261_v18  ;;  %v3564_v17 = vmul.f32 %v8259_v2, %v7944_v24  ;;  %v8318_v18 = vpop.f32.mrb[108].mxu0  ;;  %v8337_v8 = vpop.f32.mrb[110].mxu1 }
 0x280   : > { %10121 = vst [vmem:[#allocation72_spill] sm:$0xff] %v8299_v43  ;;  %10122 = vst [vmem:[#allocation73_spill] sm:$0xff] %v8301_v55  ;;  %v5948_v3 = vsel %vm5497_vm7, %v3353_v63, %v8184_v1  ;;  %v8310_v60 = vadd.f32 %v3795_v16, %v3794_v7  ;;  %v3807_v50 = vrot.slane %v3806_v5, 1  ;;  %v3236_v20 = vmul.f32 %v6661_v6, %v8066_v53  ;;  %v6758_v1 = vld [vmem:[%s7060_s17 + $0x30] sm:$0xff]  ;;  %v8327_v6 = vpop.f32.mrb[109].mxu0  ;;  %v8341_v63 = vpop.f32.mrb[111].mxu1 }
 0x281   : > { %v3360_v47 = vadd.f32 %v3359_v45, %v3358_v25  ;;  %v3809_v34 = vrot.slane %v3566_v31, 4  ;;  %v3797_v26 = vrot.slane %v3564_v17, 4  ;;  %v8316_v10 = vmul.f32 %v6663_v41, %v8081_v15  ;;  %10125 = vst [vmem:[#allocation76_spill] sm:$0xff] %v8318_v18  ;;  %10128 = vst [vmem:[#allocation79_spill] sm:$0xff] %v8327_v6  ;;  %v10130_v41 = vld [vmem:[#allocation4_spill] sm:$0xff] }
 0x282   : > { %10123 = vst [vmem:[#allocation74_spill] sm:$0xff] %v8310_v60  ;;  %v8322_v24 = vadd.f32 %v3807_v50, %v3806_v5  ;;  %v3293_v2 = vmul.f32 %v6758_v1, %v3236_v20  ;;  %v3567_v0 = vmul.f32 %v3236_v20, %v7946_v11  ;;  %v3569_v53 = vmul.f32 %v3236_v20, %v7948_v29  ;;  %v8335_v5 = vpop.f32.mrb[110].mxu0 }
 0x283   : > { %10129 = vst [vmem:[#allocation80_spill] sm:$0xff] %v8329_v4  ;;  %v8332_v45 = vsel %vm5500_vm8, %v3360_v47, %v5948_v3  ;;  %v3810_v15 = vadd.f32 %v3809_v34, %v3566_v31  ;;  %v3798_v35 = vadd.f32 %v3797_v26, %v3564_v17  ;;  %v3568_v56 = vmul.f32 %v3236_v20, %v10130_v41  ;;  %v6759_v26 = vld [vmem:[%s7060_s17 + $0x38] sm:$0xff] }
 0x284   : > { %10127 = vst [vmem:[#allocation78_spill] sm:$0xff] %v8322_v24  ;;  %10131 = vst [vmem:[#allocation4_spill] sm:$0xff] %v8335_v5  ;;  %v3361_v11 = vsel %vm1032_vm2, %v3293_v2, 0.0  ;;  %v3815_v7 = vrot.slane %v3567_v0, 4  ;;  %v3827_v29 = vrot.slane %v3569_v53, 4  ;;  %v3570_v25 = vmul.f32 %v3236_v20, %v10133_v12 }
 0x285   : > { %10132 = vst [vmem:[#allocation81_spill] sm:$0xff] %v8337_v8  ;;  %10134 = vst [vmem:[#allocation5_spill] sm:$0xff] %v8341_v63  ;;  %v3811_v16 = vrot.slane %v3810_v15, 2  ;;  %v3799_v3 = vrot.slane %v3798_v35, 2  ;;  %v3362_v50 = vrot.slane %v3361_v11, 4  ;;  %v3821_v31 = vrot.slane %v3568_v56, 4 }
 0x286   : > { %v3816_v17 = vadd.f32 %v3815_v7, %v3567_v0  ;;  %v3828_v47 = vadd.f32 %v3827_v29, %v3569_v53  ;;  %v3833_v34 = vrot.slane %v3570_v25, 4  ;;  %v3294_v1 = vmul.f32 %v6759_v26, %v8316_v10  ;;  %v8346_v63 = vpop.f32.mrb[111].mxu0  ;;  %v8352_v26 = vpop.f32.mrb[112].mxu1 }
 0x287   : > { %v3812_v41 = vadd.f32 %v3811_v16, %v3810_v15  ;;  %v3800_v8 = vadd.f32 %v3799_v3, %v3798_v35  ;;  %v3363_v2 = vadd.f32 %v3362_v50, %v3361_v11  ;;  %v3822_v23 = vadd.f32 %v3821_v31, %v3568_v56  ;;  %10135 = vst [vmem:[#allocation82_spill] sm:$0xff] %v8346_v63  ;;  %v8350_v62 = vpop.f32.mrb[112].mxu0  ;;  %v8357_v16 = vpop.f32.mrb[113].mxu1 }
 0x288   : > { %v3817_v5 = vrot.slane %v3816_v17, 2  ;;  %v3829_v18 = vrot.slane %v3828_v47, 2  ;;  %v3834_v20 = vadd.f32 %v3833_v34, %v3570_v25  ;;  %v3368_v12 = vsel %vm1032_vm2, %v3294_v1, 0.0  ;;  %10136 = vst [vmem:[#allocation83_spill] sm:$0xff] %v8350_v62  ;;  %10137 = vst [vmem:[#allocation84_spill] sm:$0xff] %v8352_v26  ;;  %v8355_v25 = vpop.f32.mrb[113].mxu0 }
 0x289   : > { %v8348_v4 = vpop.eup %6664  ;;  %v3813_v0 = vrot.slane %v3812_v41, 1  ;;  %v3801_v7 = vrot.slane %v3800_v8, 1  ;;  %v3364_v53 = vrot.slane %v3363_v2, 2  ;;  %v3823_v29 = vrot.slane %v3822_v23, 2  ;;  %10138 = vst [vmem:[#allocation85_spill] sm:$0xff] %v8355_v25  ;;  %10139 = vst [vmem:[#allocation86_spill] sm:$0xff] %v8357_v16 }
 0x28a   : > { %v3818_v35 = vadd.f32 %v3817_v5, %v3816_v17  ;;  %v3830_v56 = vadd.f32 %v3829_v18, %v3828_v47  ;;  %v3835_v11 = vrot.slane %v3834_v20, 2  ;;  %v8363_v1 = vpop.f32.mrb[114].mxu0  ;;  %v8365_v63 = vpop.f32.mrb[114].mxu1  ;;  %v3369_v5 = vrot.slane %v3368_v12, 4  ;;  %v6761_v62 = vld [vmem:[%s7060_s17 + $0x48] sm:$0xff] }
 0x28b   : > { %v8359_v3 = vadd.f32 %v3813_v0, %v3812_v41  ;;  %v8361_v50 = vadd.f32 %v3801_v7, %v3800_v8  ;;  %v3365_v31 = vadd.f32 %v3364_v53, %v3363_v2  ;;  %v3824_v34 = vadd.f32 %v3823_v29, %v3822_v23  ;;  %10142 = vst [vmem:[#allocation89_spill] sm:$0xff] %v8363_v1  ;;  %v8367_v18 = vpop.f32.mrb[115].mxu1  ;;  %v10146_v8 = vld [vmem:[#allocation7_spill] sm:$0xff] }
 0x28c   : > { %10143 = vst [vmem:[#allocation90_spill] sm:$0xff] %v8365_v63  ;;  %v3819_v6 = vrot.slane %v3818_v35, 1  ;;  %v3831_v9 = vrot.slane %v3830_v56, 1  ;;  %v3836_v15 = vadd.f32 %v3835_v11, %v3834_v20  ;;  %10144 = vst [vmem:[#allocation91_spill] sm:$0xff] %v8367_v18  ;;  %v3571_v41 = vmul.f32 %v8316_v10, %v10145_v32  ;;  %v10151_v63 = vld [vmem:[#allocation8_spill] sm:$0xff] }
 0x28d   : > { %10140 = vst [vmem:[#allocation87_spill] sm:$0xff] %v8359_v3  ;;  %10141 = vst [vmem:[#allocation88_spill] sm:$0xff] %v8361_v50  ;;  %v3366_v17 = vrot.slane %v3365_v31, 1  ;;  %v3825_v47 = vrot.slane %v3824_v34, 1  ;;  %v3573_v2 = vmul.f32 %v8316_v10, %v10146_v8  ;;  %v3370_v53 = vadd.f32 %v3369_v5, %v3368_v12  ;;  %v10152_v12 = vld [vmem:[#allocation9_spill] sm:$0xff] }
 0x28e   : > { %v8373_v23 = vadd.f32 %v3819_v6, %v3818_v35  ;;  %v8375_v0 = vadd.f32 %v3831_v9, %v3830_v56  ;;  %v3837_v7 = vrot.slane %v3836_v15, 1  ;;  %v3839_v11 = vrot.slane %v3571_v41, 4 }
 0x28f   : > { %v3367_v29 = vadd.f32 %v3366_v17, %v3365_v31  ;;  %v8377_v20 = vadd.f32 %v3825_v47, %v3824_v34  ;;  %v3851_v18 = vrot.slane %v3573_v2, 4  ;;  %v3371_v25 = vrot.slane %v3370_v53, 2  ;;  %v8392_v17 = vpop.f32.mrb[115].mxu0 }
 0x290   : > { %10147 = vst [vmem:[#allocation6_spill] sm:$0xff] %v8373_v23  ;;  %10148 = vst [vmem:[#allocation7_spill] sm:$0xff] %v8375_v0  ;;  %v8379_v16 = vadd.f32 %v3837_v7, %v3836_v15  ;;  %v3574_v32 = vmul.f32 %v8316_v10, %v10151_v63  ;;  %v2948_v8 = vsub.f32 %v8175_v19, %v8248_v13  ;;  %6666 = vrcp.f32 %v8245_v51  ;;  %v8390_v15 = vpop.xlane.xlu0 %2666 }
 0x291   : > { %10149 = vst [vmem:[#allocation92_spill] sm:$0xff] %v8377_v20  ;;  %v5950_v9 = vsel %vm5503_vm9, %v3367_v29, %v8332_v45  ;;  %v3840_v6 = vadd.f32 %v3839_v11, %v3571_v41  ;;  %v3852_v35 = vadd.f32 %v3851_v18, %v3573_v2  ;;  %v3572_v56 = vmul.f32 %v8316_v10, %v10152_v12  ;;  %v8397_v18 = vpop.f32.mrb[116].mxu0  ;;  %v8399_v10 = vpop.f32.mrb[116].mxu1 }
 0x292   : > { %10150 = vst [vmem:[#allocation93_spill] sm:$0xff] %v8379_v16  ;;  %v3372_v31 = vadd.f32 %v3371_v25, %v3370_v53  ;;  %v3857_v34 = vrot.slane %v3574_v32, 4  ;;  %v2993_v5 = vmul.f32 1.442695, %v2948_v8  ;;  %10153 = vst [vmem:[#allocation8_spill] sm:$0xff] %v8392_v17  ;;  %v10154_v13 = vrot.slane %v8238_v22, 1 }
 0x293   : > { %v3841_v63 = vrot.slane %v3840_v6, 2  ;;  %v3853_v47 = vrot.slane %v3852_v35, 2  ;;  %v3845_v19 = vrot.slane %v3572_v56, 4  ;;  %10155 = vst [vmem:[#allocation9_spill] sm:$0xff] %v8397_v18  ;;  %10156 = vst [vmem:[#allocation94_spill] sm:$0xff] %v8399_v10  ;;  %v2831_v51 = vrot.slane %v8250_v54, 1 }
 0x294   : > { %v3090_v45 = vadd.f32 %v10154_v13, %v8238_v22  ;;  %v3373_v25 = vrot.slane %v3372_v31, 1  ;;  %v3858_v41 = vadd.f32 %v3857_v34, %v3574_v32  ;;  %6668 = vpow2.f32 %v2993_v5  ;;  %v8402_v2 = vpop.f32.mrb[117].mxu0  ;;  %v8404_v7 = vpop.f32.mrb[117].mxu1 }
 0x295   : > { %10157 = vst [vmem:[#allocation95_spill] sm:$0xff] %v8402_v2  ;;  %10158 = vst [vmem:[#allocation96_spill] sm:$0xff] %v8404_v7  ;;  %v3842_v53 = vadd.f32 %v3841_v63, %v3840_v6  ;;  %v3854_v29 = vadd.f32 %v3853_v47, %v3852_v35  ;;  %v3846_v11 = vadd.f32 %v3845_v19, %v3572_v56  ;;  %v8406_v8 = vpop.f32.mrb[118].mxu0  ;;  %v8408_v22 = vpop.f32.mrb[118].mxu1  ;;  %v10161_v6 = vrot.slane %v8234_v42, 2 }
 0x296   : > { %6670 = vrcp.f32 %v3090_v45  ;;  %10159 = vst [vmem:[#allocation97_spill] sm:$0xff] %v8406_v8  ;;  %10160 = vst [vmem:[#allocation98_spill] sm:$0xff] %v8408_v22  ;;  %v3374_v32 = vadd.f32 %v3373_v25, %v3372_v31  ;;  %v3859_v12 = vrot.slane %v3858_v41, 2  ;;  %v2832_v34 = vmax.f32 %v8250_v54, %v2831_v51  ;;  %v8420_v56 = vpop.f32.mrb[119].mxu1  ;;  %v8425_v45 = vpop.xlane.xlu1 %2661 }
 0x297   : > { %v3094_v35 = vadd.f32 %v10161_v6, %v8234_v42  ;;  %10162 = vst [vmem:[#allocation99_spill] sm:$0xff] %v8420_v56  ;;  %v3843_v5 = vrot.slane %v3842_v53, 1  ;;  %v3855_v63 = vrot.slane %v3854_v29, 1  ;;  %v3847_v47 = vrot.slane %v3846_v11, 2  ;;  %v8435_v8 = vpop.xlane.xlu0 %2671  ;;  %v8485_v24 = vpop.f32.mrb[120].mxu1 }
 0x298   : > { %v10163_v19 = vrot.slane %v8236_v39, 4  ;;  %v5951_v31 = vsel %vm5506_vm10, %v3374_v32, %v5950_v9  ;;  %v3860_v25 = vadd.f32 %v3859_v12, %v3858_v41  ;;  %v2949_v54 = vsub.f32 %v8204_v36, %v2832_v34 }
 0x299   : > { %v3095_v51 = vrot.slane %v3094_v35, 1  ;;  %v8429_v22 = vadd.f32 %v3843_v5, %v3842_v53  ;;  %5977 = vst.msk [vmem:[%s8414_s27] sm:$0xff] %vm1032_vm2, %v5951_v31  ;;  %v8433_v42 = vadd.f32 %v3855_v63, %v3854_v29  ;;  %v3848_v6 = vadd.f32 %v3847_v47, %v3846_v11 }
 0x29a   : > { %v3098_v13 = vadd.f32 %v8236_v39, %v10163_v19  ;;  %v3861_v18 = vrot.slane %v3860_v25, 1  ;;  %v2995_v19 = vmul.f32 1.442695, %v2949_v54  ;;  %v2833_v7 = vrot.slane %v8425_v45, 4  ;;  %v6667_v29 = vpop.eup %6666  ;;  %v6760_v54 = vld [vmem:[%s7060_s17 + $0x40] sm:$0xff] }
 0x29b   : > { %10164 = vst [vmem:[#allocation100_spill] sm:$0xff] %v8429_v22  ;;  %10165 = vst [vmem:[#allocation101_spill] sm:$0xff] %v8433_v42  ;;  %v3096_v56 = vadd.f32 %v3095_v51, %v3094_v35  ;;  %v3849_v9 = vrot.slane %v3848_v6, 1  ;;  %v10166_v36 = vrot.slane %v8348_v4, 4  ;;  %v2839_v32 = vrot.slane %v8390_v15, 4 }
 0x29c   : > { %v3099_v10 = vrot.slane %v3098_v13, 2  ;;  %v8444_v11 = vadd.f32 %v3861_v18, %v3860_v25  ;;  %6672 = vpow2.f32 %v2995_v19  ;;  %v2834_v12 = vmax.f32 %v8425_v45, %v2833_v7 }
 0x29d   : > { %v8441_v53 = vadd.f32 %v8348_v4, %v10166_v36  ;;  %v2845_v34 = vrot.slane %v8435_v8, 4  ;;  %v8448_v35 = vadd.f32 %v3849_v9, %v3848_v6  ;;  %6674 = vrcp.f32 %v3096_v56  ;;  %v10170_v6 = vld [vmem:[#allocation11_spill] sm:$0xff]  ;;  %v10171_v9 = vld [vmem:[#allocation12_spill] sm:$0xff] }
 0x29e   : > { %v3100_v41 = vadd.f32 %v3099_v10, %v3098_v13  ;;  %10167 = vst [vmem:[#allocation102_spill] sm:$0xff] %v8444_v11  ;;  %v3240_v10 = vmul.f32 %v6667_v29, %v8088_v28  ;;  %v8451_v63 = vpop.eup %6668  ;;  %v2835_v47 = vrot.slane %v2834_v12, 2  ;;  %v8455_v31 = vmax.f32 %v8390_v15, %v2839_v32  ;;  %v10169_v28 = vld [vmem:[#allocation10_spill] sm:$0xff]  ;;  %v10172_v29 = vld [vmem:[#allocation13_spill] sm:$0xff]  ;;  %10177 = vst [vmem:[#allocation12_spill] sm:$0xff] %v8485_v24 }
 0x29f   : > { %10168 = vst [vmem:[#allocation103_spill] sm:$0xff] %v8448_v35  ;;  %v8458_v18 = vmax.f32 %v8435_v8, %v2845_v34 }
 0x2a0   : > { %v3101_v5 = vrot.slane %v3100_v41, 1  ;;  %v6671_v7 = vpop.eup %6670  ;;  %v3295_v51 = vmul.f32 %v6760_v54, %v3240_v10  ;;  %v3575_v56 = vmul.f32 %v3240_v10, %v10169_v28  ;;  %v3577_v19 = vmul.f32 %v3240_v10, %v10170_v6 }
 0x2a1   : > { %v3576_v36 = vmul.f32 %v3240_v10, %v10171_v9  ;;  %v3578_v13 = vmul.f32 %v3240_v10, %v10172_v29  ;;  %v8467_v32 = vmul.f32 %v6671_v7, %v8099_v44  ;;  %v8472_v26 = vmax.f32 %v2834_v12, %v2835_v47  ;;  %v10173_v10 = vld [vmem:[#allocation14_spill] sm:$0xff]  ;;  %v10174_v7 = vld [vmem:[#allocation15_spill] sm:$0xff] }
 0x2a2   : > { %v8469_v2 = vadd.f32 %v3101_v5, %v3100_v41  ;;  %v3375_v34 = vsel %vm1032_vm2, %v3295_v51, 0.0  ;;  %v3863_v17 = vrot.slane %v3575_v56, 4  ;;  %v3875_v25 = vrot.slane %v3577_v19, 4  ;;  %v8480_v5 = vpop.f32.mrb[119].mxu0 }
 0x2a3   : > { %v3376_v54 = vrot.slane %v3375_v34, 4  ;;  %v3869_v1 = vrot.slane %v3576_v36, 4  ;;  %v3881_v28 = vrot.slane %v3578_v13, 4  ;;  %v3296_v6 = vmul.f32 %v6761_v62, %v8467_v32  ;;  %10175 = vst [vmem:[#allocation10_spill] sm:$0xff] %v8480_v5  ;;  %v8483_v0 = vpop.f32.mrb[120].mxu0 }
 0x2a4   : > { %v3864_v9 = vadd.f32 %v3863_v17, %v3575_v56  ;;  %v3876_v42 = vadd.f32 %v3875_v25, %v3577_v19  ;;  %v3579_v44 = vmul.f32 %v8467_v32, %v10173_v10  ;;  %v3581_v41 = vmul.f32 %v8467_v32, %v10174_v7  ;;  %10176 = vst [vmem:[#allocation11_spill] sm:$0xff] %v8483_v0  ;;  %v8487_v19 = vpop.f32.mrb[121].mxu0  ;;  %v8489_v10 = vpop.f32.mrb[121].mxu1 }
 0x2a5   : > { %v3377_v51 = vadd.f32 %v3376_v54, %v3375_v34  ;;  %v3870_v29 = vadd.f32 %v3869_v1, %v3576_v36  ;;  %v3882_v12 = vadd.f32 %v3881_v28, %v3578_v13  ;;  %v3382_v47 = vsel %vm1032_vm2, %v3296_v6, 0.0  ;;  %10178 = vst [vmem:[#allocation13_spill] sm:$0xff] %v8487_v19  ;;  %10179 = vst [vmem:[#allocation14_spill] sm:$0xff] %v8489_v10  ;;  %v8493_v36 = vpop.f32.mrb[122].mxu0  ;;  %v8495_v54 = vpop.f32.mrb[122].mxu1 }
 0x2a6   : > { %v3865_v62 = vrot.slane %v3864_v9, 2  ;;  %v3877_v17 = vrot.slane %v3876_v42, 2  ;;  %v3383_v25 = vrot.slane %v3382_v47, 4  ;;  %v3887_v56 = vrot.slane %v3579_v44, 4  ;;  %v8491_v7 = vpop.eup %6672  ;;  %10180 = vst [vmem:[#allocation15_spill] sm:$0xff] %v8493_v36  ;;  %10181 = vst [vmem:[#allocation104_spill] sm:$0xff] %v8495_v54 }
 0x2a7   : > { %v3378_v5 = vrot.slane %v3377_v51, 2  ;;  %v3871_v34 = vrot.slane %v3870_v29, 2  ;;  %v3883_v1 = vrot.slane %v3882_v12, 2  ;;  %v3899_v13 = vrot.slane %v3581_v41, 4  ;;  %v6675_v28 = vpop.eup %6674  ;;  %v8497_v22 = vpop.f32.mrb[123].mxu1 }
 0x2a8   : > { %v3866_v6 = vadd.f32 %v3865_v62, %v3864_v9  ;;  %v3878_v24 = vadd.f32 %v3877_v17, %v3876_v42  ;;  %v3384_v0 = vadd.f32 %v3383_v25, %v3382_v47  ;;  %v3888_v49 = vadd.f32 %v3887_v56, %v3579_v44  ;;  %10182 = vst [vmem:[#allocation105_spill] sm:$0xff] %v8497_v22  ;;  %v8499_v54 = vpop.f32.mrb[123].mxu0 }
 0x2a9   : > { %v3379_v19 = vadd.f32 %v3378_v5, %v3377_v51  ;;  %v3872_v23 = vadd.f32 %v3871_v34, %v3870_v29  ;;  %v3884_v10 = vadd.f32 %v3883_v1, %v3882_v12  ;;  %v3900_v60 = vadd.f32 %v3899_v13, %v3581_v41  ;;  %10183 = vst [vmem:[#allocation106_spill] sm:$0xff] %v8499_v54  ;;  %v8505_v5 = vpop.f32.mrb[124].mxu0  ;;  %v8507_v51 = vpop.f32.mrb[124].mxu1 }
 0x2aa   : > { %v3867_v59 = vrot.slane %v3866_v6, 1  ;;  %v3879_v35 = vrot.slane %v3878_v24, 1  ;;  %v3385_v20 = vrot.slane %v3384_v0, 2  ;;  %v3889_v50 = vrot.slane %v3888_v49, 2  ;;  %10186 = vst [vmem:[#allocation109_spill] sm:$0xff] %v8505_v5  ;;  %10187 = vst [vmem:[#allocation110_spill] sm:$0xff] %v8507_v51 }
 0x2ab   : > { %v3380_v43 = vrot.slane %v3379_v19, 1  ;;  %v3873_v11 = vrot.slane %v3872_v23, 1  ;;  %v3885_v36 = vrot.slane %v3884_v10, 1  ;;  %v3901_v16 = vrot.slane %v3900_v60, 2  ;;  %v8513_v17 = vpop.f32.mrb[125].mxu0  ;;  %v8515_v25 = vpop.f32.mrb[125].mxu1 }
 0x2ac   : > { %v8501_v9 = vadd.f32 %v3867_v59, %v3866_v6  ;;  %v8503_v42 = vadd.f32 %v3879_v35, %v3878_v24  ;;  %v3386_v44 = vadd.f32 %v3385_v20, %v3384_v0  ;;  %v3890_v47 = vadd.f32 %v3889_v50, %v3888_v49  ;;  %10190 = vst [vmem:[#allocation113_spill] sm:$0xff] %v8513_v17  ;;  %v10192_v24 = vld [vmem:[#allocation16_spill] sm:$0xff]  ;;  %v8520_v50 = vpop.f32.mrb[126].mxu0  ;;  %v10195_v20 = vld [vmem:[#allocation17_spill] sm:$0xff] }
 0x2ad   : > { %v3381_v41 = vadd.f32 %v3380_v43, %v3379_v19  ;;  %v8509_v29 = vadd.f32 %v3873_v11, %v3872_v23  ;;  %v8511_v12 = vadd.f32 %v3885_v36, %v3884_v10  ;;  %v3902_v62 = vadd.f32 %v3901_v16, %v3900_v60  ;;  %10191 = vst [vmem:[#allocation114_spill] sm:$0xff] %v8515_v25  ;;  %v8522_v43 = vpop.f32.mrb[126].mxu1  ;;  %v8533_v1 = vpop.f32.mrb[127].mxu0  ;;  %v6762_v6 = vld [vmem:[%s7060_s17 + $0x50] sm:$0xff] }
 0x2ae   : > { %10184 = vst [vmem:[#allocation107_spill] sm:$0xff] %v8501_v9  ;;  %10185 = vst [vmem:[#allocation108_spill] sm:$0xff] %v8503_v42  ;;  %v3387_v59 = vrot.slane %v3386_v44, 1  ;;  %v3891_v56 = vrot.slane %v3890_v47, 1  ;;  %v3582_v0 = vmul.f32 %v8467_v32, %v10192_v24  ;;  %v3580_v60 = vmul.f32 %v8467_v32, %v10195_v20  ;;  %v8528_v11 = vpop.f32.mrb[127].mxu1  ;;  %v10200_v32 = vld [vmem:[#allocation18_spill] sm:$0xff] }
 0x2af   : > { %10188 = vst [vmem:[#allocation111_spill] sm:$0xff] %v8509_v29  ;;  %10189 = vst [vmem:[#allocation112_spill] sm:$0xff] %v8511_v12  ;;  %v3903_v23 = vrot.slane %v3902_v62, 1  ;;  %v3244_v16 = vmul.f32 %v6675_v28, %v8140_v38  ;;  %6676 = vrcp.f32 %v8469_v2  ;;  %v2837_v34 = vrot.slane %v8472_v26, 1  ;;  %v8539_v38 = vpop.f32.mrb[128].mxu0  ;;  %v6765_v12 = vld [vmem:[%s7060_s17 + $0x68] sm:$0xff] }
 0x2b0   : > { %10193 = vst [vmem:[#allocation16_spill] sm:$0xff] %v8520_v50  ;;  %10194 = vst [vmem:[#allocation115_spill] sm:$0xff] %v8522_v43  ;;  %v3388_v35 = vadd.f32 %v3387_v59, %v3386_v44  ;;  %v8530_v19 = vadd.f32 %v3891_v56, %v3890_v47  ;;  %v3905_v10 = vrot.slane %v3582_v0, 4  ;;  %v3893_v36 = vrot.slane %v3580_v60, 4  ;;  %v10201_v44 = vld [vmem:[#allocation19_spill] sm:$0xff]  ;;  %v10202_v59 = vld [vmem:[#allocation20_spill] sm:$0xff] }
 0x2b1   : > { %10196 = vst [vmem:[#allocation17_spill] sm:$0xff] %v8528_v11  ;;  %10198 = vst [vmem:[#allocation117_spill] sm:$0xff] %v8533_v1  ;;  %v8535_v13 = vadd.f32 %v3903_v23, %v3902_v62  ;;  %v3297_v24 = vmul.f32 %v6762_v6, %v3244_v16  ;;  %v3583_v20 = vmul.f32 %v3244_v16, %v10200_v32  ;;  %v10203_v62 = vld [vmem:[#allocation21_spill] sm:$0xff]  ;;  %v10231_v42 = vld [vmem:[#allocation31_spill] sm:$0xff] }
 0x2b2   : > { %10197 = vst [vmem:[#allocation116_spill] sm:$0xff] %v8530_v19  ;;  %v5952_v2 = vsel %vm5488_vm4, %v3388_v35, %v3381_v41  ;;  %v3906_v28 = vadd.f32 %v3905_v10, %v3582_v0  ;;  %v3585_v47 = vmul.f32 %v3244_v16, %v10201_v44  ;;  %v3584_v56 = vmul.f32 %v3244_v16, %v10202_v59 }
 0x2b3   : > { %10199 = vst [vmem:[#allocation118_spill] sm:$0xff] %v8535_v13  ;;  %v3894_v49 = vadd.f32 %v3893_v36, %v3580_v60  ;;  %v3389_v43 = vsel %vm1032_vm2, %v3297_v24, 0.0  ;;  %v3911_v51 = vrot.slane %v3583_v20, 4  ;;  %v3586_v23 = vmul.f32 %v3244_v16, %v10203_v62 }
 0x2b4   : > { %v3907_v50 = vrot.slane %v3906_v28, 2  ;;  %v3390_v5 = vrot.slane %v3389_v43, 4  ;;  %v3923_v6 = vrot.slane %v3585_v47, 4  ;;  %v3917_v11 = vrot.slane %v3584_v56, 4 }
 0x2b5   : > { %v3895_v32 = vrot.slane %v3894_v49, 2  ;;  %v3912_v25 = vadd.f32 %v3911_v51, %v3583_v20  ;;  %v3929_v22 = vrot.slane %v3586_v23, 4  ;;  %v2838_v41 = vmax.f32 %v8472_v26, %v2837_v34  ;;  %v8548_v26 = vpop.f32.mrb[128].mxu1 }
 0x2b6   : > { %v3908_v0 = vadd.f32 %v3907_v50, %v3906_v28  ;;  %v3391_v35 = vadd.f32 %v3390_v5, %v3389_v43  ;;  %v3924_v10 = vadd.f32 %v3923_v6, %v3585_v47  ;;  %v3918_v44 = vadd.f32 %v3917_v11, %v3584_v56  ;;  %v6763_v6 = vld [vmem:[%s7060_s17 + $0x58] sm:$0xff] }
 0x2b7   : > { %v3896_v59 = vadd.f32 %v3895_v32, %v3894_v49  ;;  %v3913_v60 = vrot.slane %v3912_v25, 2  ;;  %v3930_v36 = vadd.f32 %v3929_v22, %v3586_v23  ;;  %v2950_v24 = vsub.f32 %v8425_v45, %v2838_v41 }
 0x2b8   : > { %v3909_v1 = vrot.slane %v3908_v0, 1  ;;  %v3392_v16 = vrot.slane %v3391_v35, 2  ;;  %v3925_v62 = vrot.slane %v3924_v10, 2  ;;  %v3919_v17 = vrot.slane %v3918_v44, 2 }
 0x2b9   : > { %v6677_v54 = vpop.eup %6676  ;;  %v3897_v3 = vrot.slane %v3896_v59, 1  ;;  %v3914_v55 = vadd.f32 %v3913_v60, %v3912_v25  ;;  %v3931_v51 = vrot.slane %v3930_v36, 2  ;;  %v2997_v20 = vmul.f32 1.442695, %v2950_v24 }
 0x2ba   : > { %v8550_v5 = vadd.f32 %v3909_v1, %v3908_v0  ;;  %v3393_v50 = vadd.f32 %v3392_v16, %v3391_v35  ;;  %v3926_v49 = vadd.f32 %v3925_v62, %v3924_v10  ;;  %v3920_v43 = vadd.f32 %v3919_v17, %v3918_v44  ;;  %v10207_v1 = vld [vmem:[#allocation22_spill] sm:$0xff]  ;;  %v10210_v17 = vld [vmem:[#allocation23_spill] sm:$0xff]  ;;  %v10213_v16 = vld [vmem:[#allocation25_spill] sm:$0xff] }
 0x2bb   : > { %v8552_v22 = vadd.f32 %v3897_v3, %v3896_v59  ;;  %v3915_v45 = vrot.slane %v3914_v55, 1  ;;  %v3932_v11 = vadd.f32 %v3931_v51, %v3930_v36  ;;  %v3246_v34 = vmul.f32 %v6677_v54, %v8236_v39  ;;  %v10212_v59 = vld [vmem:[#allocation24_spill] sm:$0xff] }
 0x2bc   : > { %10204 = vst [vmem:[#allocation18_spill] sm:$0xff] %v8550_v5  ;;  %v3394_v28 = vrot.slane %v3393_v50, 1  ;;  %v3927_v47 = vrot.slane %v3926_v49, 1  ;;  %v3921_v56 = vrot.slane %v3920_v43, 1  ;;  %6678 = vpow2.f32 %v2997_v20 }
 0x2bd   : > { %10205 = vst [vmem:[#allocation19_spill] sm:$0xff] %v8552_v22  ;;  %v8555_v25 = vadd.f32 %v3915_v45, %v3914_v55  ;;  %v3933_v23 = vrot.slane %v3932_v11, 1  ;;  %v3298_v32 = vmul.f32 %v6763_v6, %v3246_v34  ;;  %v3587_v41 = vmul.f32 %v3246_v34, %v10207_v1 }
 0x2be   : > { %v3395_v0 = vadd.f32 %v3394_v28, %v3393_v50  ;;  %v8559_v35 = vadd.f32 %v3927_v47, %v3926_v49  ;;  %v8561_v3 = vadd.f32 %v3921_v56, %v3920_v43  ;;  %v3589_v10 = vmul.f32 %v3246_v34, %v10210_v17  ;;  %v8578_v17 = vpop.xlane.xlu1 %2681 }
 0x2bf   : > { %10206 = vst [vmem:[#allocation20_spill] sm:$0xff] %v8555_v25  ;;  %v8564_v44 = vadd.f32 %v3933_v23, %v3932_v11  ;;  %v3396_v39 = vsel %vm1032_vm2, %v3298_v32, 0.0  ;;  %v3935_v54 = vrot.slane %v3587_v41, 4  ;;  %v3590_v55 = vmul.f32 %v3246_v34, %v10212_v59 }
 0x2c0   : > { %10208 = vst [vmem:[#allocation21_spill] sm:$0xff] %v8559_v35  ;;  %10209 = vst [vmem:[#allocation22_spill] sm:$0xff] %v8561_v3  ;;  %v5953_v60 = vsel %vm5491_vm5, %v3395_v0, %v5952_v2  ;;  %v3397_v36 = vrot.slane %v3396_v39, 4  ;;  %v3947_v24 = vrot.slane %v3589_v10, 4  ;;  %v3588_v62 = vmul.f32 %v3246_v34, %v10213_v16 }
 0x2c1   : > { %10211 = vst [vmem:[#allocation23_spill] sm:$0xff] %v8564_v44  ;;  %v3936_v51 = vadd.f32 %v3935_v54, %v3587_v41  ;;  %v3953_v20 = vrot.slane %v3590_v55, 4  ;;  %v10214_v50 = vrot.slane %v8441_v53, 2  ;;  %v10215_v43 = vrot.slane %v8451_v63, 4  ;;  %v10226_v44 = vld [vmem:[#allocation26_spill] sm:$0xff] }
 0x2c2   : > { %v3398_v11 = vadd.f32 %v3397_v36, %v3396_v39  ;;  %v3948_v28 = vadd.f32 %v3947_v24, %v3589_v10  ;;  %v3941_v47 = vrot.slane %v3588_v62, 4  ;;  %v2841_v56 = vrot.slane %v8455_v31, 2  ;;  %v8580_v39 = vpop.f32.mrb[129].mxu0  ;;  %v8582_v10 = vpop.f32.mrb[129].mxu1 }
 0x2c3   : > { %v3106_v49 = vadd.f32 %v10214_v50, %v8441_v53  ;;  %v3110_v45 = vadd.f32 %v8451_v63, %v10215_v43  ;;  %v3937_v2 = vrot.slane %v3936_v51, 2  ;;  %v3954_v23 = vadd.f32 %v3953_v20, %v3590_v55  ;;  %10216 = vst [vmem:[#allocation24_spill] sm:$0xff] %v8582_v10 }
 0x2c4   : > { %v3399_v34 = vrot.slane %v3398_v11, 2  ;;  %v3949_v1 = vrot.slane %v3948_v28, 2  ;;  %v3942_v41 = vadd.f32 %v3941_v47, %v3588_v62  ;;  %v2842_v0 = vmax.f32 %v8455_v31, %v2841_v56  ;;  %v8587_v47 = vpop.xlane.xlu0 %2676 }
 0x2c5   : > { %v3107_v6 = vrot.slane %v3106_v49, 1  ;;  %v3111_v32 = vrot.slane %v3110_v45, 2  ;;  %v3938_v53 = vadd.f32 %v3937_v2, %v3936_v51  ;;  %v3955_v54 = vrot.slane %v3954_v23, 2  ;;  %v8589_v2 = vpop.xlane.xlu1 %2691 }
 0x2c6   : > { %v8584_v36 = vpop.eup %6678  ;;  %v3400_v55 = vadd.f32 %v3399_v34, %v3398_v11  ;;  %v3950_v24 = vadd.f32 %v3949_v1, %v3948_v28  ;;  %v3943_v20 = vrot.slane %v3942_v41, 2  ;;  %v2843_v50 = vrot.slane %v2842_v0, 1 }
 0x2c7   : > { %v3108_v59 = vadd.f32 %v3107_v6, %v3106_v49  ;;  %v3112_v16 = vadd.f32 %v3111_v32, %v3110_v45  ;;  %v3939_v43 = vrot.slane %v3938_v53, 1  ;;  %v3956_v62 = vadd.f32 %v3955_v54, %v3954_v23 }
 0x2c8   : > { %v3121_v31 = vrot.slane %v8584_v36, 4  ;;  %v3401_v51 = vrot.slane %v3400_v55, 1  ;;  %v3951_v49 = vrot.slane %v3950_v24, 1  ;;  %v3944_v45 = vadd.f32 %v3943_v20, %v3942_v41 }
 0x2c9   : > { %6680 = vrcp.f32 %v3108_v59  ;;  %v3113_v56 = vrot.slane %v3112_v16, 1  ;;  %v8591_v6 = vadd.f32 %v3939_v43, %v3938_v53  ;;  %v3957_v32 = vrot.slane %v3956_v62, 1  ;;  %v8602_v53 = vpop.xlane.xlu0 %2686 }
 0x2ca   : > { %v2844_v11 = vmax.f32 %v2842_v0, %v2843_v50  ;;  %v10218_v28 = vrot.slane %v8491_v7, 4  ;;  %v3402_v23 = vadd.f32 %v3401_v51, %v3400_v55  ;;  %v8596_v1 = vadd.f32 %v3951_v49, %v3950_v24  ;;  %v8611_v51 = vpop.f32.mrb[130].mxu0 }
 0x2cb   : > { %10217 = vst [vmem:[#allocation25_spill] sm:$0xff] %v8591_v6  ;;  %v3945_v54 = vrot.slane %v3944_v45, 1  ;;  %v3114_v59 = vadd.f32 %v3113_v56, %v3112_v16  ;;  %v8598_v35 = vadd.f32 %v3957_v32, %v3956_v62  ;;  %v3122_v25 = vadd.f32 %v8584_v36, %v3121_v31  ;;  %10222 = vst [vmem:[#allocation122_spill] sm:$0xff] %v8611_v51  ;;  %v8619_v56 = vpop.xlane.xlu1 %2696  ;;  %v8636_v6 = vpop.f32.mrb[131].mxu0 }
 0x2cc   : > { %v3116_v34 = vadd.f32 %v8491_v7, %v10218_v28  ;;  %10219 = vst [vmem:[#allocation119_spill] sm:$0xff] %v8596_v1  ;;  %v2951_v41 = vsub.f32 %v8390_v15, %v2844_v11  ;;  %v8605_v0 = vsel %vm5494_vm6, %v3402_v23, %v5953_v60  ;;  %v2847_v55 = vrot.slane %v8458_v18, 2  ;;  %v8613_v15 = vpop.f32.mrb[130].mxu1  ;;  %10224 = vst [vmem:[#allocation124_spill] sm:$0xff] %v8636_v6 }
 0x2cd   : > { %10220 = vst [vmem:[#allocation120_spill] sm:$0xff] %v8598_v35  ;;  %v8607_v50 = vadd.f32 %v3945_v54, %v3944_v45  ;;  %6682 = vrcp.f32 %v3114_v59  ;;  %v3123_v16 = vrot.slane %v3122_v25, 2  ;;  %v2851_v62 = vrot.slane %v8587_v47, 4  ;;  %10223 = vst [vmem:[#allocation123_spill] sm:$0xff] %v8613_v15  ;;  %v8638_v35 = vpop.f32.mrb[131].mxu1 }
 0x2ce   : > { %v3117_v20 = vrot.slane %v3116_v34, 2  ;;  %v2999_v24 = vmul.f32 1.442695, %v2951_v41  ;;  %v2848_v31 = vmax.f32 %v8458_v18, %v2847_v55  ;;  %v2857_v49 = vrot.slane %v8578_v17, 4  ;;  %10225 = vst [vmem:[#allocation125_spill] sm:$0xff] %v8638_v35  ;;  %v10230_v35 = vld [vmem:[#allocation30_spill] sm:$0xff] }
 0x2cf   : > { %10221 = vst [vmem:[#allocation121_spill] sm:$0xff] %v8607_v50  ;;  %v2863_v60 = vrot.slane %v8602_v53, 4  ;;  %v2869_v45 = vrot.slane %v8589_v2, 4  ;;  %v3124_v11 = vadd.f32 %v3123_v16, %v3122_v25  ;;  %v2852_v28 = vmax.f32 %v8587_v47, %v2851_v62  ;;  %v10227_v50 = vld [vmem:[#allocation27_spill] sm:$0xff] }
 0x2d0   : > { %v3118_v43 = vadd.f32 %v3117_v20, %v3116_v34  ;;  %6684 = vpow2.f32 %v2999_v24  ;;  %v2849_v34 = vrot.slane %v2848_v31, 1  ;;  %v8623_v23 = vmax.f32 %v8578_v17, %v2857_v49 }
 0x2d1   : > { %v8626_v54 = vmax.f32 %v8602_v53, %v2863_v60  ;;  %v8629_v18 = vmax.f32 %v8589_v2, %v2869_v45  ;;  %v3125_v20 = vrot.slane %v3124_v11, 1  ;;  %v2853_v55 = vrot.slane %v2852_v28, 2 }
 0x2d2   : > { %v3119_v32 = vrot.slane %v3118_v43, 1  ;;  %v2850_v16 = vmax.f32 %v2848_v31, %v2849_v34  ;;  %v10228_v31 = vld [vmem:[#allocation28_spill] sm:$0xff] }
 0x2d3   : > { %v6681_v59 = vpop.eup %6680  ;;  %v3126_v60 = vadd.f32 %v3125_v20, %v3124_v11  ;;  %v2854_v1 = vmax.f32 %v2852_v28, %v2853_v55 }
 0x2d4   : > { %v3120_v41 = vadd.f32 %v3119_v32, %v3118_v43  ;;  %v3248_v25 = vmul.f32 %v6681_v59, %v8348_v4  ;;  %v6764_v43 = vld [vmem:[%s7060_s17 + $0x60] sm:$0xff]  ;;  %v10229_v59 = vld [vmem:[#allocation29_spill] sm:$0xff]  ;;  %v2952_v11 = vsub.f32 %v8435_v8, %v2850_v16 }
 0x2d5   : > { %v2855_v28 = vrot.slane %v2854_v1, 1 }
 0x2d6   : > { %6686 = vrcp.f32 %v3120_v41  ;;  %v3299_v32 = vmul.f32 %v6764_v43, %v3248_v25  ;;  %v3591_v24 = vmul.f32 %v3248_v25, %v10226_v44  ;;  %v3593_v4 = vmul.f32 %v3248_v25, %v10227_v50 }
 0x2d7   : > { %v3592_v34 = vmul.f32 %v3248_v25, %v10228_v31  ;;  %v3594_v62 = vmul.f32 %v3248_v25, %v10229_v59  ;;  %6688 = vrcp.f32 %v3126_v60  ;;  %v6683_v41 = vpop.eup %6682  ;;  %v8648_v50 = vmul.f32 1.442695, %v2952_v11 }
 0x2d8   : > { %v3403_v20 = vsel %vm1032_vm2, %v3299_v32, 0.0  ;;  %v3959_v55 = vrot.slane %v3591_v24, 4  ;;  %v3971_v45 = vrot.slane %v3593_v4, 4  ;;  %v3250_v44 = vmul.f32 %v6683_v41, %v8451_v63 }
 0x2d9   : > { %v3965_v49 = vrot.slane %v3592_v34, 4  ;;  %v3404_v43 = vrot.slane %v3403_v20, 4  ;;  %v3977_v3 = vrot.slane %v3594_v62, 4  ;;  %v8650_v60 = vmax.f32 %v2854_v1, %v2855_v28 }
 0x2da   : > { %v3960_v31 = vadd.f32 %v3959_v55, %v3591_v24  ;;  %v3972_v5 = vadd.f32 %v3971_v45, %v3593_v4  ;;  %v8652_v8 = vpop.eup %6684  ;;  %v3300_v32 = vmul.f32 %v6765_v12, %v3250_v44  ;;  %v3595_v22 = vmul.f32 %v3250_v44, %v10230_v35 }
 0x2db   : > { %v3966_v25 = vadd.f32 %v3965_v49, %v3592_v34  ;;  %v3405_v16 = vadd.f32 %v3404_v43, %v3403_v20  ;;  %v3978_v59 = vadd.f32 %v3977_v3, %v3594_v62  ;;  %v3597_v63 = vmul.f32 %v3250_v44, %v10231_v42 }
 0x2dc   : > { %v3961_v29 = vrot.slane %v3960_v31, 2  ;;  %v3973_v6 = vrot.slane %v3972_v5, 2  ;;  %v3410_v24 = vsel %vm1032_vm2, %v3300_v32, 0.0  ;;  %v3983_v49 = vrot.slane %v3595_v22, 4 }
 0x2dd   : > { %v3967_v13 = vrot.slane %v3966_v25, 2  ;;  %v3406_v11 = vrot.slane %v3405_v16, 2  ;;  %v3979_v41 = vrot.slane %v3978_v59, 2  ;;  %v3411_v34 = vrot.slane %v3410_v24, 4 }
 0x2de   : > { %v3962_v1 = vadd.f32 %v3961_v29, %v3960_v31  ;;  %v3974_v45 = vadd.f32 %v3973_v6, %v3972_v5  ;;  %v3984_v12 = vadd.f32 %v3983_v49, %v3595_v22  ;;  %v3995_v20 = vrot.slane %v3597_v63, 4 }
 0x2df   : > { %v3968_v4 = vadd.f32 %v3967_v13, %v3966_v25  ;;  %v3407_v3 = vadd.f32 %v3406_v11, %v3405_v16  ;;  %v3980_v62 = vadd.f32 %v3979_v41, %v3978_v59  ;;  %v3412_v15 = vadd.f32 %v3411_v34, %v3410_v24  ;;  %v10236_v59 = vld [vmem:[#allocation32_spill] sm:$0xff] }
 0x2e0   : > { %v6687_v28 = vpop.eup %6686  ;;  %v3963_v35 = vrot.slane %v3962_v1, 1  ;;  %v3975_v55 = vrot.slane %v3974_v45, 1  ;;  %v3985_v51 = vrot.slane %v3984_v12, 2  ;;  %v3996_v10 = vadd.f32 %v3995_v20, %v3597_v63  ;;  %v10238_v20 = vld [vmem:[#allocation35_spill] sm:$0xff] }
 0x2e1   : > { %v3969_v43 = vrot.slane %v3968_v4, 1  ;;  %v6689_v19 = vpop.eup %6688  ;;  %v3408_v42 = vrot.slane %v3407_v3, 1  ;;  %v3981_v9 = vrot.slane %v3980_v62, 1  ;;  %v3413_v5 = vrot.slane %v3412_v15, 2 }
 0x2e2   : > { %v8658_v32 = vadd.f32 %v3963_v35, %v3962_v1  ;;  %v8660_v29 = vadd.f32 %v3975_v55, %v3974_v45  ;;  %v3986_v22 = vadd.f32 %v3985_v51, %v3984_v12  ;;  %v3997_v25 = vrot.slane %v3996_v10, 2  ;;  %v10239_v55 = vld [vmem:[#allocation36_spill] sm:$0xff] }
 0x2e3   : > { %v8662_v13 = vadd.f32 %v3969_v43, %v3968_v4  ;;  %v3409_v6 = vadd.f32 %v3408_v42, %v3407_v3  ;;  %v8664_v31 = vadd.f32 %v3981_v9, %v3980_v62  ;;  %v3414_v16 = vadd.f32 %v3413_v5, %v3412_v15  ;;  %v6766_v62 = vld [vmem:[%s7060_s17 + $0x70] sm:$0xff] }
 0x2e4   : > { %10232 = vst [vmem:[#allocation26_spill] sm:$0xff] %v8658_v32  ;;  %10233 = vst [vmem:[#allocation27_spill] sm:$0xff] %v8660_v29  ;;  %v3598_v11 = vmul.f32 %v3250_v44, %v10236_v59  ;;  %v3127_v41 = vrot.slane %v8652_v8, 4  ;;  %v3596_v63 = vmul.f32 %v3250_v44, %v8093_v48  ;;  %v3987_v49 = vrot.slane %v3986_v22, 1 }
 0x2e5   : > { %10234 = vst [vmem:[#allocation28_spill] sm:$0xff] %v8662_v13  ;;  %10235 = vst [vmem:[#allocation29_spill] sm:$0xff] %v8664_v31  ;;  %v5955_v24 = vsel %vm5497_vm7, %v3409_v6, %v8605_v0  ;;  %v3998_v1 = vadd.f32 %v3997_v25, %v3996_v10  ;;  %v3252_v45 = vmul.f32 %v6687_v28, %v8491_v7  ;;  %v3415_v4 = vrot.slane %v3414_v16, 1 }
 0x2e6   : > { %v4001_v9 = vrot.slane %v3598_v11, 4  ;;  %v3989_v34 = vrot.slane %v3596_v63, 4  ;;  %v8673_v51 = vmul.f32 %v6689_v19, %v8584_v36  ;;  %v8675_v15 = vadd.f32 %v3987_v49, %v3986_v22 }
 0x2e7   : > { %v3999_v3 = vrot.slane %v3998_v1, 1  ;;  %v3301_v12 = vmul.f32 %v6766_v62, %v3252_v45  ;;  %v3599_v48 = vmul.f32 %v3252_v45, %v10238_v20  ;;  %v3416_v44 = vadd.f32 %v3415_v4, %v3414_v16 }
 0x2e8   : > { %10237 = vst [vmem:[#allocation30_spill] sm:$0xff] %v8675_v15  ;;  %v4002_v35 = vadd.f32 %v4001_v9, %v3598_v11  ;;  %v3990_v0 = vadd.f32 %v3989_v34, %v3596_v63  ;;  %v3601_v10 = vmul.f32 %v3252_v45, %v10239_v55  ;;  %v3600_v19 = vmul.f32 %v3252_v45, %v8101_v21 }
 0x2e9   : > { %v8680_v7 = vadd.f32 %v3999_v3, %v3998_v1  ;;  %v3417_v28 = vsel %vm1032_vm2, %v3301_v12, 0.0  ;;  %v4007_v43 = vrot.slane %v3599_v48, 4  ;;  %v5956_v36 = vsel %vm5500_vm8, %v3416_v44, %v5955_v24  ;;  %v6767_v1 = vld [vmem:[%s7060_s17 + $0x78] sm:$0xff] }
 0x2ea   : > { %v4003_v42 = vrot.slane %v4002_v35, 2  ;;  %v3991_v5 = vrot.slane %v3990_v0, 2  ;;  %v3418_v6 = vrot.slane %v3417_v28, 4  ;;  %v4019_v25 = vrot.slane %v3601_v10, 4 }
 0x2eb   : > { %10240 = vst [vmem:[#allocation31_spill] sm:$0xff] %v8680_v7  ;;  %v4008_v22 = vadd.f32 %v4007_v43, %v3599_v48  ;;  %v4013_v16 = vrot.slane %v3600_v19, 4  ;;  %v3602_v59 = vmul.f32 %v3252_v45, %v8110_v40  ;;  %v3302_v4 = vmul.f32 %v6767_v1, %v8673_v51 }
 0x2ec   : > { %v4004_v11 = vadd.f32 %v4003_v42, %v4002_v35  ;;  %v3992_v63 = vadd.f32 %v3991_v5, %v3990_v0  ;;  %v3419_v49 = vadd.f32 %v3418_v6, %v3417_v28  ;;  %v4020_v34 = vadd.f32 %v4019_v25, %v3601_v10 }
 0x2ed   : > { %v4009_v9 = vrot.slane %v4008_v22, 2  ;;  %v4014_v3 = vadd.f32 %v4013_v16, %v3600_v19  ;;  %v4025_v21 = vrot.slane %v3602_v59, 4  ;;  %v3424_v20 = vsel %vm1032_vm2, %v3302_v4, 0.0 }
 0x2ee   : > { %v4005_v62 = vrot.slane %v4004_v11, 1  ;;  %v3993_v24 = vrot.slane %v3992_v63, 1  ;;  %v3420_v12 = vrot.slane %v3419_v49, 2  ;;  %v4021_v44 = vrot.slane %v4020_v34, 2 }
 0x2ef   : > { %v4010_v48 = vadd.f32 %v4009_v9, %v4008_v22  ;;  %v4015_v55 = vrot.slane %v4014_v3, 2  ;;  %v4026_v43 = vadd.f32 %v4025_v21, %v3602_v59  ;;  %v3425_v0 = vrot.slane %v3424_v20, 4 }
 0x2f0   : > { %v8689_v40 = vadd.f32 %v4005_v62, %v4004_v11  ;;  %v8691_v45 = vadd.f32 %v3993_v24, %v3992_v63  ;;  %v3421_v35 = vadd.f32 %v3420_v12, %v3419_v49  ;;  %v4022_v42 = vadd.f32 %v4021_v44, %v4020_v34 }
 0x2f1   : > { %v4011_v28 = vrot.slane %v4010_v48, 1  ;;  %v4016_v10 = vadd.f32 %v4015_v55, %v4014_v3  ;;  %v4027_v19 = vrot.slane %v4026_v43, 2  ;;  %v3426_v6 = vadd.f32 %v3425_v0, %v3424_v20 }
 0x2f2   : > { %10241 = vst [vmem:[#allocation32_spill] sm:$0xff] %v8689_v40  ;;  %10242 = vst [vmem:[#allocation35_spill] sm:$0xff] %v8691_v45  ;;  %v3422_v5 = vrot.slane %v3421_v35, 1  ;;  %v3603_v25 = vmul.f32 %v8673_v51, %v8112_v61  ;;  %v3605_v22 = vmul.f32 %v8673_v51, %v8116_v46  ;;  %v4023_v59 = vrot.slane %v4022_v42, 1 }
 0x2f3   : > { %v8697_v16 = vadd.f32 %v4011_v28, %v4010_v48  ;;  %v4017_v11 = vrot.slane %v4016_v10, 1  ;;  %v4028_v63 = vadd.f32 %v4027_v19, %v4026_v43  ;;  %v3427_v49 = vrot.slane %v3426_v6, 2 }
 0x2f4   : > { %v3423_v1 = vadd.f32 %v3422_v5, %v3421_v35  ;;  %v4031_v4 = vrot.slane %v3603_v25, 4  ;;  %v4043_v9 = vrot.slane %v3605_v22, 4  ;;  %v8699_v34 = vadd.f32 %v4023_v59, %v4022_v42 }
 0x2f5   : > { %10243 = vst [vmem:[#allocation36_spill] sm:$0xff] %v8697_v16  ;;  %v8701_v3 = vadd.f32 %v4017_v11, %v4016_v10  ;;  %v4029_v21 = vrot.slane %v4028_v63, 1  ;;  %v3606_v61 = vmul.f32 %v8673_v51, %v8120_v14  ;;  %v3428_v46 = vadd.f32 %v3427_v49, %v3426_v6  ;;  %v5312_v49 = vld [vmem:[%s10011_s4 + $0x88] sm:$0xff] }
 0x2f6   : > { %10244 = vst [vmem:[#allocation126_spill] sm:$0xff] %v8699_v34  ;;  %v5957_v62 = vsel %vm5503_vm9, %v3423_v1, %v5956_v36  ;;  %v4032_v24 = vadd.f32 %v4031_v4, %v3603_v25  ;;  %v4044_v12 = vadd.f32 %v4043_v9, %v3605_v22  ;;  %6690 = vpow2.f32 %v8648_v50  ;;  %v10259_v34 = vld [vmem:[#allocation56_spill] sm:$0xff] }
 0x2f7   : > { %10245 = vst [vmem:[#allocation127_spill] sm:$0xff] %v8701_v3  ;;  %v8706_v20 = vadd.f32 %v4029_v21, %v4028_v63  ;;  %v4049_v48 = vrot.slane %v3606_v61, 4  ;;  %v3604_v44 = vmul.f32 %v8673_v51, %v8179_v58  ;;  %v3429_v55 = vrot.slane %v3428_v46, 1  ;;  %v10307_v3 = vld [vmem:[#allocation124_spill] sm:$0xff] }
 0x2f8   : > { %v4033_v43 = vrot.slane %v4032_v24, 2  ;;  %v4045_v35 = vrot.slane %v4044_v12, 2  ;;  %v3128_v14 = vadd.f32 %v8652_v8, %v3127_v41  ;;  %v2953_v28 = vsub.f32 %v8587_v47, %v8650_v60 }
 0x2f9   : > { %10246 = vst [vmem:[#allocation128_spill] sm:$0xff] %v8706_v20  ;;  %v4050_v0 = vadd.f32 %v4049_v48, %v3606_v61  ;;  %v4037_v36 = vrot.slane %v3604_v44, 4  ;;  %v10247_v42 = vrot.slane %v8623_v23, 2  ;;  %v3430_v10 = vadd.f32 %v3429_v55, %v3428_v46 }
 0x2fa   : > { %v4034_v19 = vadd.f32 %v4033_v43, %v4032_v24  ;;  %v4046_v58 = vadd.f32 %v4045_v35, %v4044_v12  ;;  %v3129_v51 = vrot.slane %v3128_v14, 2  ;;  %v3003_v25 = vmul.f32 1.442695, %v2953_v28 }
 0x2fb   : > { %v2860_v50 = vmax.f32 %v8623_v23, %v10247_v42  ;;  %v4051_v5 = vrot.slane %v4050_v0, 2  ;;  %v4038_v6 = vadd.f32 %v4037_v36, %v3604_v44  ;;  %v5958_v41 = vsel %vm5506_vm10, %v3430_v10, %v5957_v62  ;;  %v5311_v23 = vld [vmem:[%s10011_s4 + $0x80] sm:$0xff] }
 0x2fc   : > { %v4035_v59 = vrot.slane %v4034_v19, 1  ;;  %v4047_v11 = vrot.slane %v4046_v58, 1  ;;  %v3130_v63 = vadd.f32 %v3129_v51, %v3128_v14  ;;  %5978 = vst.msk [vmem:[%s8414_s27 + $0x8] sm:$0xff] %vm1032_vm2, %v5958_v41  ;;  %6692 = vpow2.f32 %v3003_v25  ;;  %v5343_v36 = vld [vmem:[%s10011_s4 + $0x180] sm:$0xff]  ;;  %v5328_v25 = vld [vmem:[%s10011_s4 + $0x108] sm:$0xff]  ;;  %v5314_v41 = vld [vmem:[%s10011_s4 + $0x98] sm:$0xff] }
 0x2fd   : > { %v2861_v22 = vrot.slane %v2860_v50, 1  ;;  %v4052_v47 = vadd.f32 %v4051_v5, %v4050_v0  ;;  %v4039_v60 = vrot.slane %v4038_v6, 2  ;;  %v10250_v61 = vrot.slane %v8626_v54, 2 }
 0x2fe   : > { %v8728_v4 = vadd.f32 %v4035_v59, %v4034_v19  ;;  %v8730_v9 = vadd.f32 %v4047_v11, %v4046_v58  ;;  %v3131_v21 = vrot.slane %v3130_v63, 1  ;;  %v10251_v48 = vrot.slane %v8629_v18, 2  ;;  %v5296_v19 = vld [vmem:[%s10011_s4 + $0x8] sm:$0xff]  ;;  %v5327_v58 = vld [vmem:[%s10011_s4 + $0x100] sm:$0xff]  ;;  %v5313_v59 = vld [vmem:[%s10011_s4 + $0x90] sm:$0xff]  ;;  %v8773_v11 = vpop.xlane.xlu0 %2706 }
 0x2ff   : > { %v2862_v1 = vmax.f32 %v2860_v50, %v2861_v22  ;;  %v2866_v62 = vmax.f32 %v8626_v54, %v10250_v61  ;;  %v4053_v46 = vrot.slane %v4052_v47, 1  ;;  %v4040_v24 = vadd.f32 %v4039_v60, %v4038_v6  ;;  %v5344_v54 = vld [vmem:[%s10011_s4 + $0x188] sm:$0xff]  ;;  %v8765_v22 = vpop.xlane.xlu1 %2701 }
 0x300   : > { %10248 = vst [vmem:[#allocation129_spill] sm:$0xff] %v8728_v4  ;;  %10249 = vst [vmem:[#allocation130_spill] sm:$0xff] %v8730_v9  ;;  %v2872_v44 = vmax.f32 %v8629_v18, %v10251_v48  ;;  %v3132_v55 = vadd.f32 %v3131_v21, %v3130_v63  ;;  %v10252_v35 = vrot.slane %v8619_v56, 4  ;;  %v6423_v0 = vpack.c.bf16 %v5312_v49, %v5311_v23  ;;  %v8751_v18 = vpop.eup %6690  ;;  %v5346_v23 = vld [vmem:[%s10011_s4 + $0x198] sm:$0xff]  ;;  %v5297_v49 = vld [vmem:[%s10011_s4 + $0x10] sm:$0xff] }
 0x301   : > { %v2954_v12 = vsub.f32 %v8578_v17, %v2862_v1  ;;  %v2867_v43 = vrot.slane %v2866_v62, 1  ;;  %v5295_v17 = vld [vmem:[%s10011_s4] sm:$0xff]  ;;  %v8753_v28 = vadd.f32 %v4053_v46, %v4052_v47  ;;  %v4041_v42 = vrot.slane %v4040_v24, 1  ;;  %v5345_v1 = vld [vmem:[%s10011_s4 + $0x190] sm:$0xff]  ;;  %v5330_v48 = vld [vmem:[%s10011_s4 + $0x118] sm:$0xff] }
 0x302   : > { %v2876_v14 = vmax.f32 %v8619_v56, %v10252_v35  ;;  %v2873_v10 = vrot.slane %v2872_v44, 1  ;;  %v3133_v51 = vrot.slane %v8751_v18, 4  ;;  %6694 = vrcp.f32 %v3132_v55  ;;  %6424 = vmatprep.subr.bf16.mxu0 %v6423_v0 }
 0x303   : > { %10253 = vst [vmem:[#allocation131_spill] sm:$0xff] %v8753_v28  ;;  %v3005_v50 = vmul.f32 1.442695, %v2954_v12  ;;  %v2868_v5 = vmax.f32 %v2866_v62, %v2867_v43  ;;  %v8775_v63 = vadd.f32 %v4041_v42, %v4040_v24  ;;  %v6455_v60 = vpack.c.bf16 %v5344_v54, %v5343_v36  ;;  %v5298_v24 = vld [vmem:[%s10011_s4 + $0x18] sm:$0xff]  ;;  %v5329_v12 = vld [vmem:[%s10011_s4 + $0x110] sm:$0xff]  ;;  %v5315_v54 = vld [vmem:[%s10011_s4 + $0xa0] sm:$0xff] }
 0x304   : > { %v2877_v6 = vrot.slane %v2876_v14, 2  ;;  %v2874_v47 = vmax.f32 %v2872_v44, %v2873_v10  ;;  %v3134_v21 = vadd.f32 %v8751_v18, %v3133_v51  ;;  %v6425_v46 = vpack.c.bf16 %v5296_v19, %v5295_v17  ;;  %v5316_v17 = vld [vmem:[%s10011_s4 + $0xa8] sm:$0xff] }
 0x305   : > { %10254 = vst [vmem:[#allocation132_spill] sm:$0xff] %v8775_v63  ;;  %6696 = vpow2.f32 %v3005_v50  ;;  %v2955_v61 = vsub.f32 %v8602_v53, %v2868_v5  ;;  %6456 = vmatprep.subr.bf16.mxu1 %v6455_v60  ;;  %v6457_v55 = vpack.c.bf16 %v5328_v25, %v5327_v58  ;;  %v2881_v53 = vrot.slane %v8765_v22, 4  ;;  %v5347_v58 = vld [vmem:[%s10011_s4 + $0x1a0] sm:$0xff]  ;;  %v5348_v51 = vld [vmem:[%s10011_s4 + $0x1a8] sm:$0xff] }
 0x306   : > { %v2878_v62 = vmax.f32 %v2876_v14, %v2877_v6  ;;  %v2956_v44 = vsub.f32 %v8589_v2, %v2874_v47  ;;  %v6427_v43 = vpack.c.bf16 %v5314_v41, %v5313_v59  ;;  %v3135_v35 = vrot.slane %v3134_v21, 2  ;;  %6426 = vmatpush3.bf16.msra.mxu0 %v6425_v46  ;;  %v8805_v42 = vpop.eup %6692  ;;  %v5299_v59 = vld [vmem:[%s10011_s4 + $0x20] sm:$0xff]  ;;  %v5300_v41 = vld [vmem:[%s10011_s4 + $0x28] sm:$0xff]  ;;  %v8821_v47 = vpop.xlane.xlu0 %2711 }
 0x307   : > { %v3007_v14 = vmul.f32 1.442695, %v2955_v61  ;;  %v6459_v36 = vpack.c.bf16 %v5346_v23, %v5345_v1  ;;  %6458 = vmatpush3.bf16.msra.mxu1 %v6457_v55  ;;  %v2882_v50 = vmax.f32 %v8765_v22, %v2881_v53  ;;  %v6429_v10 = vpack.c.bf16 %v5298_v24, %v5297_v49  ;;  %v5331_v49 = vld [vmem:[%s10011_s4 + $0x120] sm:$0xff] }
 0x308   : > { %v2879_v0 = vrot.slane %v2878_v62, 1  ;;  %v3009_v2 = vmul.f32 1.442695, %v2956_v44  ;;  %6428 = vmatprep.subr.bf16.mxu0 %v6427_v43  ;;  %v6461_v19 = vpack.c.bf16 %v5330_v48, %v5329_v12  ;;  %v3136_v5 = vadd.f32 %v3135_v35, %v3134_v21  ;;  %v5332_v21 = vld [vmem:[%s10011_s4 + $0x128] sm:$0xff] }
 0x309   : > { %v3139_v6 = vrot.slane %v8805_v42, 4  ;;  %6698 = vpow2.f32 %v3007_v14  ;;  %6460 = vmatprep.subr.bf16.mxu1 %v6459_v36  ;;  %v2883_v60 = vrot.slane %v2882_v50, 2  ;;  %v2887_v1 = vrot.slane %v8773_v11, 4 }
 0x30a   : > { %v2880_v25 = vmax.f32 %v2878_v62, %v2879_v0  ;;  %6700 = vpow2.f32 %v3009_v2  ;;  %v6431_v23 = vpack.c.bf16 %v5316_v17, %v5315_v54  ;;  %v3137_v61 = vrot.slane %v3136_v5, 1  ;;  %6430 = vmatpush3.bf16.msra.mxu0 %v6429_v10 }
 0x30b   : > { %v3140_v62 = vadd.f32 %v8805_v42, %v3139_v6  ;;  %v6463_v24 = vpack.c.bf16 %v5348_v51, %v5347_v58  ;;  %v8832_v12 = vmax.f32 %v2882_v50, %v2883_v60  ;;  %6462 = vmatpush3.bf16.msra.mxu1 %v6461_v19  ;;  %v8835_v48 = vmax.f32 %v8773_v11, %v2887_v1  ;;  %v6768_v58 = vld [vmem:[%s7060_s17 + $0x80] sm:$0xff] }
 0x30c   : > { %v2957_v46 = vsub.f32 %v8619_v56, %v2880_v25  ;;  %6432 = vmatprep.subr.bf16.mxu0 %v6431_v23  ;;  %v6433_v44 = vpack.c.bf16 %v5300_v41, %v5299_v59  ;;  %v2893_v55 = vrot.slane %v8821_v47, 4  ;;  %v6695_v53 = vpop.eup %6694  ;;  %v3138_v43 = vadd.f32 %v3137_v61, %v3136_v5 }
 0x30d   : > { %v3141_v35 = vrot.slane %v3140_v62, 2  ;;  %6464 = vmatprep.subr.bf16.mxu1 %v6463_v24  ;;  %v6465_v0 = vpack.c.bf16 %v5332_v21, %v5331_v49  ;;  %v3256_v36 = vmul.f32 %v6695_v53, %v8652_v8 }
 0x30e   : > { %v3011_v14 = vmul.f32 1.442695, %v2957_v46  ;;  %v8844_v2 = vmax.f32 %v8821_v47, %v2893_v55  ;;  %6702 = vrcp.f32 %v3138_v43  ;;  %6434 = vmatpush3.bf16.msra.mxu0 %v6433_v44 }
 0x30f   : > { %v8838_v56 = vpop.eup %6696  ;;  %v3142_v50 = vadd.f32 %v3141_v35, %v3140_v62  ;;  %v3303_v51 = vmul.f32 %v6768_v58, %v3256_v36  ;;  %v3607_v5 = vmul.f32 %v3256_v36, %v8186_v37  ;;  %v3609_v8 = vmul.f32 %v3256_v36, %v8188_v33  ;;  %6466 = vmatpush3.bf16.msra.mxu1 %v6465_v0 }
 0x310   : > { %v3145_v10 = vrot.slane %v8838_v56, 4  ;;  %v3608_v6 = vmul.f32 %v3256_v36, %v8193_v30  ;;  %v3610_v25 = vmul.f32 %v3256_v36, %v8195_v57  ;;  %6704 = vpow2.f32 %v3011_v14 }
 0x311   : > { %v3143_v59 = vrot.slane %v3142_v50, 1  ;;  %v3431_v60 = vsel %vm1032_vm2, %v3303_v51, 0.0  ;;  %v4055_v1 = vrot.slane %v3607_v5, 4  ;;  %v4067_v23 = vrot.slane %v3609_v8, 4 }
 0x312   : > { %v3146_v41 = vadd.f32 %v8838_v56, %v3145_v10  ;;  %v4061_v49 = vrot.slane %v3608_v6, 4  ;;  %v3432_v61 = vrot.slane %v3431_v60, 4  ;;  %v4073_v37 = vrot.slane %v3610_v25, 4 }
 0x313   : > { %v8855_v21 = vpop.eup %6698  ;;  %v3144_v62 = vadd.f32 %v3143_v59, %v3142_v50  ;;  %v4056_v30 = vadd.f32 %v4055_v1, %v3607_v5  ;;  %v4068_v24 = vadd.f32 %v4067_v23, %v3609_v8 }
 0x314   : > { %v3147_v33 = vrot.slane %v3146_v41, 2  ;;  %v8857_v46 = vpop.eup %6700  ;;  %v4062_v57 = vadd.f32 %v4061_v49, %v3608_v6  ;;  %v3151_v44 = vrot.slane %v8855_v21, 4  ;;  %v3433_v55 = vadd.f32 %v3432_v61, %v3431_v60 }
 0x315   : > { %v4074_v53 = vadd.f32 %v4073_v37, %v3610_v25  ;;  %6706 = vrcp.f32 %v3144_v62  ;;  %v4057_v35 = vrot.slane %v4056_v30, 2  ;;  %v4069_v14 = vrot.slane %v4068_v24, 2 }
 0x316   : > { %v3148_v43 = vadd.f32 %v3147_v33, %v3146_v41  ;;  %v4063_v0 = vrot.slane %v4062_v57, 2  ;;  %v3152_v36 = vadd.f32 %v8855_v21, %v3151_v44  ;;  %v3434_v10 = vrot.slane %v3433_v55, 2 }
 0x317   : > { %v4075_v58 = vrot.slane %v4074_v53, 2  ;;  %v3157_v51 = vrot.slane %v8857_v46, 4  ;;  %v4058_v59 = vadd.f32 %v4057_v35, %v4056_v30  ;;  %v4070_v5 = vadd.f32 %v4069_v14, %v4068_v24 }
 0x318   : > { %v3149_v50 = vrot.slane %v3148_v43, 1  ;;  %v4064_v8 = vadd.f32 %v4063_v0, %v4062_v57  ;;  %v3153_v6 = vrot.slane %v3152_v36, 2  ;;  %v6703_v1 = vpop.eup %6702  ;;  %v3435_v23 = vadd.f32 %v3434_v10, %v3433_v55 }
 0x319   : > { %v4076_v25 = vadd.f32 %v4075_v58, %v4074_v53  ;;  %v3158_v41 = vadd.f32 %v8857_v46, %v3157_v51  ;;  %v4059_v49 = vrot.slane %v4058_v59, 1  ;;  %v4071_v61 = vrot.slane %v4070_v5, 1  ;;  %v6769_v53 = vld [vmem:[%s7060_s17 + $0x88] sm:$0xff]  ;;  %v10256_v58 = vld [vmem:[#allocation52_spill] sm:$0xff] }
 0x31a   : > { %v3150_v60 = vadd.f32 %v3149_v50, %v3148_v43  ;;  %v4065_v37 = vrot.slane %v4064_v8, 1  ;;  %v3258_v62 = vmul.f32 %v6703_v1, %v8751_v18  ;;  %v8864_v33 = vpop.eup %6704  ;;  %v3436_v44 = vrot.slane %v3435_v23, 1 }
 0x31b   : > { %v4077_v19 = vrot.slane %v4076_v25, 1  ;;  %v3154_v30 = vadd.f32 %v3153_v6, %v3152_v36  ;;  %v8866_v24 = vadd.f32 %v4059_v49, %v4058_v59  ;;  %v8868_v57 = vadd.f32 %v4071_v61, %v4070_v5  ;;  %v10257_v36 = vld [vmem:[#allocation53_spill] sm:$0xff] }
 0x31c   : > { %6708 = vrcp.f32 %v3150_v60  ;;  %v8870_v55 = vadd.f32 %v4065_v37, %v4064_v8  ;;  %v3304_v43 = vmul.f32 %v6769_v53, %v3258_v62  ;;  %v3437_v35 = vadd.f32 %v3436_v44, %v3435_v23 }
 0x31d   : > { %v8873_v14 = vadd.f32 %v4077_v19, %v4076_v25  ;;  %v3611_v0 = vmul.f32 %v3258_v62, %v8206_v52  ;;  %v3613_v18 = vmul.f32 %v3258_v62, %v8213_v27  ;;  %v3614_v50 = vmul.f32 %v3258_v62, %v10256_v58  ;;  %v10258_v58 = vld [vmem:[#allocation55_spill] sm:$0xff] }
 0x31e   : > { %v3438_v10 = vsel %vm1032_vm2, %v3304_v43, 0.0  ;;  %v3612_v51 = vmul.f32 %v3258_v62, %v10257_v36  ;;  %v3155_v59 = vrot.slane %v3154_v30, 1  ;;  %v3159_v60 = vrot.slane %v3158_v41, 2  ;;  %v6770_v62 = vld [vmem:[%s7060_s17 + $0x90] sm:$0xff] }
 0x31f   : > { %10255 = vst [vmem:[#allocation133_spill] sm:$0xff] %v8873_v14  ;;  %v6707_v5 = vpop.eup %6706  ;;  %v3439_v8 = vrot.slane %v3438_v10, 4  ;;  %v4079_v6 = vrot.slane %v3611_v0, 4  ;;  %v4091_v1 = vrot.slane %v3613_v18, 4  ;;  %v4097_v23 = vrot.slane %v3614_v50, 4 }
 0x320   : > { %v4085_v19 = vrot.slane %v3612_v51, 4  ;;  %v3260_v25 = vmul.f32 %v6707_v5, %v8805_v42  ;;  %v3156_v52 = vadd.f32 %v3155_v59, %v3154_v30  ;;  %v8881_v37 = vadd.f32 %v3159_v60, %v3158_v41 }
 0x321   : > { %v3440_v49 = vadd.f32 %v3439_v8, %v3438_v10  ;;  %v4080_v27 = vadd.f32 %v4079_v6, %v3611_v0  ;;  %v4092_v61 = vadd.f32 %v4091_v1, %v3613_v18  ;;  %v4098_v44 = vadd.f32 %v4097_v23, %v3614_v50 }
 0x322   : > { %v4086_v53 = vadd.f32 %v4085_v19, %v3612_v51  ;;  %v3305_v43 = vmul.f32 %v6770_v62, %v3260_v25  ;;  %v3615_v36 = vmul.f32 %v3260_v25, %v10258_v58  ;;  %v3617_v7 = vmul.f32 %v3260_v25, %v10259_v34 }
 0x323   : > { %v3441_v17 = vrot.slane %v3440_v49, 2  ;;  %v4081_v54 = vrot.slane %v4080_v27, 2  ;;  %v4093_v9 = vrot.slane %v4092_v61, 2  ;;  %v4099_v29 = vrot.slane %v4098_v44, 2 }
 0x324   : > { %v4087_v4 = vrot.slane %v4086_v53, 2  ;;  %v3445_v42 = vsel %vm1032_vm2, %v3305_v43, 0.0  ;;  %v4103_v30 = vrot.slane %v3615_v36, 4  ;;  %v4115_v8 = vrot.slane %v3617_v7, 4 }
 0x325   : > { %v3442_v18 = vadd.f32 %v3441_v17, %v3440_v49  ;;  %v4082_v41 = vadd.f32 %v4081_v54, %v4080_v27  ;;  %v4094_v10 = vadd.f32 %v4093_v9, %v4092_v61  ;;  %v3446_v50 = vrot.slane %v3445_v42, 4  ;;  %v10261_v61 = vld [vmem:[#allocation57_spill] sm:$0xff] }
 0x326   : > { %v6709_v0 = vpop.eup %6708  ;;  %v4100_v51 = vadd.f32 %v4099_v29, %v4098_v44  ;;  %v4088_v59 = vadd.f32 %v4087_v4, %v4086_v53  ;;  %v4104_v5 = vadd.f32 %v4103_v30, %v3615_v36  ;;  %v4116_v58 = vadd.f32 %v4115_v8, %v3617_v7  ;;  %v10262_v53 = vld [vmem:[#allocation58_spill] sm:$0xff] }
 0x327   : > { %v3443_v6 = vrot.slane %v3442_v18, 1  ;;  %v4083_v1 = vrot.slane %v4082_v41, 1  ;;  %v4095_v60 = vrot.slane %v4094_v10, 1  ;;  %v3447_v23 = vadd.f32 %v3446_v50, %v3445_v42 }
 0x328   : > { %v4101_v19 = vrot.slane %v4100_v51, 1  ;;  %v4089_v34 = vrot.slane %v4088_v59, 1  ;;  %v4105_v62 = vrot.slane %v4104_v5, 2  ;;  %v4117_v17 = vrot.slane %v4116_v58, 2 }
 0x329   : > { %v3444_v16 = vadd.f32 %v3443_v6, %v3442_v18  ;;  %v8887_v43 = vadd.f32 %v4083_v1, %v4082_v41  ;;  %v8889_v15 = vadd.f32 %v4095_v60, %v4094_v10  ;;  %v3448_v54 = vrot.slane %v3447_v23, 2  ;;  %v10266_v60 = vld [vmem:[#allocation62_spill] sm:$0xff] }
 0x32a   : > { %v8891_v9 = vadd.f32 %v4101_v19, %v4100_v51  ;;  %v8893_v29 = vadd.f32 %v4089_v34, %v4088_v59  ;;  %v4106_v4 = vadd.f32 %v4105_v62, %v4104_v5  ;;  %v3616_v44 = vmul.f32 %v3260_v25, %v10261_v61  ;;  %v6771_v5 = vld [vmem:[%s7060_s17 + $0x98] sm:$0xff] }
 0x32b   : > { %v5959_v49 = vsel %vm5488_vm4, %v3444_v16, %v3437_v35  ;;  %v3449_v27 = vadd.f32 %v3448_v54, %v3447_v23  ;;  %v3618_v7 = vmul.f32 %v3260_v25, %v10262_v53  ;;  %v4118_v42 = vadd.f32 %v4117_v17, %v4116_v58  ;;  %v10264_v35 = vld [vmem:[#allocation59_spill] sm:$0xff]  ;;  %v10270_v34 = vld [vmem:[#allocation61_spill] sm:$0xff] }
 0x32c   : > { %10260 = vst [vmem:[#allocation52_spill] sm:$0xff] %v8891_v9  ;;  %v4107_v36 = vrot.slane %v4106_v4, 1  ;;  %v3262_v30 = vmul.f32 %v6709_v0, %v8838_v56  ;;  %6710 = vrcp.f32 %v3156_v52  ;;  %v4109_v41 = vrot.slane %v3616_v44, 4  ;;  %v10268_v0 = vld [vmem:[#allocation60_spill] sm:$0xff] }
 0x32d   : > { %v3450_v18 = vrot.slane %v3449_v27, 1  ;;  %v4121_v10 = vrot.slane %v3618_v7, 4  ;;  %v3161_v50 = vrot.slane %v8881_v37, 1  ;;  %v4119_v59 = vrot.slane %v4118_v42, 1 }
 0x32e   : > { %v8900_v51 = vadd.f32 %v4107_v36, %v4106_v4  ;;  %v3306_v16 = vmul.f32 %v6771_v5, %v3262_v30  ;;  %v8904_v8 = vmul.f32 %v3262_v30, %v10264_v35  ;;  %v4110_v25 = vadd.f32 %v4109_v41, %v3616_v44 }
 0x32f   : > { %v3451_v6 = vadd.f32 %v3450_v18, %v3449_v27  ;;  %v4122_v1 = vadd.f32 %v4121_v10, %v3618_v7  ;;  %v3620_v23 = vmul.f32 %v3262_v30, %v10266_v60  ;;  %v8907_v56 = vadd.f32 %v4119_v59, %v4118_v42 }
 0x330   : > { %10263 = vst [vmem:[#allocation53_spill] sm:$0xff] %v8900_v51  ;;  %10265 = vst [vmem:[#allocation55_spill] sm:$0xff] %v8904_v8  ;;  %v3452_v52 = vsel %vm1032_vm2, %v3306_v16, 0.0  ;;  %v8911_v19 = vmul.f32 %v3262_v30, %v10268_v0  ;;  %v8914_v62 = vmul.f32 %v3262_v30, %v10270_v34  ;;  %v4111_v54 = vrot.slane %v4110_v25, 2  ;;  %v8937_v0 = vpop.f32.mrb[132].mxu1 }
 0x331   : > { %10267 = vst [vmem:[#allocation56_spill] sm:$0xff] %v8907_v56  ;;  %v5960_v58 = vsel %vm5491_vm5, %v3451_v6, %v5959_v49  ;;  %v4123_v4 = vrot.slane %v4122_v1, 2  ;;  %v3453_v17 = vrot.slane %v3452_v52, 4  ;;  %v4133_v27 = vrot.slane %v3620_v23, 4 }
 0x332   : > { %10269 = vst [vmem:[#allocation57_spill] sm:$0xff] %v8911_v19  ;;  %10271 = vst [vmem:[#allocation58_spill] sm:$0xff] %v8914_v62  ;;  %v3162_v61 = vadd.f32 %v3161_v50, %v8881_v37  ;;  %v3163_v44 = vrot.slane %v8864_v33, 4  ;;  %v10272_v53 = vrot.slane %v8832_v12, 1  ;;  %v4112_v36 = vadd.f32 %v4111_v54, %v4110_v25 }
 0x333   : > { %v4124_v42 = vadd.f32 %v4123_v4, %v4122_v1  ;;  %v3454_v18 = vadd.f32 %v3453_v17, %v3452_v52  ;;  %v10273_v30 = vrot.slane %v8835_v48, 2  ;;  %v4134_v49 = vadd.f32 %v4133_v27, %v3620_v23  ;;  %v8941_v27 = vpop.f32.mrb[133].mxu1 }
 0x334   : > { %v2886_v7 = vmax.f32 %v8832_v12, %v10272_v53  ;;  %6712 = vrcp.f32 %v3162_v61  ;;  %v3164_v10 = vadd.f32 %v8864_v33, %v3163_v44  ;;  %v4113_v37 = vrot.slane %v4112_v36, 1  ;;  %10277 = vst [vmem:[#allocation61_spill] sm:$0xff] %v8941_v27  ;;  %v6772_v44 = vld [vmem:[%s7060_s17 + $0xa0] sm:$0xff] }
 0x335   : > { %v2890_v41 = vmax.f32 %v8835_v48, %v10273_v30  ;;  %v4125_v50 = vrot.slane %v4124_v42, 1  ;;  %v3455_v5 = vrot.slane %v3454_v18, 2  ;;  %v4135_v6 = vrot.slane %v4134_v49, 2 }
 0x336   : > { %v2958_v59 = vsub.f32 %v8765_v22, %v2886_v7  ;;  %v6711_v35 = vpop.eup %6710  ;;  %v3165_v12 = vrot.slane %v3164_v10, 2  ;;  %v2895_v1 = vrot.slane %v8844_v2, 2  ;;  %v8928_v60 = vadd.f32 %v4113_v37, %v4112_v36  ;;  %v8935_v22 = vpop.f32.mrb[132].mxu0 }
 0x337   : > { %v2891_v16 = vrot.slane %v2890_v41, 1  ;;  %v8930_v48 = vadd.f32 %v4125_v50, %v4124_v42  ;;  %v3456_v23 = vadd.f32 %v3455_v5, %v3454_v18  ;;  %v8933_v52 = vmul.f32 %v6711_v35, %v8855_v21  ;;  %v8939_v17 = vpop.f32.mrb[133].mxu0 }
 0x338   : > { %v3013_v25 = vmul.f32 1.442695, %v2958_v59  ;;  %10274 = vst [vmem:[#allocation59_spill] sm:$0xff] %v8928_v60  ;;  %v4136_v34 = vadd.f32 %v4135_v6, %v4134_v49  ;;  %v3166_v54 = vadd.f32 %v3165_v12, %v3164_v10  ;;  %v2896_v7 = vmax.f32 %v8844_v2, %v2895_v1  ;;  %v10279_v6 = vld [vmem:[#allocation37_spill] sm:$0xff] }
 0x339   : > { %10275 = vst [vmem:[#allocation62_spill] sm:$0xff] %v8930_v48  ;;  %10276 = vst [vmem:[#allocation60_spill] sm:$0xff] %v8933_v52  ;;  %v2892_v4 = vmax.f32 %v2890_v41, %v2891_v16  ;;  %v3457_v61 = vrot.slane %v3456_v23, 1  ;;  %v3307_v53 = vmul.f32 %v6772_v44, %v8933_v52  ;;  %v4654_v21 = vrot.slane %v8539_v38, 2  ;;  %v10280_v12 = vld [vmem:[#allocation41_spill] sm:$0xff]  ;;  %v10295_v48 = vld [vmem:[#allocation40_spill] sm:$0xff] }
 0x33a   : > { %6714 = vpow2.f32 %v3013_v25  ;;  %v4137_v36 = vrot.slane %v4136_v34, 1  ;;  %v3167_v42 = vrot.slane %v3166_v54, 1  ;;  %v4658_v30 = vrot.slane %v8539_v38, 3  ;;  %v10283_v44 = vld [vmem:[#allocation49_spill] sm:$0xff] }
 0x33b   : > { %v2959_v18 = vsub.f32 %v8773_v11, %v2892_v4  ;;  %v3458_v49 = vadd.f32 %v3457_v61, %v3456_v23  ;;  %v3459_v41 = vsel %vm1032_vm2, %v3307_v53, 0.0  ;;  %v2897_v10 = vrot.slane %v2896_v7, 1  ;;  %v10282_v61 = vld [vmem:[#allocation45_spill] sm:$0xff] }
 0x33c   : > { %v8951_v37 = vadd.f32 %v4137_v36, %v4136_v34  ;;  %v3460_v50 = vrot.slane %v3459_v41, 4  ;;  %v3168_v5 = vadd.f32 %v3167_v42, %v3166_v54  ;;  %v4890_v11 = vadd.f32 %v8539_v38, %v10279_v6  ;;  %v10286_v6 = vld [vmem:[#allocation38_spill] sm:$0xff] }
 0x33d   : > { %v3015_v16 = vmul.f32 1.442695, %v2959_v18  ;;  %v5961_v2 = vsel %vm5494_vm6, %v3458_v49, %v5960_v58  ;;  %v2898_v35 = vmax.f32 %v2896_v7, %v2897_v10  ;;  %v10281_v25 = vrot.slane %v8539_v38, 1  ;;  %v10285_v7 = vld [vmem:[#allocation33_spill] sm:$0xff] }
 0x33e   : > { %10278 = vst [vmem:[#allocation134_spill] sm:$0xff] %v8951_v37  ;;  %v6713_v23 = vpop.eup %6712  ;;  %v3461_v4 = vadd.f32 %v3460_v50, %v3459_v41  ;;  %6716 = vrcp.f32 %v3168_v5  ;;  %v8960_v34 = vadd.f32 %v4654_v21, %v10282_v61  ;;  %v8963_v54 = vadd.f32 %v4658_v30, %v10283_v44  ;;  %v6773_v41 = vld [vmem:[%s7060_s17 + $0xa8] sm:$0xff]  ;;  %v5350_v61 = vld [vmem:[%s10011_s4 + $0x1b8] sm:$0xff] }
 0x33f   : > { %v4894_v1 = vadd.f32 %v10281_v25, %v10280_v12  ;;  %v8966_v58 = vmul.f32 %v6713_v23, %v8857_v46  ;;  %6718 = vpow2.f32 %v3015_v16  ;;  %v2960_v53 = vsub.f32 %v8821_v47, %v2898_v35  ;;  %v5317_v47 = vld [vmem:[%s10011_s4 + $0xb0] sm:$0xff]  ;;  %v10287_v12 = vld [vmem:[#allocation42_spill] sm:$0xff]  ;;  %v10296_v37 = vld [vmem:[#allocation43_spill] sm:$0xff] }
 0x340   : > { %v8970_v36 = vadd.f32 %v10285_v7, %v4890_v11  ;;  %v3462_v42 = vrot.slane %v3461_v4, 2  ;;  %v4652_v49 = vrot.slane %v8548_v26, 1  ;;  %v4656_v21 = vrot.slane %v8548_v26, 2  ;;  %v5349_v23 = vld [vmem:[%s10011_s4 + $0x1b0] sm:$0xff]  ;;  %v10290_v35 = vld [vmem:[#allocation34_spill] sm:$0xff] }
 0x341   : > { %10284 = vst [vmem:[#allocation37_spill] sm:$0xff] %v8966_v58  ;;  %v8973_v18 = vadd.f32 %v10285_v7, %v4894_v1  ;;  %v3308_v30 = vmul.f32 %v6773_v41, %v8966_v58  ;;  %v3017_v10 = vmul.f32 1.442695, %v2960_v53  ;;  %v4660_v50 = vrot.slane %v8548_v26, 3  ;;  %v5318_v1 = vld [vmem:[%s10011_s4 + $0xb8] sm:$0xff]  ;;  %v10288_v53 = vld [vmem:[#allocation46_spill] sm:$0xff] }
 0x342   : > { %v3463_v16 = vadd.f32 %v3462_v42, %v3461_v4  ;;  %v4892_v11 = vadd.f32 %v8548_v26, %v10286_v6  ;;  %v4896_v25 = vadd.f32 %v4652_v49, %v10287_v12  ;;  %v9002_v42 = vadd.f32 %v4656_v21, %v10288_v53  ;;  %v10289_v6 = vld [vmem:[#allocation50_spill] sm:$0xff]  ;;  %v9046_v21 = vpop.xlane.xlu0 %2716  ;;  %v6774_v58 = vld [vmem:[%s7060_s17 + $0xb0] sm:$0xff] }
 0x343   : > { %v3466_v4 = vsel %vm1032_vm2, %v3308_v30, 0.0  ;;  %6720 = vpow2.f32 %v3017_v10  ;;  %v9005_v12 = vadd.f32 %v4660_v50, %v10289_v6  ;;  %v6435_v30 = vpack.c.bf16 %v5318_v1, %v5317_v47  ;;  %v10291_v6 = vld [vmem:[#allocation39_spill] sm:$0xff]  ;;  %v5301_v47 = vld [vmem:[%s10011_s4 + $0x30] sm:$0xff] }
 0x344   : > { %v8984_v5 = vpop.eup %6714  ;;  %v3464_v49 = vrot.slane %v3463_v16, 1  ;;  %v3467_v41 = vrot.slane %v3466_v4, 4  ;;  %v9008_v46 = vadd.f32 %v10290_v35, %v4892_v11  ;;  %v9012_v56 = vadd.f32 %v10290_v35, %v4896_v25 }
 0x345   : > { %v3169_v44 = vrot.slane %v8984_v5, 4  ;;  %v6467_v19 = vpack.c.bf16 %v5350_v61, %v5349_v23  ;;  %v4651_v53 = vrot.slane %v8580_v39, 1  ;;  %6436 = vmatprep.subr.bf16.mxu0 %v6435_v30  ;;  %v10292_v23 = vld [vmem:[#allocation44_spill] sm:$0xff]  ;;  %v5334_v30 = vld [vmem:[%s10011_s4 + $0x138] sm:$0xff] }
 0x346   : > { %v3465_v51 = vadd.f32 %v3464_v49, %v3463_v16  ;;  %v3468_v10 = vadd.f32 %v3467_v41, %v3466_v4  ;;  %v5302_v49 = vld [vmem:[%s10011_s4 + $0x38] sm:$0xff]  ;;  %v5333_v41 = vld [vmem:[%s10011_s4 + $0x130] sm:$0xff] }
 0x347   : > { %v3170_v59 = vadd.f32 %v8984_v5, %v3169_v44  ;;  %6468 = vmatprep.subr.bf16.mxu1 %v6467_v19  ;;  %v9020_v44 = vadd.f32 %v8580_v39, %v10291_v6  ;;  %v9027_v61 = vadd.f32 %v4651_v53, %v10292_v23  ;;  %v10293_v19 = vld [vmem:[#allocation24_spill] sm:$0xff] }
 0x348   : > { %v6717_v16 = vpop.eup %6716  ;;  %v5962_v25 = vsel %vm5497_vm7, %v3465_v51, %v5961_v2  ;;  %v3469_v1 = vrot.slane %v3468_v10, 2  ;;  %v4653_v4 = vrot.slane %v10293_v19, 1  ;;  %v9051_v62 = vadd.f32 %v10293_v19, %v10295_v48 }
 0x349   : > { %v3171_v8 = vrot.slane %v3170_v59, 2  ;;  %v9039_v51 = vpop.eup %6718  ;;  %v9042_v2 = vmul.f32 %v6717_v16, %v8864_v33  ;;  %v6469_v16 = vpack.c.bf16 %v5334_v30, %v5333_v41  ;;  %v10298_v30 = vld [vmem:[#allocation107_spill] sm:$0xff] }
 0x34a   : > { %v3470_v11 = vadd.f32 %v3469_v1, %v3468_v10  ;;  %v3175_v50 = vrot.slane %v9039_v51, 4  ;;  %v9054_v60 = vadd.f32 %v4653_v4, %v10296_v37  ;;  %v2899_v10 = vrot.slane %v9046_v21, 4  ;;  %v10297_v1 = vld [vmem:[#allocation122_spill] sm:$0xff] }
 0x34b   : > { %10294 = vst [vmem:[#allocation41_spill] sm:$0xff] %v9042_v2  ;;  %v3172_v53 = vadd.f32 %v3171_v8, %v3170_v59  ;;  %v3309_v33 = vmul.f32 %v6774_v58, %v9042_v2  ;;  %v6437_v59 = vpack.c.bf16 %v5302_v49, %v5301_v47  ;;  %v4678_v52 = vrot.slane %v10297_v1, 1  ;;  %6470 = vmatpush3.bf16.msra.mxu1 %v6469_v16  ;;  %v5320_v16 = vld [vmem:[%s10011_s4 + $0xc8] sm:$0xff] }
 0x34c   : > { %v3471_v6 = vrot.slane %v3470_v11, 1  ;;  %v3176_v23 = vadd.f32 %v9039_v51, %v3175_v50  ;;  %v2900_v41 = vmax.f32 %v9046_v21, %v2899_v10  ;;  %v9070_v2 = vadd.f32 %v10297_v1, %v10298_v30  ;;  %v5352_v10 = vld [vmem:[%s10011_s4 + $0x1c8] sm:$0xff] }
 0x34d   : > { %v3173_v8 = vrot.slane %v3172_v53, 1  ;;  %v9061_v32 = vpop.eup %6720  ;;  %v3473_v48 = vsel %vm1032_vm2, %v3309_v33, 0.0  ;;  %6438 = vmatpush3.bf16.msra.mxu0 %v6437_v59  ;;  %v10300_v33 = vld [vmem:[#allocation116_spill] sm:$0xff] }
 0x34e   : > { %v3472_v47 = vadd.f32 %v3471_v6, %v3470_v11  ;;  %v3474_v4 = vrot.slane %v3473_v48, 4  ;;  %v3177_v49 = vrot.slane %v3176_v23, 2  ;;  %v3181_v50 = vrot.slane %v9061_v32, 4  ;;  %10299 = vst [vmem:[#allocation45_spill] sm:$0xff] %v9070_v2 }
 0x34f   : > { %v3174_v28 = vadd.f32 %v3173_v8, %v3172_v53  ;;  %v9073_v53 = vadd.f32 %v4678_v52, %v10300_v33  ;;  %v5319_v8 = vld [vmem:[%s10011_s4 + $0xc0] sm:$0xff]  ;;  %v2901_v30 = vrot.slane %v2900_v41, 2  ;;  %v10302_v33 = vld [vmem:[#allocation123_spill] sm:$0xff] }
 0x350   : > { %v9079_v11 = vsel %vm5500_vm8, %v3472_v47, %v5962_v25  ;;  %v3475_v6 = vadd.f32 %v3474_v4, %v3473_v48  ;;  %v3178_v59 = vadd.f32 %v3177_v49, %v3176_v23  ;;  %v5351_v52 = vld [vmem:[%s10011_s4 + $0x1c0] sm:$0xff]  ;;  %v4680_v25 = vrot.slane %v10302_v33, 1 }
 0x351   : > { %6722 = vrcp.f32 %v3174_v28  ;;  %10301 = vst [vmem:[#allocation49_spill] sm:$0xff] %v9073_v53  ;;  %v3182_v28 = vadd.f32 %v9061_v32, %v3181_v50  ;;  %v10303_v50 = vld [vmem:[#allocation108_spill] sm:$0xff]  ;;  %v2902_v37 = vmax.f32 %v2900_v41, %v2901_v30  ;;  %v10305_v53 = vld [vmem:[#allocation118_spill] sm:$0xff]  ;;  %v6439_v1 = vpack.c.bf16 %v5320_v16, %v5319_v8  ;;  %v10310_v16 = vld [vmem:[#allocation19_spill] sm:$0xff] }
 0x352   : > { %v3476_v47 = vrot.slane %v3475_v6, 2  ;;  %v3179_v4 = vrot.slane %v3178_v59, 1  ;;  %v9096_v58 = vadd.f32 %v10302_v33, %v10303_v50  ;;  %v9099_v2 = vadd.f32 %v4680_v25, %v10305_v53  ;;  %v5303_v23 = vld [vmem:[%s10011_s4 + $0x40] sm:$0xff]  ;;  %v10308_v53 = vld [vmem:[#allocation111_spill] sm:$0xff]  ;;  %v5321_v30 = vld [vmem:[%s10011_s4 + $0xd0] sm:$0xff] }
 0x353   : > { %v3183_v49 = vrot.slane %v3182_v28, 2  ;;  %v6471_v20 = vpack.c.bf16 %v5352_v10, %v5351_v52  ;;  %v4679_v48 = vrot.slane %v10307_v3, 1  ;;  %v2903_v45 = vrot.slane %v2902_v37, 1  ;;  %6440 = vmatprep.subr.bf16.mxu0 %v6439_v1  ;;  %v9123_v10 = vpop.xlane.xlu1 %2721  ;;  %v5322_v25 = vld [vmem:[%s10011_s4 + $0xd8] sm:$0xff]  ;;  %v5305_v41 = vld [vmem:[%s10011_s4 + $0x50] sm:$0xff] }
 0x354   : > { %10304 = vst [vmem:[#allocation33_spill] sm:$0xff] %v9096_v58  ;;  %10306 = vst [vmem:[#allocation38_spill] sm:$0xff] %v9099_v2  ;;  %v3477_v40 = vadd.f32 %v3476_v47, %v3475_v6  ;;  %v3180_v31 = vadd.f32 %v3179_v4, %v3178_v59  ;;  %v9109_v8 = vadd.f32 %v10307_v3, %v10308_v53  ;;  %v5304_v6 = vld [vmem:[%s10011_s4 + $0x48] sm:$0xff]  ;;  %v5335_v59 = vld [vmem:[%s10011_s4 + $0x140] sm:$0xff] }
 0x355   : > { %v3184_v63 = vadd.f32 %v3183_v49, %v3182_v28  ;;  %6472 = vmatprep.subr.bf16.mxu1 %v6471_v20  ;;  %v5336_v20 = vld [vmem:[%s10011_s4 + $0x148] sm:$0xff]  ;;  %v9121_v52 = vadd.f32 %v4679_v48, %v10310_v16  ;;  %v5353_v47 = vld [vmem:[%s10011_s4 + $0x1d0] sm:$0xff]  ;;  %v2904_v4 = vmax.f32 %v2902_v37, %v2903_v45  ;;  %v5354_v16 = vld [vmem:[%s10011_s4 + $0x1d8] sm:$0xff]  ;;  %v6441_v48 = vpack.c.bf16 %v5304_v6, %v5303_v23  ;;  %v9164_v6 = vpop.xlane.xlu0 %2726 }
 0x356   : > { %10309 = vst [vmem:[#allocation42_spill] sm:$0xff] %v9109_v8  ;;  %v3478_v1 = vrot.slane %v3477_v40, 1  ;;  %6724 = vrcp.f32 %v3180_v31  ;;  %v10312_v31 = vld [vmem:[#allocation125_spill] sm:$0xff]  ;;  %v10313_v37 = vld [vmem:[#allocation112_spill] sm:$0xff]  ;;  %v2905_v23 = vrot.slane %v9123_v10, 4 }
 0x357   : > { %v3185_v28 = vrot.slane %v3184_v63, 1  ;;  %10311 = vst [vmem:[#allocation46_spill] sm:$0xff] %v9121_v52  ;;  %v4681_v49 = vrot.slane %v10312_v31, 1  ;;  %v5306_v50 = vld [vmem:[%s10011_s4 + $0x58] sm:$0xff]  ;;  %v9148_v58 = vadd.f32 %v10312_v31, %v10313_v37  ;;  %v5337_v53 = vld [vmem:[%s10011_s4 + $0x150] sm:$0xff]  ;;  %v5323_v52 = vld [vmem:[%s10011_s4 + $0xe0] sm:$0xff]  ;;  %6442 = vmatpush3.bf16.msra.mxu0 %v6441_v48 }
 0x358   : > { %v3479_v2 = vadd.f32 %v3478_v1, %v3477_v40  ;;  %v5338_v33 = vld [vmem:[%s10011_s4 + $0x158] sm:$0xff]  ;;  %v2961_v40 = vsub.f32 %v9046_v21, %v2904_v4  ;;  %v5324_v37 = vld [vmem:[%s10011_s4 + $0xe8] sm:$0xff]  ;;  %v5325_v48 = vld [vmem:[%s10011_s4 + $0xf0] sm:$0xff] }
 0x359   : > { %v3186_v45 = vadd.f32 %v3185_v28, %v3184_v63  ;;  %10314 = vst [vmem:[#allocation50_spill] sm:$0xff] %v9148_v58  ;;  %v10315_v63 = vld [vmem:[#allocation18_spill] sm:$0xff]  ;;  %v6473_v28 = vpack.c.bf16 %v5336_v20, %v5335_v59  ;;  %v5356_v21 = vld [vmem:[%s10011_s4 + $0x1e8] sm:$0xff]  ;;  %v6443_v20 = vpack.c.bf16 %v5322_v25, %v5321_v30  ;;  %v9195_v25 = vpop.xlane.xlu1 %2731  ;;  %v5309_v31 = vld [vmem:[%s10011_s4 + $0x70] sm:$0xff] }
 0x35a   : > { %v9161_v1 = vadd.f32 %v4681_v49, %v10315_v63  ;;  %v5355_v58 = vld [vmem:[%s10011_s4 + $0x1e0] sm:$0xff]  ;;  %v9177_v4 = vsel %vm5503_vm9, %v3479_v2, %v9079_v11  ;;  %v5308_v63 = vld [vmem:[%s10011_s4 + $0x68] sm:$0xff]  ;;  %v3019_v11 = vmul.f32 1.442695, %v2961_v40  ;;  %v6775_v40 = vld [vmem:[%s7060_s17 + $0xb8] sm:$0xff] }
 0x35b   : > { %v6723_v8 = vpop.eup %6722  ;;  %6726 = vrcp.f32 %v3186_v45  ;;  %v5307_v49 = vld [vmem:[%s10011_s4 + $0x60] sm:$0xff]  ;;  %6474 = vmatpush3.bf16.msra.mxu1 %v6473_v28  ;;  %v6445_v45 = vpack.c.bf16 %v5306_v50, %v5305_v41  ;;  %v5340_v30 = vld [vmem:[%s10011_s4 + $0x168] sm:$0xff]  ;;  %6444 = vmatprep.subr.bf16.mxu0 %v6443_v20  ;;  %v2911_v50 = vrot.slane %v9164_v6, 4  ;;  %v6447_v41 = vpack.c.bf16 %v5324_v37, %v5323_v52  ;;  %v5310_v52 = vld [vmem:[%s10011_s4 + $0x78] sm:$0xff] }
 0x35c   : > { %10316 = vst [vmem:[#allocation34_spill] sm:$0xff] %v9161_v1  ;;  %v9180_v59 = vmul.f32 %v6723_v8, %v8984_v5  ;;  %v5339_v2 = vld [vmem:[%s10011_s4 + $0x160] sm:$0xff]  ;;  %v2906_v5 = vmax.f32 %v9123_v10, %v2905_v23  ;;  %v6475_v8 = vpack.c.bf16 %v5354_v16, %v5353_v47  ;;  %v5326_v1 = vld [vmem:[%s10011_s4 + $0xf8] sm:$0xff]  ;;  %v6477_v47 = vpack.c.bf16 %v5338_v33, %v5337_v53  ;;  %v5357_v16 = vld [vmem:[%s10011_s4 + $0x1f0] sm:$0xff] }
 0x35d   : > { %v5358_v23 = vld [vmem:[%s10011_s4 + $0x1f8] sm:$0xff]  ;;  %6728 = vpow2.f32 %v3019_v11  ;;  %v6479_v20 = vpack.c.bf16 %v5356_v21, %v5355_v58  ;;  %v6449_v33 = vpack.c.bf16 %v5308_v63, %v5307_v49  ;;  %v5341_v53 = vld [vmem:[%s10011_s4 + $0x170] sm:$0xff]  ;;  %6446 = vmatpush3.bf16.msra.mxu0 %v6445_v45  ;;  %v2912_v11 = vmax.f32 %v9164_v6, %v2911_v50 }
 0x35e   : > { %10317 = vst [vmem:[#allocation39_spill] sm:$0xff] %v9180_v59  ;;  %v3310_v28 = vmul.f32 %v6775_v40, %v9180_v59  ;;  %v2907_v13 = vrot.slane %v2906_v5, 2  ;;  %6476 = vmatprep.subr.bf16.mxu1 %v6475_v8  ;;  %v5342_v37 = vld [vmem:[%s10011_s4 + $0x178] sm:$0xff]  ;;  %v6481_v8 = vpack.c.bf16 %v5340_v30, %v5339_v2  ;;  %v2917_v58 = vrot.slane %v9195_v25, 4  ;;  %6448 = vmatprep.subr.bf16.mxu0 %v6447_v41  ;;  %v6776_v41 = vld [vmem:[%s7060_s17 + $0xc0] sm:$0xff] }
 0x35f   : > { %6478 = vmatpush3.bf16.msra.mxu1 %v6477_v47  ;;  %v6451_v63 = vpack.c.bf16 %v5326_v1, %v5325_v48  ;;  %v6483_v59 = vpack.c.bf16 %v5358_v23, %v5357_v16  ;;  %v2913_v3 = vrot.slane %v2912_v11, 2  ;;  %v6453_v27 = vpack.c.bf16 %v5310_v52, %v5309_v31 }
 0x360   : > { %v3480_v40 = vsel %vm1032_vm2, %v3310_v28, 0.0  ;;  %v2908_v49 = vmax.f32 %v2906_v5, %v2907_v13  ;;  %v6725_v9 = vpop.eup %6724  ;;  %6480 = vmatprep.subr.bf16.mxu1 %v6479_v20  ;;  %v2918_v14 = vmax.f32 %v9195_v25, %v2917_v58  ;;  %v6485_v28 = vpack.c.bf16 %v5342_v37, %v5341_v53  ;;  %v10320_v53 = vld [vmem:[#allocation51_spill] sm:$0xff] }
 0x361   : > { %v3481_v21 = vrot.slane %v3480_v40, 4  ;;  %v9229_v50 = vmul.f32 %v6725_v9, %v9039_v51  ;;  %v4665_v30 = vrot.slane %v10293_v19, 4  ;;  %v2914_v13 = vmax.f32 %v2912_v11, %v2913_v3  ;;  %6450 = vmatpush3.bf16.msra.mxu0 %v6449_v33  ;;  %v10318_v3 = vld [vmem:[#allocation48_spill] sm:$0xff] }
 0x362   : > { %v2909_v2 = vrot.slane %v2908_v49, 1  ;;  %v2919_v5 = vrot.slane %v2918_v14, 2  ;;  %v4669_v1 = vrot.slane %v10293_v19, 5  ;;  %v4673_v48 = vrot.slane %v10293_v19, 6  ;;  %6452 = vmatprep.subr.bf16.mxu0 %v6451_v63 }
 0x363   : > { %v3482_v45 = vadd.f32 %v3481_v21, %v3480_v40  ;;  %v3311_v16 = vmul.f32 %v6776_v41, %v9229_v50  ;;  %6482 = vmatpush3.bf16.msra.mxu1 %v6481_v8  ;;  %v4677_v9 = vrot.slane %v10293_v19, 7  ;;  %v2915_v23 = vrot.slane %v2914_v13, 1 }
 0x364   : > { %v2910_v31 = vmax.f32 %v2908_v49, %v2909_v2  ;;  %v2920_v20 = vmax.f32 %v2918_v14, %v2919_v5  ;;  %6484 = vmatprep.subr.bf16.mxu1 %v6483_v59  ;;  %v10319_v33 = vrot.slane %v10293_v19, 2  ;;  %v10321_v37 = vrot.slane %v10293_v19, 3  ;;  %v10322_v59 = vld [vmem:[#allocation73_spill] sm:$0xff] }
 0x365   : > { %v3483_v47 = vrot.slane %v3482_v45, 2  ;;  %v6727_v51 = vpop.eup %6726  ;;  %v3487_v58 = vsel %vm1032_vm2, %v3311_v16, 0.0  ;;  %v2916_v63 = vmax.f32 %v2914_v13, %v2915_v23  ;;  %6454 = vmatpush3.bf16.msra.mxu0 %v6453_v27  ;;  %v4909_v2 = vadd.f32 %v4665_v30, %v10322_v59  ;;  %v9256_v27 = vpop.f32.mrb[134].mxu0 }
 0x366   : > { %v4901_v52 = vadd.f32 %v10319_v33, %v10318_v3  ;;  %v4905_v40 = vadd.f32 %v10321_v37, %v10320_v53  ;;  %v9245_v8 = vmul.f32 %v6727_v51, %v9061_v32  ;;  %v2962_v21 = vsub.f32 %v9123_v10, %v2910_v31  ;;  %v6777_v3 = vld [vmem:[%s7060_s17 + $0xc8] sm:$0xff]  ;;  %10324 = vst [vmem:[#allocation44_spill] sm:$0xff] %v9256_v27  ;;  %v9258_v30 = vpop.f32.mrb[134].mxu1  ;;  %v10326_v33 = vld [vmem:[#allocation93_spill] sm:$0xff] }
 0x367   : > { %v3484_v11 = vadd.f32 %v3483_v47, %v3482_v45  ;;  %v3488_v49 = vrot.slane %v3487_v58, 4  ;;  %v2921_v14 = vrot.slane %v2920_v20, 1  ;;  %v9249_v5 = vpop.eup %6728  ;;  %6486 = vmatpush3.bf16.msra.mxu1 %v6485_v28  ;;  %v10323_v47 = vld [vmem:[#allocation87_spill] sm:$0xff]  ;;  %v2963_v10 = vsub.f32 %v9164_v6, %v2916_v63  ;;  %10325 = vst [vmem:[#allocation24_spill] sm:$0xff] %v9258_v30 }
 0x368   : > { %v3312_v19 = vmul.f32 %v6777_v3, %v9245_v8  ;;  %v3021_v45 = vmul.f32 1.442695, %v2962_v21  ;;  %v4913_v16 = vadd.f32 %v4669_v1, %v10323_v47  ;;  %v3187_v51 = vrot.slane %v9249_v5, 4  ;;  %v10327_v21 = vld [vmem:[#allocation102_spill] sm:$0xff]  ;;  %v10328_v63 = vld [vmem:[#allocation3_spill] sm:$0xff] }
 0x369   : > { %v3485_v41 = vrot.slane %v3484_v11, 1  ;;  %v3489_v32 = vadd.f32 %v3488_v49, %v3487_v58  ;;  %v2922_v13 = vmax.f32 %v2920_v20, %v2921_v14  ;;  %v4917_v53 = vadd.f32 %v4673_v48, %v10326_v33 }
 0x36a   : > { %v3494_v23 = vsel %vm1032_vm2, %v3312_v19, 0.0  ;;  %6730 = vpow2.f32 %v3021_v45  ;;  %v3188_v1 = vadd.f32 %v9249_v5, %v3187_v51  ;;  %v3023_v58 = vmul.f32 1.442695, %v2963_v10 }
 0x36b   : > { %v3486_v31 = vadd.f32 %v3485_v41, %v3484_v11  ;;  %v3490_v28 = vrot.slane %v3489_v32, 2  ;;  %v3495_v37 = vrot.slane %v3494_v23, 4  ;;  %v2964_v20 = vsub.f32 %v9195_v25, %v2922_v13  ;;  %v9270_v11 = vld [vmem:[%s10010_s3 + $0xc2] ss:$8 sm:$0xf] }
 0x36c   : > { %v4921_v49 = vadd.f32 %v4677_v9, %v10327_v21  ;;  %v9274_v48 = vrot.slane %v9270_v11, %v10328_v63  ;;  %v3189_v41 = vrot.slane %v3188_v1, 2  ;;  %6732 = vpow2.f32 %v3023_v58 }
 0x36d   : > { %v5965_v6 = vsel %vm5506_vm10, %v3486_v31, %v9177_v4  ;;  %v3491_v14 = vadd.f32 %v3490_v28, %v3489_v32  ;;  %v3496_v59 = vadd.f32 %v3495_v37, %v3494_v23  ;;  %v9278_v4 = vpop.f32.mrb[135].mxu0  ;;  %v3025_v25 = vmul.f32 1.442695, %v2964_v20 }
 0x36e   : > { %5979 = vst.msk [vmem:[%s8414_s27 + $0x10] sm:$0xff] %vm1032_vm2, %v5965_v6  ;;  %10329 = vst [vmem:[#allocation40_spill] sm:$0xff] %v9278_v4  ;;  %v5042_v9 = vadd.f32 %v9274_v48, %v9051_v62  ;;  %v5046_v3 = vadd.f32 %v9274_v48, %v9054_v60  ;;  %v5050_v19 = vadd.f32 %v9274_v48, %v4901_v52  ;;  %v10337_v4 = vld [vmem:[#allocation92_spill] sm:$0xff] }
 0x36f   : > { %v3492_v45 = vrot.slane %v3491_v14, 1  ;;  %v3497_v47 = vrot.slane %v3496_v59, 2  ;;  %v3190_v51 = vadd.f32 %v3189_v41, %v3188_v1  ;;  %v5054_v10 = vadd.f32 %v9274_v48, %v4905_v40 }
 0x370   : > { %6734 = vpow2.f32 %v3025_v25  ;;  %v5058_v32 = vadd.f32 %v9274_v48, %v4909_v2  ;;  %v5062_v13 = vadd.f32 %v9274_v48, %v4913_v16  ;;  %v5066_v31 = vadd.f32 %v9274_v48, %v4917_v53  ;;  %v9295_v25 = vpop.f32.mrb[135].mxu1 }
 0x371   : > { %v3493_v23 = vadd.f32 %v3492_v45, %v3491_v14  ;;  %v3498_v33 = vadd.f32 %v3497_v47, %v3496_v59  ;;  %v3191_v62 = vrot.slane %v3190_v51, 1  ;;  %v5070_v28 = vadd.f32 %v9274_v48, %v4921_v49  ;;  %v9293_v49 = vpop.xlane.xlu0 %2736  ;;  %10330 = vst [vmem:[#allocation43_spill] sm:$0xff] %v9295_v25 }
 0x372   : > { %v5170_v60 = vmax.f32 %v5042_v9, 0.0  ;;  %v5174_v37 = vmax.f32 %v5046_v3, 0.0  ;;  %v5178_v52 = vmax.f32 %v5050_v19, 0.0  ;;  %v5182_v58 = vmax.f32 %v5054_v10, 0.0 }
 0x373   : > { %v3499_v6 = vrot.slane %v3498_v33, 1  ;;  %v3192_v1 = vadd.f32 %v3191_v62, %v3190_v51  ;;  %v5186_v20 = vmax.f32 %v5058_v32, 0.0  ;;  %v5190_v40 = vmax.f32 %v5062_v13, 0.0 }
 0x374   : > { %v9290_v21 = vpop.eup %6730  ;;  %v5194_v2 = vmax.f32 %v5066_v31, 0.0  ;;  %v5198_v63 = vmax.f32 %v5070_v28, 0.0  ;;  %v5536_v16 = vrot.slane %v5174_v37, 7  ;;  %v5538_v41 = vrot.slane %v5178_v52, 6 }
 0x375   : > { %v3500_v53 = vadd.f32 %v3499_v6, %v3498_v33  ;;  %6736 = vrcp.f32 %v3192_v1  ;;  %v3193_v14 = vrot.slane %v9290_v21, 4  ;;  %v5540_v59 = vrot.slane %v5182_v58, 5 }
 0x376   : > { %v5537_v9 = vsel %vm5488_vm4, %v5536_v16, %v5170_v60  ;;  %v5542_v3 = vrot.slane %v5186_v20, 4  ;;  %v5544_v19 = vrot.slane %v5190_v40, 3  ;;  %v5546_v45 = vrot.slane %v5194_v2, 2  ;;  %v9298_v47 = vpop.eup %6732 }
 0x377   : > { %v9301_v51 = vsel %vm5488_vm4, %v3500_v53, %v3493_v23  ;;  %v3194_v10 = vadd.f32 %v9290_v21, %v3193_v14  ;;  %v5539_v32 = vsel %vm5491_vm5, %v5538_v41, %v5537_v9  ;;  %v5548_v13 = vrot.slane %v5198_v63, 1  ;;  %v10331_v41 = vld [vmem:[#allocation47_spill] sm:$0xff] }
 0x378   : > { %v3199_v31 = vrot.slane %v9298_v47, 4  ;;  %v5541_v33 = vsel %vm5494_vm6, %v5540_v59, %v5539_v32  ;;  %v2923_v62 = vrot.slane %v9293_v49, 4  ;;  %v4663_v28 = vrot.slane %v8580_v39, 4  ;;  %v10333_v32 = vld [vmem:[#allocation54_spill] sm:$0xff] }
 0x379   : > { %v3195_v60 = vrot.slane %v3194_v10, 2  ;;  %v5543_v37 = vsel %vm5497_vm7, %v5542_v3, %v5541_v33  ;;  %v4667_v52 = vrot.slane %v8580_v39, 5  ;;  %v4671_v23 = vrot.slane %v8580_v39, 6 }
 0x37a   : > { %v9312_v58 = vpop.eup %6734  ;;  %v3200_v6 = vadd.f32 %v9298_v47, %v3199_v31  ;;  %v5545_v1 = vsel %vm5500_vm8, %v5544_v19, %v5543_v37  ;;  %v2924_v20 = vmax.f32 %v9293_v49, %v2923_v62  ;;  %v4675_v40 = vrot.slane %v8580_v39, 7  ;;  %v10336_v37 = vld [vmem:[#allocation88_spill] sm:$0xff] }
 0x37b   : > { %v3196_v2 = vadd.f32 %v3195_v60, %v3194_v10  ;;  %v3205_v63 = vrot.slane %v9312_v58, 4  ;;  %v5547_v16 = vsel %vm5503_vm9, %v5546_v45, %v5545_v1  ;;  %v10332_v53 = vrot.slane %v8580_v39, 2  ;;  %v10335_v10 = vld [vmem:[#allocation72_spill] sm:$0xff] }
 0x37c   : > { %v3201_v59 = vrot.slane %v3200_v6, 2  ;;  %v5549_v9 = vsel %vm5506_vm10, %v5548_v13, %v5547_v16  ;;  %v2925_v3 = vrot.slane %v2924_v20, 2  ;;  %v10334_v19 = vrot.slane %v8580_v39, 3  ;;  %v10339_v39 = vld [vmem:[#allocation2_spill] sm:$0xff] }
 0x37d   : > { %v4899_v14 = vadd.f32 %v10332_v53, %v10331_v41  ;;  %v3197_v33 = vrot.slane %v3196_v2, 1  ;;  %v3206_v62 = vadd.f32 %v9312_v58, %v3205_v63  ;;  %5883 = vmatprep.mubr.f32.mxu1 %v5549_v9  ;;  %v4907_v60 = vadd.f32 %v4663_v28, %v10335_v10  ;;  %v10338_v53 = vld [vmem:[#allocation103_spill] sm:$0xff] }
 0x37e   : > { %v4903_v31 = vadd.f32 %v10334_v19, %v10333_v32  ;;  %v4911_v45 = vadd.f32 %v4667_v52, %v10336_v37  ;;  %v3202_v1 = vadd.f32 %v3201_v59, %v3200_v6  ;;  %v2926_v25 = vmax.f32 %v2924_v20, %v2925_v3 }
 0x37f   : > { %v4915_v41 = vadd.f32 %v4671_v23, %v10337_v4  ;;  %v4919_v13 = vadd.f32 %v4675_v40, %v10338_v53  ;;  %v6737_v16 = vpop.eup %6736  ;;  %v3198_v30 = vadd.f32 %v3197_v33, %v3196_v2  ;;  %v3207_v27 = vrot.slane %v3206_v62, 2  ;;  %v6779_v2 = vld [vmem:[%s7060_s17 + $0xd0] sm:$0xff] }
 0x380   : > { %v9334_v32 = vrot.slane %v9270_v11, %v10339_v39  ;;  %v4666_v63 = vrot.slane %v8539_v38, 5  ;;  %v9338_v28 = vmul.f32 %v6737_v16, %v9249_v5  ;;  %v3203_v52 = vrot.slane %v3202_v1, 1 }
 0x381   : > { %v2927_v6 = vrot.slane %v2926_v25, 1  ;;  %v4670_v20 = vrot.slane %v8539_v38, 6  ;;  %6738 = vrcp.f32 %v3198_v30  ;;  %v3208_v4 = vadd.f32 %v3207_v27, %v3206_v62 }
 0x382   : > { %v5040_v23 = vadd.f32 %v9334_v32, %v9020_v44  ;;  %v5044_v40 = vadd.f32 %v9334_v32, %v9027_v61  ;;  %v3313_v11 = vmul.f32 %v6779_v2, %v9338_v28  ;;  %v3204_v59 = vadd.f32 %v3203_v52, %v3202_v1 }
 0x383   : > { %v2928_v9 = vmax.f32 %v2926_v25, %v2927_v6  ;;  %v5048_v5 = vadd.f32 %v9334_v32, %v4899_v14  ;;  %v3209_v3 = vrot.slane %v3208_v4, 1  ;;  %v5052_v19 = vadd.f32 %v9334_v32, %v4903_v31 }
 0x384   : > { %v5056_v33 = vadd.f32 %v9334_v32, %v4907_v60  ;;  %v5060_v27 = vadd.f32 %v9334_v32, %v4911_v45  ;;  %v3501_v30 = vsel %vm1032_vm2, %v3313_v11, 0.0  ;;  %6740 = vrcp.f32 %v3204_v59 }
 0x385   : > { %v2965_v44 = vsub.f32 %v9293_v49, %v2928_v9  ;;  %v5064_v61 = vadd.f32 %v9334_v32, %v4915_v41  ;;  %v3502_v62 = vrot.slane %v3501_v30, 4  ;;  %v3210_v10 = vadd.f32 %v3209_v3, %v3208_v4 }
 0x386   : > { %v5068_v25 = vadd.f32 %v9334_v32, %v4919_v13  ;;  %v5168_v37 = vmax.f32 %v5040_v23, 0.0  ;;  %v5172_v1 = vmax.f32 %v5044_v40, 0.0  ;;  %v5176_v53 = vmax.f32 %v5048_v5, 0.0 }
 0x387   : > { %v3027_v14 = vmul.f32 1.442695, %v2965_v44  ;;  %v5180_v31 = vmax.f32 %v5052_v19, 0.0  ;;  %v3503_v16 = vadd.f32 %v3502_v62, %v3501_v30  ;;  %6742 = vrcp.f32 %v3210_v10  ;;  %v10340_v19 = vld [vmem:[#allocation70_spill] sm:$0xff] }
 0x388   : > { %v5184_v60 = vmax.f32 %v5056_v33, 0.0  ;;  %v5188_v45 = vmax.f32 %v5060_v27, 0.0  ;;  %v5192_v39 = vmax.f32 %v5064_v61, 0.0  ;;  %v5196_v52 = vmax.f32 %v5068_v25, 0.0  ;;  %v10342_v61 = vld [vmem:[#allocation74_spill] sm:$0xff] }
 0x389   : > { %6744 = vpow2.f32 %v3027_v14  ;;  %v5508_v6 = vrot.slane %v5172_v1, 7  ;;  %v3504_v49 = vrot.slane %v3503_v16, 2  ;;  %v5510_v2 = vrot.slane %v5176_v53, 6  ;;  %v10343_v10 = vld [vmem:[#allocation6_spill] sm:$0xff]  ;;  %v10344_v1 = vld [vmem:[#allocation100_spill] sm:$0xff] }
 0x38a   : > { %v5512_v41 = vrot.slane %v5180_v31, 5  ;;  %v5514_v11 = vrot.slane %v5184_v60, 4  ;;  %v5516_v13 = vrot.slane %v5188_v45, 3  ;;  %v5518_v23 = vrot.slane %v5192_v39, 2 }
 0x38b   : > { %v5509_v4 = vsel %vm5488_vm4, %v5508_v6, %v5168_v37  ;;  %v5520_v40 = vrot.slane %v5196_v52, 1  ;;  %v6739_v59 = vpop.eup %6738  ;;  %v3505_v9 = vadd.f32 %v3504_v49, %v3503_v16  ;;  %v4674_v3 = vrot.slane %v8539_v38, 7 }
 0x38c   : > { %v5511_v5 = vsel %vm5491_vm5, %v5510_v2, %v5509_v4  ;;  %v10341_v33 = vrot.slane %v8539_v38, 4  ;;  %v9362_v30 = vmul.f32 %v6739_v59, %v9290_v21  ;;  %v4910_v62 = vadd.f32 %v4666_v63, %v10342_v61  ;;  %v6780_v38 = vld [vmem:[%s7060_s17 + $0xd8] sm:$0xff]  ;;  %v6782_v61 = vld [vmem:[%s7060_s17 + $0xe8] sm:$0xff] }
 0x38d   : > { %v5513_v44 = vsel %vm5494_vm6, %v5512_v41, %v5511_v5  ;;  %v4914_v25 = vadd.f32 %v4670_v20, %v10343_v10  ;;  %v3506_v37 = vrot.slane %v3505_v9, 1  ;;  %v4918_v53 = vadd.f32 %v4674_v3, %v10344_v1 }
 0x38e   : > { %v4906_v27 = vadd.f32 %v10341_v33, %v10340_v19  ;;  %v5515_v14 = vsel %vm5497_vm7, %v5514_v11, %v5513_v44  ;;  %v5047_v31 = vadd.f32 %v10285_v7, %v8960_v34  ;;  %v6741_v16 = vpop.eup %6740  ;;  %v3314_v21 = vmul.f32 %v6780_v38, %v9362_v30 }
 0x38f   : > { %v5517_v60 = vsel %vm5500_vm8, %v5516_v13, %v5515_v14  ;;  %v5051_v63 = vadd.f32 %v10285_v7, %v8963_v54  ;;  %v3507_v45 = vadd.f32 %v3506_v37, %v3505_v9  ;;  %v9378_v39 = vmul.f32 %v6741_v16, %v9298_v47  ;;  %v6781_v47 = vld [vmem:[%s7060_s17 + $0xe0] sm:$0xff] }
 0x390   : > { %v5055_v20 = vadd.f32 %v10285_v7, %v4906_v27  ;;  %v5519_v52 = vsel %vm5503_vm9, %v5518_v23, %v5517_v60  ;;  %v5059_v34 = vadd.f32 %v10285_v7, %v4910_v62  ;;  %v3508_v6 = vsel %vm1032_vm2, %v3314_v21, 0.0 }
 0x391   : > { %v5521_v49 = vsel %vm5506_vm10, %v5520_v40, %v5519_v52  ;;  %v5063_v2 = vadd.f32 %v10285_v7, %v4914_v25  ;;  %v5067_v41 = vadd.f32 %v10285_v7, %v4918_v53  ;;  %v6743_v11 = vpop.eup %6742  ;;  %v5967_v54 = vsel %vm5491_vm5, %v3507_v45, %v9301_v51 }
 0x392   : > { %v3509_v4 = vrot.slane %v3508_v6, 4  ;;  %v3315_v13 = vmul.f32 %v6781_v47, %v9378_v39  ;;  %5798 = vmatprep.mubr.f32.mxu0 %v5521_v49  ;;  %v5171_v23 = vmax.f32 %v8973_v18, 0.0  ;;  %v9394_v40 = vmul.f32 %v6743_v11, %v9312_v58 }
 0x393   : > { %v9391_v59 = vpop.eup %6744  ;;  %v5175_v9 = vmax.f32 %v5047_v31, 0.0  ;;  %v5179_v5 = vmax.f32 %v5051_v63, 0.0  ;;  %v5183_v3 = vmax.f32 %v5055_v20, 0.0  ;;  %v5187_v27 = vmax.f32 %v5059_v34, 0.0 }
 0x394   : > { %v3510_v19 = vadd.f32 %v3509_v4, %v3508_v6  ;;  %v3515_v33 = vsel %vm1032_vm2, %v3315_v13, 0.0  ;;  %v3211_v51 = vrot.slane %v9391_v59, 4  ;;  %v3316_v62 = vmul.f32 %v6782_v61, %v9394_v40 }
 0x395   : > { %v3516_v44 = vrot.slane %v3515_v33, 4  ;;  %v5191_v10 = vmax.f32 %v5063_v2, 0.0  ;;  %v5195_v18 = vmax.f32 %v5067_v41, 0.0  ;;  %v5487_v58 = vrot.slane %v5171_v23, 7 }
 0x396   : > { %v3511_v25 = vrot.slane %v3510_v19, 2  ;;  %v3212_v37 = vadd.f32 %v9391_v59, %v3211_v51  ;;  %v5490_v14 = vrot.slane %v5175_v9, 6  ;;  %v3522_v53 = vsel %vm1032_vm2, %v3316_v62, 0.0 }
 0x397   : > { %v3517_v1 = vadd.f32 %v3516_v44, %v3515_v33  ;;  %v5493_v31 = vrot.slane %v5179_v5, 5  ;;  %v5496_v16 = vrot.slane %v5183_v3, 4  ;;  %v3523_v21 = vrot.slane %v3522_v53, 4 }
 0x398   : > { %v3512_v38 = vadd.f32 %v3511_v25, %v3510_v19  ;;  %v3213_v60 = vrot.slane %v3212_v37, 2  ;;  %v10345_v63 = vmax.f32 %v8970_v36, 0.0  ;;  %v5499_v34 = vrot.slane %v5187_v27, 3  ;;  %v10346_v25 = vld [vmem:[#allocation71_spill] sm:$0xff] }
 0x399   : > { %v3518_v45 = vrot.slane %v3517_v1, 2  ;;  %v5502_v6 = vrot.slane %v5191_v10, 2  ;;  %v3524_v2 = vadd.f32 %v3523_v21, %v3522_v53  ;;  %v5505_v13 = vrot.slane %v5195_v18, 1  ;;  %v10349_v53 = vld [vmem:[#allocation7_spill] sm:$0xff] }
 0x39a   : > { %v5489_v20 = vsel %vm5488_vm4, %v5487_v58, %v10345_v63  ;;  %v3513_v49 = vrot.slane %v3512_v38, 1  ;;  %v3214_v41 = vadd.f32 %v3213_v60, %v3212_v37  ;;  %v4668_v23 = vrot.slane %v8548_v26, 5 }
 0x39b   : > { %v5492_v52 = vsel %vm5491_vm5, %v5490_v14, %v5489_v20  ;;  %v3519_v4 = vadd.f32 %v3518_v45, %v3517_v1  ;;  %v3525_v36 = vrot.slane %v3524_v2, 2  ;;  %v4672_v51 = vrot.slane %v8548_v26, 6  ;;  %v10348_v14 = vld [vmem:[#allocation78_spill] sm:$0xff] }
 0x39c   : > { %v5495_v11 = vsel %vm5494_vm6, %v5493_v31, %v5492_v52  ;;  %v3514_v9 = vadd.f32 %v3513_v49, %v3512_v38  ;;  %v3215_v5 = vrot.slane %v3214_v41, 1  ;;  %v4676_v27 = vrot.slane %v8548_v26, 7  ;;  %v10350_v38 = vld [vmem:[#allocation101_spill] sm:$0xff] }
 0x39d   : > { %v5498_v47 = vsel %vm5497_vm7, %v5496_v16, %v5495_v11  ;;  %v3520_v19 = vrot.slane %v3519_v4, 1  ;;  %v3526_v61 = vadd.f32 %v3525_v36, %v3524_v2  ;;  %v10347_v37 = vrot.slane %v8548_v26, 4  ;;  %v9431_v11 = vpop.xlane.xlu1 %2741 }
 0x39e   : > { %v5501_v3 = vsel %vm5500_vm8, %v5499_v34, %v5498_v47  ;;  %v5968_v44 = vsel %vm5494_vm6, %v3514_v9, %v5967_v54  ;;  %v3216_v62 = vadd.f32 %v3215_v5, %v3214_v41  ;;  %v4912_v1 = vadd.f32 %v4668_v23, %v10348_v14 }
 0x39f   : > { %v5504_v33 = vsel %vm5503_vm9, %v5502_v6, %v5501_v3  ;;  %v3521_v18 = vadd.f32 %v3520_v19, %v3519_v4  ;;  %v4908_v58 = vadd.f32 %v10347_v37, %v10346_v25  ;;  %v4916_v31 = vadd.f32 %v4672_v51, %v10349_v53 }
 0x3a0   : > { %v5507_v10 = vsel %vm5506_vm10, %v5505_v13, %v5504_v33  ;;  %v3527_v16 = vrot.slane %v3526_v61, 1  ;;  %6746 = vrcp.f32 %v3216_v62  ;;  %v4920_v21 = vadd.f32 %v4676_v27, %v10350_v38 }
 0x3a1   : > { %5799 = vmatmul.mubr.f32.vlgmr.msra.gmra.mrb[136].mxu0 %v5507_v10  ;;  %v5049_v54 = vadd.f32 %v10290_v35, %v9002_v42  ;;  %v5969_v60 = vsel %vm5497_vm7, %v3521_v18, %v5968_v44  ;;  %v5053_v63 = vadd.f32 %v10290_v35, %v9005_v12  ;;  %v5057_v20 = vadd.f32 %v10290_v35, %v4908_v58 }
 0x3a2   : > { %v5061_v26 = vadd.f32 %v10290_v35, %v4912_v1  ;;  %v3528_v45 = vadd.f32 %v3527_v16, %v3526_v61  ;;  %v5065_v52 = vadd.f32 %v10290_v35, %v4916_v31  ;;  %v5069_v34 = vadd.f32 %v10290_v35, %v4920_v21 }
 0x3a3   : > { %v5173_v6 = vmax.f32 %v9012_v56, 0.0  ;;  %v5177_v49 = vmax.f32 %v5049_v54, 0.0  ;;  %v5181_v2 = vmax.f32 %v5053_v63, 0.0  ;;  %v5185_v41 = vmax.f32 %v5057_v20, 0.0 }
 0x3a4   : > { %v5189_v42 = vmax.f32 %v5061_v26, 0.0  ;;  %v9434_v4 = vsel %vm5500_vm8, %v3528_v45, %v5969_v60  ;;  %v5193_v12 = vmax.f32 %v5065_v52, 0.0  ;;  %v5197_v47 = vmax.f32 %v5069_v34, 0.0  ;;  %v10352_v52 = vld [vmem:[#allocation61_spill] sm:$0xff] }
 0x3a5   : > { %v5522_v13 = vrot.slane %v5173_v6, 7  ;;  %v5524_v23 = vrot.slane %v5177_v49, 6  ;;  %v5526_v9 = vrot.slane %v5181_v2, 5  ;;  %v5528_v36 = vrot.slane %v5185_v41, 4  ;;  %v10353_v41 = vld [vmem:[#allocation133_spill] sm:$0xff] }
 0x3a6   : > { %v5530_v5 = vrot.slane %v5189_v42, 3  ;;  %v10351_v3 = vmax.f32 %v9008_v46, 0.0  ;;  %v5532_v19 = vrot.slane %v5193_v12, 2  ;;  %v5534_v33 = vrot.slane %v5197_v47, 1 }
 0x3a7   : > { %v2929_v51 = vrot.slane %v9431_v11, 4  ;;  %v4706_v44 = vrot.slane %v8935_v22, 1  ;;  %v9448_v46 = vadd.f32 %v8935_v22, %v8866_v24  ;;  %v4708_v25 = vrot.slane %v8937_v0, 1 }
 0x3a8   : > { %v5523_v56 = vsel %vm5488_vm4, %v5522_v13, %v10351_v3  ;;  %v9460_v24 = vadd.f32 %v8937_v0, %v8868_v57  ;;  %v4707_v54 = vrot.slane %v8939_v17, 1  ;;  %v9475_v57 = vadd.f32 %v8939_v17, %v8870_v55  ;;  %v10354_v55 = vld [vmem:[#allocation124_spill] sm:$0xff] }
 0x3a9   : > { %v5525_v27 = vsel %vm5491_vm5, %v5524_v23, %v5523_v56  ;;  %v2930_v18 = vmax.f32 %v9431_v11, %v2929_v51  ;;  %v9453_v58 = vadd.f32 %v4706_v44, %v8887_v43  ;;  %v9463_v38 = vadd.f32 %v4708_v25, %v8889_v15  ;;  %v6783_v15 = vld [vmem:[%s7060_s17 + $0xf0] sm:$0xff]  ;;  %v10356_v56 = vld [vmem:[#allocation22_spill] sm:$0xff]  ;;  %v10358_v51 = vld [vmem:[#allocation121_spill] sm:$0xff] }
 0x3aa   : > { %v5527_v10 = vsel %vm5494_vm6, %v5526_v9, %v5525_v27  ;;  %v6747_v53 = vpop.eup %6746  ;;  %v4709_v34 = vrot.slane %v10352_v52, 1  ;;  %v9487_v42 = vadd.f32 %v10352_v52, %v10353_v41  ;;  %v4691_v12 = vrot.slane %v10354_v55, 4  ;;  %v10355_v13 = vld [vmem:[#allocation52_spill] sm:$0xff]  ;;  %v10361_v25 = vld [vmem:[#allocation35_spill] sm:$0xff] }
 0x3ab   : > { %v5529_v37 = vsel %vm5497_vm7, %v5528_v36, %v5527_v10  ;;  %v2931_v16 = vrot.slane %v2930_v18, 2  ;;  %v9466_v21 = vmul.f32 %v6747_v53, %v9391_v59  ;;  %v9480_v59 = vadd.f32 %v4707_v54, %v8893_v29  ;;  %v10360_v10 = vld [vmem:[#allocation28_spill] sm:$0xff]  ;;  %v10362_v53 = vld [vmem:[#allocation127_spill] sm:$0xff] }
 0x3ac   : > { %v5531_v31 = vsel %vm5500_vm8, %v5530_v5, %v5529_v37  ;;  %v9492_v23 = vadd.f32 %v4709_v34, %v10355_v13  ;;  %v4695_v29 = vrot.slane %v10354_v55, 5  ;;  %v4699_v9 = vrot.slane %v10354_v55, 6  ;;  %v10363_v54 = vld [vmem:[#allocation132_spill] sm:$0xff] }
 0x3ad   : > { %v5533_v43 = vsel %vm5503_vm9, %v5532_v19, %v5531_v31  ;;  %v2932_v20 = vmax.f32 %v2930_v18, %v2931_v16  ;;  %v3317_v45 = vmul.f32 %v6783_v15, %v9466_v21  ;;  %v4703_v3 = vrot.slane %v10354_v55, 7 }
 0x3ae   : > { %v5535_v63 = vsel %vm5506_vm10, %v5534_v33, %v5533_v43  ;;  %v10357_v19 = vrot.slane %v10354_v55, 2  ;;  %v10359_v27 = vrot.slane %v10354_v55, 3  ;;  %v4939_v18 = vadd.f32 %v4691_v12, %v10360_v10 }
 0x3af   : > { %5884 = vmatmul.mubr.f32.vlgmr.msra.gmra.mrb[136].mxu1 %v5535_v63  ;;  %v2933_v49 = vrot.slane %v2932_v20, 1  ;;  %v3529_v47 = vsel %vm1032_vm2, %v3317_v45, 0.0  ;;  %v4943_v37 = vadd.f32 %v4695_v29, %v10361_v25  ;;  %v4947_v31 = vadd.f32 %v4699_v9, %v10362_v53  ;;  %v10365_v45 = vld [vmem:[#allocation46_spill] sm:$0xff] }
 0x3b0   : > { %v3530_v36 = vrot.slane %v3529_v47, 4  ;;  %v4931_v33 = vadd.f32 %v10357_v19, %v10356_v56  ;;  %v4935_v44 = vadd.f32 %v10359_v27, %v10358_v51  ;;  %v4951_v63 = vadd.f32 %v4703_v3, %v10363_v54 }
 0x3b1   : > { %v2934_v5 = vmax.f32 %v2932_v20, %v2933_v49  ;;  %v10364_v20 = vld [vmem:[#allocation42_spill] sm:$0xff]  ;;  %v5076_v34 = vadd.f32 %v9334_v32, %v10365_v45  ;;  %v5088_v55 = vadd.f32 %v9334_v32, %v4939_v18 }
 0x3b2   : > { %v3531_v16 = vadd.f32 %v3530_v36, %v3529_v47  ;;  %v5072_v15 = vadd.f32 %v9334_v32, %v10364_v20  ;;  %v5080_v49 = vadd.f32 %v9334_v32, %v4931_v33  ;;  %v5084_v41 = vadd.f32 %v9334_v32, %v4935_v44 }
 0x3b3   : > { %v2966_v43 = vsub.f32 %v9431_v11, %v2934_v5  ;;  %v5092_v47 = vadd.f32 %v9334_v32, %v4943_v37  ;;  %v5096_v11 = vadd.f32 %v9334_v32, %v4947_v31  ;;  %v5100_v29 = vadd.f32 %v9334_v32, %v4951_v63 }
 0x3b4   : > { %v3532_v12 = vrot.slane %v3531_v16, 2  ;;  %v5200_v9 = vmax.f32 %v5072_v15, 0.0  ;;  %v5204_v36 = vmax.f32 %v5076_v34, 0.0  ;;  %v5208_v5 = vmax.f32 %v5080_v49, 0.0 }
 0x3b5   : > { %v3029_v13 = vmul.f32 1.442695, %v2966_v43  ;;  %v5212_v56 = vmax.f32 %v5084_v41, 0.0  ;;  %v5216_v19 = vmax.f32 %v5088_v55, 0.0  ;;  %v5220_v33 = vmax.f32 %v5092_v47, 0.0  ;;  %v10367_v55 = vld [vmem:[#allocation23_spill] sm:$0xff] }
 0x3b6   : > { %v3533_v3 = vadd.f32 %v3532_v12, %v3531_v16  ;;  %v5224_v51 = vmax.f32 %v5096_v11, 0.0  ;;  %v5228_v27 = vmax.f32 %v5100_v29, 0.0  ;;  %v5564_v44 = vrot.slane %v5204_v36, 7  ;;  %v10366_v16 = vld [vmem:[#allocation125_spill] sm:$0xff]  ;;  %v10369_v29 = vld [vmem:[#allocation120_spill] sm:$0xff] }
 0x3b7   : > { %6748 = vpow2.f32 %v3029_v13  ;;  %v5566_v18 = vrot.slane %v5208_v5, 6  ;;  %v5568_v25 = vrot.slane %v5212_v56, 5  ;;  %v5570_v53 = vrot.slane %v5216_v19, 4  ;;  %v10371_v5 = vld [vmem:[#allocation29_spill] sm:$0xff]  ;;  %v10372_v19 = vld [vmem:[#allocation32_spill] sm:$0xff] }
 0x3b8   : > { %v3534_v10 = vrot.slane %v3533_v3, 1  ;;  %v5565_v37 = vsel %vm5488_vm4, %v5564_v44, %v5200_v9  ;;  %v5572_v31 = vrot.slane %v5220_v33, 3  ;;  %v5574_v43 = vrot.slane %v5224_v51, 2  ;;  %v10373_v51 = vld [vmem:[#allocation128_spill] sm:$0xff]  ;;  %v10374_v44 = vld [vmem:[#allocation131_spill] sm:$0xff] }
 0x3b9   : > { %v5576_v54 = vrot.slane %v5228_v27, 1  ;;  %v5567_v20 = vsel %vm5491_vm5, %v5566_v18, %v5565_v37  ;;  %v4693_v15 = vrot.slane %v10366_v16, 4  ;;  %v4697_v45 = vrot.slane %v10366_v16, 5 }
 0x3ba   : > { %v3535_v63 = vadd.f32 %v3534_v10, %v3533_v3  ;;  %v5569_v34 = vsel %vm5494_vm6, %v5568_v25, %v5567_v20  ;;  %v4701_v49 = vrot.slane %v10366_v16, 6  ;;  %v4705_v41 = vrot.slane %v10366_v16, 7 }
 0x3bb   : > { %v10368_v12 = vrot.slane %v10366_v16, 2  ;;  %v5571_v11 = vsel %vm5497_vm7, %v5570_v53, %v5569_v34  ;;  %v10370_v9 = vrot.slane %v10366_v16, 3  ;;  %v4941_v3 = vadd.f32 %v4693_v15, %v10371_v5  ;;  %v10376_v53 = vld [vmem:[#allocation34_spill] sm:$0xff] }
 0x3bc   : > { %v9530_v47 = vsel %vm5503_vm9, %v3535_v63, %v9434_v4  ;;  %v5573_v56 = vsel %vm5500_vm8, %v5572_v31, %v5571_v11  ;;  %v4945_v33 = vadd.f32 %v4697_v45, %v10372_v19  ;;  %v4949_v27 = vadd.f32 %v4701_v49, %v10373_v51  ;;  %v10375_v4 = vld [vmem:[#allocation50_spill] sm:$0xff] }
 0x3bd   : > { %v4933_v13 = vadd.f32 %v10368_v12, %v10367_v55  ;;  %v4937_v36 = vadd.f32 %v10370_v9, %v10369_v29  ;;  %v4953_v10 = vadd.f32 %v4705_v41, %v10374_v44  ;;  %v5575_v18 = vsel %vm5503_vm9, %v5574_v43, %v5573_v56 }
 0x3be   : > { %v5074_v25 = vadd.f32 %v9274_v48, %v10375_v4  ;;  %v5078_v37 = vadd.f32 %v9274_v48, %v10376_v53  ;;  %v5577_v20 = vsel %vm5506_vm10, %v5576_v54, %v5575_v18  ;;  %v5090_v16 = vadd.f32 %v9274_v48, %v4941_v3  ;;  %v10377_v4 = vld [vmem:[#allocation122_spill] sm:$0xff] }
 0x3bf   : > { %v5082_v63 = vadd.f32 %v9274_v48, %v4933_v13  ;;  %v5086_v31 = vadd.f32 %v9274_v48, %v4937_v36  ;;  %v5094_v15 = vadd.f32 %v9274_v48, %v4945_v33  ;;  %5803 = vmatprep.mubr.f32.mxu0 %v5577_v20  ;;  %v5098_v43 = vadd.f32 %v9274_v48, %v4949_v27 }
 0x3c0   : > { %v5102_v34 = vadd.f32 %v9274_v48, %v4953_v10  ;;  %v5202_v49 = vmax.f32 %v5074_v25, 0.0  ;;  %v5206_v41 = vmax.f32 %v5078_v37, 0.0  ;;  %v5218_v54 = vmax.f32 %v5090_v16, 0.0 }
 0x3c1   : > { %v9551_v45 = vpop.eup %6748  ;;  %v5210_v12 = vmax.f32 %v5082_v63, 0.0  ;;  %v5214_v13 = vmax.f32 %v5086_v31, 0.0  ;;  %v5222_v11 = vmax.f32 %v5094_v15, 0.0  ;;  %v5226_v29 = vmax.f32 %v5098_v43, 0.0  ;;  %v10378_v31 = vld [vmem:[#allocation20_spill] sm:$0xff] }
 0x3c2   : > { %v3217_v55 = vrot.slane %v9551_v45, 4  ;;  %v5230_v9 = vmax.f32 %v5102_v34, 0.0  ;;  %v5592_v36 = vrot.slane %v5206_v41, 7  ;;  %v5598_v19 = vrot.slane %v5218_v54, 4 }
 0x3c3   : > { %v5594_v3 = vrot.slane %v5210_v12, 6  ;;  %v5596_v56 = vrot.slane %v5214_v13, 5  ;;  %v5600_v51 = vrot.slane %v5222_v11, 3  ;;  %v5602_v27 = vrot.slane %v5226_v29, 2  ;;  %v10382_v12 = vld [vmem:[#allocation26_spill] sm:$0xff] }
 0x3c4   : > { %v3218_v5 = vadd.f32 %v9551_v45, %v3217_v55  ;;  %v5593_v33 = vsel %vm5488_vm4, %v5592_v36, %v5202_v49  ;;  %v5604_v44 = vrot.slane %v5230_v9, 1  ;;  %v4690_v25 = vrot.slane %v10377_v4, 4  ;;  %v10380_v49 = vld [vmem:[#allocation25_spill] sm:$0xff]  ;;  %v10383_v11 = vld [vmem:[#allocation30_spill] sm:$0xff]  ;;  %v10384_v9 = vld [vmem:[#allocation36_spill] sm:$0xff] }
 0x3c5   : > { %v5595_v18 = vsel %vm5491_vm5, %v5594_v3, %v5593_v33  ;;  %v4694_v53 = vrot.slane %v10377_v4, 5  ;;  %v4698_v63 = vrot.slane %v10377_v4, 6  ;;  %v4702_v20 = vrot.slane %v10377_v4, 7  ;;  %v10385_v3 = vld [vmem:[#allocation129_spill] sm:$0xff] }
 0x3c6   : > { %v3219_v10 = vrot.slane %v3218_v5, 2  ;;  %v5597_v37 = vsel %vm5494_vm6, %v5596_v56, %v5595_v18  ;;  %v10379_v16 = vrot.slane %v10377_v4, 2  ;;  %v10381_v41 = vrot.slane %v10377_v4, 3 }
 0x3c7   : > { %v5599_v34 = vsel %vm5497_vm7, %v5598_v19, %v5597_v37  ;;  %v4938_v13 = vadd.f32 %v4690_v25, %v10382_v12  ;;  %v4942_v29 = vadd.f32 %v4694_v53, %v10383_v11  ;;  %v4946_v36 = vadd.f32 %v4698_v63, %v10384_v9 }
 0x3c8   : > { %v4930_v15 = vadd.f32 %v10379_v16, %v10378_v31  ;;  %v3220_v43 = vadd.f32 %v3219_v10, %v3218_v5  ;;  %v4934_v55 = vadd.f32 %v10381_v41, %v10380_v49  ;;  %v5601_v54 = vsel %vm5500_vm8, %v5600_v51, %v5599_v34  ;;  %v10386_v5 = vld [vmem:[#allocation45_spill] sm:$0xff] }
 0x3c9   : > { %v4950_v56 = vadd.f32 %v4702_v20, %v10385_v3  ;;  %v5603_v18 = vsel %vm5503_vm9, %v5602_v27, %v5601_v54  ;;  %v5071_v19 = vadd.f32 %v10285_v7, %v10386_v5  ;;  %v10387_v10 = vld [vmem:[#allocation49_spill] sm:$0xff]  ;;  %v5087_v53 = vadd.f32 %v10285_v7, %v4938_v13 }
 0x3ca   : > { %v3221_v33 = vrot.slane %v3220_v43, 1  ;;  %v5075_v4 = vadd.f32 %v10285_v7, %v10387_v10  ;;  %v5605_v37 = vsel %vm5506_vm10, %v5604_v44, %v5603_v18  ;;  %v5079_v25 = vadd.f32 %v10285_v7, %v4930_v15 }
 0x3cb   : > { %v5083_v51 = vadd.f32 %v10285_v7, %v4934_v55  ;;  %5888 = vmatprep.mubr.f32.mxu1 %v5605_v37  ;;  %v5091_v20 = vadd.f32 %v10285_v7, %v4942_v29  ;;  %v5095_v27 = vadd.f32 %v10285_v7, %v4946_v36  ;;  %v5099_v31 = vadd.f32 %v10285_v7, %v4950_v56  ;;  %v10388_v29 = vld [vmem:[#allocation123_spill] sm:$0xff] }
 0x3cc   : > { %v3222_v63 = vadd.f32 %v3221_v33, %v3220_v43  ;;  %v5199_v16 = vmax.f32 %v5071_v19, 0.0  ;;  %v5203_v34 = vmax.f32 %v5075_v4, 0.0  ;;  %v5207_v49 = vmax.f32 %v5079_v25, 0.0  ;;  %v10389_v4 = vld [vmem:[#allocation21_spill] sm:$0xff] }
 0x3cd   : > { %v5211_v41 = vmax.f32 %v5083_v51, 0.0  ;;  %v5215_v44 = vmax.f32 %v5087_v53, 0.0  ;;  %v5219_v12 = vmax.f32 %v5091_v20, 0.0  ;;  %v5223_v15 = vmax.f32 %v5095_v27, 0.0  ;;  %v10391_v51 = vld [vmem:[#allocation119_spill] sm:$0xff] }
 0x3ce   : > { %6750 = vrcp.f32 %v3222_v63  ;;  %v5227_v54 = vmax.f32 %v5099_v31, 0.0  ;;  %v5550_v55 = vrot.slane %v5203_v34, 7  ;;  %v5552_v11 = vrot.slane %v5207_v49, 6  ;;  %v10393_v27 = vld [vmem:[#allocation27_spill] sm:$0xff]  ;;  %v10395_v49 = vld [vmem:[#allocation126_spill] sm:$0xff] }
 0x3cf   : > { %v5554_v13 = vrot.slane %v5211_v41, 5  ;;  %v5556_v43 = vrot.slane %v5215_v44, 4  ;;  %v5558_v9 = vrot.slane %v5219_v12, 3  ;;  %v5560_v3 = vrot.slane %v5223_v15, 2  ;;  %v10396_v12 = vld [vmem:[#allocation130_spill] sm:$0xff] }
 0x3d0   : > { %v4692_v33 = vrot.slane %v10388_v29, 4  ;;  %v5551_v36 = vsel %vm5488_vm4, %v5550_v55, %v5199_v16  ;;  %v5562_v56 = vrot.slane %v5227_v54, 1  ;;  %v4696_v18 = vrot.slane %v10388_v29, 5  ;;  %v10394_v16 = vld [vmem:[#allocation31_spill] sm:$0xff]  ;;  %v10397_v54 = vld [vmem:[#allocation33_spill] sm:$0xff] }
 0x3d1   : > { %v4700_v5 = vrot.slane %v10388_v29, 6  ;;  %v5553_v19 = vsel %vm5491_vm5, %v5552_v11, %v5551_v36  ;;  %v4704_v10 = vrot.slane %v10388_v29, 7  ;;  %v10390_v37 = vrot.slane %v10388_v29, 2  ;;  %v10398_v11 = vld [vmem:[#allocation38_spill] sm:$0xff] }
 0x3d2   : > { %v10392_v53 = vrot.slane %v10388_v29, 3  ;;  %v5555_v20 = vsel %vm5494_vm6, %v5554_v13, %v5553_v19  ;;  %v4940_v31 = vadd.f32 %v4692_v33, %v10393_v27  ;;  %v4944_v34 = vadd.f32 %v4696_v18, %v10394_v16 }
 0x3d3   : > { %v4932_v25 = vadd.f32 %v10390_v37, %v10389_v4  ;;  %v4948_v41 = vadd.f32 %v4700_v5, %v10395_v49  ;;  %v5557_v44 = vsel %vm5497_vm7, %v5556_v43, %v5555_v20  ;;  %v4952_v15 = vadd.f32 %v4704_v10, %v10396_v12  ;;  %v6784_v12 = vld [vmem:[%s7060_s17 + $0xf8] sm:$0xff] }
 0x3d4   : > { %v4936_v63 = vadd.f32 %v10392_v53, %v10391_v51  ;;  %v5073_v55 = vadd.f32 %v10290_v35, %v10397_v54  ;;  %v5077_v36 = vadd.f32 %v10290_v35, %v10398_v11  ;;  %v5559_v29 = vsel %vm5500_vm8, %v5558_v9, %v5557_v44  ;;  %v10399_v11 = vld [vmem:[#allocation83_spill] sm:$0xff] }
 0x3d5   : > { %v5081_v13 = vadd.f32 %v10290_v35, %v4932_v25  ;;  %v5089_v18 = vadd.f32 %v10290_v35, %v4940_v31  ;;  %v5561_v5 = vsel %vm5503_vm9, %v5560_v3, %v5559_v29  ;;  %v5093_v43 = vadd.f32 %v10290_v35, %v4944_v34 }
 0x3d6   : > { %v5085_v33 = vadd.f32 %v10290_v35, %v4936_v63  ;;  %v5097_v19 = vadd.f32 %v10290_v35, %v4948_v41  ;;  %v5101_v10 = vadd.f32 %v10290_v35, %v4952_v15  ;;  %v5563_v4 = vsel %vm5506_vm10, %v5562_v56, %v5561_v5 }
 0x3d7   : > { %v5201_v37 = vmax.f32 %v5073_v55, 0.0  ;;  %v5205_v51 = vmax.f32 %v5077_v36, 0.0  ;;  %v5209_v9 = vmax.f32 %v5081_v13, 0.0  ;;  %5804 = vmatmul.mubr.f32.gmra.mrb[138].mxu0 %v5563_v4  ;;  %v5217_v63 = vmax.f32 %v5089_v18, 0.0 }
 0x3d8   : > { %v6751_v53 = vpop.eup %6750  ;;  %v5213_v25 = vmax.f32 %v5085_v33, 0.0  ;;  %v5221_v20 = vmax.f32 %v5093_v43, 0.0  ;;  %v5225_v27 = vmax.f32 %v5097_v19, 0.0  ;;  %v5229_v31 = vmax.f32 %v5101_v10, 0.0  ;;  %v10401_v33 = vld [vmem:[#allocation44_spill] sm:$0xff] }
 0x3d9   : > { %v9620_v3 = vmul.f32 %v6751_v53, %v9551_v45  ;;  %v5578_v16 = vrot.slane %v5205_v51, 7  ;;  %v5580_v34 = vrot.slane %v5209_v9, 6  ;;  %v5584_v41 = vrot.slane %v5217_v63, 4  ;;  %v10400_v45 = vld [vmem:[#allocation89_spill] sm:$0xff]  ;;  %v10402_v53 = vld [vmem:[#allocation84_spill] sm:$0xff] }
 0x3da   : > { %v5582_v49 = vrot.slane %v5213_v25, 5  ;;  %v5586_v44 = vrot.slane %v5221_v20, 3  ;;  %v5588_v56 = vrot.slane %v5225_v27, 2  ;;  %v5590_v55 = vrot.slane %v5229_v31, 1  ;;  %v10403_v27 = vld [vmem:[#allocation90_spill] sm:$0xff] }
 0x3db   : > { %v3318_v15 = vmul.f32 %v6784_v12, %v9620_v3  ;;  %v5579_v54 = vsel %vm5488_vm4, %v5578_v16, %v5201_v37  ;;  %v3639_v36 = vmul.f32 %v9229_v50, %v10399_v11  ;;  %v3643_v13 = vmul.f32 %v9245_v8, %v10400_v45  ;;  %v10404_v16 = vld [vmem:[#allocation24_spill] sm:$0xff] }
 0x3dc   : > { %v5581_v29 = vsel %vm5491_vm5, %v5580_v34, %v5579_v54  ;;  %v4734_v18 = vrot.slane %v10401_v33, 1  ;;  %v3641_v25 = vmul.f32 %v9229_v50, %v10402_v53  ;;  %v3645_v31 = vmul.f32 %v9245_v8, %v10403_v27  ;;  %v10405_v27 = vld [vmem:[#allocation85_spill] sm:$0xff] }
 0x3dd   : > { %v3536_v43 = vsel %vm1032_vm2, %v3318_v15, 0.0  ;;  %v5583_v19 = vsel %vm5494_vm6, %v5582_v49, %v5581_v29  ;;  %v4247_v10 = vrot.slane %v3639_v36, 4  ;;  %v4271_v9 = vrot.slane %v3643_v13, 4 }
 0x3de   : > { %v3537_v37 = vrot.slane %v3536_v43, 4  ;;  %v5585_v51 = vsel %vm5497_vm7, %v5584_v41, %v5583_v19  ;;  %v4736_v34 = vrot.slane %v10404_v16, 1  ;;  %v4259_v54 = vrot.slane %v3641_v25, 4 }
 0x3df   : > { %v5587_v63 = vsel %vm5500_vm8, %v5586_v44, %v5585_v51  ;;  %v4248_v20 = vadd.f32 %v4247_v10, %v3639_v36  ;;  %v4272_v15 = vadd.f32 %v4271_v9, %v3643_v13  ;;  %v4283_v29 = vrot.slane %v3645_v31, 4 }
 0x3e0   : > { %v3538_v12 = vadd.f32 %v3537_v37, %v3536_v43  ;;  %v5589_v49 = vsel %vm5503_vm9, %v5588_v56, %v5587_v63  ;;  %v4260_v36 = vadd.f32 %v4259_v54, %v3641_v25  ;;  %v3640_v43 = vmul.f32 %v9229_v50, %v10405_v27  ;;  %v10406_v56 = vld [vmem:[#allocation8_spill] sm:$0xff] }
 0x3e1   : > { %v5591_v11 = vsel %vm5506_vm10, %v5590_v55, %v5589_v49  ;;  %v4249_v41 = vrot.slane %v4248_v20, 2  ;;  %v4273_v44 = vrot.slane %v4272_v15, 2  ;;  %v4284_v53 = vadd.f32 %v4283_v29, %v3645_v31  ;;  %v10407_v63 = vld [vmem:[#allocation40_spill] sm:$0xff] }
 0x3e2   : > { %v3539_v19 = vrot.slane %v3538_v12, 2  ;;  %5889 = vmatmul.mubr.f32.gmra.mrb[138].mxu1 %v5591_v11  ;;  %v3644_v13 = vmul.f32 %v9245_v8, %v10406_v56  ;;  %v4261_v9 = vrot.slane %v4260_v36, 2  ;;  %v4735_v49 = vrot.slane %v10407_v63, 1 }
 0x3e3   : > { %v4250_v51 = vadd.f32 %v4249_v41, %v4248_v20  ;;  %v4274_v55 = vadd.f32 %v4273_v44, %v4272_v15  ;;  %v4285_v4 = vrot.slane %v4284_v53, 2  ;;  %v4253_v11 = vrot.slane %v3640_v43, 4 }
 0x3e4   : > { %v3540_v37 = vadd.f32 %v3539_v19, %v3538_v12  ;;  %v4277_v5 = vrot.slane %v3644_v13, 4  ;;  %v4262_v10 = vadd.f32 %v4261_v9, %v4260_v36 }
 0x3e5   : > { %v4251_v45 = vrot.slane %v4250_v51, 1  ;;  %v4275_v54 = vrot.slane %v4274_v55, 1  ;;  %v4286_v41 = vadd.f32 %v4285_v4, %v4284_v53  ;;  %v4254_v29 = vadd.f32 %v4253_v11, %v3640_v43  ;;  %v10409_v4 = vld [vmem:[#allocation86_spill] sm:$0xff] }
 0x3e6   : > { %v3541_v25 = vrot.slane %v3540_v37, 1  ;;  %v4278_v27 = vadd.f32 %v4277_v5, %v3644_v13  ;;  %v4263_v15 = vrot.slane %v4262_v10, 1  ;;  %v3642_v5 = vmul.f32 %v9229_v50, %v10409_v4  ;;  %v10410_v13 = vld [vmem:[#allocation91_spill] sm:$0xff]  ;;  %v10419_v4 = vld [vmem:[#allocation41_spill] sm:$0xff] }
 0x3e7   : > { %v4252_v31 = vadd.f32 %v4251_v45, %v4250_v51  ;;  %v4276_v12 = vadd.f32 %v4275_v54, %v4274_v55  ;;  %v4287_v1 = vrot.slane %v4286_v41, 1  ;;  %v4255_v14 = vrot.slane %v4254_v29, 2 }
 0x3e8   : > { %v3542_v56 = vadd.f32 %v3541_v25, %v3540_v37  ;;  %v4279_v62 = vrot.slane %v4278_v27, 2  ;;  %v4264_v45 = vadd.f32 %v4263_v15, %v4262_v10  ;;  %v3646_v37 = vmul.f32 %v9245_v8, %v10410_v13  ;;  %v10412_v25 = vld [vmem:[#allocation43_spill] sm:$0xff] }
 0x3e9   : > { %v9654_v44 = vadd.f32 %v10401_v33, %v4252_v31  ;;  %v9658_v9 = vadd.f32 %v4734_v18, %v4276_v12  ;;  %v4288_v51 = vadd.f32 %v4287_v1, %v4286_v41  ;;  %v4256_v53 = vadd.f32 %v4255_v14, %v4254_v29  ;;  %v10415_v1 = vld [vmem:[#allocation60_spill] sm:$0xff]  ;;  %v10416_v8 = vld [vmem:[#allocation75_spill] sm:$0xff]  ;;  %v10417_v29 = vld [vmem:[#allocation37_spill] sm:$0xff] }
 0x3ea   : > { %v5972_v36 = vsel %vm5506_vm10, %v3542_v56, %v9530_v47  ;;  %v4280_v43 = vadd.f32 %v4279_v62, %v4278_v27  ;;  %v9667_v55 = vadd.f32 %v10404_v16, %v4264_v45  ;;  %v4265_v11 = vrot.slane %v3642_v5, 4  ;;  %v10414_v62 = vld [vmem:[#allocation65_spill] sm:$0xff]  ;;  %v10418_v45 = vld [vmem:[#allocation79_spill] sm:$0xff] }
 0x3eb   : > { %10408 = vst [vmem:[#allocation107_spill] sm:$0xff] %v9658_v9  ;;  %5980 = vst.msk [vmem:[%s8414_s27 + $0x18] sm:$0xff] %vm1032_vm2, %v5972_v36  ;;  %v4737_v47 = vrot.slane %v10412_v25, 1  ;;  %v9671_v10 = vadd.f32 %v4736_v34, %v4288_v51  ;;  %v4257_v54 = vrot.slane %v4256_v53, 1  ;;  %v4289_v31 = vrot.slane %v3646_v37, 4  ;;  %v10420_v51 = vld [vmem:[#allocation82_spill] sm:$0xff] }
 0x3ec   : > { %10411 = vst [vmem:[#allocation116_spill] sm:$0xff] %v9667_v55  ;;  %v4281_v50 = vrot.slane %v4280_v43, 1  ;;  %v4266_v56 = vadd.f32 %v4265_v11, %v3642_v5  ;;  %v3624_v41 = vmul.f32 %v10415_v1, %v10414_v62  ;;  %v3628_v27 = vmul.f32 %v10417_v29, %v10416_v8  ;;  %v10421_v18 = vld [vmem:[#allocation39_spill] sm:$0xff] }
 0x3ed   : > { %10413 = vst [vmem:[#allocation108_spill] sm:$0xff] %v9671_v10  ;;  %v4258_v12 = vadd.f32 %v4257_v54, %v4256_v53  ;;  %v4290_v36 = vadd.f32 %v4289_v31, %v3646_v37  ;;  %v3632_v13 = vmul.f32 %v10419_v4, %v10418_v45  ;;  %v3636_v19 = vmul.f32 %v10421_v18, %v10420_v51 }
 0x3ee   : > { %v4282_v15 = vadd.f32 %v4281_v50, %v4280_v43  ;;  %v4267_v34 = vrot.slane %v4266_v56, 2  ;;  %v4157_v20 = vrot.slane %v3624_v41, 4  ;;  %v4181_v5 = vrot.slane %v3628_v27, 4 }
 0x3ef   : > { %v9683_v11 = vadd.f32 %v10407_v63, %v4258_v12  ;;  %v4291_v62 = vrot.slane %v4290_v36, 2  ;;  %v4205_v61 = vrot.slane %v3632_v13, 4  ;;  %v4229_v37 = vrot.slane %v3636_v19, 4 }
 0x3f0   : > { %v9685_v14 = vadd.f32 %v4735_v49, %v4282_v15  ;;  %v4268_v8 = vadd.f32 %v4267_v34, %v4266_v56  ;;  %v4158_v53 = vadd.f32 %v4157_v20, %v3624_v41  ;;  %v4182_v43 = vadd.f32 %v4181_v5, %v3628_v27 }
 0x3f1   : > { %v4292_v54 = vadd.f32 %v4291_v62, %v4290_v36  ;;  %v4206_v50 = vadd.f32 %v4205_v61, %v3632_v13  ;;  %v4719_v31 = vrot.slane %v8939_v17, 4  ;;  %v4723_v45 = vrot.slane %v8939_v17, 5  ;;  %v10422_v13 = vld [vmem:[#allocation59_spill] sm:$0xff]  ;;  %v10424_v62 = vld [vmem:[#allocation134_spill] sm:$0xff] }
 0x3f2   : > { %v4269_v51 = vrot.slane %v4268_v8, 1  ;;  %v4159_v2 = vrot.slane %v4158_v53, 2  ;;  %v4183_v6 = vrot.slane %v4182_v43, 2  ;;  %v4230_v26 = vadd.f32 %v4229_v37, %v3636_v19 }
 0x3f3   : > { %v4293_v12 = vrot.slane %v4292_v54, 1  ;;  %v4207_v60 = vrot.slane %v4206_v50, 2  ;;  %v4727_v49 = vrot.slane %v8939_v17, 6  ;;  %v4731_v15 = vrot.slane %v8939_v17, 7 }
 0x3f4   : > { %v4270_v56 = vadd.f32 %v4269_v51, %v4268_v8  ;;  %v4160_v20 = vadd.f32 %v4159_v2, %v4158_v53  ;;  %v4184_v41 = vadd.f32 %v4183_v6, %v4182_v43  ;;  %v4231_v27 = vrot.slane %v4230_v26, 2 }
 0x3f5   : > { %v4294_v36 = vadd.f32 %v4293_v12, %v4292_v54  ;;  %v4208_v61 = vadd.f32 %v4207_v60, %v4206_v50  ;;  %v10423_v34 = vrot.slane %v8939_v17, 2  ;;  %v10425_v10 = vrot.slane %v8939_v17, 3 }
 0x3f6   : > { %v9698_v37 = vadd.f32 %v10412_v25, %v4270_v56  ;;  %v4161_v55 = vrot.slane %v4160_v20, 1  ;;  %v4185_v16 = vrot.slane %v4184_v41, 1  ;;  %v4232_v9 = vadd.f32 %v4231_v27, %v4230_v26 }
 0x3f7   : > { %v4963_v5 = vadd.f32 %v10423_v34, %v10422_v13  ;;  %v4967_v19 = vadd.f32 %v10425_v10, %v10424_v62  ;;  %v9700_v8 = vadd.f32 %v4737_v47, %v4294_v36  ;;  %v4209_v6 = vrot.slane %v4208_v61, 1  ;;  %v10426_v34 = vld [vmem:[#allocation66_spill] sm:$0xff] }
 0x3f8   : > { %v5104_v60 = vadd.f32 %v9334_v32, %v9475_v57  ;;  %v5108_v2 = vadd.f32 %v9334_v32, %v9480_v59  ;;  %v4162_v53 = vadd.f32 %v4161_v55, %v4160_v20  ;;  %v4186_v43 = vadd.f32 %v4185_v16, %v4184_v41 }
 0x3f9   : > { %v4233_v54 = vrot.slane %v4232_v9, 1  ;;  %v5112_v17 = vadd.f32 %v9334_v32, %v4963_v5  ;;  %v4210_v10 = vadd.f32 %v4209_v6, %v4208_v61  ;;  %v5116_v50 = vadd.f32 %v9334_v32, %v4967_v19 }
 0x3fa   : > { %v5232_v51 = vmax.f32 %v5104_v60, 0.0  ;;  %v5236_v12 = vmax.f32 %v5108_v2, 0.0  ;;  %v4971_v47 = vadd.f32 %v4719_v31, %v4162_v53  ;;  %v4975_v56 = vadd.f32 %v4723_v45, %v4186_v43  ;;  %v10427_v31 = vld [vmem:[#allocation69_spill] sm:$0xff]  ;;  %v10428_v2 = vld [vmem:[#allocation80_spill] sm:$0xff] }
 0x3fb   : > { %v4234_v26 = vadd.f32 %v4233_v54, %v4232_v9  ;;  %v5240_v27 = vmax.f32 %v5112_v17, 0.0  ;;  %v4979_v36 = vadd.f32 %v4727_v49, %v4210_v10  ;;  %v5244_v13 = vmax.f32 %v5116_v50, 0.0  ;;  %v10429_v43 = vld [vmem:[#allocation5_spill] sm:$0xff] }
 0x3fc   : > { %v5620_v57 = vrot.slane %v5236_v12, 7  ;;  %v3626_v59 = vmul.f32 %v10415_v1, %v10426_v34  ;;  %v5120_v16 = vadd.f32 %v9334_v32, %v4971_v47  ;;  %v5124_v20 = vadd.f32 %v9334_v32, %v4975_v56 }
 0x3fd   : > { %v4983_v55 = vadd.f32 %v4731_v15, %v4234_v26  ;;  %v5622_v41 = vrot.slane %v5240_v27, 6  ;;  %v5128_v61 = vadd.f32 %v9334_v32, %v4979_v36  ;;  %v5624_v9 = vrot.slane %v5244_v13, 5 }
 0x3fe   : > { %v5621_v5 = vsel %vm5488_vm4, %v5620_v57, %v5232_v51  ;;  %v3630_v45 = vmul.f32 %v10417_v29, %v10427_v31  ;;  %v5248_v62 = vmax.f32 %v5120_v16, 0.0  ;;  %v5252_v19 = vmax.f32 %v5124_v20, 0.0  ;;  %v10430_v51 = vld [vmem:[#allocation58_spill] sm:$0xff] }
 0x3ff   : > { %v5132_v49 = vadd.f32 %v9334_v32, %v4983_v55  ;;  %v5623_v6 = vsel %vm5491_vm5, %v5622_v41, %v5621_v5  ;;  %v5256_v15 = vmax.f32 %v5128_v61, 0.0  ;;  %v3634_v53 = vmul.f32 %v10419_v4, %v10428_v2 }
 0x400   : > { %v5625_v60 = vsel %vm5494_vm6, %v5624_v9, %v5623_v6  ;;  %v3638_v54 = vmul.f32 %v10421_v18, %v10429_v43  ;;  %v5626_v10 = vrot.slane %v5248_v62, 4  ;;  %v5628_v50 = vrot.slane %v5252_v19, 3 }
 0x401   : > { %v5260_v17 = vmax.f32 %v5132_v49, 0.0  ;;  %v4145_v12 = vrot.slane %v10430_v51, 4  ;;  %v5630_v26 = vrot.slane %v5256_v15, 2  ;;  %v4169_v47 = vrot.slane %v3626_v59, 4 }
 0x402   : > { %v4193_v56 = vrot.slane %v3630_v45, 4  ;;  %v4217_v27 = vrot.slane %v3634_v53, 4  ;;  %v5627_v36 = vsel %vm5497_vm7, %v5626_v10, %v5625_v60  ;;  %v4241_v34 = vrot.slane %v3638_v54, 4 }
 0x403   : > { %v5632_v13 = vrot.slane %v5260_v17, 1  ;;  %v4146_v57 = vadd.f32 %v4145_v12, %v10430_v51  ;;  %v5629_v55 = vsel %vm5500_vm8, %v5628_v50, %v5627_v36  ;;  %v4170_v16 = vadd.f32 %v4169_v47, %v3626_v59  ;;  %v10431_v50 = vld [vmem:[#allocation62_spill] sm:$0xff] }
 0x404   : > { %v4194_v20 = vadd.f32 %v4193_v56, %v3630_v45  ;;  %v4218_v41 = vadd.f32 %v4217_v27, %v3634_v53  ;;  %v5631_v61 = vsel %vm5503_vm9, %v5630_v26, %v5629_v55  ;;  %v4242_v9 = vadd.f32 %v4241_v34, %v3638_v54 }
 0x405   : > { %v4147_v5 = vrot.slane %v4146_v57, 2  ;;  %v4721_v31 = vrot.slane %v10352_v52, 4  ;;  %v5633_v49 = vsel %vm5506_vm10, %v5632_v13, %v5631_v61  ;;  %v4171_v62 = vrot.slane %v4170_v16, 2 }
 0x406   : > { %v4195_v19 = vrot.slane %v4194_v20, 2  ;;  %v4219_v6 = vrot.slane %v4218_v41, 2  ;;  %5808 = vmatprep.mubr.f32.mxu0 %v5633_v49  ;;  %v4243_v60 = vrot.slane %v4242_v9, 2  ;;  %v4725_v2 = vrot.slane %v10352_v52, 5 }
 0x407   : > { %v4148_v15 = vadd.f32 %v4147_v5, %v4146_v57  ;;  %v4729_v59 = vrot.slane %v10352_v52, 6  ;;  %v4172_v45 = vadd.f32 %v4171_v62, %v4170_v16  ;;  %v4733_v17 = vrot.slane %v10352_v52, 7  ;;  %v10434_v62 = vld [vmem:[#allocation63_spill] sm:$0xff] }
 0x408   : > { %v4196_v53 = vadd.f32 %v4195_v19, %v4194_v20  ;;  %v4220_v43 = vadd.f32 %v4219_v6, %v4218_v41  ;;  %v4244_v10 = vadd.f32 %v4243_v60, %v4242_v9  ;;  %v10432_v51 = vrot.slane %v10352_v52, 2 }
 0x409   : > { %v4149_v54 = vrot.slane %v4148_v15, 1  ;;  %v5106_v26 = vadd.f32 %v9274_v48, %v9487_v42  ;;  %v4173_v47 = vrot.slane %v4172_v45, 1  ;;  %v5110_v36 = vadd.f32 %v9274_v48, %v9492_v23 }
 0x40a   : > { %v4965_v12 = vadd.f32 %v10432_v51, %v10431_v50  ;;  %v4197_v56 = vrot.slane %v4196_v53, 1  ;;  %v4221_v27 = vrot.slane %v4220_v43, 1  ;;  %v4245_v57 = vrot.slane %v4244_v10, 1 }
 0x40b   : > { %v4150_v13 = vadd.f32 %v4149_v54, %v4148_v15  ;;  %v5234_v55 = vmax.f32 %v5106_v26, 0.0  ;;  %v4174_v16 = vadd.f32 %v4173_v47, %v4172_v45  ;;  %v5238_v61 = vmax.f32 %v5110_v36, 0.0  ;;  %v10435_v45 = vld [vmem:[#allocation67_spill] sm:$0xff]  ;;  %v10437_v36 = vld [vmem:[#allocation4_spill] sm:$0xff] }
 0x40c   : > { %v5114_v34 = vadd.f32 %v9274_v48, %v4965_v12  ;;  %v4198_v20 = vadd.f32 %v4197_v56, %v4196_v53  ;;  %v4222_v41 = vadd.f32 %v4221_v27, %v4220_v43  ;;  %v4246_v5 = vadd.f32 %v4245_v57, %v4244_v10 }
 0x40d   : > { %v10433_v9 = vrot.slane %v10352_v52, 3  ;;  %v3623_v19 = vmul.f32 %v10415_v1, %v10434_v62  ;;  %v4973_v6 = vadd.f32 %v4721_v31, %v4174_v16  ;;  %v5648_v15 = vrot.slane %v5238_v61, 7  ;;  %v10438_v16 = vld [vmem:[#allocation55_spill] sm:$0xff] }
 0x40e   : > { %v5242_v42 = vmax.f32 %v5114_v34, 0.0  ;;  %v4977_v60 = vadd.f32 %v4725_v2, %v4198_v20  ;;  %v4981_v23 = vadd.f32 %v4729_v59, %v4222_v41  ;;  %v4985_v54 = vadd.f32 %v4733_v17, %v4246_v5  ;;  %v10436_v17 = vld [vmem:[#allocation76_spill] sm:$0xff] }
 0x40f   : > { %v4969_v49 = vadd.f32 %v10433_v9, %v4150_v13  ;;  %v3627_v53 = vmul.f32 %v10417_v29, %v10435_v45  ;;  %v5122_v43 = vadd.f32 %v9274_v48, %v4973_v6  ;;  %v5649_v12 = vsel %vm5488_vm4, %v5648_v15, %v5234_v55 }
 0x410   : > { %v5650_v51 = vrot.slane %v5242_v42, 6  ;;  %v5126_v52 = vadd.f32 %v9274_v48, %v4977_v60  ;;  %v5130_v10 = vadd.f32 %v9274_v48, %v4981_v23  ;;  %v5134_v31 = vadd.f32 %v9274_v48, %v4985_v54 }
 0x411   : > { %v5118_v50 = vadd.f32 %v9274_v48, %v4969_v49  ;;  %v3631_v26 = vmul.f32 %v10419_v4, %v10436_v17  ;;  %v5250_v47 = vmax.f32 %v5122_v43, 0.0  ;;  %v3635_v13 = vmul.f32 %v10421_v18, %v10437_v36 }
 0x412   : > { %v5651_v59 = vsel %vm5491_vm5, %v5650_v51, %v5649_v12  ;;  %v5254_v56 = vmax.f32 %v5126_v52, 0.0  ;;  %v5258_v27 = vmax.f32 %v5130_v10, 0.0  ;;  %v5262_v57 = vmax.f32 %v5134_v31, 0.0 }
 0x413   : > { %v5246_v2 = vmax.f32 %v5118_v50, 0.0  ;;  %v4127_v20 = vrot.slane %v10438_v16, 4  ;;  %v4151_v41 = vrot.slane %v3623_v19, 4  ;;  %v5654_v55 = vrot.slane %v5250_v47, 4 }
 0x414   : > { %v5656_v61 = vrot.slane %v5254_v56, 3  ;;  %v5658_v5 = vrot.slane %v5258_v27, 2  ;;  %v4175_v9 = vrot.slane %v3627_v53, 4  ;;  %v5660_v42 = vrot.slane %v5262_v57, 1 }
 0x415   : > { %v5652_v34 = vrot.slane %v5246_v2, 5  ;;  %v4128_v62 = vadd.f32 %v4127_v20, %v10438_v16  ;;  %v4152_v6 = vadd.f32 %v4151_v41, %v3623_v19  ;;  %v4199_v15 = vrot.slane %v3631_v26, 4  ;;  %v10439_v16 = vld [vmem:[#allocation53_spill] sm:$0xff] }
 0x416   : > { %v4176_v23 = vadd.f32 %v4175_v9, %v3627_v53  ;;  %v4223_v54 = vrot.slane %v3635_v13, 4  ;;  %v4718_v43 = vrot.slane %v8935_v22, 4  ;;  %v4722_v17 = vrot.slane %v8935_v22, 5 }
 0x417   : > { %v5653_v49 = vsel %vm5494_vm6, %v5652_v34, %v5651_v59  ;;  %v4129_v51 = vrot.slane %v4128_v62, 2  ;;  %v4153_v45 = vrot.slane %v4152_v6, 2  ;;  %v4200_v12 = vadd.f32 %v4199_v15, %v3631_v26 }
 0x418   : > { %v5655_v60 = vsel %vm5497_vm7, %v5654_v55, %v5653_v49  ;;  %v4177_v10 = vrot.slane %v4176_v23, 2  ;;  %v4224_v31 = vadd.f32 %v4223_v54, %v3635_v13  ;;  %v4726_v27 = vrot.slane %v8935_v22, 6 }
 0x419   : > { %v5657_v50 = vsel %vm5500_vm8, %v5656_v61, %v5655_v60  ;;  %v4130_v59 = vadd.f32 %v4129_v51, %v4128_v62  ;;  %v4154_v19 = vadd.f32 %v4153_v45, %v4152_v6  ;;  %v4201_v47 = vrot.slane %v4200_v12, 2 }
 0x41a   : > { %v5659_v52 = vsel %vm5503_vm9, %v5658_v5, %v5657_v50  ;;  %v4178_v53 = vadd.f32 %v4177_v10, %v4176_v23  ;;  %v4225_v56 = vrot.slane %v4224_v31, 2  ;;  %v4730_v34 = vrot.slane %v8935_v22, 7 }
 0x41b   : > { %v5661_v2 = vsel %vm5506_vm10, %v5660_v42, %v5659_v52  ;;  %v4131_v36 = vrot.slane %v4130_v59, 1  ;;  %v4155_v57 = vrot.slane %v4154_v19, 1  ;;  %v10440_v26 = vrot.slane %v8935_v22, 2 }
 0x41c   : > { %5893 = vmatprep.mubr.f32.mxu1 %v5661_v2  ;;  %v4179_v20 = vrot.slane %v4178_v53, 1  ;;  %v4202_v41 = vadd.f32 %v4201_v47, %v4200_v12  ;;  %v4226_v55 = vadd.f32 %v4225_v56, %v4224_v31  ;;  %v5103_v61 = vadd.f32 %v10285_v7, %v9448_v46  ;;  %v10442_v12 = vld [vmem:[#allocation64_spill] sm:$0xff] }
 0x41d   : > { %v4962_v13 = vadd.f32 %v10440_v26, %v10439_v16  ;;  %v4132_v5 = vadd.f32 %v4131_v36, %v4130_v59  ;;  %v4156_v9 = vadd.f32 %v4155_v57, %v4154_v19  ;;  %v5107_v49 = vadd.f32 %v10285_v7, %v9453_v58  ;;  %v10443_v56 = vld [vmem:[#allocation68_spill] sm:$0xff]  ;;  %v10444_v16 = vld [vmem:[#allocation77_spill] sm:$0xff] }
 0x41e   : > { %v4180_v62 = vadd.f32 %v4179_v20, %v4178_v53  ;;  %v4203_v6 = vrot.slane %v4202_v41, 1  ;;  %v4227_v60 = vrot.slane %v4226_v55, 1  ;;  %v5231_v23 = vmax.f32 %v5103_v61, 0.0 }
 0x41f   : > { %v5111_v42 = vadd.f32 %v10285_v7, %v4962_v13  ;;  %v10441_v15 = vrot.slane %v8935_v22, 3  ;;  %v4970_v50 = vadd.f32 %v4718_v43, %v4156_v9  ;;  %v5235_v51 = vmax.f32 %v5107_v49, 0.0 }
 0x420   : > { %v4204_v52 = vadd.f32 %v4203_v6, %v4202_v41  ;;  %v4228_v10 = vadd.f32 %v4227_v60, %v4226_v55  ;;  %v4974_v46 = vadd.f32 %v4722_v17, %v4180_v62  ;;  %v3625_v31 = vmul.f32 %v10415_v1, %v10442_v12  ;;  %v10445_v55 = vld [vmem:[#allocation81_spill] sm:$0xff] }
 0x421   : > { %v4966_v54 = vadd.f32 %v10441_v15, %v4132_v5  ;;  %v5239_v45 = vmax.f32 %v5111_v42, 0.0  ;;  %v5119_v2 = vadd.f32 %v10285_v7, %v4970_v50  ;;  %v5606_v59 = vrot.slane %v5235_v51, 7 }
 0x422   : > { %v4978_v53 = vadd.f32 %v4726_v27, %v4204_v52  ;;  %v4982_v47 = vadd.f32 %v4730_v34, %v4228_v10  ;;  %v5123_v22 = vadd.f32 %v10285_v7, %v4974_v46  ;;  %v3629_v43 = vmul.f32 %v10417_v29, %v10443_v56  ;;  %v10446_v29 = vld [vmem:[#allocation57_spill] sm:$0xff] }
 0x423   : > { %v5115_v58 = vadd.f32 %v10285_v7, %v4966_v54  ;;  %v5608_v19 = vrot.slane %v5239_v45, 6  ;;  %v5247_v57 = vmax.f32 %v5119_v2, 0.0  ;;  %v5607_v17 = vsel %vm5488_vm4, %v5606_v59, %v5231_v23 }
 0x424   : > { %v3633_v1 = vmul.f32 %v10419_v4, %v10444_v16  ;;  %v5127_v26 = vadd.f32 %v10285_v7, %v4978_v53  ;;  %v5131_v13 = vadd.f32 %v10285_v7, %v4982_v47  ;;  %v5251_v20 = vmax.f32 %v5123_v22, 0.0 }
 0x425   : > { %v5243_v36 = vmax.f32 %v5115_v58, 0.0  ;;  %v5609_v27 = vsel %vm5491_vm5, %v5608_v19, %v5607_v17  ;;  %v5612_v41 = vrot.slane %v5247_v57, 4  ;;  %v3637_v61 = vmul.f32 %v10421_v18, %v10445_v55 }
 0x426   : > { %v4139_v5 = vrot.slane %v10446_v29, 4  ;;  %v5255_v9 = vmax.f32 %v5127_v26, 0.0  ;;  %v5259_v49 = vmax.f32 %v5131_v13, 0.0  ;;  %v5614_v42 = vrot.slane %v5251_v20, 3  ;;  %v10447_v13 = vld [vmem:[#allocation56_spill] sm:$0xff] }
 0x427   : > { %v5610_v34 = vrot.slane %v5243_v36, 5  ;;  %v4163_v62 = vrot.slane %v3625_v31, 4  ;;  %v4187_v60 = vrot.slane %v3629_v43, 4  ;;  %v4211_v23 = vrot.slane %v3633_v1, 4 }
 0x428   : > { %v4140_v6 = vadd.f32 %v4139_v5, %v10446_v29  ;;  %v5616_v54 = vrot.slane %v5255_v9, 2  ;;  %v5618_v50 = vrot.slane %v5259_v49, 1  ;;  %v4235_v58 = vrot.slane %v3637_v61, 4 }
 0x429   : > { %v5611_v4 = vsel %vm5494_vm6, %v5610_v34, %v5609_v27  ;;  %v4164_v51 = vadd.f32 %v4163_v62, %v3625_v31  ;;  %v4188_v52 = vadd.f32 %v4187_v60, %v3629_v43  ;;  %v4212_v10 = vadd.f32 %v4211_v23, %v3633_v1 }
 0x42a   : > { %v5613_v15 = vsel %vm5497_vm7, %v5612_v41, %v5611_v4  ;;  %v4141_v18 = vrot.slane %v4140_v6, 2  ;;  %v4720_v2 = vrot.slane %v8937_v0, 4  ;;  %v4236_v56 = vadd.f32 %v4235_v58, %v3637_v61  ;;  %v10451_v58 = vld [vmem:[#allocation10_spill] sm:$0xff] }
 0x42b   : > { %v5615_v45 = vsel %vm5500_vm8, %v5614_v42, %v5613_v15  ;;  %v4165_v12 = vrot.slane %v4164_v51, 2  ;;  %v4189_v53 = vrot.slane %v4188_v52, 2  ;;  %v4213_v47 = vrot.slane %v4212_v10, 2 }
 0x42c   : > { %v5617_v46 = vsel %vm5503_vm9, %v5616_v54, %v5615_v45  ;;  %v4142_v19 = vadd.f32 %v4141_v18, %v4140_v6  ;;  %v4724_v31 = vrot.slane %v8937_v0, 5  ;;  %v4728_v36 = vrot.slane %v8937_v0, 6 }
 0x42d   : > { %v5619_v59 = vsel %vm5506_vm10, %v5618_v50, %v5617_v46  ;;  %v4166_v22 = vadd.f32 %v4165_v12, %v4164_v51  ;;  %v4190_v57 = vadd.f32 %v4189_v53, %v4188_v52  ;;  %v4214_v17 = vadd.f32 %v4213_v47, %v4212_v10  ;;  %v10450_v50 = vld [vmem:[#allocation95_spill] sm:$0xff] }
 0x42e   : > { %5809 = vmatmul.mubr.f32.gmra.mrb[140].mxu0 %v5619_v59  ;;  %v4143_v43 = vrot.slane %v4142_v19, 1  ;;  %v4732_v16 = vrot.slane %v8937_v0, 7  ;;  %v4237_v26 = vrot.slane %v4236_v56, 2  ;;  %v10448_v20 = vrot.slane %v8937_v0, 2 }
 0x42f   : > { %v4167_v1 = vrot.slane %v4166_v22, 1  ;;  %v5105_v34 = vadd.f32 %v10290_v35, %v9460_v24  ;;  %v4191_v55 = vrot.slane %v4190_v57, 1  ;;  %v4215_v61 = vrot.slane %v4214_v17, 1 }
 0x430   : > { %v4964_v27 = vadd.f32 %v10448_v20, %v10447_v13  ;;  %v4144_v41 = vadd.f32 %v4143_v43, %v4142_v19  ;;  %v5109_v29 = vadd.f32 %v10290_v35, %v9463_v38  ;;  %v4238_v9 = vadd.f32 %v4237_v26, %v4236_v56 }
 0x431   : > { %v4168_v5 = vadd.f32 %v4167_v1, %v4166_v22  ;;  %v5233_v42 = vmax.f32 %v5105_v34, 0.0  ;;  %v4192_v62 = vadd.f32 %v4191_v55, %v4190_v57  ;;  %v4216_v4 = vadd.f32 %v4215_v61, %v4214_v17  ;;  %v10453_v1 = vld [vmem:[#allocation106_spill] sm:$0xff] }
 0x432   : > { %v5113_v49 = vadd.f32 %v10290_v35, %v4964_v27  ;;  %v10449_v6 = vrot.slane %v8937_v0, 3  ;;  %v5237_v23 = vmax.f32 %v5109_v29, 0.0  ;;  %v4239_v15 = vrot.slane %v4238_v9, 1  ;;  %v10454_v27 = vld [vmem:[#allocation113_spill] sm:$0xff] }
 0x433   : > { %v4972_v54 = vadd.f32 %v4720_v2, %v4168_v5  ;;  %v3648_v51 = vmul.f32 %v9338_v28, %v10450_v50  ;;  %v4976_v45 = vadd.f32 %v4724_v31, %v4192_v62  ;;  %v4980_v18 = vadd.f32 %v4728_v36, %v4216_v4  ;;  %v10452_v31 = vld [vmem:[#allocation13_spill] sm:$0xff] }
 0x434   : > { %v4968_v60 = vadd.f32 %v10449_v6, %v4144_v41  ;;  %v5241_v24 = vmax.f32 %v5113_v49, 0.0  ;;  %v5634_v52 = vrot.slane %v5237_v23, 7  ;;  %v4240_v10 = vadd.f32 %v4239_v15, %v4238_v9  ;;  %v10455_v41 = vld [vmem:[#allocation117_spill] sm:$0xff] }
 0x435   : > { %v5121_v46 = vadd.f32 %v10290_v35, %v4972_v54  ;;  %v3652_v0 = vmul.f32 %v9362_v30, %v10451_v58  ;;  %v5125_v59 = vadd.f32 %v10290_v35, %v4976_v45  ;;  %v5129_v2 = vadd.f32 %v10290_v35, %v4980_v18 }
 0x436   : > { %v5117_v38 = vadd.f32 %v10290_v35, %v4968_v60  ;;  %v5636_v12 = vrot.slane %v5241_v24, 6  ;;  %v5635_v53 = vsel %vm5488_vm4, %v5634_v52, %v5233_v42  ;;  %v4984_v47 = vadd.f32 %v4732_v16, %v4240_v10 }
 0x437   : > { %v5249_v22 = vmax.f32 %v5121_v46, 0.0  ;;  %v3656_v36 = vmul.f32 %v9378_v39, %v10452_v31  ;;  %v5253_v43 = vmax.f32 %v5125_v59, 0.0  ;;  %v5257_v57 = vmax.f32 %v5129_v2, 0.0 }
 0x438   : > { %v5245_v19 = vmax.f32 %v5117_v38, 0.0  ;;  %v5637_v56 = vsel %vm5491_vm5, %v5636_v12, %v5635_v53  ;;  %v3660_v26 = vmul.f32 %v9394_v40, %v10453_v1  ;;  %v5133_v13 = vadd.f32 %v10290_v35, %v4984_v47 }
 0x439   : > { %v5640_v20 = vrot.slane %v5249_v22, 4  ;;  %v3664_v34 = vmul.f32 %v9466_v21, %v10454_v27  ;;  %v3668_v16 = vmul.f32 %v9620_v3, %v10455_v41  ;;  %v5642_v61 = vrot.slane %v5253_v43, 3 }
 0x43a   : > { %v5638_v17 = vrot.slane %v5245_v19, 5  ;;  %v5644_v29 = vrot.slane %v5257_v57, 2  ;;  %v4301_v5 = vrot.slane %v3648_v51, 4  ;;  %v5261_v9 = vmax.f32 %v5133_v13, 0.0 }
 0x43b   : > { %v4325_v42 = vrot.slane %v3652_v0, 4  ;;  %v4349_v62 = vrot.slane %v3656_v36, 4  ;;  %v4373_v60 = vrot.slane %v3660_v26, 4  ;;  %v4397_v23 = vrot.slane %v3664_v34, 4 }
 0x43c   : > { %v5639_v55 = vsel %vm5494_vm6, %v5638_v17, %v5637_v56  ;;  %v4302_v6 = vadd.f32 %v4301_v5, %v3648_v51  ;;  %v5646_v54 = vrot.slane %v5261_v9, 1  ;;  %v4421_v52 = vrot.slane %v3668_v16, 4 }
 0x43d   : > { %v5641_v49 = vsel %vm5497_vm7, %v5640_v20, %v5639_v55  ;;  %v4326_v24 = vadd.f32 %v4325_v42, %v3652_v0  ;;  %v4350_v50 = vadd.f32 %v4349_v62, %v3656_v36  ;;  %v4374_v18 = vadd.f32 %v4373_v60, %v3660_v26  ;;  %v10458_v60 = vld [vmem:[#allocation96_spill] sm:$0xff] }
 0x43e   : > { %v5643_v4 = vsel %vm5500_vm8, %v5642_v61, %v5641_v49  ;;  %v4303_v45 = vrot.slane %v4302_v6, 2  ;;  %v4398_v38 = vadd.f32 %v4397_v23, %v3664_v34  ;;  %v4747_v58 = vrot.slane %v10407_v63, 4 }
 0x43f   : > { %v5645_v15 = vsel %vm5503_vm9, %v5644_v29, %v5643_v4  ;;  %v4327_v46 = vrot.slane %v4326_v24, 2  ;;  %v4351_v12 = vrot.slane %v4350_v50, 2  ;;  %v4375_v51 = vrot.slane %v4374_v18, 2 }
 0x440   : > { %v5647_v10 = vsel %vm5506_vm10, %v5646_v54, %v5645_v15  ;;  %v4304_v59 = vadd.f32 %v4303_v45, %v4302_v6  ;;  %v4399_v2 = vrot.slane %v4398_v38, 2  ;;  %v4422_v19 = vadd.f32 %v4421_v52, %v3668_v16 }
 0x441   : > { %5894 = vmatmul.mubr.f32.gmra.mrb[140].mxu1 %v5647_v10  ;;  %v4328_v53 = vadd.f32 %v4327_v46, %v4326_v24  ;;  %v4352_v47 = vadd.f32 %v4351_v12, %v4350_v50  ;;  %v4751_v0 = vrot.slane %v10407_v63, 5  ;;  %v4755_v22 = vrot.slane %v10407_v63, 6 }
 0x442   : > { %v4305_v56 = vrot.slane %v4304_v59, 1  ;;  %v4376_v31 = vadd.f32 %v4375_v51, %v4374_v18  ;;  %v4400_v36 = vadd.f32 %v4399_v2, %v4398_v38  ;;  %v4423_v43 = vrot.slane %v4422_v19, 2  ;;  %v10459_v38 = vld [vmem:[#allocation99_spill] sm:$0xff]  ;;  %v10460_v2 = vld [vmem:[#allocation14_spill] sm:$0xff] }
 0x443   : > { %v4329_v57 = vrot.slane %v4328_v53, 1  ;;  %v4353_v17 = vrot.slane %v4352_v47, 1  ;;  %v4759_v1 = vrot.slane %v10407_v63, 7  ;;  %v5136_v26 = vadd.f32 %v9334_v32, %v9683_v11 }
 0x444   : > { %v4306_v13 = vadd.f32 %v4305_v56, %v4304_v59  ;;  %v4377_v20 = vrot.slane %v4376_v31, 1  ;;  %v4401_v27 = vrot.slane %v4400_v36, 1  ;;  %v4424_v34 = vadd.f32 %v4423_v43, %v4422_v19 }
 0x445   : > { %v4330_v41 = vadd.f32 %v4329_v57, %v4328_v53  ;;  %v4354_v16 = vadd.f32 %v4353_v17, %v4352_v47  ;;  %v5140_v55 = vadd.f32 %v9334_v32, %v9685_v14  ;;  %v5264_v61 = vmax.f32 %v5136_v26, 0.0  ;;  %v10462_v57 = vld [vmem:[#allocation114_spill] sm:$0xff] }
 0x446   : > { %v4378_v29 = vadd.f32 %v4377_v20, %v4376_v31  ;;  %v4402_v5 = vadd.f32 %v4401_v27, %v4400_v36  ;;  %v4425_v9 = vrot.slane %v4424_v34, 1  ;;  %v10456_v49 = vrot.slane %v10407_v63, 2  ;;  %v10461_v36 = vld [vmem:[#allocation105_spill] sm:$0xff] }
 0x447   : > { %v10457_v62 = vrot.slane %v10407_v63, 3  ;;  %v5003_v11 = vadd.f32 %v4747_v58, %v4354_v16  ;;  %v5268_v6 = vmax.f32 %v5140_v55, 0.0  ;;  %v3650_v23 = vmul.f32 %v9338_v28, %v10458_v60 }
 0x448   : > { %v4995_v42 = vadd.f32 %v10456_v49, %v4306_v13  ;;  %v4426_v15 = vadd.f32 %v4425_v9, %v4424_v34  ;;  %v5007_v54 = vadd.f32 %v4751_v0, %v4378_v29  ;;  %v5011_v24 = vadd.f32 %v4755_v22, %v4402_v5  ;;  %v10463_v34 = vld [vmem:[#allocation17_spill] sm:$0xff] }
 0x449   : > { %v4999_v4 = vadd.f32 %v10457_v62, %v4330_v41  ;;  %v5152_v45 = vadd.f32 %v9334_v32, %v5003_v11  ;;  %v5676_v18 = vrot.slane %v5268_v6, 7  ;;  %v3654_v52 = vmul.f32 %v9362_v30, %v10459_v38 }
 0x44a   : > { %v5144_v14 = vadd.f32 %v9334_v32, %v4995_v42  ;;  %v5015_v63 = vadd.f32 %v4759_v1, %v4426_v15  ;;  %v5156_v10 = vadd.f32 %v9334_v32, %v5007_v54  ;;  %v5160_v46 = vadd.f32 %v9334_v32, %v5011_v24 }
 0x44b   : > { %v5148_v50 = vadd.f32 %v9334_v32, %v4999_v4  ;;  %v5280_v59 = vmax.f32 %v5152_v45, 0.0  ;;  %v5677_v51 = vsel %vm5488_vm4, %v5676_v18, %v5264_v61  ;;  %v3658_v19 = vmul.f32 %v9378_v39, %v10460_v2 }
 0x44c   : > { %v5272_v12 = vmax.f32 %v5144_v14, 0.0  ;;  %v5164_v53 = vadd.f32 %v9334_v32, %v5015_v63  ;;  %v5284_v47 = vmax.f32 %v5156_v10, 0.0  ;;  %v5288_v0 = vmax.f32 %v5160_v46, 0.0 }
 0x44d   : > { %v5276_v58 = vmax.f32 %v5148_v50, 0.0  ;;  %v5682_v31 = vrot.slane %v5280_v59, 4  ;;  %v3662_v43 = vmul.f32 %v9394_v40, %v10461_v36  ;;  %v3666_v17 = vmul.f32 %v9466_v21, %v10462_v57 }
 0x44e   : > { %v5678_v22 = vrot.slane %v5272_v12, 6  ;;  %v5292_v1 = vmax.f32 %v5164_v53, 0.0  ;;  %v5684_v13 = vrot.slane %v5284_v47, 3  ;;  %v5686_v20 = vrot.slane %v5288_v0, 2 }
 0x44f   : > { %v5680_v56 = vrot.slane %v5276_v58, 5  ;;  %v3670_v32 = vmul.f32 %v9620_v3, %v10463_v34  ;;  %v4313_v41 = vrot.slane %v3650_v23, 4  ;;  %v4337_v16 = vrot.slane %v3654_v52, 4 }
 0x450   : > { %v5679_v26 = vsel %vm5491_vm5, %v5678_v22, %v5677_v51  ;;  %v5688_v61 = vrot.slane %v5292_v1, 1  ;;  %v4361_v29 = vrot.slane %v3658_v19, 4  ;;  %v4385_v5 = vrot.slane %v3662_v43, 4 }
 0x451   : > { %v5681_v27 = vsel %vm5494_vm6, %v5680_v56, %v5679_v26  ;;  %v4314_v49 = vadd.f32 %v4313_v41, %v3650_v23  ;;  %v4338_v42 = vadd.f32 %v4337_v16, %v3654_v52  ;;  %v4409_v62 = vrot.slane %v3666_v17, 4 }
 0x452   : > { %v5683_v55 = vsel %vm5497_vm7, %v5682_v31, %v5681_v27  ;;  %v4362_v11 = vadd.f32 %v4361_v29, %v3658_v19  ;;  %v4386_v6 = vadd.f32 %v4385_v5, %v3662_v43  ;;  %v4433_v60 = vrot.slane %v3670_v32, 4  ;;  %v10466_v29 = vld [vmem:[#allocation9_spill] sm:$0xff] }
 0x453   : > { %v5685_v9 = vsel %vm5500_vm8, %v5684_v13, %v5683_v55  ;;  %v4315_v54 = vrot.slane %v4314_v49, 2  ;;  %v4339_v24 = vrot.slane %v4338_v42, 2  ;;  %v4410_v14 = vadd.f32 %v4409_v62, %v3666_v17 }
 0x454   : > { %v5687_v4 = vsel %vm5503_vm9, %v5686_v20, %v5685_v9  ;;  %v4363_v50 = vrot.slane %v4362_v11, 2  ;;  %v4387_v45 = vrot.slane %v4386_v6, 2  ;;  %v4434_v18 = vadd.f32 %v4433_v60, %v3670_v32 }
 0x455   : > { %v5689_v15 = vsel %vm5506_vm10, %v5688_v61, %v5687_v4  ;;  %v4749_v38 = vrot.slane %v10412_v25, 4  ;;  %v4316_v63 = vadd.f32 %v4315_v54, %v4314_v49  ;;  %v4340_v23 = vadd.f32 %v4339_v24, %v4338_v42 }
 0x456   : > { %5813 = vmatprep.mubr.f32.mxu0 %v5689_v15  ;;  %v4411_v52 = vrot.slane %v4410_v14, 2  ;;  %v4753_v10 = vrot.slane %v10412_v25, 5  ;;  %v4364_v46 = vadd.f32 %v4363_v50, %v4362_v11  ;;  %v4388_v12 = vadd.f32 %v4387_v45, %v4386_v6 }
 0x457   : > { %v4435_v58 = vrot.slane %v4434_v18, 2  ;;  %v4757_v59 = vrot.slane %v10412_v25, 6  ;;  %v4317_v51 = vrot.slane %v4316_v63, 1  ;;  %v4341_v2 = vrot.slane %v4340_v23, 1 }
 0x458   : > { %v4412_v19 = vadd.f32 %v4411_v52, %v4410_v14  ;;  %v4761_v53 = vrot.slane %v10412_v25, 7  ;;  %v4365_v47 = vrot.slane %v4364_v46, 1  ;;  %v4389_v0 = vrot.slane %v4388_v12, 1 }
 0x459   : > { %v4436_v22 = vadd.f32 %v4435_v58, %v4434_v18  ;;  %v5138_v56 = vadd.f32 %v9274_v48, %v9698_v37  ;;  %v4318_v31 = vadd.f32 %v4317_v51, %v4316_v63  ;;  %v4342_v36 = vadd.f32 %v4341_v2, %v4340_v23  ;;  %v10468_v18 = vld [vmem:[#allocation11_spill] sm:$0xff]  ;;  %v10470_v51 = vld [vmem:[#allocation109_spill] sm:$0xff] }
 0x45a   : > { %v4413_v43 = vrot.slane %v4412_v19, 1  ;;  %v5142_v57 = vadd.f32 %v9274_v48, %v9700_v8  ;;  %v4366_v17 = vadd.f32 %v4365_v47, %v4364_v46  ;;  %v4390_v1 = vadd.f32 %v4389_v0, %v4388_v12 }
 0x45b   : > { %v4437_v26 = vrot.slane %v4436_v22, 1  ;;  %v5266_v13 = vmax.f32 %v5138_v56, 0.0  ;;  %v10464_v27 = vrot.slane %v10412_v25, 2  ;;  %v10465_v32 = vrot.slane %v10412_v25, 3  ;;  %v10467_v25 = vld [vmem:[#allocation97_spill] sm:$0xff] }
 0x45c   : > { %v4414_v20 = vadd.f32 %v4413_v43, %v4412_v19  ;;  %v5270_v16 = vmax.f32 %v5142_v57, 0.0  ;;  %v5005_v37 = vadd.f32 %v4749_v38, %v4366_v17  ;;  %v5009_v61 = vadd.f32 %v4753_v10, %v4390_v1  ;;  %v10469_v10 = vld [vmem:[#allocation15_spill] sm:$0xff] }
 0x45d   : > { %v4997_v34 = vadd.f32 %v10464_v27, %v4318_v31  ;;  %v5001_v41 = vadd.f32 %v10465_v32, %v4342_v36  ;;  %v4438_v55 = vadd.f32 %v4437_v26, %v4436_v22  ;;  %v3647_v5 = vmul.f32 %v9338_v28, %v10466_v29 }
 0x45e   : > { %v5013_v9 = vadd.f32 %v4757_v59, %v4414_v20  ;;  %v5704_v42 = vrot.slane %v5270_v16, 7  ;;  %v5154_v4 = vadd.f32 %v9274_v48, %v5005_v37  ;;  %v5158_v11 = vadd.f32 %v9274_v48, %v5009_v61 }
 0x45f   : > { %v5146_v8 = vadd.f32 %v9274_v48, %v4997_v34  ;;  %v5150_v49 = vadd.f32 %v9274_v48, %v5001_v41  ;;  %v5017_v62 = vadd.f32 %v4761_v53, %v4438_v55  ;;  %v3651_v6 = vmul.f32 %v9362_v30, %v10467_v25  ;;  %v10471_v53 = vld [vmem:[#allocation16_spill] sm:$0xff] }
 0x460   : > { %v5162_v60 = vadd.f32 %v9274_v48, %v5013_v9  ;;  %v5705_v24 = vsel %vm5488_vm4, %v5704_v42, %v5266_v13  ;;  %v5282_v50 = vmax.f32 %v5154_v4, 0.0  ;;  %v5286_v45 = vmax.f32 %v5158_v11, 0.0 }
 0x461   : > { %v5274_v15 = vmax.f32 %v5146_v8, 0.0  ;;  %v5278_v54 = vmax.f32 %v5150_v49, 0.0  ;;  %v5166_v14 = vadd.f32 %v9274_v48, %v5017_v62  ;;  %v3655_v38 = vmul.f32 %v9378_v39, %v10468_v18 }
 0x462   : > { %v5290_v63 = vmax.f32 %v5162_v60, 0.0  ;;  %v3659_v46 = vmul.f32 %v9394_v40, %v10469_v10  ;;  %v5710_v58 = vrot.slane %v5282_v50, 4  ;;  %v5712_v59 = vrot.slane %v5286_v45, 3 }
 0x463   : > { %v5706_v23 = vrot.slane %v5274_v15, 6  ;;  %v5708_v52 = vrot.slane %v5278_v54, 5  ;;  %v5294_v12 = vmax.f32 %v5166_v14, 0.0  ;;  %v3663_v2 = vmul.f32 %v9466_v21, %v10470_v51 }
 0x464   : > { %v5714_v48 = vrot.slane %v5290_v63, 2  ;;  %v3667_v47 = vmul.f32 %v9620_v3, %v10471_v53  ;;  %v4295_v0 = vrot.slane %v3647_v5, 4  ;;  %v4319_v31 = vrot.slane %v3651_v6, 4 }
 0x465   : > { %v5707_v19 = vsel %vm5491_vm5, %v5706_v23, %v5705_v24  ;;  %v5716_v56 = vrot.slane %v5294_v12, 1  ;;  %v4343_v36 = vrot.slane %v3655_v38, 4  ;;  %v4367_v17 = vrot.slane %v3659_v46, 4 }
 0x466   : > { %v5709_v22 = vsel %vm5494_vm6, %v5708_v52, %v5707_v19  ;;  %v4296_v57 = vadd.f32 %v4295_v0, %v3647_v5  ;;  %v4391_v1 = vrot.slane %v3663_v2, 4  ;;  %v4320_v13 = vadd.f32 %v4319_v31, %v3651_v6 }
 0x467   : > { %v5711_v43 = vsel %vm5497_vm7, %v5710_v58, %v5709_v22  ;;  %v4344_v20 = vadd.f32 %v4343_v36, %v3655_v38  ;;  %v4415_v27 = vrot.slane %v3667_v47, 4  ;;  %v4368_v41 = vadd.f32 %v4367_v17, %v3659_v46  ;;  %v10472_v46 = vld [vmem:[#allocation107_spill] sm:$0xff]  ;;  %v10475_v36 = vld [vmem:[#allocation94_spill] sm:$0xff] }
 0x468   : > { %v5713_v26 = vsel %vm5500_vm8, %v5712_v59, %v5711_v43  ;;  %v4297_v32 = vrot.slane %v4296_v57, 2  ;;  %v4392_v16 = vadd.f32 %v4391_v1, %v3663_v2  ;;  %v4321_v37 = vrot.slane %v4320_v13, 2 }
 0x469   : > { %v5715_v34 = vsel %vm5503_vm9, %v5714_v48, %v5713_v26  ;;  %v4345_v61 = vrot.slane %v4344_v20, 2  ;;  %v4416_v29 = vadd.f32 %v4415_v27, %v3667_v47  ;;  %v4369_v5 = vrot.slane %v4368_v41, 2  ;;  %v10476_v27 = vld [vmem:[#allocation98_spill] sm:$0xff] }
 0x46a   : > { %v5717_v55 = vsel %vm5506_vm10, %v5716_v56, %v5715_v34  ;;  %v4298_v9 = vadd.f32 %v4297_v32, %v4296_v57  ;;  %v4393_v8 = vrot.slane %v4392_v16, 2  ;;  %v4746_v49 = vrot.slane %v10401_v33, 4 }
 0x46b   : > { %5898 = vmatprep.mubr.f32.mxu1 %v5717_v55  ;;  %v4322_v42 = vadd.f32 %v4321_v37, %v4320_v13  ;;  %v4346_v62 = vadd.f32 %v4345_v61, %v4344_v20  ;;  %v4417_v4 = vrot.slane %v4416_v29, 2  ;;  %v4750_v11 = vrot.slane %v10401_v33, 5 }
 0x46c   : > { %v4299_v25 = vrot.slane %v4298_v9, 1  ;;  %v4370_v6 = vadd.f32 %v4369_v5, %v4368_v41  ;;  %v4394_v60 = vadd.f32 %v4393_v8, %v4392_v16  ;;  %v4754_v15 = vrot.slane %v10401_v33, 6  ;;  %v10477_v5 = vld [vmem:[#allocation12_spill] sm:$0xff] }
 0x46d   : > { %v4323_v54 = vrot.slane %v4322_v42, 1  ;;  %v4347_v24 = vrot.slane %v4346_v62, 1  ;;  %v4418_v14 = vadd.f32 %v4417_v4, %v4416_v29  ;;  %v4758_v50 = vrot.slane %v10401_v33, 7 }
 0x46e   : > { %v4300_v45 = vadd.f32 %v4299_v25, %v4298_v9  ;;  %v4371_v18 = vrot.slane %v4370_v6, 1  ;;  %v4395_v38 = vrot.slane %v4394_v60, 1  ;;  %v5135_v63 = vadd.f32 %v10285_v7, %v9654_v44 }
 0x46f   : > { %v4324_v23 = vadd.f32 %v4323_v54, %v4322_v42  ;;  %v4348_v52 = vadd.f32 %v4347_v24, %v4346_v62  ;;  %v4419_v10 = vrot.slane %v4418_v14, 1  ;;  %v5139_v12 = vadd.f32 %v10285_v7, %v10472_v46  ;;  %v10480_v24 = vld [vmem:[#allocation115_spill] sm:$0xff] }
 0x470   : > { %v4372_v58 = vadd.f32 %v4371_v18, %v4370_v6  ;;  %v4396_v59 = vadd.f32 %v4395_v38, %v4394_v60  ;;  %v10473_v51 = vrot.slane %v10401_v33, 2  ;;  %v5263_v19 = vmax.f32 %v5135_v63, 0.0  ;;  %v10479_v6 = vld [vmem:[#allocation110_spill] sm:$0xff] }
 0x471   : > { %v4420_v48 = vadd.f32 %v4419_v10, %v4418_v14  ;;  %v10474_v53 = vrot.slane %v10401_v33, 3  ;;  %v5002_v0 = vadd.f32 %v4746_v49, %v4348_v52  ;;  %v5267_v22 = vmax.f32 %v5139_v12, 0.0 }
 0x472   : > { %v4994_v2 = vadd.f32 %v10473_v51, %v4300_v45  ;;  %v5006_v56 = vadd.f32 %v4750_v11, %v4372_v58  ;;  %v5010_v44 = vadd.f32 %v4754_v15, %v4396_v59  ;;  %v3649_v43 = vmul.f32 %v9338_v28, %v10475_v36 }
 0x473   : > { %v4998_v47 = vadd.f32 %v10474_v53, %v4324_v23  ;;  %v5014_v57 = vadd.f32 %v4758_v50, %v4420_v48  ;;  %v5151_v1 = vadd.f32 %v10285_v7, %v5002_v0  ;;  %v5662_v26 = vrot.slane %v5267_v22, 7  ;;  %v10481_v53 = vld [vmem:[#allocation24_spill] sm:$0xff] }
 0x474   : > { %v5143_v31 = vadd.f32 %v10285_v7, %v4994_v2  ;;  %v5155_v13 = vadd.f32 %v10285_v7, %v5006_v56  ;;  %v5159_v33 = vadd.f32 %v10285_v7, %v5010_v44  ;;  %v3653_v34 = vmul.f32 %v9362_v30, %v10476_v27  ;;  %v9934_v32 = vpop.f32.mrb[136].mxu0  ;;  %v10478_v30 = vld [vmem:[#allocation104_spill] sm:$0xff] }
 0x475   : > { %v5147_v17 = vadd.f32 %v10285_v7, %v4998_v47  ;;  %v5163_v41 = vadd.f32 %v10285_v7, %v5014_v57  ;;  %v5279_v28 = vmax.f32 %v5151_v1, 0.0  ;;  %v5663_v55 = vsel %vm5488_vm4, %v5662_v26, %v5263_v19  ;;  %v9938_v37 = vpop.f32.mrb[137].mxu0 }
 0x476   : > { %v5271_v20 = vmax.f32 %v5143_v31, 0.0  ;;  %v5283_v61 = vmax.f32 %v5155_v13, 0.0  ;;  %v5287_v29 = vmax.f32 %v5159_v33, 0.0  ;;  %v3657_v8 = vmul.f32 %v9378_v39, %v10477_v5 }
 0x477   : > { %v5275_v16 = vmax.f32 %v5147_v17, 0.0  ;;  %v5291_v49 = vmax.f32 %v5163_v41, 0.0  ;;  %v5668_v62 = vrot.slane %v5279_v28, 4  ;;  %v3661_v4 = vmul.f32 %v9394_v40, %v10478_v30 }
 0x478   : > { %v5664_v9 = vrot.slane %v5271_v20, 6  ;;  %v5670_v11 = vrot.slane %v5283_v61, 3  ;;  %v5672_v25 = vrot.slane %v5287_v29, 2  ;;  %v3665_v60 = vmul.f32 %v9466_v21, %v10479_v6  ;;  %v10483_v29 = vld [vmem:[#allocation108_spill] sm:$0xff]  ;;  %v9967_v6 = vld [vmem:[%s10010_s3 + $0xc3] ss:$0 sm:$0xff] }
 0x479   : > { %v5666_v42 = vrot.slane %v5275_v16, 5  ;;  %v5674_v54 = vrot.slane %v5291_v49, 1  ;;  %v3669_v14 = vmul.f32 %v9620_v3, %v10480_v24  ;;  %v4307_v39 = vrot.slane %v3649_v43, 4 }
 0x47a   : > { %v5665_v7 = vsel %vm5491_vm5, %v5664_v9, %v5663_v55  ;;  %v4331_v45 = vrot.slane %v3653_v34, 4  ;;  %v4355_v18 = vrot.slane %v3657_v8, 4  ;;  %v4379_v38 = vrot.slane %v3661_v4, 4 }
 0x47b   : > { %v5667_v15 = vsel %vm5494_vm6, %v5666_v42, %v5665_v7  ;;  %v4308_v63 = vadd.f32 %v4307_v39, %v3649_v43  ;;  %v4403_v23 = vrot.slane %v3665_v60, 4  ;;  %v4427_v52 = vrot.slane %v3669_v14, 4 }
 0x47c   : > { %v5669_v50 = vsel %vm5497_vm7, %v5668_v62, %v5667_v15  ;;  %v4332_v21 = vadd.f32 %v4331_v45, %v3653_v34  ;;  %v4356_v46 = vadd.f32 %v4355_v18, %v3657_v8  ;;  %v4380_v12 = vadd.f32 %v4379_v38, %v3661_v4  ;;  %v10482_v34 = vld [vmem:[#allocation116_spill] sm:$0xff] }
 0x47d   : > { %v5671_v40 = vsel %vm5500_vm8, %v5670_v11, %v5669_v50  ;;  %v4309_v59 = vrot.slane %v4308_v63, 2  ;;  %v4404_v3 = vadd.f32 %v4403_v23, %v3665_v60  ;;  %v4428_v51 = vadd.f32 %v4427_v52, %v3669_v14 }
 0x47e   : > { %v5673_v10 = vsel %vm5503_vm9, %v5672_v25, %v5671_v40  ;;  %v4333_v2 = vrot.slane %v4332_v21, 2  ;;  %v4357_v19 = vrot.slane %v4356_v46, 2  ;;  %v4381_v48 = vrot.slane %v4380_v12, 2 }
 0x47f   : > { %v5675_v58 = vsel %vm5506_vm10, %v5674_v54, %v5673_v10  ;;  %v4748_v47 = vrot.slane %v10481_v53, 4  ;;  %v4310_v0 = vadd.f32 %v4309_v59, %v4308_v63  ;;  %v4405_v22 = vrot.slane %v4404_v3, 2 }
 0x480   : > { %5814 = vmatmul.mubr.f32.gmra.mrb[142].mxu0 %v5675_v58  ;;  %v4429_v56 = vrot.slane %v4428_v51, 2  ;;  %v4752_v44 = vrot.slane %v10481_v53, 5  ;;  %v4334_v31 = vadd.f32 %v4333_v2, %v4332_v21  ;;  %v4358_v36 = vadd.f32 %v4357_v19, %v4356_v46 }
 0x481   : > { %v4382_v43 = vadd.f32 %v4381_v48, %v4380_v12  ;;  %v4756_v57 = vrot.slane %v10481_v53, 6  ;;  %v4311_v17 = vrot.slane %v4310_v0, 1  ;;  %v4406_v1 = vadd.f32 %v4405_v22, %v4404_v3 }
 0x482   : > { %v4430_v26 = vadd.f32 %v4429_v56, %v4428_v51  ;;  %v4760_v13 = vrot.slane %v10481_v53, 7  ;;  %v4335_v33 = vrot.slane %v4334_v31, 1  ;;  %v4359_v20 = vrot.slane %v4358_v36, 1  ;;  %v6395_v16 = vpop.f32.mrb[136].mxu1 }
 0x483   : > { %v4383_v27 = vrot.slane %v4382_v43, 1  ;;  %v5137_v41 = vadd.f32 %v10290_v35, %v10482_v34  ;;  %v4312_v28 = vadd.f32 %v4311_v17, %v4310_v0  ;;  %v4407_v55 = vrot.slane %v4406_v1, 1  ;;  %v6396_v5 = vpop.f32.mrb[137].mxu1 }
 0x484   : > { %v4431_v61 = vrot.slane %v4430_v26, 1  ;;  %v5141_v9 = vadd.f32 %v10290_v35, %v10483_v29  ;;  %v4336_v8 = vadd.f32 %v4335_v33, %v4334_v31  ;;  %v4360_v49 = vadd.f32 %v4359_v20, %v4358_v36 }
 0x485   : > { %v4384_v42 = vadd.f32 %v4383_v27, %v4382_v43  ;;  %v5265_v62 = vmax.f32 %v5137_v41, 0.0  ;;  %v4408_v30 = vadd.f32 %v4407_v55, %v4406_v1  ;;  %v10484_v7 = vrot.slane %v10481_v53, 2 }
 0x486   : > { %v4432_v4 = vadd.f32 %v4431_v61, %v4430_v26  ;;  %v5269_v25 = vmax.f32 %v5141_v9, 0.0  ;;  %v10485_v60 = vrot.slane %v10481_v53, 3  ;;  %v5004_v54 = vadd.f32 %v4748_v47, %v4360_v49 }
 0x487   : > { %v4996_v11 = vadd.f32 %v10484_v7, %v4312_v28  ;;  %v5008_v24 = vadd.f32 %v4752_v44, %v4384_v42  ;;  %v6353_v14 = vadd.f32 %v9938_v37, %v9934_v32  ;;  %v5012_v39 = vadd.f32 %v4756_v57, %v4408_v30 }
 0x488   : > { %v5000_v15 = vadd.f32 %v10485_v60, %v4336_v8  ;;  %v5016_v50 = vadd.f32 %v4760_v13, %v4432_v4  ;;  %v5690_v18 = vrot.slane %v5269_v25, 7  ;;  %v5153_v40 = vadd.f32 %v10290_v35, %v5004_v54 }
 0x489   : > { %v5145_v45 = vadd.f32 %v10290_v35, %v4996_v11  ;;  %v5157_v63 = vadd.f32 %v10290_v35, %v5008_v24  ;;  %v5801_v23 = vadd.f32 %v6353_v14, %v9967_v6  ;;  %v5161_v52 = vadd.f32 %v10290_v35, %v5012_v39 }
 0x48a   : > { %v5149_v38 = vadd.f32 %v10290_v35, %v5000_v15  ;;  %v5165_v10 = vadd.f32 %v10290_v35, %v5016_v50  ;;  %v5691_v32 = vsel %vm5488_vm4, %v5690_v18, %v5265_v62  ;;  %v5281_v46 = vmax.f32 %v5153_v40, 0.0 }
 0x48b   : > { %v5273_v21 = vmax.f32 %v5145_v45, 0.0  ;;  %v5285_v12 = vmax.f32 %v5157_v63, 0.0  ;;  %v6397_v58 = vadd.f32 %v6396_v5, %v6395_v16  ;;  %v5289_v59 = vmax.f32 %v5161_v52, 0.0 }
 0x48c   : > { %v5277_v37 = vmax.f32 %v5149_v38, 0.0  ;;  %v5293_v3 = vmax.f32 %v5165_v10, 0.0  ;;  %v5696_v19 = vrot.slane %v5281_v46, 4 }
 0x48d   : > { %v5692_v51 = vrot.slane %v5273_v21, 6  ;;  %v5698_v48 = vrot.slane %v5285_v12, 3  ;;  %v5886_v53 = vadd.f32 %v6397_v58, %v5801_v23  ;;  %v5700_v0 = vrot.slane %v5289_v59, 2 }
 0x48e   : > { %v5694_v2 = vrot.slane %v5277_v37, 5  ;;  %v5702_v22 = vrot.slane %v5293_v3, 1 }
 0x48f   : > { %v5693_v47 = vsel %vm5491_vm5, %v5692_v51, %v5691_v32  ;;  %v5904_v56 = vmax.f32 %v5886_v53, 0.0 }
 0x490   : > { %v5695_v35 = vsel %vm5494_vm6, %v5694_v2, %v5693_v47 }
 0x491   : > { %v5697_v44 = vsel %vm5497_vm7, %v5696_v19, %v5695_v35  ;;  %5909 = vst.msk [vmem:[%s9986_s16] sm:$0xff] %vm5908_vm11, %v5904_v56 }
 0x492   : > { %v5699_v31 = vsel %vm5500_vm8, %v5698_v48, %v5697_v44 }
 0x493   : > { %v5701_v36 = vsel %vm5503_vm9, %v5700_v0, %v5699_v31 }
 0x494   : > { %v5703_v43 = vsel %vm5506_vm10, %v5702_v22, %v5701_v36 }
 0x495   : > { %5899 = vmatmul.mubr.f32.gmra.mrb[142].mxu1 %v5703_v43 }
 0x4aa   : > { %v6354_v57 = vpop.f32.mrb[138].mxu0 }
 0x4ab   : > { %v6355_v17 = vpop.f32.mrb[139].mxu0 }
 0x4ac   : > { %v6356_v1 = vadd.f32 %v6355_v17, %v6354_v57 }
 0x4ae   : > { %v5806_v13 = vadd.f32 %v6356_v1, %v9967_v6 }
 0x4b5   : > { %v6398_v26 = vpop.f32.mrb[138].mxu1 }
 0x4b6   : > { %v6399_v33 = vpop.f32.mrb[139].mxu1 }
 0x4b7   : > { %v6400_v20 = vadd.f32 %v6399_v33, %v6398_v26 }
 0x4b9   : > { %v5891_v27 = vadd.f32 %v6400_v20, %v5806_v13 }
 0x4bb   : > { %v5905_v34 = vmax.f32 %v5891_v27, 0.0 }
 0x4bd   : > { %5910 = vst.msk [vmem:[%s9986_s16 + $0x8] sm:$0xff] %vm5908_vm11, %v5905_v34 }
 0x501   : > { %v6357_v41 = vpop.f32.mrb[140].mxu0 }
 0x502   : > { %v6358_v16 = vpop.f32.mrb[141].mxu0 }
 0x503   : > { %v6359_v28 = vadd.f32 %v6358_v16, %v6357_v41 }
 0x505   : > { %v5811_v61 = vadd.f32 %v6359_v28, %v9967_v6 }
 0x514   : > { %v6401_v55 = vpop.f32.mrb[140].mxu1 }
 0x515   : > { %v6402_v29 = vpop.f32.mrb[141].mxu1 }
 0x516   : > { %v6403_v9 = vadd.f32 %v6402_v29, %v6401_v55 }
 0x518   : > { %v5896_v5 = vadd.f32 %v6403_v9, %v5811_v61 }
 0x51a   : > { %v5906_v8 = vmax.f32 %v5896_v5, 0.0 }
 0x51c   : > { %5911 = vst.msk [vmem:[%s9986_s16 + $0x10] sm:$0xff] %vm5908_vm11, %v5906_v8 }
 0x553   : > { %v6360_v49 = vpop.f32.mrb[142].mxu0 }
 0x554   : > { %v6361_v42 = vpop.f32.mrb[143].mxu0 }
 0x555   : > { %v6362_v62 = vadd.f32 %v6361_v42, %v6360_v49 }
 0x557   : > { %v5816_v4 = vadd.f32 %v6362_v62, %v9967_v6 }
 0x568   : > { %v6404_v30 = vpop.f32.mrb[142].mxu1 }
 0x569   : > { %v6405_v7 = vpop.f32.mrb[143].mxu1 }
 0x56a   : > { %v6406_v11 = vadd.f32 %v6405_v7, %v6404_v30 }
 0x56c   : > { %v5901_v25 = vadd.f32 %v6406_v11, %v5816_v4 }
 0x56e   : > { %v5907_v60 = vmax.f32 %v5901_v25, 0.0 }
 0x570   : > { %5912 = vst.msk [vmem:[%s9986_s16 + $0x18] sm:$0xff] %vm5908_vm11, %v5907_v60 }
 0x571 PF: > { %s17_s21 = sadd.s32 1, %s6791_s21  }
 0x572   : > { %p14_p5 = scmp.ge.s32.totalorder %s17_s21, 4  }
 0x574   :  { %16 = sbr.rel (!%p14_p5) target bundleno = 1 (0x1), region = 91 }

</bundles_post_ra>
